<compile_context>
chip_gen: v6e
topology: v6e:2x2x1
jax: 0.10.0
libtpu: 0.0.40
codegen_flags: <defaults>
</compile_context>

<pallas_src>
import jax
import jax.numpy as jnp
from jax.experimental import pallas as pl
from jax.experimental.pallas import tpu as pltpu

# ----------------------------- model config ---------------------------------
NUM_LAYER_POS = 8
SKIP_LAYER = 5                  # requiresPositionEmbedding=(5,)
POS_HIDDEN = 256
COLOR_HIDDEN = 128
POS_FEATURE = 256
L_POS = 10                      # numPositionEmbeddingFunctions
L_DIR = 4                       # numDirectionEmbeddingFunctions

POS_ENC_DIM = 3 + 3 * 2 * L_POS         # 63
DIR_ENC_DIM = 3 + 3 * 2 * L_DIR         # 27
POS_ENC_PAD = 64                         # 63 -> 64 lanes (full-dim block)
DIR_ENC_PAD = 32                         # 27 -> 32 lanes (full-dim block)
OUT_DIM = 4                              # [rgb(3), sigma(1)]

MAX_TILE_N = 2048                        # points per grid step (upper bound)


def _choose_tile(n):
    """Largest tile <= MAX_TILE_N that still yields grid >= 2 (v7x: 2 TCs)."""
    half = -(-n // 2)            # ceil(n / 2)
    half = -(-half // 8) * 8     # round up to a multiple of 8 (sublane constraint)
    return max(8, min(MAX_TILE_N, half))


# --------------------------- positional encoder ------------------------------
def encode(x, num_freqs, use_log_scale=True):
    """Standard NeRF encoder: [x, sin(f_k x), cos(f_k x)]_k, f_k = 2^k."""
    if use_log_scale:
        freqs = 2.0 ** jnp.arange(num_freqs, dtype=jnp.float32)
    else:
        freqs = jnp.linspace(1.0, 2.0 ** (num_freqs - 1), num_freqs)
    xb = x[:, None, :] * freqs[None, :, None]              # (N, L, 3)
    enc = jnp.stack([jnp.sin(xb), jnp.cos(xb)], axis=2)    # (N, L, 2, 3)
    enc = enc.reshape(x.shape[0], -1)                      # (N, 6L)
    return jnp.concatenate([x, enc], axis=-1)              # (N, 3 + 6L)


# ------------------------------ parameters -----------------------------------
def init_linear(key, fan_in, fan_out):
    """Deterministic PyTorch-style uniform init; weight stored as (in, out)."""
    kw, kb = jax.random.split(key)
    bound = 1.0 / jnp.sqrt(fan_in)
    w = jax.random.uniform(kw, (fan_in, fan_out), jnp.float32, -bound, bound)
    b = jax.random.uniform(kb, (fan_out,), jnp.float32, -bound, bound)
    return w, b


def init_params(key):
    keys = jax.random.split(key, NUM_LAYER_POS + 4)
    params = {"pos": []}
    for i in range(NUM_LAYER_POS):
        if i == 0:
            fan_in = POS_ENC_DIM
        elif i == SKIP_LAYER:
            fan_in = POS_ENC_DIM + POS_HIDDEN
        else:
            fan_in = POS_HIDDEN
        params["pos"].append(init_linear(keys[i], fan_in, POS_HIDDEN))
    params["density"] = init_linear(keys[NUM_LAYER_POS + 0], POS_HIDDEN, 1)
    params["feature"] = init_linear(keys[NUM_LAYER_POS + 1], POS_HIDDEN, POS_FEATURE)
    params["color"] = init_linear(keys[NUM_LAYER_POS + 2],
                                  DIR_ENC_DIM + POS_FEATURE, COLOR_HIDDEN)
    params["rgb"] = init_linear(keys[NUM_LAYER_POS + 3], COLOR_HIDDEN, 3)
    return params


def pad_params(params):
    """Pack / split parameters into the kernel's expected arrays.

    Returns (11 arrays):
      w0 (64,256) bf16, b0 (1,256) f32,
      w5x (64,256) bf16,
      w_stack (8,256,256) bf16  = [w1,w2,w3,w4, w5y, w6, w7, wfeat],
      b_stack (8,256) f32       = [b1,b2,b3,b4, b5,  b6, b7, bfeat],
      wcol_f (256,128) bf16, wcol_d (32,128) bf16, bcol (1,128) f32,
      w_head_c (8,128) f32 (rows 0..2 = rgb weight columns),
      w_head_y (1,256) f32 (density weight row),
      b_head (1,4) f32          = [br(3), bd(1)]
    """
    bf16 = jnp.bfloat16

    # layer 0
    w0_raw, b0_raw = params["pos"][0]
    w0 = jnp.zeros((POS_ENC_PAD, POS_HIDDEN), jnp.float32)
    w0 = w0.at[:POS_ENC_DIM, :].set(w0_raw).astype(bf16)
    b0 = b0_raw.reshape(1, -1)

    # skip layer 5: torch input is cat([x_enc(63), y(256)]) -> K-split weight
    w5_raw, b5_raw = params["pos"][SKIP_LAYER]
    w5x = jnp.zeros((POS_ENC_PAD, POS_HIDDEN), jnp.float32)
    w5x = w5x.at[:POS_ENC_DIM, :].set(w5_raw[:POS_ENC_DIM, :]).astype(bf16)
    w5y = w5_raw[POS_ENC_DIM:, :]

    # packed 256x256 weights + biases
    stack_w = [params["pos"][i][0] for i in (1, 2, 3, 4)] + [w5y] \
        + [params["pos"][i][0] for i in (6, 7)] + [params["feature"][0]]
    stack_b = [params["pos"][i][1] for i in (1, 2, 3, 4)] + [b5_raw] \
        + [params["pos"][i][1] for i in (6, 7)] + [params["feature"][1]]
    w_stack = jnp.stack(stack_w).astype(bf16)            # (8, 256, 256)
    b_stack = jnp.stack(stack_b)                          # (8, 256) f32

    # color layer: torch input cat([feat(256), d_enc(27)]) -> K-split weight
    wc, bc = params["color"]
    wcol_f = wc[:POS_FEATURE, :].astype(bf16)
    wcol_d = jnp.zeros((DIR_ENC_PAD, COLOR_HIDDEN), jnp.float32)
    wcol_d = wcol_d.at[:DIR_ENC_DIM, :].set(wc[POS_FEATURE:, :]).astype(bf16)
    bcol = bc.reshape(1, -1)

    # heads (kept f32; consumed by VPU/XLU lane reductions, not the MXU)
    wr, br = params["rgb"]                                # (128,3), (3,)
    wd, bd = params["density"]                            # (256,1), (1,)
    w_head_c = jnp.zeros((8, COLOR_HIDDEN), jnp.float32).at[0:3, :].set(wr.T)
    w_head_y = wd.T                                       # (1, 256)
    b_head = jnp.concatenate([br, bd]).reshape(1, 4)

    return [w0, b0, w5x, w_stack, b_stack,
            wcol_f, wcol_d, bcol,
            w_head_c, w_head_y, b_head]


# ------------------------------- kernel --------------------------------------
def nerf_kernel(
    xe_ref, de_ref,
    w0_ref, b0_ref, w5x_ref, w_stack_ref, b_stack_ref,
    wcol_f_ref, wcol_d_ref, bcol_ref,
    w_head_c_ref, w_head_y_ref, b_head_ref,
    out_ref,
):
    f32 = jnp.float32
    bf16 = jnp.bfloat16

    def dense(x_bf, w, b, relu=True):
        # bf16 MXU dot, f32 accumulate, f32 bias add (+ReLU), bf16 materialize
        acc = jnp.dot(x_bf, w, preferred_element_type=f32) + b
        if relu:
            acc = jnp.maximum(acc, 0.0)
        return acc.astype(bf16)

    xe = xe_ref[...]                       # (T, 64) bf16 padded pos encoding
    de = de_ref[...]                       # (T, 32) bf16 padded dir encoding

    # layer 0
    y = dense(xe, w0_ref[...], b0_ref[...])

    # layers 1..4  (w_stack rows 0..3)
    for k in range(4):
        y = dense(y, w_stack_ref[k], b_stack_ref[k:k + 1, :])

    # skip layer 5: cat([xe, y]) @ W == xe @ w5x + y @ w5y   (w_stack row 4)
    acc = (jnp.dot(xe, w5x_ref[...], preferred_element_type=f32)
           + jnp.dot(y, w_stack_ref[4], preferred_element_type=f32)
           + b_stack_ref[4:5, :])
    y = jnp.maximum(acc, 0.0).astype(bf16)

    # layers 6..7  (w_stack rows 5, 6)
    for k in (5, 6):
        y = dense(y, w_stack_ref[k], b_stack_ref[k:k + 1, :])

    # feature layer (w_stack row 7), no ReLU (matches torch)
    feat = dense(y, w_stack_ref[7], b_stack_ref[7:8, :], relu=False)

    # color layer: cat([feat, de]) @ W == feat @ wcol_f + de @ wcol_d
    acc = (jnp.dot(feat, wcol_f_ref[...], preferred_element_type=f32)
           + jnp.dot(de, wcol_d_ref[...], preferred_element_type=f32)
           + bcol_ref[...])
    c = jnp.maximum(acc, 0.0)              # (T, 128) f32 — feeds reductions only

    # heads: rgb / sigma as VPU multiply + lane reduction (f32 weights),
    # replacing two mostly-zero 128-wide MXU dots.
    def lane_dot(x_f32, w_row):
        return jnp.sum(x_f32 * w_row, axis=-1, keepdims=True)

    y_f32 = y.astype(f32)
    out_ref[:, 0:1] = lane_dot(c, w_head_c_ref[0:1, :]) + b_head_ref[:, 0:1]
    out_ref[:, 1:2] = lane_dot(c, w_head_c_ref[1:2, :]) + b_head_ref[:, 1:2]
    out_ref[:, 2:3] = lane_dot(c, w_head_c_ref[2:3, :]) + b_head_ref[:, 2:3]
    out_ref[:, 3:4] = lane_dot(y_f32, w_head_y_ref[...]) + b_head_ref[:, 3:4]


# ------------------------------- wrapper --------------------------------------
@jax.jit
def nerf_forward(x, d, params):
    n = x.shape[0]
    tile = _choose_tile(n)
    n_pad = ((n + tile - 1) // tile) * tile
    if n_pad != n:
        x = jnp.pad(x, ((0, n_pad - n), (0, 0)))
        d = jnp.pad(d, ((0, n_pad - n), (0, 0)))

    # sin/cos encoding in f32 (plain JAX), then cast to bf16 for the MXU.
    xe = encode(x, L_POS)                                       # (Np, 63) f32
    de = encode(d, L_DIR)                                       # (Np, 27) f32
    xe = jnp.pad(xe, ((0, 0), (0, POS_ENC_PAD - POS_ENC_DIM))).astype(jnp.bfloat16)
    de = jnp.pad(de, ((0, 0), (0, DIR_ENC_PAD - DIR_ENC_DIM))).astype(jnp.bfloat16)

    padded = pad_params(params)

    grid = (n_pad // tile,)
    xe_spec = pl.BlockSpec((tile, POS_ENC_PAD), lambda i: (i, 0))
    de_spec = pl.BlockSpec((tile, DIR_ENC_PAD), lambda i: (i, 0))
    # whole-array weight blocks with constant index_map -> DMA'd once, resident
    # across grid steps; single pipeline buffer (the second would be dead).
    weight_specs = [
        pl.BlockSpec(p.shape, lambda i, _z=(0,) * p.ndim: _z,
                     pipeline_mode=pl.Buffered(1))
        for p in padded
    ]

    out = pl.pallas_call(
        nerf_kernel,
        out_shape=jax.ShapeDtypeStruct((n_pad, OUT_DIM), jnp.float32),
        grid_spec=pltpu.PrefetchScalarGridSpec(
            num_scalar_prefetch=0,
            grid=grid,
            in_specs=[xe_spec, de_spec] + weight_specs,
            out_specs=pl.BlockSpec((tile, OUT_DIM), lambda i: (i, 0)),
        ),
        compiler_params=pltpu.CompilerParams(
            dimension_semantics=("parallel",),
            vmem_limit_bytes=32 << 20,
        ),
    )(xe, de, *padded)

    return out[:n] if n_pad != n else out                        # (n, 4)


# ---------------------------- pure-JAX reference ------------------------------
def nerf_reference(x, d, params):
    xe = encode(x, L_POS)
    de = encode(d, L_DIR)
    y = xe
    for i in range(NUM_LAYER_POS):
        w, b = params["pos"][i]
        inp = jnp.concatenate([xe, y], axis=1) if i == SKIP_LAYER else y
        y = jax.nn.relu(inp @ w + b)
    wd, bd = params["density"]
    sigma = y @ wd + bd
    wf, bf = params["feature"]
    feat = y @ wf + bf
    wc, bc = params["color"]
    c = jax.nn.relu(jnp.concatenate([feat, de], axis=1) @ wc + bc)
    wr, br = params["rgb"]
    rgb = c @ wr + br
    return jnp.concatenate([rgb, sigma], axis=-1)


# --------------------------------- main ---------------------------------------
if __name__ == "__main__":
    key = jax.random.PRNGKey(0)
    kp, kx, kd = jax.random.split(key, 3)

    params = init_params(kp)

    N = 1024                                            # tile=512 -> grid=2
    x = jax.random.normal(kx, (N, 3), jnp.float32)      # 3D positions
    d = jax.random.normal(kd, (N, 3), jnp.float32)
    d = d / jnp.linalg.norm(d, axis=-1, keepdims=True)  # unit view directions

    out = nerf_forward(x, d, params)
    out = jax.block_until_ready(out)

    ref = nerf_reference(x, d, params)
    assert out.shape == (N, 4)
    # Tolerance sized for the bf16 weight/activation pipeline vs. f32 reference.
    assert jnp.allclose(out, ref, atol=3e-2, rtol=3e-2), (
        f"max abs err {jnp.max(jnp.abs(out - ref))}")

    print("KERNEL_OK")
</pallas_src>

<mosaic_0001>
module attributes {stable_mosaic.version = 11 : i64} {
  func.func @nerf_kernel(%arg0: i32, %arg1: memref<512x64xbf16, #tpu.memory_space<vmem>>, %arg2: memref<512x32xbf16, #tpu.memory_space<vmem>>, %arg3: memref<64x256xbf16, #tpu.memory_space<vmem>>, %arg4: memref<1x256xf32, #tpu.memory_space<vmem>>, %arg5: memref<64x256xbf16, #tpu.memory_space<vmem>>, %arg6: memref<8x256x256xbf16, #tpu.memory_space<vmem>>, %arg7: memref<8x256xf32, #tpu.memory_space<vmem>>, %arg8: memref<256x128xbf16, #tpu.memory_space<vmem>>, %arg9: memref<32x128xbf16, #tpu.memory_space<vmem>>, %arg10: memref<1x128xf32, #tpu.memory_space<vmem>>, %arg11: memref<8x128xf32, #tpu.memory_space<vmem>>, %arg12: memref<1x256xf32, #tpu.memory_space<vmem>>, %arg13: memref<1x4xf32, #tpu.memory_space<vmem>>, %arg14: memref<512x4xf32, #tpu.memory_space<vmem>>) attributes {dimension_semantics = [#tpu.dimension_semantics<parallel>], iteration_bounds = array<i64: 2>, scalar_prefetch = 0 : i64, scratch_operands = 0 : i64, tpu.core_type = #tpu.core_type<tc>, window_params = [{transform_indices = @transform_0, window_bounds = array<i64: 512, 64>}, {transform_indices = @transform_1, window_bounds = array<i64: 512, 32>}, {pipeline_mode = #tpu.pipeline_mode<synchronous>, transform_indices = @transform_2, window_bounds = array<i64: 64, 256>}, {pipeline_mode = #tpu.pipeline_mode<synchronous>, transform_indices = @transform_3, window_bounds = array<i64: 1, 256>}, {pipeline_mode = #tpu.pipeline_mode<synchronous>, transform_indices = @transform_4, window_bounds = array<i64: 64, 256>}, {pipeline_mode = #tpu.pipeline_mode<synchronous>, transform_indices = @transform_5, window_bounds = array<i64: 8, 256, 256>}, {pipeline_mode = #tpu.pipeline_mode<synchronous>, transform_indices = @transform_6, window_bounds = array<i64: 8, 256>}, {pipeline_mode = #tpu.pipeline_mode<synchronous>, transform_indices = @transform_7, window_bounds = array<i64: 256, 128>}, {pipeline_mode = #tpu.pipeline_mode<synchronous>, transform_indices = @transform_8, window_bounds = array<i64: 32, 128>}, {pipeline_mode = #tpu.pipeline_mode<synchronous>, transform_indices = @transform_9, window_bounds = array<i64: 1, 128>}, {pipeline_mode = #tpu.pipeline_mode<synchronous>, transform_indices = @transform_10, window_bounds = array<i64: 8, 128>}, {pipeline_mode = #tpu.pipeline_mode<synchronous>, transform_indices = @transform_11, window_bounds = array<i64: 1, 256>}, {pipeline_mode = #tpu.pipeline_mode<synchronous>, transform_indices = @transform_12, window_bounds = array<i64: 1, 4>}, {transform_indices = @transform_13, window_bounds = array<i64: 512, 4>}]} {
    %c0 = arith.constant 0 : index
    %c0_0 = arith.constant 0 : index
    %0 = vector.load %arg1[%c0, %c0_0] : memref<512x64xbf16, #tpu.memory_space<vmem>>, vector<512x64xbf16>
    %c0_1 = arith.constant 0 : index
    %c0_2 = arith.constant 0 : index
    %1 = vector.load %arg2[%c0_1, %c0_2] : memref<512x32xbf16, #tpu.memory_space<vmem>>, vector<512x32xbf16>
    %c0_3 = arith.constant 0 : index
    %c0_4 = arith.constant 0 : index
    %2 = vector.load %arg3[%c0_3, %c0_4] : memref<64x256xbf16, #tpu.memory_space<vmem>>, vector<64x256xbf16>
    %c0_5 = arith.constant 0 : index
    %c0_6 = arith.constant 0 : index
    %3 = vector.load %arg4[%c0_5, %c0_6] : memref<1x256xf32, #tpu.memory_space<vmem>>, vector<1x256xf32>
    %cst = arith.constant dense<0.000000e+00> : vector<512x256xf32>
    %4 = tpu.matmul %0, %2, %cst {dimension_numbers = #tpu.dot_dimension_numbers<[1], [0], [0], [1], [0, 0, 1, 1], [], []>} : vector<512x64xbf16>, vector<64x256xbf16>, vector<512x256xf32> -> vector<512x256xf32>
    %5 = vector.broadcast %3 : vector<1x256xf32> to vector<512x256xf32>
    %6 = arith.addf %4, %5 : vector<512x256xf32>
    %cst_7 = arith.constant 0.000000e+00 : f32
    %7 = vector.broadcast %cst_7 : f32 to vector<512x256xf32>
    %8 = arith.maximumf %6, %7 : vector<512x256xf32>
    %9 = arith.truncf %8 : vector<512x256xf32> to vector<512x256xbf16>
    %c0_8 = arith.constant 0 : index
    %c0_9 = arith.constant 0 : index
    %c0_10 = arith.constant 0 : index
    %10 = vector.load %arg6[%c0_8, %c0_9, %c0_10] : memref<8x256x256xbf16, #tpu.memory_space<vmem>>, vector<1x256x256xbf16>
    %11 = vector.shape_cast %10 : vector<1x256x256xbf16> to vector<256x256xbf16>
    %c0_11 = arith.constant 0 : index
    %c0_12 = arith.constant 0 : index
    %12 = vector.load %arg7[%c0_11, %c0_12] : memref<8x256xf32, #tpu.memory_space<vmem>>, vector<1x256xf32>
    %cst_13 = arith.constant dense<0.000000e+00> : vector<512x256xf32>
    %13 = tpu.matmul %9, %11, %cst_13 {dimension_numbers = #tpu.dot_dimension_numbers<[1], [0], [0], [1], [0, 0, 1, 1], [], []>} : vector<512x256xbf16>, vector<256x256xbf16>, vector<512x256xf32> -> vector<512x256xf32>
    %14 = vector.broadcast %12 : vector<1x256xf32> to vector<512x256xf32>
    %15 = arith.addf %13, %14 : vector<512x256xf32>
    %cst_14 = arith.constant 0.000000e+00 : f32
    %16 = vector.broadcast %cst_14 : f32 to vector<512x256xf32>
    %17 = arith.maximumf %15, %16 : vector<512x256xf32>
    %18 = arith.truncf %17 : vector<512x256xf32> to vector<512x256xbf16>
    %c1 = arith.constant 1 : index
    %c0_15 = arith.constant 0 : index
    %c0_16 = arith.constant 0 : index
    %19 = vector.load %arg6[%c1, %c0_15, %c0_16] : memref<8x256x256xbf16, #tpu.memory_space<vmem>>, vector<1x256x256xbf16>
    %20 = vector.shape_cast %19 : vector<1x256x256xbf16> to vector<256x256xbf16>
    %c1_17 = arith.constant 1 : index
    %c0_18 = arith.constant 0 : index
    %21 = vector.load %arg7[%c1_17, %c0_18] : memref<8x256xf32, #tpu.memory_space<vmem>>, vector<1x256xf32>
    %cst_19 = arith.constant dense<0.000000e+00> : vector<512x256xf32>
    %22 = tpu.matmul %18, %20, %cst_19 {dimension_numbers = #tpu.dot_dimension_numbers<[1], [0], [0], [1], [0, 0, 1, 1], [], []>} : vector<512x256xbf16>, vector<256x256xbf16>, vector<512x256xf32> -> vector<512x256xf32>
    %23 = vector.broadcast %21 : vector<1x256xf32> to vector<512x256xf32>
    %24 = arith.addf %22, %23 : vector<512x256xf32>
    %cst_20 = arith.constant 0.000000e+00 : f32
    %25 = vector.broadcast %cst_20 : f32 to vector<512x256xf32>
    %26 = arith.maximumf %24, %25 : vector<512x256xf32>
    %27 = arith.truncf %26 : vector<512x256xf32> to vector<512x256xbf16>
    %c2 = arith.constant 2 : index
    %c0_21 = arith.constant 0 : index
    %c0_22 = arith.constant 0 : index
    %28 = vector.load %arg6[%c2, %c0_21, %c0_22] : memref<8x256x256xbf16, #tpu.memory_space<vmem>>, vector<1x256x256xbf16>
    %29 = vector.shape_cast %28 : vector<1x256x256xbf16> to vector<256x256xbf16>
    %c2_23 = arith.constant 2 : index
    %c0_24 = arith.constant 0 : index
    %30 = vector.load %arg7[%c2_23, %c0_24] : memref<8x256xf32, #tpu.memory_space<vmem>>, vector<1x256xf32>
    %cst_25 = arith.constant dense<0.000000e+00> : vector<512x256xf32>
    %31 = tpu.matmul %27, %29, %cst_25 {dimension_numbers = #tpu.dot_dimension_numbers<[1], [0], [0], [1], [0, 0, 1, 1], [], []>} : vector<512x256xbf16>, vector<256x256xbf16>, vector<512x256xf32> -> vector<512x256xf32>
    %32 = vector.broadcast %30 : vector<1x256xf32> to vector<512x256xf32>
    %33 = arith.addf %31, %32 : vector<512x256xf32>
    %cst_26 = arith.constant 0.000000e+00 : f32
    %34 = vector.broadcast %cst_26 : f32 to vector<512x256xf32>
    %35 = arith.maximumf %33, %34 : vector<512x256xf32>
    %36 = arith.truncf %35 : vector<512x256xf32> to vector<512x256xbf16>
    %c3 = arith.constant 3 : index
    %c0_27 = arith.constant 0 : index
    %c0_28 = arith.constant 0 : index
    %37 = vector.load %arg6[%c3, %c0_27, %c0_28] : memref<8x256x256xbf16, #tpu.memory_space<vmem>>, vector<1x256x256xbf16>
    %38 = vector.shape_cast %37 : vector<1x256x256xbf16> to vector<256x256xbf16>
    %c3_29 = arith.constant 3 : index
    %c0_30 = arith.constant 0 : index
    %39 = vector.load %arg7[%c3_29, %c0_30] : memref<8x256xf32, #tpu.memory_space<vmem>>, vector<1x256xf32>
    %cst_31 = arith.constant dense<0.000000e+00> : vector<512x256xf32>
    %40 = tpu.matmul %36, %38, %cst_31 {dimension_numbers = #tpu.dot_dimension_numbers<[1], [0], [0], [1], [0, 0, 1, 1], [], []>} : vector<512x256xbf16>, vector<256x256xbf16>, vector<512x256xf32> -> vector<512x256xf32>
    %41 = vector.broadcast %39 : vector<1x256xf32> to vector<512x256xf32>
    %42 = arith.addf %40, %41 : vector<512x256xf32>
    %cst_32 = arith.constant 0.000000e+00 : f32
    %43 = vector.broadcast %cst_32 : f32 to vector<512x256xf32>
    %44 = arith.maximumf %42, %43 : vector<512x256xf32>
    %45 = arith.truncf %44 : vector<512x256xf32> to vector<512x256xbf16>
    %c0_33 = arith.constant 0 : index
    %c0_34 = arith.constant 0 : index
    %46 = vector.load %arg5[%c0_33, %c0_34] : memref<64x256xbf16, #tpu.memory_space<vmem>>, vector<64x256xbf16>
    %cst_35 = arith.constant dense<0.000000e+00> : vector<512x256xf32>
    %47 = tpu.matmul %0, %46, %cst_35 {dimension_numbers = #tpu.dot_dimension_numbers<[1], [0], [0], [1], [0, 0, 1, 1], [], []>} : vector<512x64xbf16>, vector<64x256xbf16>, vector<512x256xf32> -> vector<512x256xf32>
    %c4 = arith.constant 4 : index
    %c0_36 = arith.constant 0 : index
    %c0_37 = arith.constant 0 : index
    %48 = vector.load %arg6[%c4, %c0_36, %c0_37] : memref<8x256x256xbf16, #tpu.memory_space<vmem>>, vector<1x256x256xbf16>
    %49 = vector.shape_cast %48 : vector<1x256x256xbf16> to vector<256x256xbf16>
    %cst_38 = arith.constant dense<0.000000e+00> : vector<512x256xf32>
    %50 = tpu.matmul %45, %49, %cst_38 {dimension_numbers = #tpu.dot_dimension_numbers<[1], [0], [0], [1], [0, 0, 1, 1], [], []>} : vector<512x256xbf16>, vector<256x256xbf16>, vector<512x256xf32> -> vector<512x256xf32>
    %51 = arith.addf %47, %50 : vector<512x256xf32>
    %c4_39 = arith.constant 4 : index
    %c0_40 = arith.constant 0 : index
    %52 = vector.load %arg7[%c4_39, %c0_40] : memref<8x256xf32, #tpu.memory_space<vmem>>, vector<1x256xf32>
    %53 = vector.broadcast %52 : vector<1x256xf32> to vector<512x256xf32>
    %54 = arith.addf %51, %53 : vector<512x256xf32>
    %cst_41 = arith.constant 0.000000e+00 : f32
    %55 = vector.broadcast %cst_41 : f32 to vector<512x256xf32>
    %56 = arith.maximumf %54, %55 : vector<512x256xf32>
    %57 = arith.truncf %56 : vector<512x256xf32> to vector<512x256xbf16>
    %c5 = arith.constant 5 : index
    %c0_42 = arith.constant 0 : index
    %c0_43 = arith.constant 0 : index
    %58 = vector.load %arg6[%c5, %c0_42, %c0_43] : memref<8x256x256xbf16, #tpu.memory_space<vmem>>, vector<1x256x256xbf16>
    %59 = vector.shape_cast %58 : vector<1x256x256xbf16> to vector<256x256xbf16>
    %c5_44 = arith.constant 5 : index
    %c0_45 = arith.constant 0 : index
    %60 = vector.load %arg7[%c5_44, %c0_45] : memref<8x256xf32, #tpu.memory_space<vmem>>, vector<1x256xf32>
    %cst_46 = arith.constant dense<0.000000e+00> : vector<512x256xf32>
    %61 = tpu.matmul %57, %59, %cst_46 {dimension_numbers = #tpu.dot_dimension_numbers<[1], [0], [0], [1], [0, 0, 1, 1], [], []>} : vector<512x256xbf16>, vector<256x256xbf16>, vector<512x256xf32> -> vector<512x256xf32>
    %62 = vector.broadcast %60 : vector<1x256xf32> to vector<512x256xf32>
    %63 = arith.addf %61, %62 : vector<512x256xf32>
    %cst_47 = arith.constant 0.000000e+00 : f32
    %64 = vector.broadcast %cst_47 : f32 to vector<512x256xf32>
    %65 = arith.maximumf %63, %64 : vector<512x256xf32>
    %66 = arith.truncf %65 : vector<512x256xf32> to vector<512x256xbf16>
    %c6 = arith.constant 6 : index
    %c0_48 = arith.constant 0 : index
    %c0_49 = arith.constant 0 : index
    %67 = vector.load %arg6[%c6, %c0_48, %c0_49] : memref<8x256x256xbf16, #tpu.memory_space<vmem>>, vector<1x256x256xbf16>
    %68 = vector.shape_cast %67 : vector<1x256x256xbf16> to vector<256x256xbf16>
    %c6_50 = arith.constant 6 : index
    %c0_51 = arith.constant 0 : index
    %69 = vector.load %arg7[%c6_50, %c0_51] : memref<8x256xf32, #tpu.memory_space<vmem>>, vector<1x256xf32>
    %cst_52 = arith.constant dense<0.000000e+00> : vector<512x256xf32>
    %70 = tpu.matmul %66, %68, %cst_52 {dimension_numbers = #tpu.dot_dimension_numbers<[1], [0], [0], [1], [0, 0, 1, 1], [], []>} : vector<512x256xbf16>, vector<256x256xbf16>, vector<512x256xf32> -> vector<512x256xf32>
    %71 = vector.broadcast %69 : vector<1x256xf32> to vector<512x256xf32>
    %72 = arith.addf %70, %71 : vector<512x256xf32>
    %cst_53 = arith.constant 0.000000e+00 : f32
    %73 = vector.broadcast %cst_53 : f32 to vector<512x256xf32>
    %74 = arith.maximumf %72, %73 : vector<512x256xf32>
    %75 = arith.truncf %74 : vector<512x256xf32> to vector<512x256xbf16>
    %c7 = arith.constant 7 : index
    %c0_54 = arith.constant 0 : index
    %c0_55 = arith.constant 0 : index
    %76 = vector.load %arg6[%c7, %c0_54, %c0_55] : memref<8x256x256xbf16, #tpu.memory_space<vmem>>, vector<1x256x256xbf16>
    %77 = vector.shape_cast %76 : vector<1x256x256xbf16> to vector<256x256xbf16>
    %c7_56 = arith.constant 7 : index
    %c0_57 = arith.constant 0 : index
    %78 = vector.load %arg7[%c7_56, %c0_57] : memref<8x256xf32, #tpu.memory_space<vmem>>, vector<1x256xf32>
    %cst_58 = arith.constant dense<0.000000e+00> : vector<512x256xf32>
    %79 = tpu.matmul %75, %77, %cst_58 {dimension_numbers = #tpu.dot_dimension_numbers<[1], [0], [0], [1], [0, 0, 1, 1], [], []>} : vector<512x256xbf16>, vector<256x256xbf16>, vector<512x256xf32> -> vector<512x256xf32>
    %80 = vector.broadcast %78 : vector<1x256xf32> to vector<512x256xf32>
    %81 = arith.addf %79, %80 : vector<512x256xf32>
    %82 = arith.truncf %81 : vector<512x256xf32> to vector<512x256xbf16>
    %c0_59 = arith.constant 0 : index
    %c0_60 = arith.constant 0 : index
    %83 = vector.load %arg8[%c0_59, %c0_60] : memref<256x128xbf16, #tpu.memory_space<vmem>>, vector<256x128xbf16>
    %cst_61 = arith.constant dense<0.000000e+00> : vector<512x128xf32>
    %84 = tpu.matmul %82, %83, %cst_61 {dimension_numbers = #tpu.dot_dimension_numbers<[1], [0], [0], [1], [0, 0, 1, 1], [], []>} : vector<512x256xbf16>, vector<256x128xbf16>, vector<512x128xf32> -> vector<512x128xf32>
    %c0_62 = arith.constant 0 : index
    %c0_63 = arith.constant 0 : index
    %85 = vector.load %arg9[%c0_62, %c0_63] : memref<32x128xbf16, #tpu.memory_space<vmem>>, vector<32x128xbf16>
    %cst_64 = arith.constant dense<0.000000e+00> : vector<512x128xf32>
    %86 = tpu.matmul %1, %85, %cst_64 {dimension_numbers = #tpu.dot_dimension_numbers<[1], [0], [0], [1], [0, 0, 1, 1], [], []>} : vector<512x32xbf16>, vector<32x128xbf16>, vector<512x128xf32> -> vector<512x128xf32>
    %87 = arith.addf %84, %86 : vector<512x128xf32>
    %c0_65 = arith.constant 0 : index
    %c0_66 = arith.constant 0 : index
    %88 = vector.load %arg10[%c0_65, %c0_66] : memref<1x128xf32, #tpu.memory_space<vmem>>, vector<1x128xf32>
    %89 = vector.broadcast %88 : vector<1x128xf32> to vector<512x128xf32>
    %90 = arith.addf %87, %89 : vector<512x128xf32>
    %cst_67 = arith.constant 0.000000e+00 : f32
    %91 = vector.broadcast %cst_67 : f32 to vector<512x128xf32>
    %92 = arith.maximumf %90, %91 : vector<512x128xf32>
    %93 = arith.extf %75 : vector<512x256xbf16> to vector<512x256xf32>
    %c0_68 = arith.constant 0 : index
    %c0_69 = arith.constant 0 : index
    %94 = vector.load %arg11[%c0_68, %c0_69] : memref<8x128xf32, #tpu.memory_space<vmem>>, vector<1x128xf32>
    %95 = vector.broadcast %94 : vector<1x128xf32> to vector<512x128xf32>
    %96 = arith.mulf %92, %95 : vector<512x128xf32>
    %cst_70 = arith.constant dense<0.000000e+00> : vector<512xf32>
    %97 = vector.multi_reduction <add>, %96, %cst_70 [1] : vector<512x128xf32> to vector<512xf32>
    %98 = vector.shape_cast %97 : vector<512xf32> to vector<512x1xf32>
    %c0_71 = arith.constant 0 : index
    %c0_72 = arith.constant 0 : index
    %99 = vector.load %arg13[%c0_71, %c0_72] : memref<1x4xf32, #tpu.memory_space<vmem>>, vector<1x1xf32>
    %100 = vector.broadcast %99 : vector<1x1xf32> to vector<512x1xf32>
    %101 = arith.addf %98, %100 : vector<512x1xf32>
    %c0_73 = arith.constant 0 : index
    %c0_74 = arith.constant 0 : index
    %102 = vector.load %arg14[%c0_73, %c0_74] : memref<512x4xf32, #tpu.memory_space<vmem>>, vector<512x1xf32>
    tpu.vector_store %arg14[%c0_73, %c0_74], %101 {strides = array<i32>} : memref<512x4xf32, #tpu.memory_space<vmem>>, vector<512x1xf32>,
    %c1_75 = arith.constant 1 : index
    %c0_76 = arith.constant 0 : index
    %103 = vector.load %arg11[%c1_75, %c0_76] : memref<8x128xf32, #tpu.memory_space<vmem>>, vector<1x128xf32>
    %104 = vector.broadcast %103 : vector<1x128xf32> to vector<512x128xf32>
    %105 = arith.mulf %92, %104 : vector<512x128xf32>
    %cst_77 = arith.constant dense<0.000000e+00> : vector<512xf32>
    %106 = vector.multi_reduction <add>, %105, %cst_77 [1] : vector<512x128xf32> to vector<512xf32>
    %107 = vector.shape_cast %106 : vector<512xf32> to vector<512x1xf32>
    %c0_78 = arith.constant 0 : index
    %c1_79 = arith.constant 1 : index
    %108 = vector.load %arg13[%c0_78, %c1_79] : memref<1x4xf32, #tpu.memory_space<vmem>>, vector<1x1xf32>
    %109 = vector.broadcast %108 : vector<1x1xf32> to vector<512x1xf32>
    %110 = arith.addf %107, %109 : vector<512x1xf32>
    %c0_80 = arith.constant 0 : index
    %c1_81 = arith.constant 1 : index
    %111 = vector.load %arg14[%c0_80, %c1_81] : memref<512x4xf32, #tpu.memory_space<vmem>>, vector<512x1xf32>
    tpu.vector_store %arg14[%c0_80, %c1_81], %110 {strides = array<i32>} : memref<512x4xf32, #tpu.memory_space<vmem>>, vector<512x1xf32>,
    %c2_82 = arith.constant 2 : index
    %c0_83 = arith.constant 0 : index
    %112 = vector.load %arg11[%c2_82, %c0_83] : memref<8x128xf32, #tpu.memory_space<vmem>>, vector<1x128xf32>
    %113 = vector.broadcast %112 : vector<1x128xf32> to vector<512x128xf32>
    %114 = arith.mulf %92, %113 : vector<512x128xf32>
    %cst_84 = arith.constant dense<0.000000e+00> : vector<512xf32>
    %115 = vector.multi_reduction <add>, %114, %cst_84 [1] : vector<512x128xf32> to vector<512xf32>
    %116 = vector.shape_cast %115 : vector<512xf32> to vector<512x1xf32>
    %c0_85 = arith.constant 0 : index
    %c2_86 = arith.constant 2 : index
    %117 = vector.load %arg13[%c0_85, %c2_86] : memref<1x4xf32, #tpu.memory_space<vmem>>, vector<1x1xf32>
    %118 = vector.broadcast %117 : vector<1x1xf32> to vector<512x1xf32>
    %119 = arith.addf %116, %118 : vector<512x1xf32>
    %c0_87 = arith.constant 0 : index
    %c2_88 = arith.constant 2 : index
    %120 = vector.load %arg14[%c0_87, %c2_88] : memref<512x4xf32, #tpu.memory_space<vmem>>, vector<512x1xf32>
    tpu.vector_store %arg14[%c0_87, %c2_88], %119 {strides = array<i32>} : memref<512x4xf32, #tpu.memory_space<vmem>>, vector<512x1xf32>,
    %c0_89 = arith.constant 0 : index
    %c0_90 = arith.constant 0 : index
    %121 = vector.load %arg12[%c0_89, %c0_90] : memref<1x256xf32, #tpu.memory_space<vmem>>, vector<1x256xf32>
    %122 = vector.broadcast %121 : vector<1x256xf32> to vector<512x256xf32>
    %123 = arith.mulf %93, %122 : vector<512x256xf32>
    %cst_91 = arith.constant dense<0.000000e+00> : vector<512xf32>
    %124 = vector.multi_reduction <add>, %123, %cst_91 [1] : vector<512x256xf32> to vector<512xf32>
    %125 = vector.shape_cast %124 : vector<512xf32> to vector<512x1xf32>
    %c0_92 = arith.constant 0 : index
    %c3_93 = arith.constant 3 : index
    %126 = vector.load %arg13[%c0_92, %c3_93] : memref<1x4xf32, #tpu.memory_space<vmem>>, vector<1x1xf32>
    %127 = vector.broadcast %126 : vector<1x1xf32> to vector<512x1xf32>
    %128 = arith.addf %125, %127 : vector<512x1xf32>
    %c0_94 = arith.constant 0 : index
    %c3_95 = arith.constant 3 : index
    %129 = vector.load %arg14[%c0_94, %c3_95] : memref<512x4xf32, #tpu.memory_space<vmem>>, vector<512x1xf32>
    tpu.vector_store %arg14[%c0_94, %c3_95], %128 {strides = array<i32>} : memref<512x4xf32, #tpu.memory_space<vmem>>, vector<512x1xf32>,
    return
  }
  func.func @transform_0(%arg0: i32) -> (i32, i32) {
    %c0_i32 = arith.constant 0 : i32
    %c0_i32_0 = arith.constant 0 : i32
    return %arg0, %c0_i32 : i32, i32
  }
  func.func @transform_1(%arg0: i32) -> (i32, i32) {
    %c0_i32 = arith.constant 0 : i32
    %c0_i32_0 = arith.constant 0 : i32
    return %arg0, %c0_i32 : i32, i32
  }
  func.func @transform_2(%arg0: i32) -> (i32, i32) {
    %c0_i32 = arith.constant 0 : i32
    %c0_i32_0 = arith.constant 0 : i32
    %c0_i32_1 = arith.constant 0 : i32
    return %c0_i32, %c0_i32_0 : i32, i32
  }
  func.func @transform_3(%arg0: i32) -> (i32, i32) {
    %c0_i32 = arith.constant 0 : i32
    %c0_i32_0 = arith.constant 0 : i32
    %c0_i32_1 = arith.constant 0 : i32
    return %c0_i32, %c0_i32_0 : i32, i32
  }
  func.func @transform_4(%arg0: i32) -> (i32, i32) {
    %c0_i32 = arith.constant 0 : i32
    %c0_i32_0 = arith.constant 0 : i32
    %c0_i32_1 = arith.constant 0 : i32
    return %c0_i32, %c0_i32_0 : i32, i32
  }
  func.func @transform_5(%arg0: i32) -> (i32, i32, i32) {
    %c0_i32 = arith.constant 0 : i32
    %c0_i32_0 = arith.constant 0 : i32
    %c0_i32_1 = arith.constant 0 : i32
    %c0_i32_2 = arith.constant 0 : i32
    return %c0_i32, %c0_i32_0, %c0_i32_1 : i32, i32, i32
  }
  func.func @transform_6(%arg0: i32) -> (i32, i32) {
    %c0_i32 = arith.constant 0 : i32
    %c0_i32_0 = arith.constant 0 : i32
    %c0_i32_1 = arith.constant 0 : i32
    return %c0_i32, %c0_i32_0 : i32, i32
  }
  func.func @transform_7(%arg0: i32) -> (i32, i32) {
    %c0_i32 = arith.constant 0 : i32
    %c0_i32_0 = arith.constant 0 : i32
    %c0_i32_1 = arith.constant 0 : i32
    return %c0_i32, %c0_i32_0 : i32, i32
  }
  func.func @transform_8(%arg0: i32) -> (i32, i32) {
    %c0_i32 = arith.constant 0 : i32
    %c0_i32_0 = arith.constant 0 : i32
    %c0_i32_1 = arith.constant 0 : i32
    return %c0_i32, %c0_i32_0 : i32, i32
  }
  func.func @transform_9(%arg0: i32) -> (i32, i32) {
    %c0_i32 = arith.constant 0 : i32
    %c0_i32_0 = arith.constant 0 : i32
    %c0_i32_1 = arith.constant 0 : i32
    return %c0_i32, %c0_i32_0 : i32, i32
  }
  func.func @transform_10(%arg0: i32) -> (i32, i32) {
    %c0_i32 = arith.constant 0 : i32
    %c0_i32_0 = arith.constant 0 : i32
    %c0_i32_1 = arith.constant 0 : i32
    return %c0_i32, %c0_i32_0 : i32, i32
  }
  func.func @transform_11(%arg0: i32) -> (i32, i32) {
    %c0_i32 = arith.constant 0 : i32
    %c0_i32_0 = arith.constant 0 : i32
    %c0_i32_1 = arith.constant 0 : i32
    return %c0_i32, %c0_i32_0 : i32, i32
  }
  func.func @transform_12(%arg0: i32) -> (i32, i32) {
    %c0_i32 = arith.constant 0 : i32
    %c0_i32_0 = arith.constant 0 : i32
    %c0_i32_1 = arith.constant 0 : i32
    return %c0_i32, %c0_i32_0 : i32, i32
  }
  func.func @transform_13(%arg0: i32) -> (i32, i32) {
    %c0_i32 = arith.constant 0 : i32
    %c0_i32_0 = arith.constant 0 : i32
    return %arg0, %c0_i32 : i32, i32
  }
}

</mosaic_0001>

<bundles_post_ra>
// kernel: nerf_forward.1
= control target key start
LH: loop header
LB: loop body
LE: loop exit
PB: predicated region body
PF: predicated region fallthrough
CT: control target
= control target key end

     0   :  { %s12099_s25 = smov 0   ;;  %s17290_s0 = inlined_call_operand.vmem [shape: bf16[1024,64], index: 0, kind: input, shape index: {}]   ;;  %s17291_s1 = inlined_call_operand.vmem [shape: bf16[1024,32], index: 1, kind: input, shape index: {}]   ;;  %s17292_s2 = inlined_call_operand.vmem [shape: bf16[64,256], index: 2, kind: input, shape index: {}]   ;;  %s17293_s3 = inlined_call_operand.vmem [shape: f32[1,256], index: 3, kind: input, shape index: {}]   ;;  %s17294_s4 = inlined_call_operand.vmem [shape: bf16[64,256], index: 4, kind: input, shape index: {}]   ;;  %s17295_s5 = inlined_call_operand.vmem [shape: bf16[8,256,256], index: 5, kind: input, shape index: {}]   ;;  %s17296_s6 = inlined_call_operand.vmem [shape: f32[8,256], index: 6, kind: input, shape index: {}]   ;;  %s17297_s7 = inlined_call_operand.vmem [shape: bf16[256,128], index: 7, kind: input, shape index: {}]   ;;  %s17298_s8 = inlined_call_operand.vmem [shape: bf16[32,128], index: 8, kind: input, shape index: {}]   ;;  %s17299_s9 = inlined_call_operand.vmem [shape: f32[1,128], index: 9, kind: input, shape index: {}]   ;;  %s17300_s10 = inlined_call_operand.vmem [shape: f32[8,128], index: 10, kind: input, shape index: {}]   ;;  %s17301_s11 = inlined_call_operand.vmem [shape: f32[1,256], index: 11, kind: input, shape index: {}]   ;;  %s17302_s12 = inlined_call_operand.vmem [shape: f32[1,4], index: 12, kind: input, shape index: {}]   ;;  %s17303_s13 = inlined_call_operand.vmem [shape: f32[1024,4], index: 13, kind: output, shape index: {}]  }
   0x1 LB: > { %s10641_s26 = sadd.s32 4294967295, %s12026_s25   ;;  %p10645_p0 = scmp.ge.s32.totalorder %s12026_s25, 1  ;;  %s12026_s25 = sphi %s12099_s25, %s23_s25  }
   0x2   : > { %p399_p1 = scmp.lt.s32.totalorder %s12026_s25, 3 }
   0x4   : > { %p400_p2 = pnand %p10645_p0, %p399_p1 }
   0x6   : > { %403 = sbr.rel (%p400_p2) target bundleno = 2764 (0xacc), region = 72 }
   0xb   : > { %v11486_v0 = vld [vmem:[%s17292_s2 + $0x34] ss:$8 sps:$4 sm:$0xff]   ;;  %s10646_s29 = sshll.u32 %s10641_s26, 6  ;;  %v11488_v1 = vld [vmem:[%s17292_s2 + $0x30] ss:$8 sps:$4 sm:$0xff]   ;;  %v12028_v2 = vmov 0  }
   0xc   : > { %944 = vmatprep.mubr.bf16.mxu0 %v12028_v2  ;;  %p449_p3 = scmp.lt.s32.totalorder %s10646_s29, 127  ;;  %920 = vmatprep.subr.bf16.mxu0 %v11486_v0  ;;  %v11489_v3 = vld [vmem:[%s17292_s2 + $0x24] ss:$8 sps:$4 sm:$0xff]   ;;  %v11491_v4 = vld [vmem:[%s17292_s2 + $0x20] ss:$8 sps:$4 sm:$0xff]   ;;  %vm815_vm0 = vcmask 523264  }
   0xd   : > { %921 = vmatpush1.bf16.msra.mxu0 %v11488_v1  ;;  %v11492_v5 = vld [vmem:[%s17292_s2 + $0x14] ss:$8 sps:$4 sm:$0xff]   ;;  %v11494_v6 = vld [vmem:[%s17292_s2 + $0x10] ss:$8 sps:$4 sm:$0xff]   ;;  %v11495_v9 = vld [vmem:[%s17292_s2 + $0x4] ss:$8 sps:$4 sm:$0xff]  }
   0xe   : > { %s17379_s29 = smov (!%p449_p3, %s10646_s29), 127  ;;  %922 = vmatprep.subr.bf16.mxu0 %v11489_v3  ;;  %v11501_v7 = vld [vmem:[%s17295_s5 + $0x74] ss:$8 sps:$4 sm:$0xff]   ;;  %v11499_v8 = vld [vmem:[%s17295_s5 + $0x70] ss:$8 sps:$4 sm:$0xff]   ;;  %vm8072_vm1 = vcmask 261120  }
   0xf   : > { %s10647_s21 = sshll.u32 %s17379_s29, 2  ;;  %11445 = vmatprep.subr.bf16.mxu1 %v11501_v7  ;;  %v11497_v10 = vld [vmem:[%s17292_s2] ss:$8 sps:$4 sm:$0xff]   ;;  %v11506_v11 = vld [vmem:[%s17295_s5 + $0x64] ss:$8 sps:$4 sm:$0xff]   ;;  %s10651_s16 = sshll.u32 %s17379_s29, 3 }
  0x10   : > { %s12134_s27 = scalar_lea.vmem %s17290_s0, %s10647_s21  ;;  %11461 = vmatpush1.bf16.msra.mxu1 %v11499_v8  ;;  %v11504_v12 = vld [vmem:[%s17295_s5 + $0x60] ss:$8 sps:$4 sm:$0xff]   ;;  %v11511_v14 = vld [vmem:[%s17295_s5 + $0x54] ss:$8 sps:$4 sm:$0xff]   ;;  %v11509_v15 = vld [vmem:[%s17295_s5 + $0x50] ss:$8 sps:$4 sm:$0xff]   ;;  %s15043_s18 = scalar_lea.vmem %s17291_s1, %s10647_s21 }
  0x11   : > { %923 = vmatpush1.bf16.msra.mxu0 %v11491_v4  ;;  %11446 = vmatprep.subr.bf16.mxu1 %v11506_v11  ;;  %v11498_v13 = vld [vmem:[%s12134_s27] sm:$0xff]   ;;  %v11521_v18 = vld [vmem:[%s17295_s5 + $0x34] ss:$8 sps:$4 sm:$0xff]   ;;  %v11502_v19 = vld [vmem:[%s12134_s27 + $0x8] sm:$0xff]   ;;  %s16079_s21 = scalar_lea.vmem %s17303_s13, %s10651_s16  ;;  %vm9374_vm2 = vcmask 7168   ;;  %vm9707_vm3 = vcmask 15368  }
  0x12   : > { %924 = vmatprep.subr.bf16.mxu0 %v11492_v5  ;;  %v11516_v16 = vld [vmem:[%s17295_s5 + $0x44] ss:$8 sps:$4 sm:$0xff]   ;;  %v11514_v17 = vld [vmem:[%s17295_s5 + $0x40] ss:$8 sps:$4 sm:$0xff]   ;;  %v11519_v20 = vld [vmem:[%s17295_s5 + $0x30] ss:$8 sps:$4 sm:$0xff]  }
  0x13   : > { %v11526_v21 = vld [vmem:[%s17295_s5 + $0x24] ss:$8 sps:$4 sm:$0xff]   ;;  %v11524_v22 = vld [vmem:[%s17295_s5 + $0x20] ss:$8 sps:$4 sm:$0xff]   ;;  %v11531_v23 = vld [vmem:[%s17295_s5 + $0x14] ss:$8 sps:$4 sm:$0xff]  }
  0x14   : > { %11462 = vmatpush1.bf16.msra.mxu1 %v11504_v12  ;;  %v11503_v24 = vld [vmem:[%s12134_s27 + $0x10] sm:$0xff]   ;;  %v11536_v26 = vld [vmem:[%s17295_s5 + $0x4] ss:$8 sps:$4 sm:$0xff]   ;;  %v11534_v27 = vld [vmem:[%s17295_s5] ss:$8 sps:$4 sm:$0xff]   ;;  %vm10040_vm4 = vcmask 23568  }
  0x15   : > { %925 = vmatpush1.bf16.msra.mxu0 %v11494_v6  ;;  %11447 = vmatprep.subr.bf16.mxu1 %v11511_v14  ;;  %v11529_v25 = vld [vmem:[%s17295_s5 + $0x10] ss:$8 sps:$4 sm:$0xff]   ;;  %v11541_v28 = vld [vmem:[%s17295_s5 + $0xf4] ss:$8 sps:$4 sm:$0xff]   ;;  %v11546_v31 = vld [vmem:[%s17295_s5 + $0xe4] ss:$8 sps:$4 sm:$0xff]  }
  0x16   : > { %926 = vmatprep.subr.bf16.mxu0 %v11495_v9  ;;  %v11507_v29 = vld [vmem:[%s12134_s27 + $0x18] sm:$0xff]   ;;  %v11544_v32 = vld [vmem:[%s17295_s5 + $0xe0] ss:$8 sps:$4 sm:$0xff]   ;;  %v11513_v37 = vld [vmem:[%s12134_s27 + $0x30] sm:$0xff]   ;;  %vm10508_vm5 = vcmask 31768  }
  0x17   : > { %v11539_v30 = vld [vmem:[%s17295_s5 + $0xf0] ss:$8 sps:$4 sm:$0xff]   ;;  %v11508_v33 = vld [vmem:[%s12134_s27 + $0x20] sm:$0xff]   ;;  %v11551_v34 = vld [vmem:[%s17295_s5 + $0xd4] ss:$8 sps:$4 sm:$0xff]  }
  0x18   : > { %11463 = vmatpush1.bf16.msra.mxu1 %v11509_v15  ;;  %v11549_v35 = vld [vmem:[%s17295_s5 + $0xd0] ss:$8 sps:$4 sm:$0xff]   ;;  %v11512_v36 = vld [vmem:[%s12134_s27 + $0x28] sm:$0xff]   ;;  %v11518_v41 = vld [vmem:[%s12134_s27 + $0x40] sm:$0xff]  }
  0x19   : > { %927 = vmatpush1.bf16.msra.mxu0 %v11497_v10  ;;  %11448 = vmatprep.subr.bf16.mxu1 %v11516_v16  ;;  %v11554_v38 = vld [vmem:[%s17295_s5 + $0xc0] ss:$8 sps:$4 sm:$0xff]   ;;  %v11556_v39 = vld [vmem:[%s17295_s5 + $0xc4] ss:$8 sps:$4 sm:$0xff]   ;;  %v11517_v40 = vld [vmem:[%s12134_s27 + $0x38] sm:$0xff]  }
  0x1a   : > { %1661 = vmatprep.subr.bf16.mxu0 %v11501_v7  ;;  %v11522_v42 = vld [vmem:[%s12134_s27 + $0x48] sm:$0xff]   ;;  %v11559_v43 = vld [vmem:[%s17295_s5 + $0xb0] ss:$8 sps:$4 sm:$0xff]   ;;  %v11561_v44 = vld [vmem:[%s17295_s5 + $0xb4] ss:$8 sps:$4 sm:$0xff]  }
  0x1b   : > { %v11523_v45 = vld [vmem:[%s12134_s27 + $0x50] sm:$0xff]   ;;  %v11527_v46 = vld [vmem:[%s12134_s27 + $0x58] sm:$0xff]   ;;  %v11564_v47 = vld [vmem:[%s17295_s5 + $0xa0] ss:$8 sps:$4 sm:$0xff]  }
  0x1c   : > { %10692 = vmatmul.mubr.msk.bf16.vlgmr.msra.gmra.mxu0 %vm815_vm0, %v11498_v13  ;;  %11464 = vmatpush1.bf16.msra.mxu1 %v11514_v17  ;;  %v11566_v48 = vld [vmem:[%s17295_s5 + $0xa4] ss:$8 sps:$4 sm:$0xff]   ;;  %v11569_v51 = vld [vmem:[%s17295_s5 + $0x90] ss:$8 sps:$4 sm:$0xff]   ;;  %v11571_v52 = vld [vmem:[%s17295_s5 + $0x94] ss:$8 sps:$4 sm:$0xff]  }
  0x1d   : > { %1662 = vmatpush1.bf16.msra.mxu0 %v11499_v8  ;;  %954 = vmatprep.mubr.bf16.mxu0 %v12028_v2  ;;  %v11528_v49 = vld [vmem:[%s12134_s27 + $0x60] sm:$0xff]   ;;  %v11532_v50 = vld [vmem:[%s12134_s27 + $0x68] sm:$0xff]   ;;  %v11533_v53 = vld [vmem:[%s12134_s27 + $0x70] sm:$0xff]  }
  0x1e   : > { %1663 = vmatprep.subr.bf16.mxu0 %v11506_v11  ;;  %11449 = vmatprep.subr.bf16.mxu1 %v11521_v18  ;;  %v11537_v54 = vld [vmem:[%s12134_s27 + $0x78] sm:$0xff]   ;;  %v11574_v55 = vld [vmem:[%s17295_s5 + $0x80] ss:$8 sps:$4 sm:$0xff]   ;;  %v11576_v56 = vld [vmem:[%s17295_s5 + $0x84] ss:$8 sps:$4 sm:$0xff]  }
  0x1f   : > { %v11538_v57 = vld [vmem:[%s12134_s27 + $0x80] sm:$0xff]   ;;  %v11542_v58 = vld [vmem:[%s12134_s27 + $0x88] sm:$0xff]   ;;  %v11543_v59 = vld [vmem:[%s12134_s27 + $0x90] sm:$0xff]  }
  0x20   : > { %11465 = vmatpush1.bf16.msra.mxu1 %v11519_v20  ;;  %v11547_v60 = vld [vmem:[%s12134_s27 + $0x98] sm:$0xff]   ;;  %v11548_v61 = vld [vmem:[%s12134_s27 + $0xa0] sm:$0xff]   ;;  %v11552_v62 = vld [vmem:[%s12134_s27 + $0xa8] sm:$0xff]  }
  0x21   : > { %1664 = vmatpush1.bf16.msra.mxu0 %v11504_v12  ;;  %11450 = vmatprep.subr.bf16.mxu1 %v11526_v21  ;;  %v11553_v63 = vld [vmem:[%s12134_s27 + $0xb0] sm:$0xff]   ;;  %v11557_v0 = vld [vmem:[%s12134_s27 + $0xb8] sm:$0xff]   ;;  %v11558_v1 = vld [vmem:[%s12134_s27 + $0xc0] sm:$0xff]  }
  0x22   : > { %1665 = vmatprep.subr.bf16.mxu0 %v11511_v14  ;;  %v11562_v6 = vld [vmem:[%s12134_s27 + $0xc8] sm:$0xff]   ;;  %v11563_v11 = vld [vmem:[%s12134_s27 + $0xd0] sm:$0xff]  }
  0x24   : > { %10693 = vmatmul.mubr.msk.bf16.gmra.mxu0 %vm815_vm0, %v11502_v19  ;;  %11466 = vmatpush1.bf16.msra.mxu1 %v11524_v22 }
  0x25   : > { %964 = vmatprep.mubr.bf16.mxu0 %v12028_v2  ;;  %1666 = vmatpush1.bf16.msra.mxu0 %v11509_v15 }
  0x26   : > { %1667 = vmatprep.subr.bf16.mxu0 %v11516_v16  ;;  %11451 = vmatprep.subr.bf16.mxu1 %v11531_v23  ;;  %v11567_v16 = vld [vmem:[%s12134_s27 + $0xd8] sm:$0xff]  }
  0x28   : > { %11467 = vmatpush1.bf16.msra.mxu1 %v11529_v25 }
  0x29   : > { %1668 = vmatpush1.bf16.msra.mxu0 %v11514_v17  ;;  %11452 = vmatprep.subr.bf16.mxu1 %v11536_v26 }
  0x2a   : > { %1669 = vmatprep.subr.bf16.mxu0 %v11521_v18 }
  0x2c   : > { %10694 = vmatmul.mubr.msk.bf16.gmra.mxu0 %vm815_vm0, %v11503_v24  ;;  %11468 = vmatpush1.bf16.msra.mxu1 %v11534_v27 }
  0x2d   : > { %974 = vmatprep.mubr.bf16.mxu0 %v12028_v2  ;;  %1670 = vmatpush1.bf16.msra.mxu0 %v11519_v20 }
  0x2e   : > { %1671 = vmatprep.subr.bf16.mxu0 %v11526_v21  ;;  %11453 = vmatprep.subr.bf16.mxu1 %v11541_v28  ;;  %v11568_v21 = vld [vmem:[%s12134_s27 + $0xe0] sm:$0xff]  }
  0x30   : > { %11469 = vmatpush2.bf16.msra.mxu1 %v11539_v30 }
  0x31   : > { %1672 = vmatpush1.bf16.msra.mxu0 %v11524_v22  ;;  %11454 = vmatprep.subr.bf16.mxu1 %v11546_v31 }
  0x32   : > { %1673 = vmatprep.subr.bf16.mxu0 %v11531_v23 }
  0x34   : > { %10695 = vmatmul.mubr.msk.bf16.gmra.mxu0 %vm815_vm0, %v11507_v29  ;;  %11470 = vmatpush2.bf16.msra.mxu1 %v11544_v32 }
  0x35   : > { %984 = vmatprep.mubr.bf16.mxu0 %v12028_v2  ;;  %1674 = vmatpush1.bf16.msra.mxu0 %v11529_v25  ;;  %v605_v25 = vlaneseq }
  0x36   : > { %1675 = vmatprep.subr.bf16.mxu0 %v11536_v26  ;;  %11455 = vmatprep.subr.bf16.mxu1 %v11551_v34 }
  0x37   : > { %v606_v29 = vshrl.u32 %v605_v25, 7  ;;  %v11584_v25 = vld [vmem:[%s17295_s5 + $0x150] ss:$8 sps:$4 sm:$0xff]  }
  0x38   : > { %11471 = vmatpush2.bf16.msra.mxu1 %v11549_v35 }
  0x39   : > { %1676 = vmatpush1.bf16.msra.mxu0 %v11534_v27  ;;  %11456 = vmatprep.subr.bf16.mxu1 %v11556_v39  ;;  %v11572_v27 = vld [vmem:[%s12134_s27 + $0xe8] sm:$0xff]  }
  0x3a   : > { %1677 = vmatprep.subr.bf16.mxu0 %v11541_v28 }
  0x3c   : > { %10696 = vmatmul.mubr.msk.bf16.gmra.mxu0 %vm815_vm0, %v11508_v33  ;;  %11472 = vmatpush2.bf16.msra.mxu1 %v11554_v38  ;;  %v603_v33 = vld [vmem:[%s17293_s3] sm:$0x3] }
  0x3d   : > { %994 = vmatprep.mubr.bf16.mxu0 %v12028_v2  ;;  %1678 = vmatpush2.bf16.msra.mxu0 %v11539_v30 }
  0x3e   : > { %1679 = vmatprep.subr.bf16.mxu0 %v11546_v31  ;;  %11457 = vmatprep.subr.bf16.mxu1 %v11561_v44  ;;  %v12357_v31 = vsub.s32 1, %v606_v29 }
  0x40   : > { %11473 = vmatpush2.bf16.msra.mxu1 %v11559_v43 }
  0x41   : > { %1680 = vmatpush2.bf16.msra.mxu0 %v11544_v32  ;;  %11458 = vmatprep.subr.bf16.mxu1 %v11566_v48 }
  0x42   : > { %1681 = vmatprep.subr.bf16.mxu0 %v11551_v34 }
  0x44   : > { %10697 = vmatmul.mubr.msk.bf16.gmra.mxu0 %vm815_vm0, %v11512_v36  ;;  %11474 = vmatpush2.bf16.msra.mxu1 %v11564_v47  ;;  %v12369_v36 = vrot.slane %v603_v33, %v12357_v31 }
  0x45   : > { %1004 = vmatprep.mubr.bf16.mxu0 %v12028_v2  ;;  %1682 = vmatpush2.bf16.msra.mxu0 %v11549_v35  ;;  %v11573_v35 = vld [vmem:[%s12134_s27 + $0xf0] sm:$0xff]  }
  0x46   : > { %1683 = vmatprep.subr.bf16.mxu0 %v11556_v39  ;;  %11459 = vmatprep.subr.bf16.mxu1 %v11571_v52  ;;  %v12374_v39 = vsub.s32 0, %v606_v29 }
  0x48   : > { %11475 = vmatpush2.bf16.msra.mxu1 %v11569_v51 }
  0x49   : > { %1684 = vmatpush2.bf16.msra.mxu0 %v11554_v38  ;;  %11460 = vmatprep.subr.bf16.mxu1 %v11576_v56 }
  0x4a   : > { %1685 = vmatprep.subr.bf16.mxu0 %v11561_v44  ;;  %v12384_v44 = vrot.slane %v603_v33, %v12374_v39 }
  0x4c   : > { %10698 = vmatmul.mubr.msk.bf16.gmra.mxu0 %vm815_vm0, %v11513_v37  ;;  %11476 = vmatpush2.bf16.msra.mxu1 %v11574_v55 }
  0x4d   : > { %1014 = vmatprep.mubr.bf16.mxu0 %v12028_v2  ;;  %1686 = vmatpush2.bf16.msra.mxu0 %v11559_v43 }
  0x4e   : > { %1687 = vmatprep.subr.bf16.mxu0 %v11566_v48 }
  0x51   : > { %1688 = vmatpush2.bf16.msra.mxu0 %v11564_v47 }
  0x52   : > { %1689 = vmatprep.subr.bf16.mxu0 %v11571_v52 }
  0x54   : > { %10699 = vmatmul.mubr.msk.bf16.gmra.mxu0 %vm815_vm0, %v11517_v40 }
  0x55   : > { %1024 = vmatprep.mubr.bf16.mxu0 %v12028_v2  ;;  %1690 = vmatpush2.bf16.msra.mxu0 %v11569_v51 }
  0x56   : > { %1691 = vmatprep.subr.bf16.mxu0 %v11576_v56 }
  0x59   : > { %1692 = vmatpush2.bf16.msra.mxu0 %v11574_v55  ;;  %v11580_v55 = vld [vmem:[%s17295_s5 + $0x174] ss:$8 sps:$4 sm:$0xff]  }
  0x5a   : > { %2412 = vmatprep.subr.bf16.mxu0 %v11580_v55 }
  0x5c   : > { %10700 = vmatmul.mubr.msk.bf16.gmra.mxu0 %vm815_vm0, %v11518_v41 }
  0x5d   : > { %1034 = vmatprep.mubr.bf16.mxu0 %v12028_v2 }
  0x64   : > { %10701 = vmatmul.mubr.msk.bf16.gmra.mxu0 %vm815_vm0, %v11522_v42 }
  0x65   : > { %1044 = vmatprep.mubr.bf16.mxu0 %v12028_v2 }
  0x6c   : > { %10702 = vmatmul.mubr.msk.bf16.gmra.mxu0 %vm815_vm0, %v11523_v45 }
  0x6d   : > { %1054 = vmatprep.mubr.bf16.mxu0 %v12028_v2 }
  0x74   : > { %10703 = vmatmul.mubr.msk.bf16.gmra.mxu0 %vm815_vm0, %v11527_v46  ;;  %v11577_v46 = vld [vmem:[%s12134_s27 + $0xf8] sm:$0xff]  }
  0x75   : > { %1064 = vmatprep.mubr.bf16.mxu0 %v12028_v2 }
  0x7c   : > { %10704 = vmatmul.mubr.msk.bf16.gmra.mxu0 %vm815_vm0, %v11528_v49 }
  0x7d   : > { %1074 = vmatprep.mubr.bf16.mxu0 %v12028_v2 }
  0x84   : > { %10705 = vmatmul.mubr.msk.bf16.gmra.mxu0 %vm815_vm0, %v11532_v50 }
  0x85   : > { %1084 = vmatprep.mubr.bf16.mxu0 %v12028_v2 }
  0x8c   : > { %10706 = vmatmul.mubr.msk.bf16.gmra.mxu0 %vm815_vm0, %v11533_v53 }
  0x8d   : > { %1094 = vmatprep.mubr.bf16.mxu0 %v12028_v2 }
  0x94   : > { %10707 = vmatmul.mubr.msk.bf16.gmra.mxu0 %vm815_vm0, %v11537_v54 }
  0x95   : > { %1104 = vmatprep.mubr.bf16.mxu0 %v12028_v2 }
  0x9c   : > { %10708 = vmatmul.mubr.msk.bf16.gmra.mxu0 %vm815_vm0, %v11538_v57 }
  0x9d   : > { %1114 = vmatprep.mubr.bf16.mxu0 %v12028_v2 }
  0xa4   : > { %10709 = vmatmul.mubr.msk.bf16.gmra.mxu0 %vm815_vm0, %v11542_v58 }
  0xa5   : > { %1124 = vmatprep.mubr.bf16.mxu0 %v12028_v2 }
  0xac   : > { %10710 = vmatmul.mubr.msk.bf16.gmra.mxu0 %vm815_vm0, %v11543_v59 }
  0xad   : > { %1134 = vmatprep.mubr.bf16.mxu0 %v12028_v2 }
  0xb4   : > { %10711 = vmatmul.mubr.msk.bf16.gmra.mxu0 %vm815_vm0, %v11547_v60 }
  0xb5   : > { %1144 = vmatprep.mubr.bf16.mxu0 %v12028_v2 }
  0xbc   : > { %10712 = vmatmul.mubr.msk.bf16.gmra.mxu0 %vm815_vm0, %v11548_v61 }
  0xbd   : > { %1154 = vmatprep.mubr.bf16.mxu0 %v12028_v2 }
  0xc4   : > { %10713 = vmatmul.mubr.msk.bf16.gmra.mxu0 %vm815_vm0, %v11552_v62  ;;  %v11578_v62 = vld [vmem:[%s17295_s5 + $0x170] ss:$8 sps:$4 sm:$0xff]  }
  0xc5   : > { %1164 = vmatprep.mubr.bf16.mxu0 %v12028_v2 }
  0xcc   : > { %10714 = vmatmul.mubr.msk.bf16.gmra.mxu0 %vm815_vm0, %v11553_v63 }
  0xcd   : > { %1174 = vmatprep.mubr.bf16.mxu0 %v12028_v2 }
  0xd4   : > { %10715 = vmatmul.mubr.msk.bf16.gmra.mxu0 %vm815_vm0, %v11557_v0 }
  0xd5   : > { %1184 = vmatprep.mubr.bf16.mxu0 %v12028_v2 }
  0xdc   : > { %v12311_v3 = vpop.f32.mrf.mxu0  ;;  %10716 = vmatmul.mubr.msk.bf16.gmra.mxu0 %vm815_vm0, %v11558_v1 }
  0xdd   : > { %1194 = vmatprep.mubr.bf16.mxu0 %v12028_v2  ;;  %v947_v52 = vadd.f32 %v12311_v3, %v12384_v44 }
  0xde   : > { %v948_v4 = vpop.f32.mrf.mxu0 }
  0xdf   : > { %v949_v41 = vadd.f32 %v948_v4, %v12369_v36  ;;  %v1265_v59 = vmax.f32 %v947_v52, 0.0 }
  0xe0   : > { %v950_v5 = vpop.f32.mrf.mxu0 }
  0xe1   : > { %v1266_v47 = vmax.f32 %v949_v41, 0.0  ;;  %v951_v48 = vadd.f32 %v950_v5, %v12384_v44 }
  0xe2   : > { %v952_v7 = vpop.f32.mrf.mxu0 }
  0xe3   : > { %v953_v38 = vadd.f32 %v952_v7, %v12369_v36  ;;  %v1267_v56 = vmax.f32 %v951_v48, 0.0 }
  0xe4   : > { %v12316_v8 = vpop.f32.mrf.mxu0  ;;  %10717 = vmatmul.mubr.msk.bf16.gmra.mxu0 %vm815_vm0, %v11562_v6 }
  0xe5   : > { %1204 = vmatprep.mubr.bf16.mxu0 %v12028_v2  ;;  %v1268_v43 = vmax.f32 %v953_v38, 0.0  ;;  %v1393_v63 = vpack.c.bf16 %v1267_v56, %v1265_v59  ;;  %v957_v5 = vadd.f32 %v12316_v8, %v12384_v44 }
  0xe6   : > { %v958_v9 = vpop.f32.mrf.mxu0 }
  0xe7   : > { %v1394_v51 = vpack.c.bf16 %v1268_v43, %v1266_v47  ;;  %v959_v54 = vadd.f32 %v958_v9, %v12369_v36  ;;  %v11581_v9 = vld [vmem:[%s17295_s5 + $0x160] ss:$8 sps:$4 sm:$0xff]  }
  0xe8   : > { %v12320_v10 = vpop.f32.mrf.mxu0 }
  0xe9   : > { %v1270_v61 = vmax.f32 %v959_v54, 0.0  ;;  %v961_v0 = vadd.f32 %v12320_v10, %v12384_v44  ;;  %v11583_v10 = vld [vmem:[%s17295_s5 + $0x164] ss:$8 sps:$4 sm:$0xff]  }
  0xea   : > { %v962_v12 = vpop.f32.mrf.mxu0 }
  0xeb   : > { %v963_v50 = vadd.f32 %v962_v12, %v12369_v36 }
  0xec   : > { %v12323_v13 = vpop.f32.mrf.mxu0  ;;  %10718 = vmatmul.mubr.msk.bf16.gmra.mxu0 %vm815_vm0, %v11563_v11  ;;  %v1271_v11 = vmax.f32 %v961_v0, 0.0 }
  0xed   : > { %1214 = vmatprep.mubr.bf16.mxu0 %v12028_v2  ;;  %v1272_v58 = vmax.f32 %v963_v50, 0.0  ;;  %v967_v41 = vadd.f32 %v12323_v13, %v12384_v44 }
  0xee   : > { %v12327_v14 = vpop.f32.mrf.mxu0 }
  0xef   : > { %v1396_v4 = vpack.c.bf16 %v1272_v58, %v1270_v61  ;;  %v969_v7 = vadd.f32 %v12327_v14, %v12369_v36  ;;  %v1269_v14 = vmax.f32 %v957_v5, 0.0  ;;  %v1273_v50 = vmax.f32 %v967_v41, 0.0 }
  0xf0   : > { %v12329_v15 = vpop.f32.mrf.mxu0 }
  0xf1   : > { %v971_v29 = vadd.f32 %v12329_v15, %v12384_v44  ;;  %v11587_v15 = vld [vmem:[%s17295_s5 + $0x140] ss:$8 sps:$4 sm:$0xff]  }
  0xf2   : > { %v972_v17 = vpop.f32.mrf.mxu0 }
  0xf3   : > { %v973_v3 = vadd.f32 %v972_v17, %v12369_v36  ;;  %v1275_v47 = vmax.f32 %v971_v29, 0.0 }
  0xf4   : > { %v12332_v18 = vpop.f32.mrf.mxu0  ;;  %10719 = vmatmul.mubr.msk.bf16.gmra.mxu0 %vm815_vm0, %v11567_v16  ;;  %v11586_v16 = vld [vmem:[%s17295_s5 + $0x154] ss:$8 sps:$4 sm:$0xff]  }
  0xf5   : > { %1224 = vmatprep.mubr.bf16.mxu0 %v12028_v2  ;;  %v1276_v8 = vmax.f32 %v973_v3, 0.0  ;;  %v977_v59 = vadd.f32 %v12332_v18, %v12384_v44 }
  0xf6   : > { %v12336_v19 = vpop.f32.mrf.mxu0 }
  0xf7   : > { %v1277_v18 = vmax.f32 %v977_v59, 0.0 }
  0xf8   : > { %v12338_v20 = vpop.f32.mrf.mxu0 }
  0xf9   : > { %v981_v54 = vadd.f32 %v12338_v20, %v12384_v44  ;;  %v11590_v20 = vld [vmem:[%s17295_s5 + $0x130] ss:$8 sps:$4 sm:$0xff]  }
  0xfa   : > { %v12341_v22 = vpop.f32.mrf.mxu0 }
  0xfc   : > { %v12343_v23 = vpop.f32.mrf.mxu0  ;;  %10720 = vmatmul.mubr.msk.bf16.gmra.mxu0 %vm815_vm0, %v11568_v21  ;;  %v1274_v21 = vmax.f32 %v969_v7, 0.0  ;;  %v11595_v7 = vld [vmem:[%s17295_s5 + $0x124] ss:$8 sps:$4 sm:$0xff]  }
  0xfd   : > { %1234 = vmatprep.mubr.bf16.mxu0 %v12028_v2 }
  0xfe   : > { %v12347_v24 = vpop.f32.mrf.mxu0  ;;  %v1398_v38 = vpack.c.bf16 %v1276_v8, %v1274_v21 }
 0x100   : > { %v12349_v26 = vpop.f32.mrf.mxu0 }
 0x102   : > { %v12352_v28 = vpop.f32.mrf.mxu0 }
 0x103   : > { %v993_v56 = vadd.f32 %v12352_v28, %v12369_v36  ;;  %v1279_v28 = vmax.f32 %v981_v54, 0.0 }
 0x104   : > { %v12354_v30 = vpop.f32.mrf.mxu0  ;;  %10721 = vmatmul.mubr.msk.bf16.gmra.mxu0 %vm815_vm0, %v11572_v27  ;;  %v1395_v27 = vpack.c.bf16 %v1271_v11, %v1269_v14  ;;  %v987_v14 = vadd.f32 %v12343_v23, %v12384_v44 }
 0x105   : > { %1244 = vmatprep.mubr.bf16.mxu0 %v12028_v2  ;;  %v1284_v3 = vmax.f32 %v993_v56, 0.0  ;;  %v997_v54 = vadd.f32 %v12354_v30, %v12384_v44 }
 0x106   : > { %v12360_v32 = vpop.f32.mrf.mxu0  ;;  %v1281_v23 = vmax.f32 %v987_v14, 0.0 }
 0x108   : > { %v12365_v34 = vpop.f32.mrf.mxu0 }
 0x10a   : > { %v12371_v37 = vpop.f32.mrf.mxu0 }
 0x10b   : > { %v1003_v8 = vadd.f32 %v12371_v37, %v12369_v36  ;;  %v11598_v37 = vld [vmem:[%s17295_s5 + $0x114] ss:$8 sps:$4 sm:$0xff]  }
 0x10c   : > { %v12376_v40 = vpop.f32.mrf.mxu0  ;;  %10722 = vmatmul.mubr.msk.bf16.gmra.mxu0 %vm815_vm0, %v11573_v35  ;;  %v983_v35 = vadd.f32 %v12341_v22, %v12369_v36  ;;  %v11589_v22 = vld [vmem:[%s17295_s5 + $0x144] ss:$8 sps:$4 sm:$0xff]  }
 0x10d   : > { %1254 = vmatprep.mubr.bf16.mxu0 %v12028_v2 }
 0x10e   : > { %v12381_v42 = vpop.f32.mrf.mxu0  ;;  %v1280_v13 = vmax.f32 %v983_v35, 0.0  ;;  %v1288_v35 = vmax.f32 %v1003_v8, 0.0  ;;  %v11602_v8 = vld [vmem:[%s17295_s5 + $0x1f0] ss:$8 sps:$4 sm:$0xff]  }
 0x10f   : > { %v1009_v59 = vadd.f32 %v12381_v42, %v12369_v36 }
 0x110   : > { %v12386_v45 = vpop.f32.mrf.mxu0 }
 0x112   : > { %v12390_v49 = vpop.f32.mrf.mxu0 }
 0x114   : > { %v12395_v53 = vpop.f32.mrf.mxu0  ;;  %10723 = vmatmul.mubr.msk.bf16.gmra.mxu0 %vm815_vm0, %v11577_v46  ;;  %v979_v46 = vadd.f32 %v12336_v19, %v12369_v36  ;;  %v1397_v19 = vpack.c.bf16 %v1275_v47, %v1273_v50  ;;  %v1013_v50 = vadd.f32 %v12390_v49, %v12369_v36  ;;  %v11601_v49 = vld [vmem:[%s17295_s5 + $0x104] ss:$8 sps:$4 sm:$0xff]  }
 0x115   : > { %1693 = vmatprep.mubr.bf16.mxu0 %v1394_v51 }
 0x116   : > { %v12402_v57 = vpop.f32.mrf.mxu0  ;;  %v1278_v52 = vmax.f32 %v979_v46, 0.0 }
 0x118   : > { %v12404_v60 = vpop.f32.mrf.mxu0  ;;  %v1400_v58 = vpack.c.bf16 %v1280_v13, %v1278_v52 }
 0x11a   : > { %v12411_v1 = vpop.f32.mrf.mxu0 }
 0x11c   : > { %v12416_v6 = vpop.f32.mrf.mxu0  ;;  %1694 = vmatmul.mubr.bf16.vlgmr.msra.gmra.mxu0 %v1393_v63  ;;  %v11592_v63 = vld [vmem:[%s17295_s5 + $0x134] ss:$8 sps:$4 sm:$0xff]  }
 0x11d   : > { %1703 = vmatprep.mubr.bf16.mxu0 %v1396_v4  ;;  %2413 = vmatpush1.bf16.msra.mxu0 %v11578_v62  ;;  %v989_v62 = vadd.f32 %v12347_v24, %v12369_v36  ;;  %v11593_v24 = vld [vmem:[%s17295_s5 + $0x120] ss:$8 sps:$4 sm:$0xff]  }
 0x11e   : > { %v12426_v12 = vpop.f32.mrf.mxu0  ;;  %2414 = vmatprep.subr.bf16.mxu0 %v11583_v10  ;;  %v991_v10 = vadd.f32 %v12349_v26, %v12384_v44  ;;  %v11596_v26 = vld [vmem:[%s17295_s5 + $0x110] ss:$8 sps:$4 sm:$0xff]  }
 0x11f   : > { %v1282_v5 = vmax.f32 %v989_v62, 0.0 }
 0x120   : > { %v12431_v17 = vpop.f32.mrf.mxu0 }
 0x121   : > { %2415 = vmatpush1.bf16.msra.mxu0 %v11581_v9  ;;  %v1399_v9 = vpack.c.bf16 %v1279_v28, %v1277_v18 }
 0x122   : > { %v12438_v33 = vpop.f32.mrf.mxu0  ;;  %2416 = vmatprep.subr.bf16.mxu0 %v11586_v16  ;;  %v1402_v16 = vpack.c.bf16 %v1284_v3, %v1282_v5  ;;  %v1292_v3 = vmax.f32 %v1013_v50, 0.0  ;;  %v1285_v5 = vmax.f32 %v997_v54, 0.0 }
 0x124   : > { %v12444_v43 = vpop.f32.mrf.mxu0  ;;  %1704 = vmatmul.mubr.bf16.gmra.mxu0 %v1395_v27  ;;  %v1283_v27 = vmax.f32 %v991_v10, 0.0 }
 0x125   : > { %1713 = vmatprep.mubr.bf16.mxu0 %v1398_v38  ;;  %2417 = vmatpush1.bf16.msra.mxu0 %v11584_v25  ;;  %v999_v25 = vadd.f32 %v12360_v32, %v12369_v36 }
 0x126   : > { %v12454_v48 = vpop.f32.mrf.mxu0  ;;  %2418 = vmatprep.subr.bf16.mxu0 %v11589_v22  ;;  %v1001_v22 = vadd.f32 %v12365_v34, %v12384_v44 }
 0x127   : > { %v1286_v41 = vmax.f32 %v999_v25, 0.0 }
 0x128   : > { %v12456_v51 = vpop.f32.mrf.mxu0 }
 0x129   : > { %2419 = vmatpush1.bf16.msra.mxu0 %v11587_v15  ;;  %v1401_v15 = vpack.c.bf16 %v1283_v27, %v1281_v23 }
 0x12a   : > { %v12460_v55 = vpop.f32.mrf.mxu0  ;;  %2420 = vmatprep.subr.bf16.mxu0 %v11592_v63  ;;  %v1287_v63 = vmax.f32 %v1001_v22, 0.0 }
 0x12c   : > { %v12466_v61 = vpop.f32.mrf.mxu0  ;;  %1714 = vmatmul.mubr.bf16.gmra.mxu0 %v1397_v19  ;;  %v1404_v19 = vpack.c.bf16 %v1288_v35, %v1286_v41  ;;  %v1403_v14 = vpack.c.bf16 %v1287_v63, %v1285_v5  ;;  %v1007_v35 = vadd.f32 %v12376_v40, %v12384_v44  ;;  %v11607_v40 = vld [vmem:[%s17295_s5 + $0x1e4] ss:$8 sps:$4 sm:$0xff]  }
 0x12d   : > { %1723 = vmatprep.mubr.bf16.mxu0 %v1400_v58  ;;  %2421 = vmatpush1.bf16.msra.mxu0 %v11590_v20  ;;  %v11599_v20 = vld [vmem:[%s17295_s5 + $0x100] ss:$8 sps:$4 sm:$0xff]  }
 0x12e   : > { %v12476_v0 = vpop.f32.mrf.mxu0  ;;  %2422 = vmatprep.subr.bf16.mxu0 %v11595_v7  ;;  %v1290_v7 = vmax.f32 %v1009_v59, 0.0  ;;  %v1289_v50 = vmax.f32 %v1007_v35, 0.0  ;;  %v1021_v59 = vadd.f32 %v12404_v60, %v12384_v44  ;;  %v1029_v60 = vadd.f32 %v12426_v12, %v12369_v36 }
 0x130   : > { %v12478_v4 = vpop.f32.mrf.mxu0 }
 0x131   : > { %2423 = vmatpush1.bf16.msra.mxu0 %v11593_v24 }
 0x132   : > { %v12488_v11 = vpop.f32.mrf.mxu0  ;;  %2424 = vmatprep.subr.bf16.mxu0 %v11598_v37  ;;  %v1023_v37 = vadd.f32 %v12411_v1, %v12369_v36 }
 0x134   : > { %v1056_v21 = vpop.f32.mrf.mxu0  ;;  %1724 = vmatmul.mubr.bf16.gmra.mxu0 %v1399_v9  ;;  %v1296_v22 = vmax.f32 %v1023_v37, 0.0  ;;  %v11613_v37 = vld [vmem:[%s17295_s5 + $0x1c4] ss:$8 sps:$4 sm:$0xff]  }
 0x135   : > { %1733 = vmatprep.mubr.bf16.mxu0 %v1402_v16  ;;  %2425 = vmatpush1.bf16.msra.mxu0 %v11596_v26  ;;  %v1057_v47 = vadd.f32 %v1056_v21, %v12384_v44  ;;  %v11604_v16 = vld [vmem:[%s17295_s5 + $0x1f4] ss:$8 sps:$4 sm:$0xff]   ;;  %v1011_v21 = vadd.f32 %v12386_v45, %v12384_v44  ;;  %v1019_v45 = vadd.f32 %v12402_v57, %v12369_v36 }
 0x136   : > { %v1058_v29 = vpop.f32.mrf.mxu0  ;;  %2426 = vmatprep.subr.bf16.mxu0 %v11601_v49 }
 0x137   : > { %v1059_v46 = vadd.f32 %v1058_v29, %v12369_v36  ;;  %v1309_v28 = vmax.f32 %v1057_v47, 0.0  ;;  %v1406_v29 = vpack.c.bf16 %v1292_v3, %v1290_v7 }
 0x138   : > { %v1060_v38 = vpop.f32.mrf.mxu0 }
 0x139   : > { %v1061_v32 = vadd.f32 %v1060_v38, %v12384_v44  ;;  %v1310_v62 = vmax.f32 %v1059_v46, 0.0  ;;  %2427 = vmatpush1.bf16.msra.mxu0 %v11599_v20  ;;  %v1033_v20 = vadd.f32 %v12438_v33, %v12369_v36  ;;  %v11610_v33 = vld [vmem:[%s17295_s5 + $0x1d4] ss:$8 sps:$4 sm:$0xff]  }
 0x13a   : > { %v1062_v13 = vpop.f32.mrf.mxu0  ;;  %2428 = vmatprep.subr.bf16.mxu0 %v11604_v16 }
 0x13b   : > { %v1063_v52 = vadd.f32 %v1062_v13, %v12369_v36  ;;  %v1311_v56 = vmax.f32 %v1061_v32, 0.0  ;;  %v1291_v32 = vmax.f32 %v1011_v21, 0.0  ;;  %v11605_v13 = vld [vmem:[%s17295_s5 + $0x1e0] ss:$8 sps:$4 sm:$0xff]  }
 0x13c   : > { %v1066_v58 = vpop.f32.mrf.mxu0  ;;  %1734 = vmatmul.mubr.bf16.gmra.mxu0 %v1401_v15 }
 0x13d   : > { %1743 = vmatprep.mubr.bf16.mxu0 %v1404_v19  ;;  %v1312_v34 = vmax.f32 %v1063_v52, 0.0  ;;  %v1415_v24 = vpack.c.bf16 %v1311_v56, %v1309_v28  ;;  %v1067_v25 = vadd.f32 %v1066_v58, %v12384_v44  ;;  %2429 = vmatpush2.bf16.msra.mxu0 %v11602_v8  ;;  %v1294_v19 = vmax.f32 %v1019_v45, 0.0 }
 0x13e   : > { %v1068_v30 = vpop.f32.mrf.mxu0  ;;  %2430 = vmatprep.subr.bf16.mxu0 %v11607_v40  ;;  %v1405_v58 = vpack.c.bf16 %v1291_v32, %v1289_v50  ;;  %v1017_v28 = vadd.f32 %v12395_v53, %v12384_v44 }
 0x13f   : > { %v1416_v18 = vpack.c.bf16 %v1312_v34, %v1310_v62  ;;  %v1069_v9 = vadd.f32 %v1068_v30, %v12369_v36  ;;  %v1313_v15 = vmax.f32 %v1067_v25, 0.0  ;;  %v1408_v63 = vpack.c.bf16 %v1296_v22, %v1294_v19 }
 0x140   : > { %v1070_v42 = vpop.f32.mrf.mxu0  ;;  %v1293_v8 = vmax.f32 %v1017_v28, 0.0 }
 0x141   : > { %v1071_v10 = vadd.f32 %v1070_v42, %v12384_v44  ;;  %1803 = vmatprep.mubr.bf16.mxu1 %v1416_v18  ;;  %v1314_v41 = vmax.f32 %v1069_v9, 0.0  ;;  %2431 = vmatpush2.bf16.msra.mxu0 %v11605_v13  ;;  %v1295_v42 = vmax.f32 %v1021_v59, 0.0  ;;  %v1300_v9 = vmax.f32 %v1033_v20, 0.0 }
 0x142   : > { %v1072_v26 = vpop.f32.mrf.mxu0  ;;  %1804 = vmatmul.mubr.bf16.vlgmr.msra.gmra.mxu1 %v1415_v24  ;;  %v11608_v24 = vld [vmem:[%s17295_s5 + $0x1d0] ss:$8 sps:$4 sm:$0xff]   ;;  %2432 = vmatprep.subr.bf16.mxu0 %v11610_v33 }
 0x143   : > { %v1073_v27 = vadd.f32 %v1072_v26, %v12369_v36  ;;  %v1315_v23 = vmax.f32 %v1071_v10, 0.0  ;;  %v11611_v26 = vld [vmem:[%s17295_s5 + $0x1c0] ss:$8 sps:$4 sm:$0xff]  }
 0x144   : > { %v1076_v38 = vpop.f32.mrf.mxu0  ;;  %1744 = vmatmul.mubr.bf16.gmra.mxu0 %v1403_v14  ;;  %v1298_v14 = vmax.f32 %v1029_v60, 0.0 }
 0x145   : > { %v1316_v46 = vmax.f32 %v1073_v27, 0.0  ;;  %1753 = vmatprep.mubr.bf16.mxu0 %v1406_v29  ;;  %v1417_v52 = vpack.c.bf16 %v1315_v23, %v1313_v15  ;;  %v1077_v62 = vadd.f32 %v1076_v38, %v12384_v44  ;;  %2433 = vmatpush2.bf16.msra.mxu0 %v11608_v24  ;;  %v1407_v27 = vpack.c.bf16 %v1295_v42, %v1293_v8 }
 0x146   : > { %v1078_v1 = vpop.f32.mrf.mxu0  ;;  %v1031_v29 = vadd.f32 %v12431_v17, %v12384_v44  ;;  %v1043_v38 = vadd.f32 %v12460_v55, %v12369_v36  ;;  %2434 = vmatprep.subr.bf16.mxu0 %v11613_v37  ;;  %v1039_v17 = vadd.f32 %v12454_v48, %v12369_v36 }
 0x147   : > { %v1418_v47 = vpack.c.bf16 %v1316_v46, %v1314_v41  ;;  %v1079_v54 = vadd.f32 %v1078_v1, %v12369_v36  ;;  %v1317_v7 = vmax.f32 %v1077_v62, 0.0  ;;  %v1410_v41 = vpack.c.bf16 %v1300_v9, %v1298_v14 }
 0x148   : > { %v1080_v57 = vpop.f32.mrf.mxu0  ;;  %v1027_v46 = vadd.f32 %v12416_v6, %v12384_v44  ;;  %v1304_v40 = vmax.f32 %v1043_v38, 0.0  ;;  %v11616_v6 = vld [vmem:[%s17295_s5 + $0x1b4] ss:$8 sps:$4 sm:$0xff]   ;;  %v1041_v62 = vadd.f32 %v12456_v51, %v12384_v44  ;;  %v11619_v51 = vld [vmem:[%s17295_s5 + $0x1a4] ss:$8 sps:$4 sm:$0xff]  }
 0x149   : > { %v1081_v56 = vadd.f32 %v1080_v57, %v12384_v44  ;;  %1813 = vmatprep.mubr.bf16.mxu1 %v1418_v47  ;;  %v1318_v18 = vmax.f32 %v1079_v54, 0.0  ;;  %2435 = vmatpush2.bf16.msra.mxu0 %v11611_v26  ;;  %v1299_v47 = vmax.f32 %v1031_v29, 0.0  ;;  %v1302_v54 = vmax.f32 %v1039_v17, 0.0 }
 0x14a   : > { %v1082_v34 = vpop.f32.mrf.mxu0  ;;  %1814 = vmatmul.mubr.bf16.gmra.mxu1 %v1417_v52  ;;  %v11614_v52 = vld [vmem:[%s17295_s5 + $0x1b0] ss:$8 sps:$4 sm:$0xff]   ;;  %v1297_v57 = vmax.f32 %v1027_v46, 0.0  ;;  %2436 = vmatprep.subr.bf16.mxu0 %v11616_v6  ;;  %v1303_v33 = vmax.f32 %v1041_v62, 0.0  ;;  %v1051_v26 = vadd.f32 %v12478_v4, %v12384_v44 }
 0x14b   : > { %v1083_v49 = vadd.f32 %v1082_v34, %v12369_v36  ;;  %v1319_v30 = vmax.f32 %v1081_v56, 0.0  ;;  %v1412_v28 = vpack.c.bf16 %v1304_v40, %v1302_v54 }
 0x14c   : > { %v1086_v3 = vpop.f32.mrf.mxu0  ;;  %1754 = vmatmul.mubr.bf16.gmra.mxu0 %v1405_v58  ;;  %v1409_v59 = vpack.c.bf16 %v1299_v47, %v1297_v57 }
 0x14d   : > { %v1320_v5 = vmax.f32 %v1083_v49, 0.0  ;;  %1763 = vmatprep.mubr.bf16.mxu0 %v1408_v63  ;;  %v1419_v16 = vpack.c.bf16 %v1319_v30, %v1317_v7  ;;  %v1087_v35 = vadd.f32 %v1086_v3, %v12384_v44  ;;  %2437 = vmatpush2.bf16.msra.mxu0 %v11614_v52  ;;  %v1053_v49 = vadd.f32 %v12488_v11, %v12369_v36  ;;  %v11617_v11 = vld [vmem:[%s17295_s5 + $0x1a0] ss:$8 sps:$4 sm:$0xff]  }
 0x14e   : > { %v1088_v53 = vpop.f32.mrf.mxu0  ;;  %v1037_v30 = vadd.f32 %v12444_v43, %v12384_v44  ;;  %2438 = vmatprep.subr.bf16.mxu0 %v11619_v51 }
 0x14f   : > { %v1420_v10 = vpack.c.bf16 %v1320_v5, %v1318_v18  ;;  %v1089_v21 = vadd.f32 %v1088_v53, %v12369_v36  ;;  %v1321_v13 = vmax.f32 %v1087_v35, 0.0  ;;  %v1049_v18 = vadd.f32 %v12476_v0, %v12369_v36  ;;  %v11622_v0 = vld [vmem:[%s17295_s5 + $0x194] ss:$8 sps:$4 sm:$0xff]  }
 0x150   : > { %v1090_v12 = vpop.f32.mrf.mxu0  ;;  %v1308_v7 = vmax.f32 %v1053_v49, 0.0  ;;  %v1301_v9 = vmax.f32 %v1037_v30, 0.0 }
 0x151   : > { %v1091_v25 = vadd.f32 %v1090_v12, %v12384_v44  ;;  %1823 = vmatprep.mubr.bf16.mxu1 %v1420_v10  ;;  %v1322_v1 = vmax.f32 %v1089_v21, 0.0  ;;  %2439 = vmatpush2.bf16.msra.mxu0 %v11617_v11  ;;  %v11620_v21 = vld [vmem:[%s17295_s5 + $0x190] ss:$8 sps:$4 sm:$0xff]  }
 0x152   : > { %v1092_v23 = vpop.f32.mrf.mxu0  ;;  %1824 = vmatmul.mubr.bf16.gmra.mxu1 %v1419_v16  ;;  %v1306_v16 = vmax.f32 %v1049_v18, 0.0  ;;  %2440 = vmatprep.subr.bf16.mxu0 %v11622_v0 }
 0x153   : > { %v1093_v45 = vadd.f32 %v1092_v23, %v12369_v36  ;;  %v1323_v32 = vmax.f32 %v1091_v25, 0.0  ;;  %v1411_v25 = vpack.c.bf16 %v1303_v33, %v1301_v9  ;;  %v1047_v23 = vadd.f32 %v12466_v61, %v12384_v44 }
 0x154   : > { %v1096_v15 = vpop.f32.mrf.mxu0  ;;  %1764 = vmatmul.mubr.bf16.gmra.mxu0 %v1407_v27  ;;  %v1414_v35 = vpack.c.bf16 %v1308_v7, %v1306_v16 }
 0x155   : > { %v1324_v22 = vmax.f32 %v1093_v45, 0.0  ;;  %1773 = vmatprep.mubr.bf16.mxu0 %v1410_v41  ;;  %v1421_v19 = vpack.c.bf16 %v1323_v32, %v1321_v13  ;;  %v1097_v34 = vadd.f32 %v1096_v15, %v12384_v44  ;;  %2441 = vmatpush2.bf16.msra.mxu0 %v11620_v21  ;;  %v11625_v41 = vld [vmem:[%s17295_s5 + $0x184] ss:$8 sps:$4 sm:$0xff]   ;;  %v11623_v32 = vld [vmem:[%s17295_s5 + $0x180] ss:$8 sps:$4 sm:$0xff]   ;;  %v1307_v15 = vmax.f32 %v1051_v26, 0.0 }
 0x156   : > { %v1098_v55 = vpop.f32.mrf.mxu0  ;;  %2442 = vmatprep.subr.bf16.mxu0 %v11625_v41  ;;  %v1305_v61 = vmax.f32 %v1047_v23, 0.0 }
 0x157   : > { %v1422_v50 = vpack.c.bf16 %v1324_v22, %v1322_v1  ;;  %v1099_v56 = vadd.f32 %v1098_v55, %v12369_v36  ;;  %v1325_v42 = vmax.f32 %v1097_v34, 0.0 }
 0x158   : > { %v1100_v48 = vpop.f32.mrf.mxu0 }
 0x159   : > { %v1101_v58 = vadd.f32 %v1100_v48, %v12384_v44  ;;  %1833 = vmatprep.mubr.bf16.mxu1 %v1422_v50  ;;  %v1326_v5 = vmax.f32 %v1099_v56, 0.0  ;;  %2443 = vmatpush2.bf16.msra.mxu0 %v11623_v32  ;;  %v1413_v50 = vpack.c.bf16 %v1307_v15, %v1305_v61 }
 0x15a   : > { %v1102_v20 = vpop.f32.mrf.mxu0  ;;  %1834 = vmatmul.mubr.bf16.gmra.mxu1 %v1421_v19 }
 0x15b   : > { %v1103_v63 = vadd.f32 %v1102_v20, %v12369_v36  ;;  %v1327_v3 = vmax.f32 %v1101_v58, 0.0 }
 0x15c   : > { %v1106_v60 = vpop.f32.mrf.mxu0  ;;  %1774 = vmatmul.mubr.bf16.gmra.mxu0 %v1409_v59 }
 0x15d   : > { %v1328_v24 = vmax.f32 %v1103_v63, 0.0  ;;  %1783 = vmatprep.mubr.bf16.mxu0 %v1412_v28  ;;  %v1423_v10 = vpack.c.bf16 %v1327_v3, %v1325_v42  ;;  %v1107_v37 = vadd.f32 %v1106_v60, %v12384_v44 }
 0x15e   : > { %v1108_v43 = vpop.f32.mrf.mxu0 }
 0x15f   : > { %v1424_v53 = vpack.c.bf16 %v1328_v24, %v1326_v5  ;;  %v1109_v12 = vadd.f32 %v1108_v43, %v12369_v36  ;;  %v1329_v17 = vmax.f32 %v1107_v37, 0.0 }
 0x160   : > { %v1110_v8 = vpop.f32.mrf.mxu0 }
 0x161   : > { %v1111_v14 = vadd.f32 %v1110_v8, %v12384_v44  ;;  %1843 = vmatprep.mubr.bf16.mxu1 %v1424_v53  ;;  %v1330_v4 = vmax.f32 %v1109_v12, 0.0 }
 0x162   : > { %v1112_v27 = vpop.f32.mrf.mxu0  ;;  %1844 = vmatmul.mubr.bf16.gmra.mxu1 %v1423_v10 }
 0x163   : > { %v1113_v29 = vadd.f32 %v1112_v27, %v12369_v36  ;;  %v1331_v38 = vmax.f32 %v1111_v14, 0.0 }
 0x164   : > { %v1116_v45 = vpop.f32.mrf.mxu0  ;;  %1784 = vmatmul.mubr.bf16.gmra.mxu0 %v1411_v25 }
 0x165   : > { %v1332_v46 = vmax.f32 %v1113_v29, 0.0  ;;  %1793 = vmatprep.mubr.bf16.mxu0 %v1414_v35  ;;  %v1425_v47 = vpack.c.bf16 %v1331_v38, %v1329_v17  ;;  %v1117_v52 = vadd.f32 %v1116_v45, %v12384_v44 }
 0x166   : > { %v1118_v1 = vpop.f32.mrf.mxu0 }
 0x167   : > { %v1426_v22 = vpack.c.bf16 %v1332_v46, %v1330_v4  ;;  %v1119_v55 = vadd.f32 %v1118_v1, %v12369_v36  ;;  %v1333_v58 = vmax.f32 %v1117_v52, 0.0 }
 0x168   : > { %v1120_v13 = vpop.f32.mrf.mxu0 }
 0x169   : > { %v1121_v40 = vadd.f32 %v1120_v13, %v12384_v44  ;;  %1853 = vmatprep.mubr.bf16.mxu1 %v1426_v22  ;;  %v1334_v54 = vmax.f32 %v1119_v55, 0.0 }
 0x16a   : > { %v1122_v6 = vpop.f32.mrf.mxu0  ;;  %1854 = vmatmul.mubr.bf16.gmra.mxu1 %v1425_v47 }
 0x16b   : > { %v1123_v57 = vadd.f32 %v1122_v6, %v12369_v36  ;;  %v1335_v19 = vmax.f32 %v1121_v40, 0.0 }
 0x16c   : > { %v1126_v48 = vpop.f32.mrf.mxu0  ;;  %1794 = vmatmul.mubr.bf16.gmra.mxu0 %v1413_v50 }
 0x16d   : > { %v1336_v56 = vmax.f32 %v1123_v57, 0.0  ;;  %v1427_v34 = vpack.c.bf16 %v1335_v19, %v1333_v58  ;;  %v1127_v28 = vadd.f32 %v1126_v48, %v12384_v44 }
 0x16e   : > { %v1128_v59 = vpop.f32.mrf.mxu0 }
 0x16f   : > { %v1428_v62 = vpack.c.bf16 %v1336_v56, %v1334_v54  ;;  %v1129_v49 = vadd.f32 %v1128_v59, %v12369_v36  ;;  %v1337_v24 = vmax.f32 %v1127_v28, 0.0 }
 0x170   : > { %v1130_v20 = vpop.f32.mrf.mxu0 }
 0x171   : > { %v1131_v63 = vadd.f32 %v1130_v20, %v12384_v44  ;;  %1863 = vmatprep.mubr.bf16.mxu1 %v1428_v62  ;;  %v1338_v18 = vmax.f32 %v1129_v49, 0.0 }
 0x172   : > { %v1132_v30 = vpop.f32.mrf.mxu0  ;;  %1864 = vmatmul.mubr.bf16.gmra.mxu1 %v1427_v34 }
 0x173   : > { %v1133_v3 = vadd.f32 %v1132_v30, %v12369_v36  ;;  %v1339_v60 = vmax.f32 %v1131_v63, 0.0 }
 0x174   : > { %v1136_v51 = vpop.f32.mrf.mxu0 }
 0x175   : > { %v1340_v5 = vmax.f32 %v1133_v3, 0.0  ;;  %v1429_v42 = vpack.c.bf16 %v1339_v60, %v1337_v24  ;;  %v1137_v9 = vadd.f32 %v1136_v51, %v12384_v44  ;;  %v11626_v51 = vld [vmem:[%s17295_s5 + $0x270] ss:$8 sps:$4 sm:$0xff]  }
 0x176   : > { %v1138_v11 = vpop.f32.mrf.mxu0 }
 0x177   : > { %v1430_v33 = vpack.c.bf16 %v1340_v5, %v1338_v18  ;;  %v1139_v7 = vadd.f32 %v1138_v11, %v12369_v36  ;;  %v1341_v21 = vmax.f32 %v1137_v9, 0.0  ;;  %v11628_v18 = vld [vmem:[%s17295_s5 + $0x274] ss:$8 sps:$4 sm:$0xff]  }
 0x178   : > { %v1140_v43 = vpop.f32.mrf.mxu0  ;;  %3163 = vmatprep.subr.bf16.mxu1 %v11628_v18 }
 0x179   : > { %v1141_v53 = vadd.f32 %v1140_v43, %v12384_v44  ;;  %1873 = vmatprep.mubr.bf16.mxu1 %v1430_v33  ;;  %v1342_v12 = vmax.f32 %v1139_v7, 0.0  ;;  %3164 = vmatpush1.bf16.msra.mxu1 %v11626_v51 }
 0x17a   : > { %v1142_v10 = vpop.f32.mrf.mxu0  ;;  %1874 = vmatmul.mubr.bf16.gmra.mxu1 %v1429_v42 }
 0x17b   : > { %v1143_v8 = vadd.f32 %v1142_v10, %v12369_v36  ;;  %v1343_v0 = vmax.f32 %v1141_v53, 0.0 }
 0x17c   : > { %v1146_v16 = vpop.f32.mrf.mxu0 }
 0x17d   : > { %v1344_v14 = vmax.f32 %v1143_v8, 0.0  ;;  %v1431_v37 = vpack.c.bf16 %v1343_v0, %v1341_v21  ;;  %v1147_v23 = vadd.f32 %v1146_v16, %v12384_v44 }
 0x17e   : > { %v1148_v25 = vpop.f32.mrf.mxu0 }
 0x17f   : > { %v1432_v26 = vpack.c.bf16 %v1344_v14, %v1342_v12  ;;  %v1149_v29 = vadd.f32 %v1148_v25, %v12369_v36  ;;  %v1345_v15 = vmax.f32 %v1147_v23, 0.0  ;;  %v11629_v25 = vld [vmem:[%s17295_s5 + $0x260] ss:$8 sps:$4 sm:$0xff]  }
 0x180   : > { %v1150_v27 = vpop.f32.mrf.mxu0 }
 0x181   : > { %v1151_v35 = vadd.f32 %v1150_v27, %v12384_v44  ;;  %1883 = vmatprep.mubr.bf16.mxu1 %v1432_v26  ;;  %v1346_v46 = vmax.f32 %v1149_v29, 0.0  ;;  %v11631_v26 = vld [vmem:[%s17295_s5 + $0x264] ss:$8 sps:$4 sm:$0xff]  }
 0x182   : > { %v1152_v38 = vpop.f32.mrf.mxu0  ;;  %1884 = vmatmul.mubr.bf16.gmra.mxu1 %v1431_v37  ;;  %3165 = vmatprep.subr.bf16.mxu1 %v11631_v26  ;;  %v11638_v26 = vld [vmem:[%s17295_s5 + $0x230] ss:$8 sps:$4 sm:$0xff]  }
 0x183   : > { %v1153_v45 = vadd.f32 %v1152_v38, %v12369_v36  ;;  %v1347_v41 = vmax.f32 %v1151_v35, 0.0  ;;  %3166 = vmatpush1.bf16.msra.mxu1 %v11629_v25 }
 0x184   : > { %v1156_v4 = vpop.f32.mrf.mxu0 }
 0x185   : > { %v1348_v32 = vmax.f32 %v1153_v45, 0.0  ;;  %v1433_v22 = vpack.c.bf16 %v1347_v41, %v1345_v15  ;;  %v1157_v55 = vadd.f32 %v1156_v4, %v12384_v44 }
 0x186   : > { %v1158_v17 = vpop.f32.mrf.mxu0 }
 0x187   : > { %v1434_v1 = vpack.c.bf16 %v1348_v32, %v1346_v46  ;;  %v1159_v47 = vadd.f32 %v1158_v17, %v12369_v36  ;;  %v1349_v48 = vmax.f32 %v1157_v55, 0.0 }
 0x188   : > { %v1160_v61 = vpop.f32.mrf.mxu0 }
 0x189   : > { %v1161_v13 = vadd.f32 %v1160_v61, %v12384_v44  ;;  %1893 = vmatprep.mubr.bf16.mxu1 %v1434_v1  ;;  %v1350_v57 = vmax.f32 %v1159_v47, 0.0  ;;  %v11632_v61 = vld [vmem:[%s17295_s5 + $0x250] ss:$8 sps:$4 sm:$0xff]   ;;  %v11634_v47 = vld [vmem:[%s17295_s5 + $0x254] ss:$8 sps:$4 sm:$0xff]  }
 0x18a   : > { %v1162_v40 = vpop.f32.mrf.mxu0  ;;  %1894 = vmatmul.mubr.bf16.gmra.mxu1 %v1433_v22  ;;  %3167 = vmatprep.subr.bf16.mxu1 %v11634_v47 }
 0x18b   : > { %v1163_v50 = vadd.f32 %v1162_v40, %v12369_v36  ;;  %v1351_v52 = vmax.f32 %v1161_v13, 0.0  ;;  %3168 = vmatpush1.bf16.msra.mxu1 %v11632_v61 }
 0x18c   : > { %v1166_v6 = vpop.f32.mrf.mxu0 }
 0x18d   : > { %v1352_v19 = vmax.f32 %v1163_v50, 0.0  ;;  %v1435_v58 = vpack.c.bf16 %v1351_v52, %v1349_v48  ;;  %v1167_v20 = vadd.f32 %v1166_v6, %v12384_v44 }
 0x18e   : > { %v1168_v54 = vpop.f32.mrf.mxu0 }
 0x18f   : > { %v1436_v56 = vpack.c.bf16 %v1352_v19, %v1350_v57  ;;  %v1169_v62 = vadd.f32 %v1168_v54, %v12369_v36  ;;  %v1353_v5 = vmax.f32 %v1167_v20, 0.0 }
 0x190   : > { %v1170_v59 = vpop.f32.mrf.mxu0 }
 0x191   : > { %v1171_v34 = vadd.f32 %v1170_v59, %v12384_v44  ;;  %1903 = vmatprep.mubr.bf16.mxu1 %v1436_v56  ;;  %v1354_v3 = vmax.f32 %v1169_v62, 0.0 }
 0x192   : > { %v1172_v49 = vpop.f32.mrf.mxu0  ;;  %1904 = vmatmul.mubr.bf16.gmra.mxu1 %v1435_v58 }
 0x193   : > { %v1173_v63 = vadd.f32 %v1172_v49, %v12369_v36  ;;  %v1355_v28 = vmax.f32 %v1171_v34, 0.0 }
 0x194   : > { %v1176_v30 = vpop.f32.mrf.mxu0 }
 0x195   : > { %v1356_v60 = vmax.f32 %v1173_v63, 0.0  ;;  %v1437_v33 = vpack.c.bf16 %v1355_v28, %v1353_v5  ;;  %v1177_v53 = vadd.f32 %v1176_v30, %v12384_v44 }
 0x196   : > { %v1178_v24 = vpop.f32.mrf.mxu0 }
 0x197   : > { %v1438_v11 = vpack.c.bf16 %v1356_v60, %v1354_v3  ;;  %v1179_v43 = vadd.f32 %v1178_v24, %v12369_v36  ;;  %v1357_v14 = vmax.f32 %v1177_v53, 0.0  ;;  %v11635_v24 = vld [vmem:[%s17295_s5 + $0x240] ss:$8 sps:$4 sm:$0xff]  }
 0x198   : > { %v1180_v42 = vpop.f32.mrf.mxu0 }
 0x199   : > { %v1181_v7 = vadd.f32 %v1180_v42, %v12384_v44  ;;  %1913 = vmatprep.mubr.bf16.mxu1 %v1438_v11  ;;  %v1358_v16 = vmax.f32 %v1179_v43, 0.0  ;;  %v11637_v11 = vld [vmem:[%s17295_s5 + $0x244] ss:$8 sps:$4 sm:$0xff]  }
 0x19a   : > { %v1182_v9 = vpop.f32.mrf.mxu0  ;;  %1914 = vmatmul.mubr.bf16.gmra.mxu1 %v1437_v33  ;;  %3169 = vmatprep.subr.bf16.mxu1 %v11637_v11 }
 0x19b   : > { %v1183_v10 = vadd.f32 %v1182_v9, %v12369_v36  ;;  %v1359_v8 = vmax.f32 %v1181_v7, 0.0  ;;  %3170 = vmatpush1.bf16.msra.mxu1 %v11635_v24  ;;  %v11646_v24 = vld [vmem:[%s17295_s5 + $0x214] ss:$8 sps:$4 sm:$0xff]  }
 0x19c   : > { %v1186_v0 = vpop.f32.mrf.mxu0 }
 0x19d   : > { %v1360_v12 = vmax.f32 %v1183_v10, 0.0  ;;  %v1439_v27 = vpack.c.bf16 %v1359_v8, %v1357_v14  ;;  %v1187_v38 = vadd.f32 %v1186_v0, %v12384_v44 }
 0x19e   : > { %v1188_v21 = vpop.f32.mrf.mxu0 }
 0x19f   : > { %v1440_v37 = vpack.c.bf16 %v1360_v12, %v1358_v16  ;;  %v1189_v35 = vadd.f32 %v1188_v21, %v12369_v36  ;;  %v1361_v17 = vmax.f32 %v1187_v38, 0.0 }
 0x1a0   : > { %v1190_v29 = vpop.f32.mrf.mxu0 }
 0x1a1   : > { %v1191_v23 = vadd.f32 %v1190_v29, %v12384_v44  ;;  %1923 = vmatprep.mubr.bf16.mxu1 %v1440_v37  ;;  %v1362_v32 = vmax.f32 %v1189_v35, 0.0  ;;  %v11640_v37 = vld [vmem:[%s17295_s5 + $0x234] ss:$8 sps:$4 sm:$0xff]  }
 0x1a2   : > { %v1192_v45 = vpop.f32.mrf.mxu0  ;;  %1924 = vmatmul.mubr.bf16.gmra.mxu1 %v1439_v27  ;;  %3171 = vmatprep.subr.bf16.mxu1 %v11640_v37 }
 0x1a3   : > { %v1193_v41 = vadd.f32 %v1192_v45, %v12369_v36  ;;  %v1363_v4 = vmax.f32 %v1191_v23, 0.0  ;;  %3172 = vmatpush1.bf16.msra.mxu1 %v11638_v26 }
 0x1a4   : > { %v1196_v46 = vpop.f32.mrf.mxu0 }
 0x1a5   : > { %v1364_v15 = vmax.f32 %v1193_v41, 0.0  ;;  %v1441_v13 = vpack.c.bf16 %v1363_v4, %v1361_v17  ;;  %v1197_v52 = vadd.f32 %v1196_v46, %v12384_v44 }
 0x1a6   : > { %v1198_v1 = vpop.f32.mrf.mxu0 }
 0x1a7   : > { %v1442_v22 = vpack.c.bf16 %v1364_v15, %v1362_v32  ;;  %v1199_v40 = vadd.f32 %v1198_v1, %v12369_v36  ;;  %v1365_v58 = vmax.f32 %v1197_v52, 0.0 }
 0x1a8   : > { %v1200_v55 = vpop.f32.mrf.mxu0 }
 0x1a9   : > { %v1201_v50 = vadd.f32 %v1200_v55, %v12384_v44  ;;  %1933 = vmatprep.mubr.bf16.mxu1 %v1442_v22  ;;  %v1366_v54 = vmax.f32 %v1199_v40, 0.0  ;;  %v11641_v55 = vld [vmem:[%s17295_s5 + $0x220] ss:$8 sps:$4 sm:$0xff]   ;;  %v11643_v40 = vld [vmem:[%s17295_s5 + $0x224] ss:$8 sps:$4 sm:$0xff]  }
 0x1aa   : > { %v1202_v6 = vpop.f32.mrf.mxu0  ;;  %1934 = vmatmul.mubr.bf16.gmra.mxu1 %v1441_v13  ;;  %3173 = vmatprep.subr.bf16.mxu1 %v11643_v40 }
 0x1ab   : > { %v1203_v57 = vadd.f32 %v1202_v6, %v12369_v36  ;;  %v1367_v19 = vmax.f32 %v1201_v50, 0.0  ;;  %3174 = vmatpush1.bf16.msra.mxu1 %v11641_v55 }
 0x1ac   : > { %v1206_v48 = vpop.f32.mrf.mxu0  ;;  %3175 = vmatprep.subr.bf16.mxu1 %v11646_v24 }
 0x1ad   : > { %v1368_v56 = vmax.f32 %v1203_v57, 0.0  ;;  %v1443_v34 = vpack.c.bf16 %v1367_v19, %v1365_v58  ;;  %v1207_v28 = vadd.f32 %v1206_v48, %v12384_v44 }
 0x1ae   : > { %v1208_v59 = vpop.f32.mrf.mxu0 }
 0x1af   : > { %v1444_v62 = vpack.c.bf16 %v1368_v56, %v1366_v54  ;;  %v1209_v49 = vadd.f32 %v1208_v59, %v12369_v36  ;;  %v1369_v33 = vmax.f32 %v1207_v28, 0.0 }
 0x1b0   : > { %v1210_v20 = vpop.f32.mrf.mxu0 }
 0x1b1   : > { %v1211_v63 = vadd.f32 %v1210_v20, %v12384_v44  ;;  %1943 = vmatprep.mubr.bf16.mxu1 %v1444_v62  ;;  %v1370_v18 = vmax.f32 %v1209_v49, 0.0 }
 0x1b2   : > { %v1212_v30 = vpop.f32.mrf.mxu0  ;;  %1944 = vmatmul.mubr.bf16.gmra.mxu1 %v1443_v34 }
 0x1b3   : > { %v1213_v3 = vadd.f32 %v1212_v30, %v12369_v36  ;;  %v1371_v60 = vmax.f32 %v1211_v63, 0.0 }
 0x1b4   : > { %v1216_v51 = vpop.f32.mrf.mxu0 }
 0x1b5   : > { %v1372_v5 = vmax.f32 %v1213_v3, 0.0  ;;  %v1445_v7 = vpack.c.bf16 %v1371_v60, %v1369_v33  ;;  %v1217_v8 = vadd.f32 %v1216_v51, %v12384_v44 }
 0x1b6   : > { %v1218_v42 = vpop.f32.mrf.mxu0 }
 0x1b7   : > { %v1446_v43 = vpack.c.bf16 %v1372_v5, %v1370_v18  ;;  %v1219_v9 = vadd.f32 %v1218_v42, %v12369_v36  ;;  %v1373_v27 = vmax.f32 %v1217_v8, 0.0  ;;  %v11644_v5 = vld [vmem:[%s17295_s5 + $0x210] ss:$8 sps:$4 sm:$0xff]  }
 0x1b8   : > { %v1220_v53 = vpop.f32.mrf.mxu0  ;;  %3176 = vmatpush1.bf16.msra.mxu1 %v11644_v5 }
 0x1b9   : > { %v1221_v10 = vadd.f32 %v1220_v53, %v12384_v44  ;;  %1953 = vmatprep.mubr.bf16.mxu1 %v1446_v43  ;;  %v1374_v21 = vmax.f32 %v1219_v9, 0.0 }
 0x1ba   : > { %v1222_v0 = vpop.f32.mrf.mxu0  ;;  %1954 = vmatmul.mubr.bf16.gmra.mxu1 %v1445_v7 }
 0x1bb   : > { %v1223_v16 = vadd.f32 %v1222_v0, %v12369_v36  ;;  %v1375_v12 = vmax.f32 %v1221_v10, 0.0 }
 0x1bc   : > { %v1226_v14 = vpop.f32.mrf.mxu0 }
 0x1bd   : > { %v1376_v25 = vmax.f32 %v1223_v16, 0.0  ;;  %v1447_v23 = vpack.c.bf16 %v1375_v12, %v1373_v27  ;;  %v1227_v4 = vadd.f32 %v1226_v14, %v12384_v44 }
 0x1be   : > { %v1228_v29 = vpop.f32.mrf.mxu0 }
 0x1bf   : > { %v1448_v35 = vpack.c.bf16 %v1376_v25, %v1374_v21  ;;  %v1229_v45 = vadd.f32 %v1228_v29, %v12369_v36  ;;  %v1377_v61 = vmax.f32 %v1227_v4, 0.0  ;;  %v1489_v25 = vld [vmem:[%s17296_s6] ss:$8 sm:$0x3] }
 0x1c0   : > { %v1230_v38 = vpop.f32.mrf.mxu0 }
 0x1c1   : > { %v1231_v41 = vadd.f32 %v1230_v38, %v12384_v44  ;;  %1963 = vmatprep.mubr.bf16.mxu1 %v1448_v35  ;;  %v1378_v1 = vmax.f32 %v1229_v45, 0.0  ;;  %v12730_v35 = vrot.slane %v1489_v25, %v12357_v31  ;;  %v12739_v38 = vrot.slane %v1489_v25, %v12374_v39 }
 0x1c2   : > { %v1232_v46 = vpop.f32.mrf.mxu0  ;;  %1964 = vmatmul.mubr.bf16.gmra.mxu1 %v1447_v23  ;;  %v11647_v23 = vld [vmem:[%s17295_s5 + $0x200] ss:$8 sps:$4 sm:$0xff]  }
 0x1c3   : > { %v1233_v32 = vadd.f32 %v1232_v46, %v12369_v36  ;;  %v1379_v15 = vmax.f32 %v1231_v41, 0.0 }
 0x1c4   : > { %v1236_v17 = vpop.f32.mrf.mxu0 }
 0x1c5   : > { %v1380_v22 = vmax.f32 %v1233_v32, 0.0  ;;  %v1449_v50 = vpack.c.bf16 %v1379_v15, %v1377_v61  ;;  %v1237_v19 = vadd.f32 %v1236_v17, %v12384_v44 }
 0x1c6   : > { %v1238_v47 = vpop.f32.mrf.mxu0 }
 0x1c7   : > { %v1450_v13 = vpack.c.bf16 %v1380_v22, %v1378_v1  ;;  %v1239_v6 = vadd.f32 %v1238_v47, %v12369_v36  ;;  %v1381_v34 = vmax.f32 %v1237_v19, 0.0 }
 0x1c8   : > { %v1240_v52 = vpop.f32.mrf.mxu0 }
 0x1c9   : > { %v1241_v57 = vadd.f32 %v1240_v52, %v12384_v44  ;;  %1973 = vmatprep.mubr.bf16.mxu1 %v1450_v13  ;;  %v1382_v59 = vmax.f32 %v1239_v6, 0.0  ;;  %v11650_v6 = vld [vmem:[%s17295_s5 + $0x2f0] ss:$8 sps:$4 sm:$0xff]  }
 0x1ca   : > { %v1242_v48 = vpop.f32.mrf.mxu0  ;;  %1974 = vmatmul.mubr.bf16.gmra.mxu1 %v1449_v50 }
 0x1cb   : > { %v1243_v54 = vadd.f32 %v1242_v48, %v12369_v36  ;;  %v1383_v56 = vmax.f32 %v1241_v57, 0.0  ;;  %v11652_v57 = vld [vmem:[%s17295_s5 + $0x2f4] ss:$8 sps:$4 sm:$0xff]  }
 0x1cc   : > { %v1246_v58 = vpop.f32.mrf.mxu0 }
 0x1cd   : > { %v1384_v62 = vmax.f32 %v1243_v54, 0.0  ;;  %v1451_v63 = vpack.c.bf16 %v1383_v56, %v1381_v34  ;;  %v1247_v60 = vadd.f32 %v1246_v58, %v12384_v44 }
 0x1ce   : > { %v1248_v20 = vpop.f32.mrf.mxu0 }
 0x1cf   : > { %v1452_v49 = vpack.c.bf16 %v1384_v62, %v1382_v59  ;;  %v1249_v30 = vadd.f32 %v1248_v20, %v12369_v36  ;;  %v1385_v7 = vmax.f32 %v1247_v60, 0.0 }
 0x1d0   : > { %v1250_v28 = vpop.f32.mrf.mxu0 }
 0x1d1   : > { %v1251_v3 = vadd.f32 %v1250_v28, %v12384_v44  ;;  %1983 = vmatprep.mubr.bf16.mxu1 %v1452_v49  ;;  %v1386_v42 = vmax.f32 %v1249_v30, 0.0 }
 0x1d2   : > { %v1252_v51 = vpop.f32.mrf.mxu0  ;;  %1984 = vmatmul.mubr.bf16.gmra.mxu1 %v1451_v63 }
 0x1d3   : > { %v1253_v18 = vadd.f32 %v1252_v51, %v12369_v36  ;;  %v1387_v11 = vmax.f32 %v1251_v3, 0.0 }
 0x1d4   : > { %v1256_v33 = vpop.f32.mrf.mxu0 }
 0x1d5   : > { %v1388_v43 = vmax.f32 %v1253_v18, 0.0  ;;  %v1453_v10 = vpack.c.bf16 %v1387_v11, %v1385_v7  ;;  %v1257_v12 = vadd.f32 %v1256_v33, %v12384_v44 }
 0x1d6   : > { %v1258_v53 = vpop.f32.mrf.mxu0 }
 0x1d7   : > { %v1454_v9 = vpack.c.bf16 %v1388_v43, %v1386_v42  ;;  %v1259_v0 = vadd.f32 %v1258_v53, %v12369_v36  ;;  %v11653_v42 = vld [vmem:[%s17295_s5 + $0x2e0] ss:$8 sps:$4 sm:$0xff]   ;;  %v11655_v43 = vld [vmem:[%s17295_s5 + $0x2e4] ss:$8 sps:$4 sm:$0xff]  }
 0x1d8   : > { %v1260_v8 = vpop.f32.mrf.mxu0 }
 0x1d9   : > { %v1261_v16 = vadd.f32 %v1260_v8, %v12384_v44  ;;  %1993 = vmatprep.mubr.bf16.mxu1 %v1454_v9  ;;  %v1390_v27 = vmax.f32 %v1259_v0, 0.0  ;;  %v11649_v44 = vld [vmem:[%s17295_s5 + $0x204] ss:$8 sps:$4 sm:$0xff]  }
 0x1da   : > { %v1262_v14 = vpop.f32.mrf.mxu0  ;;  %1994 = vmatmul.mubr.bf16.gmra.mxu1 %v1453_v10  ;;  %3177 = vmatprep.subr.bf16.mxu1 %v11649_v44 }
 0x1db   : > { %v1263_v21 = vadd.f32 %v1262_v14, %v12369_v36  ;;  %v1391_v26 = vmax.f32 %v1261_v16, 0.0  ;;  %v1389_v36 = vmax.f32 %v1257_v12, 0.0  ;;  %3178 = vmatpush1.bf16.msra.mxu1 %v11647_v23  ;;  %v11658_v23 = vld [vmem:[%s17295_s5 + $0x2d4] ss:$8 sps:$4 sm:$0xff]  }
 0x1dc   : > { %v1695_v37 = vpop.f32.mrf.mxu0  ;;  %3179 = vmatprep.subr.bf16.mxu1 %v11652_v57 }
 0x1dd   : > { %v1392_v29 = vmax.f32 %v1263_v21, 0.0  ;;  %v1455_v4 = vpack.c.bf16 %v1391_v26, %v1389_v36  ;;  %v1696_v17 = vadd.f32 %v1695_v37, %v12739_v38 }
 0x1de   : > { %v1697_v45 = vpop.f32.mrf.mxu0 }
 0x1df   : > { %v1456_v41 = vpack.c.bf16 %v1392_v29, %v1390_v27  ;;  %v1698_v32 = vadd.f32 %v1697_v45, %v12730_v35  ;;  %v2014_v40 = vmax.f32 %v1696_v17, 0.0  ;;  %3180 = vmatpush2.bf16.msra.mxu1 %v11650_v6  ;;  %v11656_v29 = vld [vmem:[%s17295_s5 + $0x2d0] ss:$8 sps:$4 sm:$0xff]  }
 0x1e0   : > { %v1699_v46 = vpop.f32.mrf.mxu0  ;;  %3181 = vmatprep.subr.bf16.mxu1 %v11655_v43 }
 0x1e1   : > { %v1700_v15 = vadd.f32 %v1699_v46, %v12739_v38  ;;  %2003 = vmatprep.mubr.bf16.mxu1 %v1456_v41  ;;  %v2015_v13 = vmax.f32 %v1698_v32, 0.0 }
 0x1e2   : > { %v1701_v1 = vpop.f32.mrf.mxu0  ;;  %2004 = vmatmul.mubr.bf16.gmra.mxu1 %v1455_v4 }
 0x1e3   : > { %v1702_v22 = vadd.f32 %v1701_v1, %v12730_v35  ;;  %v2016_v61 = vmax.f32 %v1700_v15, 0.0  ;;  %3182 = vmatpush2.bf16.msra.mxu1 %v11653_v42 }
 0x1e4   : > { %v1705_v47 = vpop.f32.mrf.mxu0  ;;  %3183 = vmatprep.subr.bf16.mxu1 %v11658_v23 }
 0x1e5   : > { %v2017_v55 = vmax.f32 %v1702_v22, 0.0  ;;  %v2142_v19 = vpack.c.bf16 %v2016_v61, %v2014_v40  ;;  %v1706_v58 = vadd.f32 %v1705_v47, %v12739_v38 }
 0x1e6   : > { %v1707_v50 = vpop.f32.mrf.mxu0 }
 0x1e7   : > { %v2143_v52 = vpack.c.bf16 %v2017_v55, %v2015_v13  ;;  %v1708_v54 = vadd.f32 %v1707_v50, %v12730_v35  ;;  %v2018_v28 = vmax.f32 %v1706_v58, 0.0  ;;  %3184 = vmatpush2.bf16.msra.mxu1 %v11656_v29  ;;  %v11659_v58 = vld [vmem:[%s17295_s5 + $0x2c0] ss:$8 sps:$4 sm:$0xff]  }
 0x1e8   : > { %v1709_v48 = vpop.f32.mrf.mxu0 }
 0x1e9   : > { %v1710_v56 = vadd.f32 %v1709_v48, %v12739_v38  ;;  %2444 = vmatprep.mubr.bf16.mxu0 %v2143_v52  ;;  %v2019_v49 = vmax.f32 %v1708_v54, 0.0 }
 0x1ea   : > { %v1711_v59 = vpop.f32.mrf.mxu0  ;;  %2445 = vmatmul.mubr.bf16.vlgmr.msra.gmra.mxu0 %v2142_v19 }
 0x1eb   : > { %v1712_v62 = vadd.f32 %v1711_v59, %v12730_v35  ;;  %v2020_v34 = vmax.f32 %v1710_v56, 0.0  ;;  %v11661_v59 = vld [vmem:[%s17295_s5 + $0x2c4] ss:$8 sps:$4 sm:$0xff]  }
 0x1ec   : > { %v1715_v20 = vpop.f32.mrf.mxu0  ;;  %3185 = vmatprep.subr.bf16.mxu1 %v11661_v59 }
 0x1ed   : > { %v2021_v63 = vmax.f32 %v1712_v62, 0.0  ;;  %v2144_v60 = vpack.c.bf16 %v2020_v34, %v2018_v28  ;;  %v1716_v24 = vadd.f32 %v1715_v20, %v12739_v38  ;;  %3186 = vmatpush2.bf16.msra.mxu1 %v11659_v58  ;;  %v11673_v58 = vld [vmem:[%s17295_s5 + $0x2a4] ss:$8 sps:$4 sm:$0xff]  }
 0x1ee   : > { %v1717_v30 = vpop.f32.mrf.mxu0 }
 0x1ef   : > { %v2145_v3 = vpack.c.bf16 %v2021_v63, %v2019_v49  ;;  %v1718_v18 = vadd.f32 %v1717_v30, %v12730_v35  ;;  %v2022_v8 = vmax.f32 %v1716_v24, 0.0 }
 0x1f0   : > { %v1719_v51 = vpop.f32.mrf.mxu0 }
 0x1f1   : > { %v1720_v5 = vadd.f32 %v1719_v51, %v12739_v38  ;;  %2454 = vmatprep.mubr.bf16.mxu0 %v2145_v3  ;;  %v2023_v9 = vmax.f32 %v1718_v18, 0.0  ;;  %v11662_v51 = vld [vmem:[%s17295_s5 + $0x370] ss:$8 sps:$4 sm:$0xff]   ;;  %v11664_v18 = vld [vmem:[%s17295_s5 + $0x374] ss:$8 sps:$4 sm:$0xff]  }
 0x1f2   : > { %v1721_v11 = vpop.f32.mrf.mxu0  ;;  %2455 = vmatmul.mubr.bf16.gmra.mxu0 %v2144_v60  ;;  %3914 = vmatprep.subr.bf16.mxu0 %v11664_v18 }
 0x1f3   : > { %v1722_v33 = vadd.f32 %v1721_v11, %v12730_v35  ;;  %v2024_v7 = vmax.f32 %v1720_v5, 0.0  ;;  %3915 = vmatpush1.bf16.msra.mxu0 %v11662_v51 }
 0x1f4   : > { %v1725_v53 = vpop.f32.mrf.mxu0 }
 0x1f5   : > { %v2025_v10 = vmax.f32 %v1722_v33, 0.0  ;;  %v2146_v12 = vpack.c.bf16 %v2024_v7, %v2022_v8  ;;  %v1726_v26 = vadd.f32 %v1725_v53, %v12739_v38 }
 0x1f6   : > { %v1727_v0 = vpop.f32.mrf.mxu0 }
 0x1f7   : > { %v2147_v16 = vpack.c.bf16 %v2025_v10, %v2023_v9  ;;  %v1728_v21 = vadd.f32 %v1727_v0, %v12730_v35  ;;  %v2026_v4 = vmax.f32 %v1726_v26, 0.0 }
 0x1f8   : > { %v1729_v14 = vpop.f32.mrf.mxu0 }
 0x1f9   : > { %v1730_v25 = vadd.f32 %v1729_v14, %v12739_v38  ;;  %2464 = vmatprep.mubr.bf16.mxu0 %v2147_v16  ;;  %v2027_v45 = vmax.f32 %v1728_v21, 0.0 }
 0x1fa   : > { %v1731_v37 = vpop.f32.mrf.mxu0  ;;  %2465 = vmatmul.mubr.bf16.gmra.mxu0 %v2146_v12 }
 0x1fb   : > { %v1732_v27 = vadd.f32 %v1731_v37, %v12730_v35  ;;  %v2028_v44 = vmax.f32 %v1730_v25, 0.0  ;;  %v11665_v37 = vld [vmem:[%s17295_s5 + $0x2b0] ss:$8 sps:$4 sm:$0xff]  }
 0x1fc   : > { %v1735_v36 = vpop.f32.mrf.mxu0 }
 0x1fd   : > { %v2029_v41 = vmax.f32 %v1732_v27, 0.0  ;;  %v2148_v15 = vpack.c.bf16 %v2028_v44, %v2026_v4  ;;  %v1736_v61 = vadd.f32 %v1735_v36, %v12739_v38  ;;  %v11667_v27 = vld [vmem:[%s17295_s5 + $0x2b4] ss:$8 sps:$4 sm:$0xff]  }
 0x1fe   : > { %v1737_v46 = vpop.f32.mrf.mxu0  ;;  %3187 = vmatprep.subr.bf16.mxu1 %v11667_v27 }
 0x1ff   : > { %v2149_v32 = vpack.c.bf16 %v2029_v41, %v2027_v45  ;;  %v1738_v1 = vadd.f32 %v1737_v46, %v12730_v35  ;;  %v2030_v19 = vmax.f32 %v1736_v61, 0.0  ;;  %3188 = vmatpush2.bf16.msra.mxu1 %v11665_v37 }
 0x200   : > { %v1739_v17 = vpop.f32.mrf.mxu0  ;;  %3189 = vmatprep.subr.bf16.mxu1 %v11673_v58 }
 0x201   : > { %v1740_v22 = vadd.f32 %v1739_v17, %v12739_v38  ;;  %2474 = vmatprep.mubr.bf16.mxu0 %v2149_v32  ;;  %v2031_v6 = vmax.f32 %v1738_v1, 0.0 }
 0x202   : > { %v1741_v47 = vpop.f32.mrf.mxu0  ;;  %v12778_v13 = vpop.f32.mrf.mxu1  ;;  %2475 = vmatmul.mubr.bf16.gmra.mxu0 %v2148_v15 }
 0x203   : > { %v1742_v55 = vadd.f32 %v1741_v47, %v12730_v35  ;;  %v2032_v40 = vmax.f32 %v1740_v22, 0.0 }
 0x204   : > { %v1745_v50 = vpop.f32.mrf.mxu0  ;;  %v12781_v52 = vpop.f32.mrf.mxu1 }
 0x205   : > { %v2033_v57 = vmax.f32 %v1742_v55, 0.0  ;;  %v2150_v62 = vpack.c.bf16 %v2032_v40, %v2030_v19  ;;  %v1746_v3 = vadd.f32 %v1745_v50, %v12739_v38 }
 0x206   : > { %v1747_v48 = vpop.f32.mrf.mxu0  ;;  %v12783_v54 = vpop.f32.mrf.mxu1 }
 0x207   : > { %v2151_v56 = vpack.c.bf16 %v2033_v57, %v2031_v6  ;;  %v1748_v63 = vadd.f32 %v1747_v48, %v12730_v35  ;;  %v2034_v53 = vmax.f32 %v1746_v3, 0.0  ;;  %v11668_v6 = vld [vmem:[%s17295_s5 + $0x360] ss:$8 sps:$4 sm:$0xff]   ;;  %v11670_v57 = vld [vmem:[%s17295_s5 + $0x364] ss:$8 sps:$4 sm:$0xff]  }
 0x208   : > { %v1749_v34 = vpop.f32.mrf.mxu0  ;;  %v12791_v20 = vpop.f32.mrf.mxu1  ;;  %3916 = vmatprep.subr.bf16.mxu0 %v11670_v57 }
 0x209   : > { %v1750_v49 = vadd.f32 %v1749_v34, %v12739_v38  ;;  %2484 = vmatprep.mubr.bf16.mxu0 %v2151_v56  ;;  %v2035_v42 = vmax.f32 %v1748_v63, 0.0  ;;  %v11671_v56 = vld [vmem:[%s17295_s5 + $0x2a0] ss:$8 sps:$4 sm:$0xff]   ;;  %3917 = vmatpush1.bf16.msra.mxu0 %v11668_v6 }
 0x20a   : > { %v1751_v28 = vpop.f32.mrf.mxu0  ;;  %v12795_v30 = vpop.f32.mrf.mxu1  ;;  %2485 = vmatmul.mubr.bf16.gmra.mxu0 %v2150_v62  ;;  %3190 = vmatpush2.bf16.msra.mxu1 %v11671_v56 }
 0x20b   : > { %v1752_v60 = vadd.f32 %v1751_v28, %v12730_v35  ;;  %v2036_v11 = vmax.f32 %v1750_v49, 0.0 }
 0x20c   : > { %v1755_v5 = vpop.f32.mrf.mxu0  ;;  %v12805_v24 = vpop.f32.mrf.mxu1 }
 0x20d   : > { %v2037_v33 = vmax.f32 %v1752_v60, 0.0  ;;  %v2152_v0 = vpack.c.bf16 %v2036_v11, %v2034_v53  ;;  %v1756_v25 = vadd.f32 %v1755_v5, %v12739_v38 }
 0x20e   : > { %v1757_v43 = vpop.f32.mrf.mxu0  ;;  %v12807_v7 = vpop.f32.mrf.mxu1 }
 0x20f   : > { %v2153_v8 = vpack.c.bf16 %v2037_v33, %v2035_v42  ;;  %v1758_v12 = vadd.f32 %v1757_v43, %v12730_v35  ;;  %v2038_v46 = vmax.f32 %v1756_v25, 0.0 }
 0x210   : > { %v1759_v9 = vpop.f32.mrf.mxu0  ;;  %v12809_v10 = vpop.f32.mrf.mxu1 }
 0x211   : > { %v1760_v16 = vadd.f32 %v1759_v9, %v12739_v38  ;;  %2494 = vmatprep.mubr.bf16.mxu0 %v2153_v8  ;;  %v2039_v45 = vmax.f32 %v1758_v12, 0.0  ;;  %v11674_v12 = vld [vmem:[%s17295_s5 + $0x290] ss:$8 sps:$4 sm:$0xff]  }
 0x212   : > { %v1761_v14 = vpop.f32.mrf.mxu0  ;;  %v12813_v21 = vpop.f32.mrf.mxu1  ;;  %2495 = vmatmul.mubr.bf16.gmra.mxu0 %v2152_v0 }
 0x213   : > { %v1762_v26 = vadd.f32 %v1761_v14, %v12730_v35  ;;  %v2040_v44 = vmax.f32 %v1760_v16, 0.0  ;;  %v11676_v14 = vld [vmem:[%s17295_s5 + $0x294] ss:$8 sps:$4 sm:$0xff]  }
 0x214   : > { %v1765_v29 = vpop.f32.mrf.mxu0  ;;  %v12823_v23 = vpop.f32.mrf.mxu1  ;;  %3191 = vmatprep.subr.bf16.mxu1 %v11676_v14 }
 0x215   : > { %v2041_v36 = vmax.f32 %v1762_v26, 0.0  ;;  %v2154_v1 = vpack.c.bf16 %v2040_v44, %v2038_v46  ;;  %v1766_v40 = vadd.f32 %v1765_v29, %v12739_v38  ;;  %3192 = vmatpush2.bf16.msra.mxu1 %v11674_v12 }
 0x216   : > { %v1767_v41 = vpop.f32.mrf.mxu0  ;;  %v12825_v4 = vpop.f32.mrf.mxu1 }
 0x217   : > { %v2155_v17 = vpack.c.bf16 %v2041_v36, %v2039_v45  ;;  %v1768_v61 = vadd.f32 %v1767_v41, %v12730_v35  ;;  %v2042_v28 = vmax.f32 %v1766_v40, 0.0 }
 0x218   : > { %v1769_v32 = vpop.f32.mrf.mxu0  ;;  %v12827_v15 = vpop.f32.mrf.mxu1 }
 0x219   : > { %v1770_v22 = vadd.f32 %v1769_v32, %v12739_v38  ;;  %2504 = vmatprep.mubr.bf16.mxu0 %v2155_v17  ;;  %v2043_v34 = vmax.f32 %v1768_v61, 0.0  ;;  %v11677_v61 = vld [vmem:[%s17295_s5 + $0x350] ss:$8 sps:$4 sm:$0xff]  }
 0x21a   : > { %v1771_v47 = vpop.f32.mrf.mxu0  ;;  %v12831_v55 = vpop.f32.mrf.mxu1  ;;  %2505 = vmatmul.mubr.bf16.gmra.mxu0 %v2154_v1 }
 0x21b   : > { %v1772_v50 = vadd.f32 %v1771_v47, %v12730_v35  ;;  %v2044_v59 = vmax.f32 %v1770_v22, 0.0  ;;  %v11679_v47 = vld [vmem:[%s17295_s5 + $0x354] ss:$8 sps:$4 sm:$0xff]  }
 0x21c   : > { %v1775_v19 = vpop.f32.mrf.mxu0  ;;  %v12841_v48 = vpop.f32.mrf.mxu1  ;;  %3918 = vmatprep.subr.bf16.mxu0 %v11679_v47  ;;  %v1818_v47 = vadd.f32 %v12805_v24, %v12730_v35  ;;  %v1832_v24 = vadd.f32 %v12827_v15, %v12730_v35 }
 0x21d   : > { %v2045_v62 = vmax.f32 %v1772_v50, 0.0  ;;  %v2156_v18 = vpack.c.bf16 %v2044_v59, %v2042_v28  ;;  %v1776_v43 = vadd.f32 %v1775_v19, %v12739_v38  ;;  %3919 = vmatpush1.bf16.msra.mxu0 %v11677_v61  ;;  %v11683_v61 = vld [vmem:[%s17295_s5 + $0x340] ss:$8 sps:$4 sm:$0xff]  }
 0x21e   : > { %v1777_v49 = vpop.f32.mrf.mxu0  ;;  %v12849_v63 = vpop.f32.mrf.mxu1 }
 0x21f   : > { %v2157_v51 = vpack.c.bf16 %v2045_v62, %v2043_v34  ;;  %v1778_v11 = vadd.f32 %v1777_v49, %v12730_v35  ;;  %v2046_v27 = vmax.f32 %v1776_v43, 0.0 }
 0x220   : > { %v1779_v3 = vpop.f32.mrf.mxu0  ;;  %v12851_v60 = vpop.f32.mrf.mxu1 }
 0x221   : > { %v1780_v5 = vadd.f32 %v1779_v3, %v12739_v38  ;;  %2514 = vmatprep.mubr.bf16.mxu0 %v2157_v51  ;;  %v2047_v25 = vmax.f32 %v1778_v11, 0.0 }
 0x222   : > { %v1781_v33 = vpop.f32.mrf.mxu0  ;;  %v12855_v42 = vpop.f32.mrf.mxu1  ;;  %2515 = vmatmul.mubr.bf16.gmra.mxu0 %v2156_v18  ;;  %v1812_v18 = vadd.f32 %v12791_v20, %v12730_v35  ;;  %v1808_v20 = vadd.f32 %v12781_v52, %v12730_v35  ;;  %v1822_v52 = vadd.f32 %v12809_v10, %v12730_v35 }
 0x223   : > { %v1782_v53 = vadd.f32 %v1781_v33, %v12730_v35  ;;  %v2048_v0 = vmax.f32 %v1780_v5, 0.0 }
 0x224   : > { %v1785_v9 = vpop.f32.mrf.mxu0  ;;  %v12859_v8 = vpop.f32.mrf.mxu1 }
 0x225   : > { %v2049_v16 = vmax.f32 %v1782_v53, 0.0  ;;  %v2158_v45 = vpack.c.bf16 %v2048_v0, %v2046_v27  ;;  %v1786_v1 = vadd.f32 %v1785_v9, %v12739_v38  ;;  %v11680_v53 = vld [vmem:[%s17295_s5 + $0x280] ss:$8 sps:$4 sm:$0xff]   ;;  %v11682_v9 = vld [vmem:[%s17295_s5 + $0x284] ss:$8 sps:$4 sm:$0xff]  }
 0x226   : > { %v1787_v26 = vpop.f32.mrf.mxu0  ;;  %v12867_v37 = vpop.f32.mrf.mxu1  ;;  %3193 = vmatprep.subr.bf16.mxu1 %v11682_v9 }
 0x227   : > { %v2159_v36 = vpack.c.bf16 %v2049_v16, %v2047_v25  ;;  %v1788_v46 = vadd.f32 %v1787_v26, %v12730_v35  ;;  %v2050_v59 = vmax.f32 %v1786_v1, 0.0  ;;  %v2061_v25 = vmax.f32 %v1812_v18, 0.0  ;;  %3194 = vmatpush2.bf16.msra.mxu1 %v11680_v53 }
 0x228   : > { %v1789_v29 = vpop.f32.mrf.mxu0  ;;  %v12869_v44 = vpop.f32.mrf.mxu1 }
 0x229   : > { %v1790_v41 = vadd.f32 %v1789_v29, %v12739_v38  ;;  %2524 = vmatprep.mubr.bf16.mxu0 %v2159_v36  ;;  %v2051_v19 = vmax.f32 %v1788_v46, 0.0  ;;  %v2059_v36 = vmax.f32 %v1808_v20, 0.0  ;;  %v1830_v20 = vadd.f32 %v12825_v4, %v12739_v38 }
 0x22a   : > { %v1791_v32 = vpop.f32.mrf.mxu0  ;;  %v12873_v17 = vpop.f32.mrf.mxu1  ;;  %2525 = vmatmul.mubr.bf16.gmra.mxu0 %v2158_v45  ;;  %v1838_v4 = vadd.f32 %v12841_v48, %v12730_v35  ;;  %v1852_v48 = vadd.f32 %v12869_v44, %v12730_v35 }
 0x22b   : > { %v1792_v22 = vadd.f32 %v1791_v32, %v12730_v35  ;;  %v2052_v6 = vmax.f32 %v1790_v41, 0.0  ;;  %v1810_v41 = vadd.f32 %v12783_v54, %v12739_v38  ;;  %v2165_v1 = vpack.c.bf16 %v2061_v25, %v2059_v36  ;;  %v11685_v54 = vld [vmem:[%s17295_s5 + $0x344] ss:$8 sps:$4 sm:$0xff]   ;;  %v11688_v25 = vld [vmem:[%s17295_s5 + $0x334] ss:$8 sps:$4 sm:$0xff]  }
 0x22c   : > { %v1795_v40 = vpop.f32.mrf.mxu0  ;;  %v12883_v50 = vpop.f32.mrf.mxu1  ;;  %3920 = vmatprep.subr.bf16.mxu0 %v11685_v54  ;;  %v1836_v54 = vadd.f32 %v12831_v55, %v12739_v38 }
 0x22d   : > { %v2053_v57 = vmax.f32 %v1792_v22, 0.0  ;;  %v2160_v28 = vpack.c.bf16 %v2052_v6, %v2050_v59  ;;  %v1796_v33 = vadd.f32 %v1795_v40, %v12739_v38  ;;  %v1806_v22 = vadd.f32 %v12778_v13, %v12739_v38  ;;  %3921 = vmatpush1.bf16.msra.mxu0 %v11683_v61 }
 0x22e   : > { %v1797_v56 = vpop.f32.mrf.mxu0  ;;  %v12885_v58 = vpop.f32.mrf.mxu1  ;;  %v2060_v40 = vmax.f32 %v1810_v41, 0.0  ;;  %v2065_v6 = vmax.f32 %v1822_v52, 0.0  ;;  %3922 = vmatprep.subr.bf16.mxu0 %v11688_v25  ;;  %v2071_v41 = vmax.f32 %v1838_v4, 0.0  ;;  %v1856_v25 = vadd.f32 %v12873_v17, %v12739_v38 }
 0x22f   : > { %v2161_v49 = vpack.c.bf16 %v2053_v57, %v2051_v19  ;;  %v1798_v3 = vadd.f32 %v1797_v56, %v12730_v35  ;;  %v2054_v27 = vmax.f32 %v1796_v33, 0.0  ;;  %v2058_v13 = vmax.f32 %v1806_v22, 0.0 }
 0x230   : > { %v1799_v62 = vpop.f32.mrf.mxu0  ;;  %v12887_v34 = vpop.f32.mrf.mxu1  ;;  %v2063_v19 = vmax.f32 %v1818_v47, 0.0  ;;  %v2069_v33 = vmax.f32 %v1832_v24, 0.0  ;;  %v1848_v47 = vadd.f32 %v12859_v8, %v12730_v35  ;;  %v1850_v24 = vadd.f32 %v12867_v37, %v12739_v38  ;;  %v11689_v37 = vld [vmem:[%s17295_s5 + $0x320] ss:$8 sps:$4 sm:$0xff]  }
 0x231   : > { %v1800_v51 = vadd.f32 %v1799_v62, %v12739_v38  ;;  %2534 = vmatprep.mubr.bf16.mxu0 %v2161_v49  ;;  %v2055_v16 = vmax.f32 %v1798_v3, 0.0  ;;  %v2164_v59 = vpack.c.bf16 %v2060_v40, %v2058_v13  ;;  %v1820_v62 = vadd.f32 %v12807_v7, %v12739_v38 }
 0x232   : > { %v1801_v5 = vpop.f32.mrf.mxu0  ;;  %v12893_v11 = vpop.f32.mrf.mxu1  ;;  %2535 = vmatmul.mubr.bf16.gmra.mxu0 %v2160_v28  ;;  %v2167_v28 = vpack.c.bf16 %v2065_v6, %v2063_v19  ;;  %v1816_v3 = vadd.f32 %v12795_v30, %v12739_v38  ;;  %v1842_v30 = vadd.f32 %v12851_v60, %v12730_v35  ;;  %v2077_v13 = vmax.f32 %v1852_v48, 0.0 }
 0x233   : > { %v1802_v43 = vadd.f32 %v1801_v5, %v12730_v35  ;;  %v2056_v12 = vmax.f32 %v1800_v51, 0.0  ;;  %v1828_v51 = vadd.f32 %v12823_v23, %v12730_v35  ;;  %v2064_v5 = vmax.f32 %v1820_v62, 0.0 }
 0x234   : > { %v12905_v0 = vpop.f32.mrf.mxu1  ;;  %v2062_v7 = vmax.f32 %v1816_v3, 0.0  ;;  %v1862_v55 = vadd.f32 %v12887_v34, %v12730_v35  ;;  %v1846_v3 = vadd.f32 %v12855_v42, %v12739_v38  ;;  %v11691_v34 = vld [vmem:[%s17295_s5 + $0x324] ss:$8 sps:$4 sm:$0xff]  }
 0x235   : > { %v2057_v14 = vmax.f32 %v1802_v43, 0.0  ;;  %v2162_v46 = vpack.c.bf16 %v2056_v12, %v2054_v27  ;;  %v2067_v53 = vmax.f32 %v1828_v51, 0.0  ;;  %v1826_v12 = vadd.f32 %v12813_v21, %v12739_v38 }
 0x236   : > { %v12907_v26 = vpop.f32.mrf.mxu1  ;;  %v2166_v9 = vpack.c.bf16 %v2064_v5, %v2062_v7  ;;  %v2068_v27 = vmax.f32 %v1830_v20, 0.0  ;;  %v1858_v51 = vadd.f32 %v12883_v50, %v12730_v35  ;;  %v2081_v7 = vmax.f32 %v1862_v55, 0.0 }
 0x237   : > { %v2163_v29 = vpack.c.bf16 %v2057_v14, %v2055_v16  ;;  %v2169_v23 = vpack.c.bf16 %v2069_v33, %v2067_v53  ;;  %v11686_v14 = vld [vmem:[%s17295_s5 + $0x330] ss:$8 sps:$4 sm:$0xff]   ;;  %v2066_v21 = vmax.f32 %v1826_v12, 0.0  ;;  %v2076_v33 = vmax.f32 %v1850_v24, 0.0 }
 0x238   : > { %v12909_v45 = vpop.f32.mrf.mxu1  ;;  %3923 = vmatpush1.bf16.msra.mxu0 %v11686_v14  ;;  %v2074_v42 = vmax.f32 %v1846_v3, 0.0  ;;  %v1868_v4 = vadd.f32 %v12905_v0, %v12730_v35  ;;  %v1870_v48 = vadd.f32 %v12907_v26, %v12739_v38  ;;  %v11692_v26 = vld [vmem:[%s17295_s5 + $0x310] ss:$8 sps:$4 sm:$0xff]  }
 0x239   : > { %2544 = vmatprep.mubr.bf16.mxu0 %v2163_v29  ;;  %v2073_v29 = vmax.f32 %v1842_v30, 0.0  ;;  %v2168_v52 = vpack.c.bf16 %v2068_v27, %v2066_v21  ;;  %3924 = vmatprep.subr.bf16.mxu0 %v11691_v34  ;;  %v1860_v30 = vadd.f32 %v12885_v58, %v12739_v38  ;;  %v2078_v58 = vmax.f32 %v1856_v25, 0.0 }
 0x23a   : > { %v12915_v32 = vpop.f32.mrf.mxu1  ;;  %2545 = vmatmul.mubr.bf16.gmra.mxu0 %v2162_v46  ;;  %v2172_v20 = vpack.c.bf16 %v2076_v33, %v2074_v42 }
 0x23b   : > { %2554 = vmatprep.mubr.bf16.mxu0 %v2165_v1  ;;  %v1840_v1 = vadd.f32 %v12849_v63, %v12739_v38  ;;  %v2171_v61 = vpack.c.bf16 %v2073_v29, %v2071_v41  ;;  %v2070_v63 = vmax.f32 %v1836_v54, 0.0  ;;  %v2080_v29 = vmax.f32 %v1860_v30, 0.0 }
 0x23c   : > { %v12927_v10 = vpop.f32.mrf.mxu1  ;;  %3925 = vmatpush1.bf16.msra.mxu0 %v11689_v37  ;;  %v1866_v54 = vadd.f32 %v12893_v11, %v12739_v38  ;;  %v1876_v37 = vadd.f32 %v12915_v32, %v12739_v38 }
 0x23d   : > { %v2072_v6 = vmax.f32 %v1840_v1, 0.0  ;;  %v2174_v1 = vpack.c.bf16 %v2080_v29, %v2078_v58 }
 0x23e   : > { %v12929_v57 = vpop.f32.mrf.mxu1  ;;  %v2082_v11 = vmax.f32 %v1866_v54, 0.0 }
 0x23f   : > { %v2170_v62 = vpack.c.bf16 %v2072_v6, %v2070_v63  ;;  %v1880_v55 = vadd.f32 %v12929_v57, %v12739_v38  ;;  %v2086_v57 = vmax.f32 %v1876_v37, 0.0  ;;  %v11698_v37 = vld [vmem:[%s17295_s5 + $0x3f0] ss:$8 sps:$4 sm:$0xff]  }
 0x240   : > { %v12931_v56 = vpop.f32.mrf.mxu1 }
 0x241   : > { %v1882_v17 = vadd.f32 %v12931_v56, %v12730_v35  ;;  %v11694_v56 = vld [vmem:[%s17295_s5 + $0x314] ss:$8 sps:$4 sm:$0xff]  }
 0x242   : > { %v12937_v49 = vpop.f32.mrf.mxu1  ;;  %2555 = vmatmul.mubr.bf16.gmra.mxu0 %v2164_v59  ;;  %v2075_v59 = vmax.f32 %v1848_v47, 0.0  ;;  %v1878_v47 = vadd.f32 %v12927_v10, %v12730_v35  ;;  %3926 = vmatprep.subr.bf16.mxu0 %v11694_v56 }
 0x243   : > { %2564 = vmatprep.mubr.bf16.mxu0 %v2167_v28  ;;  %v2089_v63 = vmax.f32 %v1882_v17, 0.0  ;;  %3927 = vmatpush1.bf16.msra.mxu0 %v11692_v26  ;;  %v1886_v25 = vadd.f32 %v12937_v49, %v12739_v38 }
 0x244   : > { %v12943_v18 = vpop.f32.mrf.mxu1  ;;  %v2173_v8 = vpack.c.bf16 %v2077_v13, %v2075_v59  ;;  %v2084_v13 = vmax.f32 %v1870_v48, 0.0 }
 0x245   : > { %v1888_v34 = vadd.f32 %v12943_v18, %v12730_v35  ;;  %v2090_v49 = vmax.f32 %v1886_v25, 0.0 }
 0x246   : > { %v12945_v43 = vpop.f32.mrf.mxu1  ;;  %v2176_v24 = vpack.c.bf16 %v2084_v13, %v2082_v11 }
 0x248   : > { %v12947_v15 = vpop.f32.mrf.mxu1 }
 0x24a   : > { %v12953_v16 = vpop.f32.mrf.mxu1  ;;  %2565 = vmatmul.mubr.bf16.gmra.mxu0 %v2166_v9  ;;  %v2079_v9 = vmax.f32 %v1858_v51, 0.0 }
 0x24b   : > { %2574 = vmatprep.mubr.bf16.mxu0 %v2169_v23  ;;  %v1872_v23 = vadd.f32 %v12909_v45, %v12730_v35 }
 0x24c   : > { %v12965_v60 = vpop.f32.mrf.mxu1  ;;  %v2175_v14 = vpack.c.bf16 %v2081_v7, %v2079_v9  ;;  %v2088_v7 = vmax.f32 %v1880_v55, 0.0 }
 0x24d   : > { %v2085_v21 = vmax.f32 %v1872_v23, 0.0  ;;  %v1890_v23 = vadd.f32 %v12945_v43, %v12739_v38  ;;  %v11695_v43 = vld [vmem:[%s17295_s5 + $0x300] ss:$8 sps:$4 sm:$0xff]  }
 0x24e   : > { %v12967_v36 = vpop.f32.mrf.mxu1  ;;  %v2178_v30 = vpack.c.bf16 %v2088_v7, %v2086_v57 }
 0x24f   : > { %v1900_v17 = vadd.f32 %v12967_v36, %v12739_v38 }
 0x250   : > { %v12969_v46 = vpop.f32.mrf.mxu1 }
 0x251   : > { %v1902_v32 = vadd.f32 %v12969_v46, %v12730_v35  ;;  %v11697_v46 = vld [vmem:[%s17295_s5 + $0x304] ss:$8 sps:$4 sm:$0xff]   ;;  %v2096_v13 = vmax.f32 %v1900_v17, 0.0 }
 0x252   : > { %v12975_v22 = vpop.f32.mrf.mxu1  ;;  %2575 = vmatmul.mubr.bf16.gmra.mxu0 %v2168_v52  ;;  %v2083_v52 = vmax.f32 %v1868_v4, 0.0  ;;  %v1898_v4 = vadd.f32 %v12965_v60, %v12730_v35  ;;  %3928 = vmatprep.subr.bf16.mxu0 %v11697_v46 }
 0x253   : > { %2584 = vmatprep.mubr.bf16.mxu0 %v2171_v61  ;;  %v2097_v58 = vmax.f32 %v1902_v32, 0.0  ;;  %3929 = vmatpush1.bf16.msra.mxu0 %v11695_v43 }
 0x254   : > { %v12981_v40 = vpop.f32.mrf.mxu1  ;;  %v2177_v0 = vpack.c.bf16 %v2085_v21, %v2083_v52  ;;  %v2092_v21 = vmax.f32 %v1890_v23, 0.0 }
 0x255   : > { %v1908_v56 = vadd.f32 %v12981_v40, %v12730_v35 }
 0x256   : > { %v12983_v19 = vpop.f32.mrf.mxu1  ;;  %v2180_v48 = vpack.c.bf16 %v2092_v21, %v2090_v49 }
 0x257   : > { %v2099_v36 = vmax.f32 %v1908_v56, 0.0 }
 0x258   : > { %v12985_v44 = vpop.f32.mrf.mxu1 }
 0x25a   : > { %v12991_v28 = vpop.f32.mrf.mxu1  ;;  %2585 = vmatmul.mubr.bf16.gmra.mxu0 %v2170_v62  ;;  %v2087_v62 = vmax.f32 %v1878_v47, 0.0  ;;  %v1896_v47 = vadd.f32 %v12953_v16, %v12739_v38 }
 0x25b   : > { %2594 = vmatprep.mubr.bf16.mxu0 %v2173_v8  ;;  %v1892_v8 = vadd.f32 %v12947_v15, %v12730_v35  ;;  %v1916_v23 = vadd.f32 %v12991_v28, %v12739_v38 }
 0x25c   : > { %v12997_v5 = vpop.f32.mrf.mxu1  ;;  %v2179_v51 = vpack.c.bf16 %v2089_v63, %v2087_v62  ;;  %v2094_v11 = vmax.f32 %v1896_v47, 0.0 }
 0x25d   : > { %v2093_v42 = vmax.f32 %v1892_v8, 0.0  ;;  %v1906_v8 = vadd.f32 %v12975_v22, %v12739_v38  ;;  %v1918_v40 = vadd.f32 %v12997_v5, %v12730_v35  ;;  %v2102_v43 = vmax.f32 %v1916_v23, 0.0 }
 0x25e   : > { %v13005_v53 = vpop.f32.mrf.mxu1 }
 0x25f   : > { %v2098_v7 = vmax.f32 %v1906_v8, 0.0  ;;  %v1920_v5 = vadd.f32 %v13005_v53, %v12739_v38 }
 0x260   : > { %v13007_v50 = vpop.f32.mrf.mxu1 }
 0x261   : > { %v1922_v16 = vadd.f32 %v13007_v50, %v12730_v35  ;;  %v2104_v25 = vmax.f32 %v1920_v5, 0.0 }
 0x262   : > { %v13013_v12 = vpop.f32.mrf.mxu1  ;;  %2595 = vmatmul.mubr.bf16.gmra.mxu0 %v2172_v20  ;;  %v2091_v20 = vmax.f32 %v1888_v34, 0.0 }
 0x263   : > { %2604 = vmatprep.mubr.bf16.mxu0 %v2175_v14  ;;  %v2105_v34 = vmax.f32 %v1922_v16, 0.0  ;;  %v2186_v21 = vpack.c.bf16 %v2104_v25, %v2102_v43  ;;  %v1926_v49 = vadd.f32 %v13013_v12, %v12739_v38 }
 0x264   : > { %v13019_v27 = vpop.f32.mrf.mxu1  ;;  %v2181_v18 = vpack.c.bf16 %v2093_v42, %v2091_v20  ;;  %v2103_v42 = vmax.f32 %v1918_v40, 0.0 }
 0x266   : > { %v13021_v41 = vpop.f32.mrf.mxu1 }
 0x268   : > { %v13023_v45 = vpop.f32.mrf.mxu1 }
 0x269   : > { %v1932_v20 = vadd.f32 %v13023_v45, %v12730_v35  ;;  %v1930_v45 = vadd.f32 %v13021_v41, %v12739_v38  ;;  %v11703_v41 = vld [vmem:[%s17295_s5 + $0x3e4] ss:$8 sps:$4 sm:$0xff]  }
 0x26a   : > { %v13029_v61 = vpop.f32.mrf.mxu1  ;;  %2605 = vmatmul.mubr.bf16.gmra.mxu0 %v2174_v1  ;;  %v2095_v1 = vmax.f32 %v1898_v4, 0.0 }
 0x26b   : > { %2614 = vmatprep.mubr.bf16.mxu0 %v2177_v0  ;;  %v1912_v0 = vadd.f32 %v12985_v44, %v12730_v35  ;;  %v1910_v44 = vadd.f32 %v12983_v19, %v12739_v38  ;;  %v11700_v19 = vld [vmem:[%s17295_s5 + $0x3f4] ss:$8 sps:$4 sm:$0xff]   ;;  %v2109_v4 = vmax.f32 %v1932_v20, 0.0 }
 0x26c   : > { %v13035_v6 = vpop.f32.mrf.mxu1  ;;  %v2183_v54 = vpack.c.bf16 %v2097_v58, %v2095_v1  ;;  %3930 = vmatprep.subr.bf16.mxu0 %v11700_v19 }
 0x26d   : > { %v2101_v63 = vmax.f32 %v1912_v0, 0.0  ;;  %v2100_v50 = vmax.f32 %v1910_v44, 0.0  ;;  %3931 = vmatpush2.bf16.msra.mxu0 %v11698_v37  ;;  %v2106_v0 = vmax.f32 %v1926_v49, 0.0 }
 0x26e   : > { %v13043_v59 = vpop.f32.mrf.mxu1  ;;  %3932 = vmatprep.subr.bf16.mxu0 %v11703_v41 }
 0x26f   : > { %v2185_v55 = vpack.c.bf16 %v2101_v63, %v2099_v36  ;;  %v2184_v57 = vpack.c.bf16 %v2100_v50, %v2098_v7  ;;  %v1936_v63 = vadd.f32 %v13029_v61, %v12739_v38  ;;  %v10788_v61 = vld [vmem:[%s17296_s6 + $0x1] ss:$8 sm:$0x3] }
 0x270   : > { %v13045_v10 = vpop.f32.mrf.mxu1  ;;  %v13174_v7 = vrot.slane %v10788_v61, %v12374_v39 }
 0x271   : > { %v1942_v28 = vadd.f32 %v13045_v10, %v12730_v35  ;;  %v2108_v10 = vmax.f32 %v1930_v45, 0.0  ;;  %v2110_v16 = vmax.f32 %v1936_v63, 0.0 }
 0x272   : > { %v13051_v3 = vpop.f32.mrf.mxu1  ;;  %2615 = vmatmul.mubr.bf16.gmra.mxu0 %v2176_v24  ;;  %v2182_v24 = vpack.c.bf16 %v2096_v13, %v2094_v11 }
 0x273   : > { %2624 = vmatprep.mubr.bf16.mxu0 %v2179_v51  ;;  %v2113_v17 = vmax.f32 %v1942_v28, 0.0  ;;  %v2188_v47 = vpack.c.bf16 %v2108_v10, %v2106_v0  ;;  %v1946_v19 = vadd.f32 %v13051_v3, %v12739_v38  ;;  %v11706_v3 = vld [vmem:[%s17295_s5 + $0x3d4] ss:$8 sps:$4 sm:$0xff]  }
 0x274   : > { %v13057_v33 = vpop.f32.mrf.mxu1 }
 0x275   : > { %v1948_v36 = vadd.f32 %v13057_v33, %v12730_v35 }
 0x276   : > { %v13059_v9 = vpop.f32.mrf.mxu1 }
 0x278   : > { %v13061_v15 = vpop.f32.mrf.mxu1 }
 0x279   : > { %v1952_v56 = vadd.f32 %v13061_v15, %v12730_v35  ;;  %v1950_v15 = vadd.f32 %v13059_v9, %v12739_v38 }
 0x27a   : > { %v13067_v14 = vpop.f32.mrf.mxu1  ;;  %2625 = vmatmul.mubr.bf16.gmra.mxu0 %v2178_v30  ;;  %v2187_v30 = vpack.c.bf16 %v2105_v34, %v2103_v42  ;;  %v13169_v34 = vrot.slane %v10788_v61, %v12357_v31 }
 0x27b   : > { %2634 = vmatprep.mubr.bf16.mxu0 %v2181_v18  ;;  %v1928_v18 = vadd.f32 %v13019_v27, %v12730_v35  ;;  %v1938_v27 = vadd.f32 %v13035_v6, %v12730_v35  ;;  %v1940_v6 = vadd.f32 %v13043_v59, %v12739_v38  ;;  %v2117_v44 = vmax.f32 %v1952_v56, 0.0 }
 0x27c   : > { %v13073_v29 = vpop.f32.mrf.mxu1  ;;  %v2115_v59 = vmax.f32 %v1948_v36, 0.0 }
 0x27d   : > { %v2107_v53 = vmax.f32 %v1928_v18, 0.0  ;;  %v1958_v9 = vadd.f32 %v13073_v29, %v12730_v35 }
 0x27e   : > { %v13081_v52 = vpop.f32.mrf.mxu1  ;;  %v2193_v33 = vpack.c.bf16 %v2117_v44, %v2115_v59 }
 0x27f   : > { %v2189_v58 = vpack.c.bf16 %v2109_v4, %v2107_v53  ;;  %v2119_v25 = vmax.f32 %v1958_v9, 0.0 }
 0x280   : > { %v13083_v60 = vpop.f32.mrf.mxu1 }
 0x281   : > { %v1962_v40 = vadd.f32 %v13083_v60, %v12730_v35  ;;  %v11704_v60 = vld [vmem:[%s17295_s5 + $0x3d0] ss:$8 sps:$4 sm:$0xff]  }
 0x282   : > { %v13091_v26 = vpop.f32.mrf.mxu1  ;;  %2635 = vmatmul.mubr.bf16.gmra.mxu0 %v2180_v48  ;;  %v11701_v48 = vld [vmem:[%s17295_s5 + $0x3e0] ss:$8 sps:$4 sm:$0xff]  }
 0x283   : > { %2644 = vmatprep.mubr.bf16.mxu0 %v2183_v54  ;;  %3933 = vmatpush2.bf16.msra.mxu0 %v11701_v48  ;;  %v2111_v54 = vmax.f32 %v1938_v27, 0.0  ;;  %v2121_v5 = vmax.f32 %v1962_v40, 0.0  ;;  %v1956_v48 = vadd.f32 %v13067_v14, %v12739_v38 }
 0x284   : > { %v13095_v62 = vpop.f32.mrf.mxu1  ;;  %3934 = vmatprep.subr.bf16.mxu0 %v11706_v3 }
 0x285   : > { %v2191_v13 = vpack.c.bf16 %v2113_v17, %v2111_v54  ;;  %v2195_v27 = vpack.c.bf16 %v2121_v5, %v2119_v25  ;;  %v1968_v0 = vadd.f32 %v13095_v62, %v12730_v35  ;;  %v2118_v63 = vmax.f32 %v1956_v48, 0.0  ;;  %v11709_v5 = vld [vmem:[%s17295_s5 + $0x3c4] ss:$8 sps:$4 sm:$0xff]  }
 0x286   : > { %v13103_v51 = vpop.f32.mrf.mxu1 }
 0x287   : > { %3935 = vmatpush2.bf16.msra.mxu0 %v11704_v60  ;;  %v2123_v44 = vmax.f32 %v1968_v0, 0.0 }
 0x288   : > { %v13113_v22 = vpop.f32.mrf.mxu1  ;;  %3936 = vmatprep.subr.bf16.mxu0 %v11709_v5  ;;  %v11710_v5 = vld [vmem:[%s17295_s5 + $0x3b0] ss:$8 sps:$4 sm:$0xff]  }
 0x289   : > { %v1972_v28 = vadd.f32 %v13113_v22, %v12730_v35 }
 0x28a   : > { %2645 = vmatmul.mubr.bf16.gmra.mxu0 %v2182_v24  ;;  %v13121_v32 = vpop.f32.mrf.mxu1  ;;  %v2112_v24 = vmax.f32 %v1940_v6, 0.0 }
 0x28b   : > { %2654 = vmatprep.mubr.bf16.mxu0 %v2185_v55  ;;  %v2125_v22 = vmax.f32 %v1972_v28, 0.0  ;;  %v1976_v0 = vadd.f32 %v13121_v32, %v12739_v38 }
 0x28c   : > { %v13125_v46 = vpop.f32.mrf.mxu1  ;;  %v2190_v8 = vpack.c.bf16 %v2112_v24, %v2110_v16 }
 0x28d   : > { %v1978_v3 = vadd.f32 %v13125_v46, %v12730_v35 }
 0x28e   : > { %v13133_v1 = vpop.f32.mrf.mxu1 }
 0x290   : > { %v13143_v12 = vpop.f32.mrf.mxu1 }
 0x291   : > { %v1982_v61 = vadd.f32 %v13143_v12, %v12730_v35  ;;  %v11707_v12 = vld [vmem:[%s17295_s5 + $0x3c0] ss:$8 sps:$4 sm:$0xff]  }
 0x292   : > { %2655 = vmatmul.mubr.bf16.gmra.mxu0 %v2184_v57  ;;  %v13151_v11 = vpop.f32.mrf.mxu1  ;;  %v2116_v57 = vmax.f32 %v1950_v15, 0.0 }
 0x293   : > { %2664 = vmatprep.mubr.bf16.mxu0 %v2187_v30  ;;  %v2114_v30 = vmax.f32 %v1946_v19, 0.0  ;;  %v1966_v19 = vadd.f32 %v13091_v26, %v12739_v38  ;;  %3937 = vmatpush2.bf16.msra.mxu0 %v11707_v12 }
 0x294   : > { %v13155_v55 = vpop.f32.mrf.mxu1 }
 0x295   : > { %v2192_v53 = vpack.c.bf16 %v2116_v57, %v2114_v30  ;;  %v2129_v30 = vmax.f32 %v1982_v61, 0.0  ;;  %v2122_v25 = vmax.f32 %v1966_v19, 0.0 }
 0x296   : > { %v13166_v50 = vpop.f32.mrf.mxu1 }
 0x298   : > { %v13182_v23 = vpop.f32.mrf.mxu1 }
 0x29a   : > { %2665 = vmatmul.mubr.bf16.gmra.mxu0 %v2186_v21  ;;  %v1960_v21 = vadd.f32 %v13081_v52, %v12739_v38  ;;  %v13194_v41 = vpop.f32.mrf.mxu1 }
 0x29b   : > { %2674 = vmatprep.mubr.bf16.mxu0 %v2189_v58 }
 0x29c   : > { %v13198_v36 = vpop.f32.mrf.mxu1 }
 0x29e   : > { %v13210_v9 = vpop.f32.mrf.mxu1 }
 0x2a2   : > { %2675 = vmatmul.mubr.bf16.gmra.mxu0 %v2188_v47  ;;  %v2120_v47 = vmax.f32 %v1960_v21, 0.0 }
 0x2a3   : > { %2684 = vmatprep.mubr.bf16.mxu0 %v2191_v13 }
 0x2a4   : > { %v2194_v59 = vpack.c.bf16 %v2120_v47, %v2118_v63 }
 0x2aa   : > { %v2446_v37 = vpop.f32.mrf.mxu0  ;;  %2685 = vmatmul.mubr.bf16.gmra.mxu0 %v2190_v8  ;;  %v1970_v8 = vadd.f32 %v13103_v51, %v12739_v38 }
 0x2ab   : > { %2694 = vmatprep.mubr.bf16.mxu0 %v2193_v33  ;;  %v2447_v4 = vadd.f32 %v2446_v37, %v13174_v7  ;;  %v2197_v33 = vpack.c.bf16 %v2125_v22, %v2123_v44 }
 0x2ac   : > { %v2448_v42 = vpop.f32.mrf.mxu0  ;;  %v2124_v26 = vmax.f32 %v1970_v8, 0.0 }
 0x2ad   : > { %v2449_v29 = vadd.f32 %v2448_v42, %v13169_v34  ;;  %v2765_v52 = vmax.f32 %v2447_v4, 0.0  ;;  %v2001_v4 = vpop.f32.mrf.mxu1 }
 0x2ae   : > { %v2450_v20 = vpop.f32.mrf.mxu0  ;;  %v2196_v28 = vpack.c.bf16 %v2124_v26, %v2122_v25  ;;  %v11712_v26 = vld [vmem:[%s17295_s5 + $0x3b4] ss:$8 sps:$4 sm:$0xff]  }
 0x2af   : > { %v2451_v18 = vadd.f32 %v2450_v20, %v13174_v7  ;;  %v2766_v10 = vmax.f32 %v2449_v29, 0.0  ;;  %3938 = vmatprep.subr.bf16.mxu0 %v11712_v26 }
 0x2b0   : > { %v2452_v43 = vpop.f32.mrf.mxu0  ;;  %3939 = vmatpush2.bf16.msra.mxu0 %v11710_v5 }
 0x2b1   : > { %v2453_v45 = vadd.f32 %v2452_v43, %v13169_v34  ;;  %v2767_v58 = vmax.f32 %v2451_v18, 0.0 }
 0x2b2   : > { %v2456_v49 = vpop.f32.mrf.mxu0  ;;  %2695 = vmatmul.mubr.bf16.gmra.mxu0 %v2192_v53  ;;  %v2127_v53 = vmax.f32 %v1978_v3, 0.0 }
 0x2b3   : > { %v2768_v17 = vmax.f32 %v2453_v45, 0.0  ;;  %2704 = vmatprep.mubr.bf16.mxu0 %v2195_v27  ;;  %v2893_v56 = vpack.c.bf16 %v2767_v58, %v2765_v52  ;;  %v2457_v16 = vadd.f32 %v2456_v49, %v13174_v7  ;;  %v1980_v58 = vadd.f32 %v13133_v1, %v12739_v38  ;;  %v13230_v52 = vpop.f32.mrf.mxu1 }
 0x2b4   : > { %v2458_v54 = vpop.f32.mrf.mxu0  ;;  %v1992_v27 = vadd.f32 %v13182_v23, %v12730_v35 }
 0x2b5   : > { %v2894_v6 = vpack.c.bf16 %v2768_v17, %v2766_v10  ;;  %v2459_v14 = vadd.f32 %v2458_v54, %v13169_v34  ;;  %v2769_v51 = vmax.f32 %v2457_v16, 0.0  ;;  %v2199_v17 = vpack.c.bf16 %v2129_v30, %v2127_v53  ;;  %v2007_v44 = vpop.f32.mrf.mxu1 }
 0x2b6   : > { %v2460_v13 = vpop.f32.mrf.mxu0  ;;  %v2133_v23 = vmax.f32 %v1992_v27, 0.0 }
 0x2b7   : > { %v2461_v24 = vadd.f32 %v2460_v13, %v13174_v7  ;;  %3195 = vmatprep.mubr.bf16.mxu1 %v2894_v6  ;;  %v2770_v42 = vmax.f32 %v2459_v14, 0.0  ;;  %v1988_v6 = vadd.f32 %v13155_v55, %v12730_v35 }
 0x2b8   : > { %v2462_v62 = vpop.f32.mrf.mxu0  ;;  %3196 = vmatmul.mubr.bf16.vlgmr.msra.gmra.mxu1 %v2893_v56  ;;  %v2128_v56 = vmax.f32 %v1980_v58, 0.0 }
 0x2b9   : > { %v2463_v15 = vadd.f32 %v2462_v62, %v13169_v34  ;;  %v2771_v40 = vmax.f32 %v2461_v24, 0.0  ;;  %v2126_v24 = vmax.f32 %v1976_v0, 0.0  ;;  %v2131_v62 = vmax.f32 %v1988_v6, 0.0 }
 0x2ba   : > { %v2466_v37 = vpop.f32.mrf.mxu0  ;;  %2705 = vmatmul.mubr.bf16.gmra.mxu0 %v2194_v59 }
 0x2bb   : > { %v2772_v60 = vmax.f32 %v2463_v15, 0.0  ;;  %2714 = vmatprep.mubr.bf16.mxu0 %v2197_v33  ;;  %v2895_v29 = vpack.c.bf16 %v2771_v40, %v2769_v51  ;;  %v2467_v21 = vadd.f32 %v2466_v37, %v13174_v7  ;;  %v2198_v55 = vpack.c.bf16 %v2128_v56, %v2126_v24 }
 0x2bc   : > { %v2468_v57 = vpop.f32.mrf.mxu0  ;;  %v1990_v15 = vadd.f32 %v13166_v50, %v12739_v38  ;;  %v2002_v40 = vadd.f32 %v2001_v4, %v12730_v35  ;;  %v2201_v19 = vpack.c.bf16 %v2133_v23, %v2131_v62 }
 0x2bd   : > { %v2896_v20 = vpack.c.bf16 %v2772_v60, %v2770_v42  ;;  %v2469_v46 = vadd.f32 %v2468_v57, %v13169_v34  ;;  %v2773_v1 = vmax.f32 %v2467_v21, 0.0  ;;  %v1986_v42 = vadd.f32 %v13151_v11, %v12739_v38  ;;  %v2009_v60 = vpop.f32.mrf.mxu1 }
 0x2be   : > { %v2470_v18 = vpop.f32.mrf.mxu0  ;;  %v1998_v57 = vadd.f32 %v13198_v36, %v12730_v35  ;;  %v2137_v30 = vmax.f32 %v2002_v40, 0.0 }
 0x2bf   : > { %v2471_v43 = vadd.f32 %v2470_v18, %v13174_v7  ;;  %3205 = vmatprep.mubr.bf16.mxu1 %v2896_v20  ;;  %v2774_v54 = vmax.f32 %v2469_v46, 0.0  ;;  %v2132_v20 = vmax.f32 %v1990_v15, 0.0  ;;  %v2130_v25 = vmax.f32 %v1986_v42, 0.0  ;;  %v2011_v4 = vpop.f32.mrf.mxu1 }
 0x2c0   : > { %v2472_v45 = vpop.f32.mrf.mxu0  ;;  %3206 = vmatmul.mubr.bf16.gmra.mxu1 %v2895_v29 }
 0x2c1   : > { %v2473_v49 = vadd.f32 %v2472_v45, %v13169_v34  ;;  %v2775_v48 = vmax.f32 %v2471_v43, 0.0  ;;  %v2135_v43 = vmax.f32 %v1998_v57, 0.0  ;;  %v2200_v45 = vpack.c.bf16 %v2132_v20, %v2130_v25 }
 0x2c2   : > { %v2476_v10 = vpop.f32.mrf.mxu0  ;;  %2715 = vmatmul.mubr.bf16.gmra.mxu0 %v2196_v28  ;;  %v2000_v28 = vadd.f32 %v13210_v9, %v12739_v38 }
 0x2c3   : > { %v2776_v47 = vmax.f32 %v2473_v49, 0.0  ;;  %2724 = vmatprep.mubr.bf16.mxu0 %v2199_v17  ;;  %v2897_v63 = vpack.c.bf16 %v2775_v48, %v2773_v1  ;;  %v2477_v59 = vadd.f32 %v2476_v10, %v13174_v7  ;;  %v2012_v49 = vadd.f32 %v2011_v4, %v12730_v35 }
 0x2c4   : > { %v2478_v22 = vpop.f32.mrf.mxu0  ;;  %v2203_v48 = vpack.c.bf16 %v2137_v30, %v2135_v43  ;;  %v1996_v10 = vadd.f32 %v13194_v41, %v12739_v38  ;;  %v2136_v1 = vmax.f32 %v2000_v28, 0.0 }
 0x2c5   : > { %v2898_v13 = vpack.c.bf16 %v2776_v47, %v2774_v54  ;;  %v2479_v32 = vadd.f32 %v2478_v22, %v13169_v34  ;;  %v2777_v12 = vmax.f32 %v2477_v59, 0.0  ;;  %v2008_v47 = vadd.f32 %v2007_v44, %v12730_v35 }
 0x2c6   : > { %v2480_v14 = vpop.f32.mrf.mxu0  ;;  %v2141_v56 = vmax.f32 %v2012_v49, 0.0  ;;  %v2134_v23 = vmax.f32 %v1996_v10, 0.0 }
 0x2c7   : > { %v2481_v16 = vadd.f32 %v2480_v14, %v13174_v7  ;;  %3215 = vmatprep.mubr.bf16.mxu1 %v2898_v13  ;;  %v2778_v3 = vmax.f32 %v2479_v32, 0.0  ;;  %v2139_v14 = vmax.f32 %v2008_v47, 0.0  ;;  %v11721_v47 = vld [vmem:[%s17295_s5 + $0x394] ss:$8 sps:$4 sm:$0xff]  }
 0x2c8   : > { %v2482_v8 = vpop.f32.mrf.mxu0  ;;  %3216 = vmatmul.mubr.bf16.gmra.mxu1 %v2897_v63  ;;  %v2202_v32 = vpack.c.bf16 %v2136_v1, %v2134_v23 }
 0x2c9   : > { %v2483_v61 = vadd.f32 %v2482_v8, %v13169_v34  ;;  %v2779_v37 = vmax.f32 %v2481_v16, 0.0  ;;  %v2010_v16 = vadd.f32 %v2009_v60, %v12739_v38  ;;  %v2205_v59 = vpack.c.bf16 %v2141_v56, %v2139_v14 }
 0x2ca   : > { %v2486_v33 = vpop.f32.mrf.mxu0  ;;  %2725 = vmatmul.mubr.bf16.gmra.mxu0 %v2198_v55  ;;  %v2006_v8 = vadd.f32 %v13230_v52, %v12739_v38  ;;  %v11716_v38 = vld [vmem:[%s17295_s5 + $0x470] ss:$8 sps:$4 sm:$0xff]   ;;  %v11718_v52 = vld [vmem:[%s17295_s5 + $0x474] ss:$8 sps:$4 sm:$0xff]  }
 0x2cb   : > { %v2780_v51 = vmax.f32 %v2483_v61, 0.0  ;;  %2734 = vmatprep.mubr.bf16.mxu0 %v2201_v19  ;;  %v2899_v29 = vpack.c.bf16 %v2779_v37, %v2777_v12  ;;  %v2487_v53 = vadd.f32 %v2486_v33, %v13174_v7  ;;  %v11713_v37 = vld [vmem:[%s17295_s5 + $0x3a0] ss:$8 sps:$4 sm:$0xff]   ;;  %v11715_v33 = vld [vmem:[%s17295_s5 + $0x3a4] ss:$8 sps:$4 sm:$0xff]   ;;  %v2140_v19 = vmax.f32 %v2010_v16, 0.0  ;;  %4660 = vmatprep.subr.bf16.mxu1 %v11718_v52 }
 0x2cc   : > { %v2488_v50 = vpop.f32.mrf.mxu0  ;;  %3940 = vmatprep.subr.bf16.mxu0 %v11715_v33  ;;  %4661 = vmatpush1.bf16.msra.mxu1 %v11716_v38 }
 0x2cd   : > { %v2900_v11 = vpack.c.bf16 %v2780_v51, %v2778_v3  ;;  %v2489_v36 = vadd.f32 %v2488_v50, %v13169_v34  ;;  %v2781_v6 = vmax.f32 %v2487_v53, 0.0  ;;  %v2138_v51 = vmax.f32 %v2006_v8, 0.0  ;;  %3941 = vmatpush2.bf16.msra.mxu0 %v11713_v37 }
 0x2ce   : > { %v2490_v18 = vpop.f32.mrf.mxu0  ;;  %3942 = vmatprep.subr.bf16.mxu0 %v11721_v47 }
 0x2cf   : > { %v2491_v46 = vadd.f32 %v2490_v18, %v13174_v7  ;;  %3225 = vmatprep.mubr.bf16.mxu1 %v2900_v11  ;;  %v2782_v17 = vmax.f32 %v2489_v36, 0.0  ;;  %v2204_v26 = vpack.c.bf16 %v2140_v19, %v2138_v51  ;;  %v11725_v51 = vld [vmem:[%s17295_s5 + $0x380] ss:$8 sps:$4 sm:$0xff]  }
 0x2d0   : > { %v2492_v21 = vpop.f32.mrf.mxu0  ;;  %3226 = vmatmul.mubr.bf16.gmra.mxu1 %v2899_v29 }
 0x2d1   : > { %v2493_v58 = vadd.f32 %v2492_v21, %v13169_v34  ;;  %v2783_v27 = vmax.f32 %v2491_v46, 0.0 }
 0x2d2   : > { %v2496_v54 = vpop.f32.mrf.mxu0  ;;  %2735 = vmatmul.mubr.bf16.gmra.mxu0 %v2200_v45 }
 0x2d3   : > { %v2784_v0 = vmax.f32 %v2493_v58, 0.0  ;;  %2744 = vmatprep.mubr.bf16.mxu0 %v2203_v48  ;;  %v2901_v13 = vpack.c.bf16 %v2783_v27, %v2781_v6  ;;  %v2497_v35 = vadd.f32 %v2496_v54, %v13174_v7  ;;  %v11719_v54 = vld [vmem:[%s17295_s5 + $0x390] ss:$8 sps:$4 sm:$0xff]  }
 0x2d4   : > { %v2498_v22 = vpop.f32.mrf.mxu0  ;;  %3943 = vmatpush2.bf16.msra.mxu0 %v11719_v54 }
 0x2d5   : > { %v2902_v9 = vpack.c.bf16 %v2784_v0, %v2782_v17  ;;  %v2499_v24 = vadd.f32 %v2498_v22, %v13169_v34  ;;  %v2785_v42 = vmax.f32 %v2497_v35, 0.0  ;;  %v11722_v22 = vld [vmem:[%s17295_s5 + $0x460] ss:$8 sps:$4 sm:$0xff]  }
 0x2d6   : > { %v2500_v63 = vpop.f32.mrf.mxu0 }
 0x2d7   : > { %3235 = vmatprep.mubr.bf16.mxu1 %v2902_v9  ;;  %v2501_v41 = vadd.f32 %v2500_v63, %v13174_v7  ;;  %v2786_v61 = vmax.f32 %v2499_v24, 0.0  ;;  %v11724_v9 = vld [vmem:[%s17295_s5 + $0x464] ss:$8 sps:$4 sm:$0xff]  }
 0x2d8   : > { %3236 = vmatmul.mubr.bf16.gmra.mxu1 %v2901_v13  ;;  %v2502_v44 = vpop.f32.mrf.mxu0  ;;  %4662 = vmatprep.subr.bf16.mxu1 %v11724_v9  ;;  %v11731_v9 = vld [vmem:[%s17295_s5 + $0x440] ss:$8 sps:$4 sm:$0xff]  }
 0x2d9   : > { %v2503_v62 = vadd.f32 %v2502_v44, %v13169_v34  ;;  %v2787_v55 = vmax.f32 %v2501_v41, 0.0  ;;  %4663 = vmatpush1.bf16.msra.mxu1 %v11722_v22 }
 0x2da   : > { %v2506_v15 = vpop.f32.mrf.mxu0  ;;  %2745 = vmatmul.mubr.bf16.gmra.mxu0 %v2202_v32 }
 0x2db   : > { %v2788_v40 = vmax.f32 %v2503_v62, 0.0  ;;  %2754 = vmatprep.mubr.bf16.mxu0 %v2205_v59  ;;  %v2903_v57 = vpack.c.bf16 %v2787_v55, %v2785_v42  ;;  %v2507_v20 = vadd.f32 %v2506_v15, %v13174_v7 }
 0x2dc   : > { %v2508_v60 = vpop.f32.mrf.mxu0 }
 0x2dd   : > { %v2904_v3 = vpack.c.bf16 %v2788_v40, %v2786_v61  ;;  %v2509_v50 = vadd.f32 %v2508_v60, %v13169_v34  ;;  %v2789_v36 = vmax.f32 %v2507_v20, 0.0 }
 0x2de   : > { %v2510_v12 = vpop.f32.mrf.mxu0 }
 0x2df   : > { %v2511_v5 = vadd.f32 %v2510_v12, %v13174_v7  ;;  %3245 = vmatprep.mubr.bf16.mxu1 %v2904_v3  ;;  %v2790_v25 = vmax.f32 %v2509_v50, 0.0 }
 0x2e0   : > { %v2512_v11 = vpop.f32.mrf.mxu0  ;;  %3246 = vmatmul.mubr.bf16.gmra.mxu1 %v2903_v57  ;;  %v11727_v57 = vld [vmem:[%s17295_s5 + $0x384] ss:$8 sps:$4 sm:$0xff]  }
 0x2e1   : > { %v2513_v30 = vadd.f32 %v2512_v11, %v13169_v34  ;;  %v2791_v29 = vmax.f32 %v2511_v5, 0.0  ;;  %v11728_v5 = vld [vmem:[%s17295_s5 + $0x450] ss:$8 sps:$4 sm:$0xff]   ;;  %3944 = vmatprep.subr.bf16.mxu0 %v11727_v57 }
 0x2e2   : > { %v2516_v18 = vpop.f32.mrf.mxu0  ;;  %2755 = vmatmul.mubr.bf16.gmra.mxu0 %v2204_v26  ;;  %v11730_v26 = vld [vmem:[%s17295_s5 + $0x454] ss:$8 sps:$4 sm:$0xff]  }
 0x2e3   : > { %v2792_v4 = vmax.f32 %v2513_v30, 0.0  ;;  %v2905_v53 = vpack.c.bf16 %v2791_v29, %v2789_v36  ;;  %v2517_v58 = vadd.f32 %v2516_v18, %v13174_v7  ;;  %4664 = vmatprep.subr.bf16.mxu1 %v11730_v26  ;;  %3945 = vmatpush2.bf16.msra.mxu0 %v11725_v51  ;;  %v11739_v26 = vld [vmem:[%s17295_s5 + $0x434] ss:$8 sps:$4 sm:$0xff]  }
 0x2e4   : > { %v2518_v46 = vpop.f32.mrf.mxu0  ;;  %4665 = vmatpush1.bf16.msra.mxu1 %v11728_v5  ;;  %v11737_v5 = vld [vmem:[%s17295_s5 + $0x430] ss:$8 sps:$4 sm:$0xff]  }
 0x2e5   : > { %v2906_v43 = vpack.c.bf16 %v2792_v4, %v2790_v25  ;;  %v2519_v45 = vadd.f32 %v2518_v46, %v13169_v34  ;;  %v2793_v6 = vmax.f32 %v2517_v58, 0.0 }
 0x2e6   : > { %v2520_v21 = vpop.f32.mrf.mxu0 }
 0x2e7   : > { %v2521_v28 = vadd.f32 %v2520_v21, %v13174_v7  ;;  %3255 = vmatprep.mubr.bf16.mxu1 %v2906_v43  ;;  %v2794_v17 = vmax.f32 %v2519_v45, 0.0 }
 0x2e8   : > { %v2522_v49 = vpop.f32.mrf.mxu0  ;;  %3256 = vmatmul.mubr.bf16.gmra.mxu1 %v2905_v53 }
 0x2e9   : > { %v2523_v27 = vadd.f32 %v2522_v49, %v13169_v34  ;;  %v2795_v48 = vmax.f32 %v2521_v28, 0.0 }
 0x2ea   : > { %v2526_v10 = vpop.f32.mrf.mxu0 }
 0x2eb   : > { %v2796_v0 = vmax.f32 %v2523_v27, 0.0  ;;  %v2907_v13 = vpack.c.bf16 %v2795_v48, %v2793_v6  ;;  %v2527_v24 = vadd.f32 %v2526_v10, %v13174_v7 }
 0x2ec   : > { %v2528_v1 = vpop.f32.mrf.mxu0 }
 0x2ed   : > { %v2908_v56 = vpack.c.bf16 %v2796_v0, %v2794_v17  ;;  %v2529_v63 = vadd.f32 %v2528_v1, %v13169_v34  ;;  %v2797_v59 = vmax.f32 %v2527_v24, 0.0 }
 0x2ee   : > { %v2530_v23 = vpop.f32.mrf.mxu0 }
 0x2ef   : > { %v2531_v14 = vadd.f32 %v2530_v23, %v13174_v7  ;;  %3265 = vmatprep.mubr.bf16.mxu1 %v2908_v56  ;;  %v2798_v44 = vmax.f32 %v2529_v63, 0.0  ;;  %v11733_v56 = vld [vmem:[%s17295_s5 + $0x444] ss:$8 sps:$4 sm:$0xff]   ;;  %v11736_v63 = vld [vmem:[%s17294_s4 + $0x34] ss:$8 sps:$4 sm:$0xff]  }
 0x2f0   : > { %v2532_v41 = vpop.f32.mrf.mxu0  ;;  %3266 = vmatmul.mubr.bf16.gmra.mxu1 %v2907_v13  ;;  %4666 = vmatprep.subr.bf16.mxu1 %v11733_v56 }
 0x2f1   : > { %v2533_v32 = vadd.f32 %v2532_v41, %v13169_v34  ;;  %v2799_v16 = vmax.f32 %v2531_v14, 0.0  ;;  %5061 = vmatprep.subr.bf16.mxu0 %v11736_v63  ;;  %4667 = vmatpush1.bf16.msra.mxu1 %v11731_v9 }
 0x2f2   : > { %v2536_v35 = vpop.f32.mrf.mxu0  ;;  %4668 = vmatprep.subr.bf16.mxu1 %v11739_v26 }
 0x2f3   : > { %v2800_v62 = vmax.f32 %v2533_v32, 0.0  ;;  %v2909_v15 = vpack.c.bf16 %v2799_v16, %v2797_v59  ;;  %v2537_v33 = vadd.f32 %v2536_v35, %v13174_v7 }
 0x2f4   : > { %v2538_v8 = vpop.f32.mrf.mxu0 }
 0x2f5   : > { %v2910_v55 = vpack.c.bf16 %v2800_v62, %v2798_v44  ;;  %v2539_v40 = vadd.f32 %v2538_v8, %v13169_v34  ;;  %v2801_v12 = vmax.f32 %v2537_v33, 0.0  ;;  %4669 = vmatpush1.bf16.msra.mxu1 %v11737_v5 }
 0x2f6   : > { %v2540_v61 = vpop.f32.mrf.mxu0 }
 0x2f7   : > { %v2541_v37 = vadd.f32 %v2540_v61, %v13174_v7  ;;  %3275 = vmatprep.mubr.bf16.mxu1 %v2910_v55  ;;  %v2802_v52 = vmax.f32 %v2539_v40, 0.0 }
 0x2f8   : > { %v2542_v19 = vpop.f32.mrf.mxu0  ;;  %3276 = vmatmul.mubr.bf16.gmra.mxu1 %v2909_v15 }
 0x2f9   : > { %v2543_v42 = vadd.f32 %v2542_v19, %v13169_v34  ;;  %v2803_v60 = vmax.f32 %v2541_v37, 0.0 }
 0x2fa   : > { %v2546_v38 = vpop.f32.mrf.mxu0 }
 0x2fb   : > { %v2804_v3 = vmax.f32 %v2543_v42, 0.0  ;;  %v2911_v11 = vpack.c.bf16 %v2803_v60, %v2801_v12  ;;  %v2547_v25 = vadd.f32 %v2546_v38, %v13174_v7 }
 0x2fc   : > { %v2548_v50 = vpop.f32.mrf.mxu0 }
 0x2fd   : > { %v2912_v20 = vpack.c.bf16 %v2804_v3, %v2802_v52  ;;  %v2549_v29 = vadd.f32 %v2548_v50, %v13169_v34  ;;  %v2805_v45 = vmax.f32 %v2547_v25, 0.0 }
 0x2fe   : > { %v2550_v30 = vpop.f32.mrf.mxu0 }
 0x2ff   : > { %v2551_v18 = vadd.f32 %v2550_v30, %v13174_v7  ;;  %3285 = vmatprep.mubr.bf16.mxu1 %v2912_v20  ;;  %v2806_v53 = vmax.f32 %v2549_v29, 0.0 }
 0x300   : > { %v2552_v4 = vpop.f32.mrf.mxu0  ;;  %3286 = vmatmul.mubr.bf16.gmra.mxu1 %v2911_v11 }
 0x301   : > { %v2553_v36 = vadd.f32 %v2552_v4, %v13169_v34  ;;  %v2807_v46 = vmax.f32 %v2551_v18, 0.0 }
 0x302   : > { %v2556_v43 = vpop.f32.mrf.mxu0 }
 0x303   : > { %v2808_v21 = vmax.f32 %v2553_v36, 0.0  ;;  %v2913_v49 = vpack.c.bf16 %v2807_v46, %v2805_v45  ;;  %v2557_v17 = vadd.f32 %v2556_v43, %v13174_v7 }
 0x304   : > { %v2558_v28 = vpop.f32.mrf.mxu0 }
 0x305   : > { %v2914_v58 = vpack.c.bf16 %v2808_v21, %v2806_v53  ;;  %v2559_v48 = vadd.f32 %v2558_v28, %v13169_v34  ;;  %v2809_v13 = vmax.f32 %v2557_v17, 0.0 }
 0x306   : > { %v2560_v27 = vpop.f32.mrf.mxu0 }
 0x307   : > { %v2561_v10 = vadd.f32 %v2560_v27, %v13174_v7  ;;  %3295 = vmatprep.mubr.bf16.mxu1 %v2914_v58  ;;  %v2810_v1 = vmax.f32 %v2559_v48, 0.0 }
 0x308   : > { %v2562_v0 = vpop.f32.mrf.mxu0  ;;  %3296 = vmatmul.mubr.bf16.gmra.mxu1 %v2913_v49 }
 0x309   : > { %v2563_v54 = vadd.f32 %v2562_v0, %v13169_v34  ;;  %v2811_v47 = vmax.f32 %v2561_v10, 0.0 }
 0x30a   : > { %v2566_v6 = vpop.f32.mrf.mxu0 }
 0x30b   : > { %v2812_v22 = vmax.f32 %v2563_v54, 0.0  ;;  %v2915_v24 = vpack.c.bf16 %v2811_v47, %v2809_v13  ;;  %v2567_v35 = vadd.f32 %v2566_v6, %v13174_v7  ;;  %v11740_v13 = vld [vmem:[%s17295_s5 + $0x420] ss:$8 sps:$4 sm:$0xff]  }
 0x30c   : > { %v2568_v23 = vpop.f32.mrf.mxu0 }
 0x30d   : > { %v2916_v14 = vpack.c.bf16 %v2812_v22, %v2810_v1  ;;  %v2569_v32 = vadd.f32 %v2568_v23, %v13169_v34  ;;  %v2813_v61 = vmax.f32 %v2567_v35, 0.0  ;;  %v11742_v23 = vld [vmem:[%s17295_s5 + $0x424] ss:$8 sps:$4 sm:$0xff]  }
 0x30e   : > { %v2570_v41 = vpop.f32.mrf.mxu0  ;;  %4670 = vmatprep.subr.bf16.mxu1 %v11742_v23 }
 0x30f   : > { %v2571_v16 = vadd.f32 %v2570_v41, %v13174_v7  ;;  %3305 = vmatprep.mubr.bf16.mxu1 %v2916_v14  ;;  %v2814_v55 = vmax.f32 %v2569_v32, 0.0  ;;  %4671 = vmatpush1.bf16.msra.mxu1 %v11740_v13 }
 0x310   : > { %v2572_v44 = vpop.f32.mrf.mxu0  ;;  %3306 = vmatmul.mubr.bf16.gmra.mxu1 %v2915_v24 }
 0x311   : > { %v2573_v62 = vadd.f32 %v2572_v44, %v13169_v34  ;;  %v2815_v59 = vmax.f32 %v2571_v16, 0.0 }
 0x312   : > { %v2576_v8 = vpop.f32.mrf.mxu0 }
 0x313   : > { %v2816_v15 = vmax.f32 %v2573_v62, 0.0  ;;  %v2917_v33 = vpack.c.bf16 %v2815_v59, %v2813_v61  ;;  %v2577_v38 = vadd.f32 %v2576_v8, %v13174_v7 }
 0x314   : > { %v2578_v40 = vpop.f32.mrf.mxu0 }
 0x315   : > { %v2918_v37 = vpack.c.bf16 %v2816_v15, %v2814_v55  ;;  %v2579_v42 = vadd.f32 %v2578_v40, %v13169_v34  ;;  %v2817_v20 = vmax.f32 %v2577_v38, 0.0 }
 0x316   : > { %v2580_v19 = vpop.f32.mrf.mxu0 }
 0x317   : > { %v2581_v60 = vadd.f32 %v2580_v19, %v13174_v7  ;;  %3315 = vmatprep.mubr.bf16.mxu1 %v2918_v37  ;;  %v2818_v12 = vmax.f32 %v2579_v42, 0.0 }
 0x318   : > { %v2582_v52 = vpop.f32.mrf.mxu0  ;;  %3316 = vmatmul.mubr.bf16.gmra.mxu1 %v2917_v33 }
 0x319   : > { %v2583_v3 = vadd.f32 %v2582_v52, %v13169_v34  ;;  %v2819_v51 = vmax.f32 %v2581_v60, 0.0 }
 0x31a   : > { %v2586_v57 = vpop.f32.mrf.mxu0 }
 0x31b   : > { %v2820_v50 = vmax.f32 %v2583_v3, 0.0  ;;  %v2919_v29 = vpack.c.bf16 %v2819_v51, %v2817_v20  ;;  %v2587_v36 = vadd.f32 %v2586_v57, %v13174_v7  ;;  %v11743_v57 = vld [vmem:[%s17295_s5 + $0x410] ss:$8 sps:$4 sm:$0xff]  }
 0x31c   : > { %v2588_v11 = vpop.f32.mrf.mxu0 }
 0x31d   : > { %v2920_v30 = vpack.c.bf16 %v2820_v50, %v2818_v12  ;;  %v2589_v25 = vadd.f32 %v2588_v11, %v13169_v34  ;;  %v2821_v58 = vmax.f32 %v2587_v36, 0.0  ;;  %v11745_v12 = vld [vmem:[%s17295_s5 + $0x414] ss:$8 sps:$4 sm:$0xff]  }
 0x31e   : > { %v2590_v18 = vpop.f32.mrf.mxu0  ;;  %4672 = vmatprep.subr.bf16.mxu1 %v11745_v12  ;;  %v11752_v12 = vld [vmem:[%s17295_s5 + $0x4f0] ss:$8 sps:$4 sm:$0xff]  }
 0x31f   : > { %v2591_v4 = vadd.f32 %v2590_v18, %v13174_v7  ;;  %3325 = vmatprep.mubr.bf16.mxu1 %v2920_v30  ;;  %v2822_v45 = vmax.f32 %v2589_v25, 0.0  ;;  %4673 = vmatpush1.bf16.msra.mxu1 %v11743_v57 }
 0x320   : > { %v2592_v46 = vpop.f32.mrf.mxu0  ;;  %3326 = vmatmul.mubr.bf16.gmra.mxu1 %v2919_v29 }
 0x321   : > { %v2593_v43 = vadd.f32 %v2592_v46, %v13169_v34  ;;  %v2823_v53 = vmax.f32 %v2591_v4, 0.0 }
 0x322   : > { %v2596_v21 = vpop.f32.mrf.mxu0 }
 0x323   : > { %v2824_v28 = vmax.f32 %v2593_v43, 0.0  ;;  %v2921_v48 = vpack.c.bf16 %v2823_v53, %v2821_v58  ;;  %v2597_v54 = vadd.f32 %v2596_v21, %v13174_v7 }
 0x324   : > { %v2598_v49 = vpop.f32.mrf.mxu0 }
 0x325   : > { %v2922_v27 = vpack.c.bf16 %v2824_v28, %v2822_v45  ;;  %v2599_v17 = vadd.f32 %v2598_v49, %v13169_v34  ;;  %v2825_v63 = vmax.f32 %v2597_v54, 0.0 }
 0x326   : > { %v2600_v10 = vpop.f32.mrf.mxu0 }
 0x327   : > { %v2601_v0 = vadd.f32 %v2600_v10, %v13174_v7  ;;  %3335 = vmatprep.mubr.bf16.mxu1 %v2922_v27  ;;  %v2826_v9 = vmax.f32 %v2599_v17, 0.0 }
 0x328   : > { %v2602_v47 = vpop.f32.mrf.mxu0  ;;  %3336 = vmatmul.mubr.bf16.gmra.mxu1 %v2921_v48 }
 0x329   : > { %v2603_v6 = vadd.f32 %v2602_v47, %v13169_v34  ;;  %v2827_v1 = vmax.f32 %v2601_v0, 0.0 }
 0x32a   : > { %v2606_v22 = vpop.f32.mrf.mxu0 }
 0x32b   : > { %v2828_v56 = vmax.f32 %v2603_v6, 0.0  ;;  %v2923_v41 = vpack.c.bf16 %v2827_v1, %v2825_v63  ;;  %v2607_v44 = vadd.f32 %v2606_v22, %v13174_v7  ;;  %v11746_v22 = vld [vmem:[%s17295_s5 + $0x400] ss:$8 sps:$4 sm:$0xff]  }
 0x32c   : > { %v2608_v14 = vpop.f32.mrf.mxu0 }
 0x32d   : > { %v2924_v24 = vpack.c.bf16 %v2828_v56, %v2826_v9  ;;  %v2609_v16 = vadd.f32 %v2608_v14, %v13169_v34  ;;  %v2829_v40 = vmax.f32 %v2607_v44, 0.0  ;;  %v11748_v9 = vld [vmem:[%s17295_s5 + $0x404] ss:$8 sps:$4 sm:$0xff]  }
 0x32e   : > { %v2610_v32 = vpop.f32.mrf.mxu0  ;;  %4674 = vmatprep.subr.bf16.mxu1 %v11748_v9  ;;  %v11755_v9 = vld [vmem:[%s17295_s5 + $0x4e0] ss:$8 sps:$4 sm:$0xff]  }
 0x32f   : > { %v2611_v35 = vadd.f32 %v2610_v32, %v13174_v7  ;;  %3345 = vmatprep.mubr.bf16.mxu1 %v2924_v24  ;;  %v2830_v15 = vmax.f32 %v2609_v16, 0.0  ;;  %4675 = vmatpush1.bf16.msra.mxu1 %v11746_v22 }
 0x330   : > { %v2612_v62 = vpop.f32.mrf.mxu0  ;;  %3346 = vmatmul.mubr.bf16.gmra.mxu1 %v2923_v41 }
 0x331   : > { %v2613_v59 = vadd.f32 %v2612_v62, %v13169_v34  ;;  %v2831_v8 = vmax.f32 %v2611_v35, 0.0 }
 0x332   : > { %v2616_v55 = vpop.f32.mrf.mxu0 }
 0x333   : > { %v2832_v61 = vmax.f32 %v2613_v59, 0.0  ;;  %v2925_v19 = vpack.c.bf16 %v2831_v8, %v2829_v40  ;;  %v2617_v52 = vadd.f32 %v2616_v55, %v13174_v7 }
 0x334   : > { %v2618_v37 = vpop.f32.mrf.mxu0 }
 0x335   : > { %v2926_v33 = vpack.c.bf16 %v2832_v61, %v2830_v15  ;;  %v2619_v60 = vadd.f32 %v2618_v37, %v13169_v34  ;;  %v2833_v11 = vmax.f32 %v2617_v52, 0.0 }
 0x336   : > { %v2620_v42 = vpop.f32.mrf.mxu0 }
 0x337   : > { %v2621_v38 = vadd.f32 %v2620_v42, %v13174_v7  ;;  %3355 = vmatprep.mubr.bf16.mxu1 %v2926_v33  ;;  %v2834_v26 = vmax.f32 %v2619_v60, 0.0 }
 0x338   : > { %v2622_v3 = vpop.f32.mrf.mxu0  ;;  %3356 = vmatmul.mubr.bf16.gmra.mxu1 %v2925_v19 }
 0x339   : > { %v2623_v51 = vadd.f32 %v2622_v3, %v13169_v34  ;;  %v2835_v50 = vmax.f32 %v2621_v38, 0.0 }
 0x33a   : > { %v2626_v5 = vpop.f32.mrf.mxu0 }
 0x33b   : > { %v2836_v20 = vmax.f32 %v2623_v51, 0.0  ;;  %v2927_v18 = vpack.c.bf16 %v2835_v50, %v2833_v11  ;;  %v2627_v46 = vadd.f32 %v2626_v5, %v13174_v7  ;;  %v11754_v50 = vld [vmem:[%s17295_s5 + $0x4f4] ss:$8 sps:$4 sm:$0xff]  }
 0x33c   : > { %v2628_v30 = vpop.f32.mrf.mxu0  ;;  %4676 = vmatprep.subr.bf16.mxu1 %v11754_v50 }
 0x33d   : > { %v2928_v29 = vpack.c.bf16 %v2836_v20, %v2834_v26  ;;  %v2629_v4 = vadd.f32 %v2628_v30, %v13169_v34  ;;  %v2837_v49 = vmax.f32 %v2627_v46, 0.0  ;;  %4677 = vmatpush2.bf16.msra.mxu1 %v11752_v12 }
 0x33e   : > { %v2630_v25 = vpop.f32.mrf.mxu0 }
 0x33f   : > { %v2631_v36 = vadd.f32 %v2630_v25, %v13174_v7  ;;  %3365 = vmatprep.mubr.bf16.mxu1 %v2928_v29  ;;  %v2838_v28 = vmax.f32 %v2629_v4, 0.0 }
 0x340   : > { %v2632_v43 = vpop.f32.mrf.mxu0  ;;  %3366 = vmatmul.mubr.bf16.gmra.mxu1 %v2927_v18 }
 0x341   : > { %v2633_v53 = vadd.f32 %v2632_v43, %v13169_v34  ;;  %v2839_v21 = vmax.f32 %v2631_v36, 0.0 }
 0x342   : > { %v2636_v45 = vpop.f32.mrf.mxu0 }
 0x343   : > { %v2840_v58 = vmax.f32 %v2633_v53, 0.0  ;;  %v2929_v10 = vpack.c.bf16 %v2839_v21, %v2837_v49  ;;  %v2637_v47 = vadd.f32 %v2636_v45, %v13174_v7 }
 0x344   : > { %v2638_v27 = vpop.f32.mrf.mxu0 }
 0x345   : > { %v2930_v48 = vpack.c.bf16 %v2840_v58, %v2838_v28  ;;  %v2639_v0 = vadd.f32 %v2638_v27, %v13169_v34  ;;  %v2841_v14 = vmax.f32 %v2637_v47, 0.0 }
 0x346   : > { %v2640_v17 = vpop.f32.mrf.mxu0 }
 0x347   : > { %v2641_v54 = vadd.f32 %v2640_v17, %v13174_v7  ;;  %3375 = vmatprep.mubr.bf16.mxu1 %v2930_v48  ;;  %v2842_v23 = vmax.f32 %v2639_v0, 0.0 }
 0x348   : > { %v2642_v6 = vpop.f32.mrf.mxu0  ;;  %3376 = vmatmul.mubr.bf16.gmra.mxu1 %v2929_v10 }
 0x349   : > { %v2643_v1 = vadd.f32 %v2642_v6, %v13169_v34  ;;  %v2843_v56 = vmax.f32 %v2641_v54, 0.0 }
 0x34a   : > { %v2646_v13 = vpop.f32.mrf.mxu0 }
 0x34b   : > { %v2844_v63 = vmax.f32 %v2643_v1, 0.0  ;;  %v2931_v32 = vpack.c.bf16 %v2843_v56, %v2841_v14  ;;  %v2647_v62 = vadd.f32 %v2646_v13, %v13174_v7  ;;  %v11757_v56 = vld [vmem:[%s17295_s5 + $0x4e4] ss:$8 sps:$4 sm:$0xff]  }
 0x34c   : > { %v2648_v24 = vpop.f32.mrf.mxu0  ;;  %4678 = vmatprep.subr.bf16.mxu1 %v11757_v56 }
 0x34d   : > { %v2932_v41 = vpack.c.bf16 %v2844_v63, %v2842_v23  ;;  %v2649_v35 = vadd.f32 %v2648_v24, %v13169_v34  ;;  %v2845_v37 = vmax.f32 %v2647_v62, 0.0  ;;  %4679 = vmatpush2.bf16.msra.mxu1 %v11755_v9 }
 0x34e   : > { %v2650_v16 = vpop.f32.mrf.mxu0 }
 0x34f   : > { %v2651_v44 = vadd.f32 %v2650_v16, %v13174_v7  ;;  %3385 = vmatprep.mubr.bf16.mxu1 %v2932_v41  ;;  %v2846_v61 = vmax.f32 %v2649_v35, 0.0 }
 0x350   : > { %v2652_v59 = vpop.f32.mrf.mxu0  ;;  %3386 = vmatmul.mubr.bf16.gmra.mxu1 %v2931_v32 }
 0x351   : > { %v2653_v8 = vadd.f32 %v2652_v59, %v13169_v34  ;;  %v2847_v55 = vmax.f32 %v2651_v44, 0.0 }
 0x352   : > { %v2656_v15 = vpop.f32.mrf.mxu0 }
 0x353   : > { %v2848_v40 = vmax.f32 %v2653_v8, 0.0  ;;  %v2933_v42 = vpack.c.bf16 %v2847_v55, %v2845_v37  ;;  %v2657_v3 = vadd.f32 %v2656_v15, %v13174_v7 }
 0x354   : > { %v2658_v33 = vpop.f32.mrf.mxu0 }
 0x355   : > { %v2934_v19 = vpack.c.bf16 %v2848_v40, %v2846_v61  ;;  %v2659_v38 = vadd.f32 %v2658_v33, %v13169_v34  ;;  %v2849_v30 = vmax.f32 %v2657_v3, 0.0 }
 0x356   : > { %v2660_v60 = vpop.f32.mrf.mxu0 }
 0x357   : > { %v2661_v52 = vadd.f32 %v2660_v60, %v13174_v7  ;;  %3395 = vmatprep.mubr.bf16.mxu1 %v2934_v19  ;;  %v2850_v20 = vmax.f32 %v2659_v38, 0.0 }
 0x358   : > { %v2662_v51 = vpop.f32.mrf.mxu0  ;;  %3396 = vmatmul.mubr.bf16.gmra.mxu1 %v2933_v42 }
 0x359   : > { %v2663_v57 = vadd.f32 %v2662_v51, %v13169_v34  ;;  %v2851_v5 = vmax.f32 %v2661_v52, 0.0  ;;  %v10853_v52 = vld [vmem:[%s17296_s6 + $0x2] ss:$8 sm:$0x3] }
 0x35a   : > { %v2666_v26 = vpop.f32.mrf.mxu0 }
 0x35b   : > { %v2852_v11 = vmax.f32 %v2663_v57, 0.0  ;;  %v2935_v25 = vpack.c.bf16 %v2851_v5, %v2849_v30  ;;  %v2667_v43 = vadd.f32 %v2666_v26, %v13174_v7  ;;  %v13432_v5 = vrot.slane %v10853_v52, %v12357_v31  ;;  %v11758_v30 = vld [vmem:[%s17295_s5 + $0x4d0] ss:$8 sps:$4 sm:$0xff]  }
 0x35c   : > { %v2668_v29 = vpop.f32.mrf.mxu0 }
 0x35d   : > { %v2936_v18 = vpack.c.bf16 %v2852_v11, %v2850_v20  ;;  %v2669_v36 = vadd.f32 %v2668_v29, %v13169_v34  ;;  %v2853_v27 = vmax.f32 %v2667_v43, 0.0  ;;  %v13436_v20 = vrot.slane %v10853_v52, %v12374_v39  ;;  %v11760_v29 = vld [vmem:[%s17295_s5 + $0x4d4] ss:$8 sps:$4 sm:$0xff]  }
 0x35e   : > { %v2670_v4 = vpop.f32.mrf.mxu0  ;;  %4680 = vmatprep.subr.bf16.mxu1 %v11760_v29 }
 0x35f   : > { %v2671_v46 = vadd.f32 %v2670_v4, %v13174_v7  ;;  %3405 = vmatprep.mubr.bf16.mxu1 %v2936_v18  ;;  %v2854_v58 = vmax.f32 %v2669_v36, 0.0  ;;  %4681 = vmatpush2.bf16.msra.mxu1 %v11758_v30 }
 0x360   : > { %v2672_v53 = vpop.f32.mrf.mxu0  ;;  %3406 = vmatmul.mubr.bf16.gmra.mxu1 %v2935_v25 }
 0x361   : > { %v2673_v21 = vadd.f32 %v2672_v53, %v13169_v34  ;;  %v2855_v45 = vmax.f32 %v2671_v46, 0.0 }
 0x362   : > { %v2676_v28 = vpop.f32.mrf.mxu0 }
 0x363   : > { %v2856_v49 = vmax.f32 %v2673_v21, 0.0  ;;  %v2937_v17 = vpack.c.bf16 %v2855_v45, %v2853_v27  ;;  %v2677_v6 = vadd.f32 %v2676_v28, %v13174_v7 }
 0x364   : > { %v2678_v48 = vpop.f32.mrf.mxu0 }
 0x365   : > { %v2938_v10 = vpack.c.bf16 %v2856_v49, %v2854_v58  ;;  %v2679_v54 = vadd.f32 %v2678_v48, %v13169_v34  ;;  %v2857_v24 = vmax.f32 %v2677_v6, 0.0 }
 0x366   : > { %v2680_v0 = vpop.f32.mrf.mxu0 }
 0x367   : > { %v2681_v47 = vadd.f32 %v2680_v0, %v13174_v7  ;;  %3415 = vmatprep.mubr.bf16.mxu1 %v2938_v10  ;;  %v2858_v63 = vmax.f32 %v2679_v54, 0.0 }
 0x368   : > { %v2682_v1 = vpop.f32.mrf.mxu0  ;;  %3416 = vmatmul.mubr.bf16.gmra.mxu1 %v2937_v17 }
 0x369   : > { %v2683_v22 = vadd.f32 %v2682_v1, %v13169_v34  ;;  %v2859_v13 = vmax.f32 %v2681_v47, 0.0 }
 0x36a   : > { %v2686_v23 = vpop.f32.mrf.mxu0 }
 0x36b   : > { %v2860_v14 = vmax.f32 %v2683_v22, 0.0  ;;  %v2939_v16 = vpack.c.bf16 %v2859_v13, %v2857_v24  ;;  %v2687_v59 = vadd.f32 %v2686_v23, %v13174_v7 }
 0x36c   : > { %v2688_v41 = vpop.f32.mrf.mxu0 }
 0x36d   : > { %v2940_v32 = vpack.c.bf16 %v2860_v14, %v2858_v63  ;;  %v2689_v44 = vadd.f32 %v2688_v41, %v13169_v34  ;;  %v2861_v33 = vmax.f32 %v2687_v59, 0.0  ;;  %v11734_v41 = vld [vmem:[%s17294_s4 + $0x30] ss:$8 sps:$4 sm:$0xff]  }
 0x36e   : > { %v2690_v35 = vpop.f32.mrf.mxu0 }
 0x36f   : > { %v2691_v62 = vadd.f32 %v2690_v35, %v13174_v7  ;;  %3425 = vmatprep.mubr.bf16.mxu1 %v2940_v32  ;;  %v2862_v40 = vmax.f32 %v2689_v44, 0.0 }
 0x370   : > { %v2692_v8 = vpop.f32.mrf.mxu0  ;;  %3426 = vmatmul.mubr.bf16.gmra.mxu1 %v2939_v16 }
 0x371   : > { %v2693_v55 = vadd.f32 %v2692_v8, %v13169_v34  ;;  %v2863_v15 = vmax.f32 %v2691_v62, 0.0  ;;  %v11751_v62 = vld [vmem:[%s17294_s4 + $0x24] ss:$8 sps:$4 sm:$0xff]  }
 0x372   : > { %v2696_v61 = vpop.f32.mrf.mxu0 }
 0x373   : > { %v2864_v37 = vmax.f32 %v2693_v55, 0.0  ;;  %v2941_v60 = vpack.c.bf16 %v2863_v15, %v2861_v33  ;;  %v2697_v12 = vadd.f32 %v2696_v61, %v13174_v7 }
 0x374   : > { %v2698_v19 = vpop.f32.mrf.mxu0 }
 0x375   : > { %v2942_v42 = vpack.c.bf16 %v2864_v37, %v2862_v40  ;;  %v2699_v3 = vadd.f32 %v2698_v19, %v13169_v34  ;;  %v2865_v43 = vmax.f32 %v2697_v12, 0.0 }
 0x376   : > { %v2700_v38 = vpop.f32.mrf.mxu0 }
 0x377   : > { %v2701_v51 = vadd.f32 %v2700_v38, %v13174_v7  ;;  %3435 = vmatprep.mubr.bf16.mxu1 %v2942_v42  ;;  %v2866_v4 = vmax.f32 %v2699_v3, 0.0 }
 0x378   : > { %v3197_v57 = vpop.f32.mrf.mxu1  ;;  %v2702_v50 = vpop.f32.mrf.mxu0  ;;  %3436 = vmatmul.mubr.bf16.gmra.mxu1 %v2941_v60  ;;  %v11749_v60 = vld [vmem:[%s17294_s4 + $0x20] ss:$8 sps:$4 sm:$0xff]  }
 0x379   : > { %v2703_v26 = vadd.f32 %v2702_v50, %v13169_v34  ;;  %v2867_v18 = vmax.f32 %v2701_v51, 0.0  ;;  %v3198_v28 = vadd.f32 %v3197_v57, %v13436_v20 }
 0x37a   : > { %v3199_v11 = vpop.f32.mrf.mxu1  ;;  %v2706_v25 = vpop.f32.mrf.mxu0 }
 0x37b   : > { %v2868_v36 = vmax.f32 %v2703_v26, 0.0  ;;  %v3200_v53 = vadd.f32 %v3199_v11, %v13432_v5  ;;  %v2943_v27 = vpack.c.bf16 %v2867_v18, %v2865_v43  ;;  %v2707_v6 = vadd.f32 %v2706_v25, %v13174_v7  ;;  %v11761_v18 = vld [vmem:[%s17295_s5 + $0x4c0] ss:$8 sps:$4 sm:$0xff]   ;;  %v11763_v25 = vld [vmem:[%s17295_s5 + $0x4c4] ss:$8 sps:$4 sm:$0xff]  }
 0x37c   : > { %v3201_v46 = vpop.f32.mrf.mxu1  ;;  %v2708_v21 = vpop.f32.mrf.mxu0  ;;  %v3516_v56 = vmax.f32 %v3198_v28, 0.0  ;;  %v11764_v43 = vld [vmem:[%s17294_s4 + $0x10] ss:$8 sps:$4 sm:$0xff]   ;;  %4682 = vmatprep.subr.bf16.mxu1 %v11763_v25 }
 0x37d   : > { %v3202_v45 = vadd.f32 %v3201_v46, %v13436_v20  ;;  %v2944_v49 = vpack.c.bf16 %v2868_v36, %v2866_v4  ;;  %v2709_v17 = vadd.f32 %v2708_v21, %v13169_v34  ;;  %v3517_v1 = vmax.f32 %v3200_v53, 0.0  ;;  %v11766_v53 = vld [vmem:[%s17294_s4 + $0x14] ss:$8 sps:$4 sm:$0xff]   ;;  %4683 = vmatpush2.bf16.msra.mxu1 %v11761_v18 }
 0x37e   : > { %v3203_v58 = vpop.f32.mrf.mxu1  ;;  %v2710_v48 = vpop.f32.mrf.mxu0  ;;  %v2869_v59 = vmax.f32 %v2707_v6, 0.0 }
 0x37f   : > { %v3204_v10 = vadd.f32 %v3203_v58, %v13432_v5  ;;  %v3518_v0 = vmax.f32 %v3202_v45, 0.0  ;;  %v2711_v54 = vadd.f32 %v2710_v48, %v13174_v7  ;;  %3445 = vmatprep.mubr.bf16.mxu1 %v2944_v49  ;;  %v2870_v32 = vmax.f32 %v2709_v17, 0.0 }
 0x380   : > { %v3207_v47 = vpop.f32.mrf.mxu1  ;;  %v2712_v9 = vpop.f32.mrf.mxu0  ;;  %3446 = vmatmul.mubr.bf16.gmra.mxu1 %v2943_v27 }
 0x381   : > { %v3519_v22 = vmax.f32 %v3204_v10, 0.0  ;;  %v2713_v13 = vadd.f32 %v2712_v9, %v13169_v34  ;;  %v2871_v63 = vmax.f32 %v2711_v54, 0.0  ;;  %v3644_v16 = vpack.c.bf16 %v3518_v0, %v3516_v56 }
 0x382   : > { %v3209_v23 = vpop.f32.mrf.mxu1  ;;  %v2716_v14 = vpop.f32.mrf.mxu0  ;;  %v3208_v61 = vadd.f32 %v3207_v47, %v13436_v20 }
 0x383   : > { %v3645_v24 = vpack.c.bf16 %v3519_v22, %v3517_v1  ;;  %v2872_v35 = vmax.f32 %v2713_v13, 0.0  ;;  %v3210_v8 = vadd.f32 %v3209_v23, %v13432_v5  ;;  %v2945_v33 = vpack.c.bf16 %v2871_v63, %v2869_v59 }
 0x384   : > { %v3211_v44 = vpop.f32.mrf.mxu1  ;;  %v2718_v55 = vpop.f32.mrf.mxu0  ;;  %v2717_v57 = vadd.f32 %v2716_v14, %v13174_v7  ;;  %v3520_v11 = vmax.f32 %v3208_v61, 0.0 }
 0x385   : > { %v3212_v15 = vadd.f32 %v3211_v44, %v13436_v20  ;;  %3946 = vmatprep.mubr.bf16.mxu0 %v3645_v24  ;;  %v2946_v37 = vpack.c.bf16 %v2872_v35, %v2870_v32  ;;  %v2719_v38 = vadd.f32 %v2718_v55, %v13169_v34  ;;  %v3521_v12 = vmax.f32 %v3210_v8, 0.0 }
 0x386   : > { %v3213_v40 = vpop.f32.mrf.mxu1  ;;  %3947 = vmatmul.mubr.bf16.vlgmr.msra.gmra.mxu0 %v3644_v16  ;;  %v2720_v19 = vpop.f32.mrf.mxu0  ;;  %v2873_v49 = vmax.f32 %v2717_v57, 0.0 }
 0x387   : > { %v3214_v42 = vadd.f32 %v3213_v40, %v13432_v5  ;;  %5062 = vmatpush1.bf16.msra.mxu0 %v11734_v41  ;;  %v3522_v52 = vmax.f32 %v3212_v15, 0.0  ;;  %v2721_v3 = vadd.f32 %v2720_v19, %v13174_v7  ;;  %3455 = vmatprep.mubr.bf16.mxu1 %v2946_v37  ;;  %v2874_v21 = vmax.f32 %v2719_v38, 0.0 }
 0x388   : > { %v3217_v51 = vpop.f32.mrf.mxu1  ;;  %5063 = vmatprep.subr.bf16.mxu0 %v11751_v62  ;;  %v2722_v26 = vpop.f32.mrf.mxu0  ;;  %3456 = vmatmul.mubr.bf16.gmra.mxu1 %v2945_v33 }
 0x389   : > { %v3523_v50 = vmax.f32 %v3214_v42, 0.0  ;;  %v2723_v30 = vadd.f32 %v2722_v26, %v13169_v34  ;;  %v2875_v4 = vmax.f32 %v2721_v3, 0.0  ;;  %v3646_v45 = vpack.c.bf16 %v3522_v52, %v3520_v11 }
 0x38a   : > { %v3219_v29 = vpop.f32.mrf.mxu1  ;;  %v2726_v36 = vpop.f32.mrf.mxu0  ;;  %v3218_v17 = vadd.f32 %v3217_v51, %v13436_v20 }
 0x38b   : > { %v3647_v46 = vpack.c.bf16 %v3523_v50, %v3521_v12  ;;  %5064 = vmatpush1.bf16.msra.mxu0 %v11749_v60  ;;  %v2876_v28 = vmax.f32 %v2723_v30, 0.0  ;;  %v3220_v27 = vadd.f32 %v3219_v29, %v13432_v5  ;;  %v2947_v47 = vpack.c.bf16 %v2875_v4, %v2873_v49 }
 0x38c   : > { %v3221_v58 = vpop.f32.mrf.mxu1  ;;  %v2728_v48 = vpop.f32.mrf.mxu0  ;;  %5065 = vmatprep.subr.bf16.mxu0 %v11766_v53  ;;  %v2727_v23 = vadd.f32 %v2726_v36, %v13174_v7  ;;  %v3524_v41 = vmax.f32 %v3218_v17, 0.0  ;;  %v11767_v36 = vld [vmem:[%s17295_s5 + $0x4b0] ss:$8 sps:$4 sm:$0xff]  }
 0x38d   : > { %v3222_v10 = vadd.f32 %v3221_v58, %v13436_v20  ;;  %3956 = vmatprep.mubr.bf16.mxu0 %v3647_v46  ;;  %v2948_v54 = vpack.c.bf16 %v2876_v28, %v2874_v21  ;;  %v2729_v22 = vadd.f32 %v2728_v48, %v13169_v34  ;;  %v3525_v63 = vmax.f32 %v3220_v27, 0.0  ;;  %v11769_v46 = vld [vmem:[%s17295_s5 + $0x4b4] ss:$8 sps:$4 sm:$0xff]  }
 0x38e   : > { %v3223_v0 = vpop.f32.mrf.mxu1  ;;  %3957 = vmatmul.mubr.bf16.gmra.mxu0 %v3646_v45  ;;  %v2730_v6 = vpop.f32.mrf.mxu0  ;;  %v2877_v61 = vmax.f32 %v2727_v23, 0.0  ;;  %4684 = vmatprep.subr.bf16.mxu1 %v11769_v46 }
 0x38f   : > { %v3224_v1 = vadd.f32 %v3223_v0, %v13432_v5  ;;  %5066 = vmatpush1.bf16.msra.mxu0 %v11764_v43  ;;  %v3526_v9 = vmax.f32 %v3222_v10, 0.0  ;;  %v2731_v56 = vadd.f32 %v2730_v6, %v13174_v7  ;;  %3465 = vmatprep.mubr.bf16.mxu1 %v2948_v54  ;;  %v2878_v59 = vmax.f32 %v2729_v22, 0.0 }
 0x390   : > { %v3227_v13 = vpop.f32.mrf.mxu1  ;;  %v2732_v24 = vpop.f32.mrf.mxu0  ;;  %3466 = vmatmul.mubr.bf16.gmra.mxu1 %v2947_v47 }
 0x391   : > { %v3527_v14 = vmax.f32 %v3224_v1, 0.0  ;;  %v2733_v32 = vadd.f32 %v2732_v24, %v13169_v34  ;;  %v2879_v35 = vmax.f32 %v2731_v56, 0.0  ;;  %v3648_v8 = vpack.c.bf16 %v3526_v9, %v3524_v41  ;;  %4685 = vmatpush2.bf16.msra.mxu1 %v11767_v36  ;;  %v11772_v36 = vld [vmem:[%s17295_s5 + $0x4a4] ss:$8 sps:$4 sm:$0xff]  }
 0x392   : > { %v3229_v16 = vpop.f32.mrf.mxu1  ;;  %v2736_v44 = vpop.f32.mrf.mxu0  ;;  %v3228_v19 = vadd.f32 %v3227_v13, %v13436_v20  ;;  %4686 = vmatprep.subr.bf16.mxu1 %v11772_v36 }
 0x393   : > { %v3649_v62 = vpack.c.bf16 %v3527_v14, %v3525_v63  ;;  %v2880_v55 = vmax.f32 %v2733_v32, 0.0  ;;  %v3230_v40 = vadd.f32 %v3229_v16, %v13432_v5  ;;  %v2949_v38 = vpack.c.bf16 %v2879_v35, %v2877_v61 }
 0x394   : > { %v3231_v15 = vpop.f32.mrf.mxu1  ;;  %v2738_v37 = vpop.f32.mrf.mxu0  ;;  %v2737_v26 = vadd.f32 %v2736_v44, %v13174_v7  ;;  %v3528_v18 = vmax.f32 %v3228_v19, 0.0 }
 0x395   : > { %v3232_v33 = vadd.f32 %v3231_v15, %v13436_v20  ;;  %3966 = vmatprep.mubr.bf16.mxu0 %v3649_v62  ;;  %v2950_v60 = vpack.c.bf16 %v2880_v55, %v2878_v59  ;;  %v2739_v51 = vadd.f32 %v2738_v37, %v13169_v34  ;;  %v3529_v11 = vmax.f32 %v3230_v40, 0.0 }
 0x396   : > { %v3233_v42 = vpop.f32.mrf.mxu1  ;;  %3967 = vmatmul.mubr.bf16.gmra.mxu0 %v3648_v8  ;;  %v2740_v52 = vpop.f32.mrf.mxu0  ;;  %v2881_v27 = vmax.f32 %v2737_v26, 0.0 }
 0x397   : > { %v3234_v3 = vadd.f32 %v3233_v42, %v13432_v5  ;;  %v3530_v57 = vmax.f32 %v3232_v33, 0.0  ;;  %v2741_v12 = vadd.f32 %v2740_v52, %v13174_v7  ;;  %3475 = vmatprep.mubr.bf16.mxu1 %v2950_v60  ;;  %v2882_v45 = vmax.f32 %v2739_v51, 0.0 }
 0x398   : > { %v3237_v50 = vpop.f32.mrf.mxu1  ;;  %v2742_v29 = vpop.f32.mrf.mxu0  ;;  %3476 = vmatmul.mubr.bf16.gmra.mxu1 %v2949_v38 }
 0x399   : > { %v3531_v30 = vmax.f32 %v3234_v3, 0.0  ;;  %v2743_v25 = vadd.f32 %v2742_v29, %v13169_v34  ;;  %v2883_v43 = vmax.f32 %v2741_v12, 0.0  ;;  %v3650_v28 = vpack.c.bf16 %v3530_v57, %v3528_v18 }
 0x39a   : > { %v3239_v4 = vpop.f32.mrf.mxu1  ;;  %v2746_v53 = vpop.f32.mrf.mxu0  ;;  %v3238_v0 = vadd.f32 %v3237_v50, %v13436_v20 }
 0x39b   : > { %v3651_v21 = vpack.c.bf16 %v3531_v30, %v3529_v11  ;;  %v2884_v58 = vmax.f32 %v2743_v25, 0.0  ;;  %v3240_v48 = vadd.f32 %v3239_v4, %v13432_v5  ;;  %v2951_v6 = vpack.c.bf16 %v2883_v43, %v2881_v27  ;;  %v11770_v4 = vld [vmem:[%s17295_s5 + $0x4a0] ss:$8 sps:$4 sm:$0xff]  }
 0x39c   : > { %v3241_v49 = vpop.f32.mrf.mxu1  ;;  %v2748_v10 = vpop.f32.mrf.mxu0  ;;  %v2747_v23 = vadd.f32 %v2746_v53, %v13174_v7  ;;  %v3532_v32 = vmax.f32 %v3238_v0, 0.0  ;;  %4687 = vmatpush2.bf16.msra.mxu1 %v11770_v4 }
 0x39d   : > { %v3242_v17 = vadd.f32 %v3241_v49, %v13436_v20  ;;  %3976 = vmatprep.mubr.bf16.mxu0 %v3651_v21  ;;  %v2952_v47 = vpack.c.bf16 %v2884_v58, %v2882_v45  ;;  %v2749_v9 = vadd.f32 %v2748_v10, %v13169_v34  ;;  %v3533_v63 = vmax.f32 %v3240_v48, 0.0 }
 0x39e   : > { %v3243_v54 = vpop.f32.mrf.mxu1  ;;  %3977 = vmatmul.mubr.bf16.gmra.mxu0 %v3650_v28  ;;  %v2750_v1 = vpop.f32.mrf.mxu0  ;;  %v2885_v61 = vmax.f32 %v2747_v23, 0.0 }
 0x39f   : > { %v3244_v22 = vadd.f32 %v3243_v54, %v13432_v5  ;;  %v3534_v56 = vmax.f32 %v3242_v17, 0.0  ;;  %v2751_v13 = vadd.f32 %v2750_v1, %v13174_v7  ;;  %3485 = vmatprep.mubr.bf16.mxu1 %v2952_v47  ;;  %v2886_v8 = vmax.f32 %v2749_v9, 0.0 }
 0x3a0   : > { %v2752_v24 = vpop.f32.mrf.mxu0  ;;  %v3247_v41 = vpop.f32.mrf.mxu1  ;;  %3486 = vmatmul.mubr.bf16.gmra.mxu1 %v2951_v6 }
 0x3a1   : > { %v3535_v14 = vmax.f32 %v3244_v22, 0.0  ;;  %v2753_v16 = vadd.f32 %v2752_v24, %v13169_v34  ;;  %v2887_v35 = vmax.f32 %v2751_v13, 0.0  ;;  %v3652_v55 = vpack.c.bf16 %v3534_v56, %v3532_v32 }
 0x3a2   : > { %v2756_v44 = vpop.f32.mrf.mxu0  ;;  %v3249_v62 = vpop.f32.mrf.mxu1  ;;  %v3248_v38 = vadd.f32 %v3247_v41, %v13436_v20 }
 0x3a3   : > { %v3653_v59 = vpack.c.bf16 %v3535_v14, %v3533_v63  ;;  %v2888_v15 = vmax.f32 %v2753_v16, 0.0  ;;  %v3250_v33 = vadd.f32 %v3249_v62, %v13432_v5  ;;  %v2953_v60 = vpack.c.bf16 %v2887_v35, %v2885_v61 }
 0x3a4   : > { %v2758_v40 = vpop.f32.mrf.mxu0  ;;  %v3251_v37 = vpop.f32.mrf.mxu1  ;;  %v2757_v50 = vadd.f32 %v2756_v44, %v13174_v7  ;;  %v3536_v46 = vmax.f32 %v3248_v38, 0.0 }
 0x3a5   : > { %3986 = vmatprep.mubr.bf16.mxu0 %v3653_v59  ;;  %v3252_v19 = vadd.f32 %v3251_v37, %v13436_v20  ;;  %v2954_v42 = vpack.c.bf16 %v2888_v15, %v2886_v8  ;;  %v2759_v51 = vadd.f32 %v2758_v40, %v13169_v34  ;;  %v3537_v29 = vmax.f32 %v3250_v33, 0.0  ;;  %v11773_v8 = vld [vmem:[%s17295_s5 + $0x490] ss:$8 sps:$4 sm:$0xff]  }
 0x3a6   : > { %3987 = vmatmul.mubr.bf16.gmra.mxu0 %v3652_v55  ;;  %v2760_v52 = vpop.f32.mrf.mxu0  ;;  %v3253_v3 = vpop.f32.mrf.mxu1  ;;  %v2889_v28 = vmax.f32 %v2757_v50, 0.0  ;;  %v11775_v55 = vld [vmem:[%s17295_s5 + $0x494] ss:$8 sps:$4 sm:$0xff]  }
 0x3a7   : > { %v2761_v57 = vadd.f32 %v2760_v52, %v13174_v7  ;;  %v3254_v12 = vadd.f32 %v3253_v3, %v13432_v5  ;;  %3495 = vmatprep.mubr.bf16.mxu1 %v2954_v42  ;;  %v3538_v26 = vmax.f32 %v3252_v19, 0.0  ;;  %v2890_v7 = vmax.f32 %v2759_v51, 0.0  ;;  %4688 = vmatprep.subr.bf16.mxu1 %v11775_v55 }
 0x3a8   : > { %v2762_v11 = vpop.f32.mrf.mxu0  ;;  %v3257_v30 = vpop.f32.mrf.mxu1  ;;  %3496 = vmatmul.mubr.bf16.gmra.mxu1 %v2953_v60 }
 0x3a9   : > { %v3539_v18 = vmax.f32 %v3254_v12, 0.0  ;;  %v2763_v25 = vadd.f32 %v2762_v11, %v13169_v34  ;;  %v2891_v43 = vmax.f32 %v2761_v57, 0.0  ;;  %v3654_v58 = vpack.c.bf16 %v3538_v26, %v3536_v46  ;;  %4689 = vmatpush2.bf16.msra.mxu1 %v11773_v8 }
 0x3aa   : > { %v3259_v53 = vpop.f32.mrf.mxu1  ;;  %v3258_v17 = vadd.f32 %v3257_v30, %v13436_v20 }
 0x3ab   : > { %v2892_v21 = vmax.f32 %v2763_v25, 0.0  ;;  %v3655_v45 = vpack.c.bf16 %v3539_v18, %v3537_v29  ;;  %v3260_v34 = vadd.f32 %v3259_v53, %v13432_v5  ;;  %v2955_v10 = vpack.c.bf16 %v2891_v43, %v2889_v28  ;;  %v11778_v28 = vld [vmem:[%s17295_s5 + $0x484] ss:$8 sps:$4 sm:$0xff]  }
 0x3ac   : > { %v3261_v49 = vpop.f32.mrf.mxu1  ;;  %v3540_v9 = vmax.f32 %v3258_v17, 0.0  ;;  %4690 = vmatprep.subr.bf16.mxu1 %v11778_v28 }
 0x3ad   : > { %v3262_v27 = vadd.f32 %v3261_v49, %v13436_v20  ;;  %3996 = vmatprep.mubr.bf16.mxu0 %v3655_v45  ;;  %v2956_v48 = vpack.c.bf16 %v2892_v21, %v2890_v7  ;;  %v3541_v1 = vmax.f32 %v3260_v34, 0.0  ;;  %v11776_v45 = vld [vmem:[%s17295_s5 + $0x480] ss:$8 sps:$4 sm:$0xff]  }
 0x3ae   : > { %v3263_v0 = vpop.f32.mrf.mxu1  ;;  %3997 = vmatmul.mubr.bf16.gmra.mxu0 %v3654_v58  ;;  %v11779_v34 = vld [vmem:[%s17294_s4] ss:$8 sps:$4 sm:$0xff]   ;;  %4691 = vmatpush2.bf16.msra.mxu1 %v11776_v45 }
 0x3af   : > { %v3264_v54 = vadd.f32 %v3263_v0, %v13432_v5  ;;  %3505 = vmatprep.mubr.bf16.mxu1 %v2956_v48  ;;  %v3542_v47 = vmax.f32 %v3262_v27, 0.0  ;;  %v11781_v27 = vld [vmem:[%s17294_s4 + $0x4] ss:$8 sps:$4 sm:$0xff]  }
 0x3b0   : > { %v3267_v6 = vpop.f32.mrf.mxu1  ;;  %3506 = vmatmul.mubr.bf16.gmra.mxu1 %v2955_v10  ;;  %5067 = vmatprep.subr.bf16.mxu0 %v11781_v27 }
 0x3b1   : > { %v3543_v22 = vmax.f32 %v3264_v54, 0.0  ;;  %v3656_v23 = vpack.c.bf16 %v3542_v47, %v3540_v9  ;;  %v3268_v41 = vadd.f32 %v3267_v6, %v13436_v20  ;;  %5068 = vmatpush1.bf16.msra.mxu0 %v11779_v34 }
 0x3b2   : > { %v3269_v56 = vpop.f32.mrf.mxu1 }
 0x3b3   : > { %v3657_v13 = vpack.c.bf16 %v3543_v22, %v3541_v1  ;;  %v3270_v14 = vadd.f32 %v3269_v56, %v13432_v5  ;;  %v3544_v15 = vmax.f32 %v3268_v41, 0.0 }
 0x3b4   : > { %v3271_v63 = vpop.f32.mrf.mxu1 }
 0x3b5   : > { %v3272_v24 = vadd.f32 %v3271_v63, %v13436_v20  ;;  %4006 = vmatprep.mubr.bf16.mxu0 %v3657_v13  ;;  %v3545_v62 = vmax.f32 %v3270_v14, 0.0 }
 0x3b6   : > { %v3273_v32 = vpop.f32.mrf.mxu1  ;;  %4007 = vmatmul.mubr.bf16.gmra.mxu0 %v3656_v23 }
 0x3b7   : > { %v3274_v16 = vadd.f32 %v3273_v32, %v13432_v5  ;;  %v3546_v35 = vmax.f32 %v3272_v24, 0.0 }
 0x3b8   : > { %v3277_v44 = vpop.f32.mrf.mxu1 }
 0x3b9   : > { %v3547_v59 = vmax.f32 %v3274_v16, 0.0  ;;  %v3658_v37 = vpack.c.bf16 %v3546_v35, %v3544_v15  ;;  %v3278_v60 = vadd.f32 %v3277_v44, %v13436_v20 }
 0x3ba   : > { %v3279_v61 = vpop.f32.mrf.mxu1 }
 0x3bb   : > { %v3659_v40 = vpack.c.bf16 %v3547_v59, %v3545_v62  ;;  %v3280_v19 = vadd.f32 %v3279_v61, %v13432_v5  ;;  %v3548_v50 = vmax.f32 %v3278_v60, 0.0  ;;  %v11784_v61 = vld [vmem:[%s17295_s5 + $0x574] ss:$8 sps:$4 sm:$0xff]  }
 0x3bc   : > { %v3281_v33 = vpop.f32.mrf.mxu1  ;;  %5945 = vmatprep.subr.bf16.mxu1 %v11784_v61 }
 0x3bd   : > { %v3282_v42 = vadd.f32 %v3281_v33, %v13436_v20  ;;  %4016 = vmatprep.mubr.bf16.mxu0 %v3659_v40  ;;  %v3549_v57 = vmax.f32 %v3280_v19, 0.0 }
 0x3be   : > { %v3283_v38 = vpop.f32.mrf.mxu1  ;;  %4017 = vmatmul.mubr.bf16.gmra.mxu0 %v3658_v37 }
 0x3bf   : > { %v3284_v52 = vadd.f32 %v3283_v38, %v13432_v5  ;;  %v3550_v3 = vmax.f32 %v3282_v42, 0.0 }
 0x3c0   : > { %v3287_v51 = vpop.f32.mrf.mxu1 }
 0x3c1   : > { %v3551_v12 = vmax.f32 %v3284_v52, 0.0  ;;  %v3660_v30 = vpack.c.bf16 %v3550_v3, %v3548_v50  ;;  %v3288_v4 = vadd.f32 %v3287_v51, %v13436_v20 }
 0x3c2   : > { %v3289_v26 = vpop.f32.mrf.mxu1 }
 0x3c3   : > { %v3661_v11 = vpack.c.bf16 %v3551_v12, %v3549_v57  ;;  %v3290_v18 = vadd.f32 %v3289_v26, %v13432_v5  ;;  %v3552_v58 = vmax.f32 %v3288_v4, 0.0 }
 0x3c4   : > { %v3291_v29 = vpop.f32.mrf.mxu1 }
 0x3c5   : > { %v3292_v25 = vadd.f32 %v3291_v29, %v13436_v20  ;;  %4026 = vmatprep.mubr.bf16.mxu0 %v3661_v11  ;;  %v3553_v7 = vmax.f32 %v3290_v18, 0.0 }
 0x3c6   : > { %v3293_v36 = vpop.f32.mrf.mxu1  ;;  %4027 = vmatmul.mubr.bf16.gmra.mxu0 %v3660_v30 }
 0x3c7   : > { %v3294_v46 = vadd.f32 %v3293_v36, %v13432_v5  ;;  %v3554_v43 = vmax.f32 %v3292_v25, 0.0 }
 0x3c8   : > { %v3297_v53 = vpop.f32.mrf.mxu1 }
 0x3c9   : > { %v3555_v21 = vmax.f32 %v3294_v46, 0.0  ;;  %v3662_v10 = vpack.c.bf16 %v3554_v43, %v3552_v58  ;;  %v3298_v47 = vadd.f32 %v3297_v53, %v13436_v20 }
 0x3ca   : > { %v3299_v49 = vpop.f32.mrf.mxu1 }
 0x3cb   : > { %v3663_v48 = vpack.c.bf16 %v3555_v21, %v3553_v7  ;;  %v3300_v0 = vadd.f32 %v3299_v49, %v13432_v5  ;;  %v3556_v23 = vmax.f32 %v3298_v47, 0.0 }
 0x3cc   : > { %v3301_v17 = vpop.f32.mrf.mxu1 }
 0x3cd   : > { %v3302_v54 = vadd.f32 %v3301_v17, %v13436_v20  ;;  %4036 = vmatprep.mubr.bf16.mxu0 %v3663_v48  ;;  %v3557_v56 = vmax.f32 %v3300_v0, 0.0 }
 0x3ce   : > { %v3303_v6 = vpop.f32.mrf.mxu1  ;;  %4037 = vmatmul.mubr.bf16.gmra.mxu0 %v3662_v10 }
 0x3cf   : > { %v3304_v1 = vadd.f32 %v3303_v6, %v13432_v5  ;;  %v3558_v22 = vmax.f32 %v3302_v54, 0.0 }
 0x3d0   : > { %v3307_v9 = vpop.f32.mrf.mxu1 }
 0x3d1   : > { %v3559_v13 = vmax.f32 %v3304_v1, 0.0  ;;  %v3664_v24 = vpack.c.bf16 %v3558_v22, %v3556_v23  ;;  %v3308_v35 = vadd.f32 %v3307_v9, %v13436_v20 }
 0x3d2   : > { %v3309_v63 = vpop.f32.mrf.mxu1 }
 0x3d3   : > { %v3665_v14 = vpack.c.bf16 %v3559_v13, %v3557_v56  ;;  %v3310_v32 = vadd.f32 %v3309_v63, %v13432_v5  ;;  %v3560_v40 = vmax.f32 %v3308_v35, 0.0 }
 0x3d4   : > { %v3311_v41 = vpop.f32.mrf.mxu1 }
 0x3d5   : > { %v3312_v16 = vadd.f32 %v3311_v41, %v13436_v20  ;;  %4046 = vmatprep.mubr.bf16.mxu0 %v3665_v14  ;;  %v3561_v55 = vmax.f32 %v3310_v32, 0.0 }
 0x3d6   : > { %v3313_v44 = vpop.f32.mrf.mxu1  ;;  %4047 = vmatmul.mubr.bf16.gmra.mxu0 %v3664_v24 }
 0x3d7   : > { %v3314_v62 = vadd.f32 %v3313_v44, %v13432_v5  ;;  %v3562_v59 = vmax.f32 %v3312_v16, 0.0 }
 0x3d8   : > { %v3317_v8 = vpop.f32.mrf.mxu1 }
 0x3d9   : > { %v3563_v15 = vmax.f32 %v3314_v62, 0.0  ;;  %v3666_v19 = vpack.c.bf16 %v3562_v59, %v3560_v40  ;;  %v3318_v52 = vadd.f32 %v3317_v8, %v13436_v20 }
 0x3da   : > { %v3319_v37 = vpop.f32.mrf.mxu1 }
 0x3db   : > { %v3667_v33 = vpack.c.bf16 %v3563_v15, %v3561_v55  ;;  %v3320_v60 = vadd.f32 %v3319_v37, %v13432_v5  ;;  %v3564_v11 = vmax.f32 %v3318_v52, 0.0 }
 0x3dc   : > { %v3321_v42 = vpop.f32.mrf.mxu1 }
 0x3dd   : > { %v3322_v38 = vadd.f32 %v3321_v42, %v13436_v20  ;;  %4056 = vmatprep.mubr.bf16.mxu0 %v3667_v33  ;;  %v3565_v50 = vmax.f32 %v3320_v60, 0.0 }
 0x3de   : > { %v3323_v3 = vpop.f32.mrf.mxu1  ;;  %4057 = vmatmul.mubr.bf16.gmra.mxu0 %v3666_v19 }
 0x3df   : > { %v3324_v51 = vadd.f32 %v3323_v3, %v13432_v5  ;;  %v3566_v57 = vmax.f32 %v3322_v38, 0.0 }
 0x3e0   : > { %v3327_v12 = vpop.f32.mrf.mxu1 }
 0x3e1   : > { %v3567_v26 = vmax.f32 %v3324_v51, 0.0  ;;  %v3668_v18 = vpack.c.bf16 %v3566_v57, %v3564_v11  ;;  %v3328_v46 = vadd.f32 %v3327_v12, %v13436_v20 }
 0x3e2   : > { %v3329_v30 = vpop.f32.mrf.mxu1 }
 0x3e3   : > { %v3669_v29 = vpack.c.bf16 %v3567_v26, %v3565_v50  ;;  %v3330_v4 = vadd.f32 %v3329_v30, %v13432_v5  ;;  %v3568_v58 = vmax.f32 %v3328_v46, 0.0 }
 0x3e4   : > { %v3331_v25 = vpop.f32.mrf.mxu1 }
 0x3e5   : > { %v3332_v36 = vadd.f32 %v3331_v25, %v13436_v20  ;;  %4066 = vmatprep.mubr.bf16.mxu0 %v3669_v29  ;;  %v3569_v45 = vmax.f32 %v3330_v4, 0.0 }
 0x3e6   : > { %v3333_v43 = vpop.f32.mrf.mxu1  ;;  %4067 = vmatmul.mubr.bf16.gmra.mxu0 %v3668_v18 }
 0x3e7   : > { %v3334_v53 = vadd.f32 %v3333_v43, %v13432_v5  ;;  %v3570_v7 = vmax.f32 %v3332_v36, 0.0 }
 0x3e8   : > { %v3337_v21 = vpop.f32.mrf.mxu1 }
 0x3e9   : > { %v3571_v28 = vmax.f32 %v3334_v53, 0.0  ;;  %v3670_v27 = vpack.c.bf16 %v3570_v7, %v3568_v58  ;;  %v3338_v0 = vadd.f32 %v3337_v21, %v13436_v20 }
 0x3ea   : > { %v3339_v49 = vpop.f32.mrf.mxu1 }
 0x3eb   : > { %v3671_v34 = vpack.c.bf16 %v3571_v28, %v3569_v45  ;;  %v3340_v10 = vadd.f32 %v3339_v49, %v13432_v5  ;;  %v3572_v56 = vmax.f32 %v3338_v0, 0.0 }
 0x3ec   : > { %v3341_v48 = vpop.f32.mrf.mxu1 }
 0x3ed   : > { %v3342_v17 = vadd.f32 %v3341_v48, %v13436_v20  ;;  %4076 = vmatprep.mubr.bf16.mxu0 %v3671_v34  ;;  %v3573_v22 = vmax.f32 %v3340_v10, 0.0 }
 0x3ee   : > { %v3343_v54 = vpop.f32.mrf.mxu1  ;;  %4077 = vmatmul.mubr.bf16.gmra.mxu0 %v3670_v27 }
 0x3ef   : > { %v3344_v47 = vadd.f32 %v3343_v54, %v13432_v5  ;;  %v3574_v6 = vmax.f32 %v3342_v17, 0.0 }
 0x3f0   : > { %v3347_v1 = vpop.f32.mrf.mxu1 }
 0x3f1   : > { %v3575_v9 = vmax.f32 %v3344_v47, 0.0  ;;  %v3672_v63 = vpack.c.bf16 %v3574_v6, %v3572_v56  ;;  %v3348_v32 = vadd.f32 %v3347_v1, %v13436_v20 }
 0x3f2   : > { %v3349_v13 = vpop.f32.mrf.mxu1 }
 0x3f3   : > { %v3673_v23 = vpack.c.bf16 %v3575_v9, %v3573_v22  ;;  %v3350_v24 = vadd.f32 %v3349_v13, %v13432_v5  ;;  %v3576_v55 = vmax.f32 %v3348_v32, 0.0 }
 0x3f4   : > { %v3351_v14 = vpop.f32.mrf.mxu1 }
 0x3f5   : > { %v3352_v41 = vadd.f32 %v3351_v14, %v13436_v20  ;;  %4086 = vmatprep.mubr.bf16.mxu0 %v3673_v23  ;;  %v3577_v59 = vmax.f32 %v3350_v24, 0.0 }
 0x3f6   : > { %v3353_v16 = vpop.f32.mrf.mxu1  ;;  %4087 = vmatmul.mubr.bf16.gmra.mxu0 %v3672_v63 }
 0x3f7   : > { %v3354_v35 = vadd.f32 %v3353_v16, %v13432_v5  ;;  %v3578_v44 = vmax.f32 %v3352_v41, 0.0 }
 0x3f8   : > { %v3357_v62 = vpop.f32.mrf.mxu1 }
 0x3f9   : > { %v3579_v8 = vmax.f32 %v3354_v35, 0.0  ;;  %v3674_v40 = vpack.c.bf16 %v3578_v44, %v3576_v55  ;;  %v3358_v42 = vadd.f32 %v3357_v62, %v13436_v20 }
 0x3fa   : > { %v3359_v15 = vpop.f32.mrf.mxu1 }
 0x3fb   : > { %v3675_v61 = vpack.c.bf16 %v3579_v8, %v3577_v59  ;;  %v3360_v33 = vadd.f32 %v3359_v15, %v13432_v5  ;;  %v3580_v12 = vmax.f32 %v3358_v42, 0.0 }
 0x3fc   : > { %v3361_v37 = vpop.f32.mrf.mxu1 }
 0x3fd   : > { %v3362_v19 = vadd.f32 %v3361_v37, %v13436_v20  ;;  %4096 = vmatprep.mubr.bf16.mxu0 %v3675_v61  ;;  %v3581_v51 = vmax.f32 %v3360_v33, 0.0 }
 0x3fe   : > { %v3363_v60 = vpop.f32.mrf.mxu1  ;;  %4097 = vmatmul.mubr.bf16.gmra.mxu0 %v3674_v40 }
 0x3ff   : > { %v3364_v38 = vadd.f32 %v3363_v60, %v13432_v5  ;;  %v3582_v52 = vmax.f32 %v3362_v19, 0.0 }
 0x400   : > { %v3367_v3 = vpop.f32.mrf.mxu1 }
 0x401   : > { %v3583_v57 = vmax.f32 %v3364_v38, 0.0  ;;  %v3676_v11 = vpack.c.bf16 %v3582_v52, %v3580_v12  ;;  %v3368_v25 = vadd.f32 %v3367_v3, %v13436_v20 }
 0x402   : > { %v3369_v50 = vpop.f32.mrf.mxu1 }
 0x403   : > { %v3677_v26 = vpack.c.bf16 %v3583_v57, %v3581_v51  ;;  %v3370_v29 = vadd.f32 %v3369_v50, %v13432_v5  ;;  %v3584_v21 = vmax.f32 %v3368_v25, 0.0 }
 0x404   : > { %v3371_v30 = vpop.f32.mrf.mxu1 }
 0x405   : > { %v3372_v18 = vadd.f32 %v3371_v30, %v13436_v20  ;;  %4106 = vmatprep.mubr.bf16.mxu0 %v3677_v26  ;;  %v3585_v53 = vmax.f32 %v3370_v29, 0.0 }
 0x406   : > { %v3373_v4 = vpop.f32.mrf.mxu1  ;;  %4107 = vmatmul.mubr.bf16.gmra.mxu0 %v3676_v11 }
 0x407   : > { %v3374_v36 = vadd.f32 %v3373_v4, %v13432_v5  ;;  %v3586_v46 = vmax.f32 %v3372_v18, 0.0 }
 0x408   : > { %v3377_v43 = vpop.f32.mrf.mxu1 }
 0x409   : > { %v3587_v7 = vmax.f32 %v3374_v36, 0.0  ;;  %v3678_v58 = vpack.c.bf16 %v3586_v46, %v3584_v21  ;;  %v3378_v48 = vadd.f32 %v3377_v43, %v13436_v20 }
 0x40a   : > { %v3379_v45 = vpop.f32.mrf.mxu1 }
 0x40b   : > { %v3679_v28 = vpack.c.bf16 %v3587_v7, %v3585_v53  ;;  %v3380_v34 = vadd.f32 %v3379_v45, %v13432_v5  ;;  %v3588_v1 = vmax.f32 %v3378_v48, 0.0 }
 0x40c   : > { %v3381_v49 = vpop.f32.mrf.mxu1 }
 0x40d   : > { %v3382_v27 = vadd.f32 %v3381_v49, %v13436_v20  ;;  %4116 = vmatprep.mubr.bf16.mxu0 %v3679_v28  ;;  %v3589_v47 = vmax.f32 %v3380_v34, 0.0 }
 0x40e   : > { %v3383_v10 = vpop.f32.mrf.mxu1  ;;  %4117 = vmatmul.mubr.bf16.gmra.mxu0 %v3678_v58 }
 0x40f   : > { %v3384_v17 = vadd.f32 %v3383_v10, %v13432_v5  ;;  %v3590_v0 = vmax.f32 %v3382_v27, 0.0 }
 0x410   : > { %v3387_v54 = vpop.f32.mrf.mxu1 }
 0x411   : > { %v3591_v6 = vmax.f32 %v3384_v17, 0.0  ;;  %v3680_v56 = vpack.c.bf16 %v3590_v0, %v3588_v1  ;;  %v3388_v14 = vadd.f32 %v3387_v54, %v13436_v20 }
 0x412   : > { %v3389_v22 = vpop.f32.mrf.mxu1 }
 0x413   : > { %v3681_v9 = vpack.c.bf16 %v3591_v6, %v3589_v47  ;;  %v3390_v23 = vadd.f32 %v3389_v22, %v13432_v5  ;;  %v3592_v62 = vmax.f32 %v3388_v14, 0.0 }
 0x414   : > { %v3391_v13 = vpop.f32.mrf.mxu1 }
 0x415   : > { %v3392_v63 = vadd.f32 %v3391_v13, %v13436_v20  ;;  %4126 = vmatprep.mubr.bf16.mxu0 %v3681_v9  ;;  %v3593_v35 = vmax.f32 %v3390_v23, 0.0 }
 0x416   : > { %v3393_v24 = vpop.f32.mrf.mxu1  ;;  %4127 = vmatmul.mubr.bf16.gmra.mxu0 %v3680_v56 }
 0x417   : > { %v3394_v41 = vadd.f32 %v3393_v24, %v13432_v5  ;;  %v3594_v32 = vmax.f32 %v3392_v63, 0.0 }
 0x418   : > { %v3397_v16 = vpop.f32.mrf.mxu1 }
 0x419   : > { %v3595_v44 = vmax.f32 %v3394_v41, 0.0  ;;  %v3682_v55 = vpack.c.bf16 %v3594_v32, %v3592_v62  ;;  %v3398_v37 = vadd.f32 %v3397_v16, %v13436_v20 }
 0x41a   : > { %v3399_v59 = vpop.f32.mrf.mxu1 }
 0x41b   : > { %v3683_v8 = vpack.c.bf16 %v3595_v44, %v3593_v35  ;;  %v3400_v61 = vadd.f32 %v3399_v59, %v13432_v5  ;;  %v3596_v3 = vmax.f32 %v3398_v37, 0.0 }
 0x41c   : > { %v3401_v15 = vpop.f32.mrf.mxu1 }
 0x41d   : > { %v3402_v40 = vadd.f32 %v3401_v15, %v13436_v20  ;;  %4136 = vmatprep.mubr.bf16.mxu0 %v3683_v8  ;;  %v3597_v38 = vmax.f32 %v3400_v61, 0.0 }
 0x41e   : > { %v3403_v33 = vpop.f32.mrf.mxu1  ;;  %4137 = vmatmul.mubr.bf16.gmra.mxu0 %v3682_v55 }
 0x41f   : > { %v3404_v19 = vadd.f32 %v3403_v33, %v13432_v5  ;;  %v3598_v42 = vmax.f32 %v3402_v40, 0.0 }
 0x420   : > { %v3407_v60 = vpop.f32.mrf.mxu1 }
 0x421   : > { %v3599_v52 = vmax.f32 %v3404_v19, 0.0  ;;  %v3684_v12 = vpack.c.bf16 %v3598_v42, %v3596_v3  ;;  %v3408_v30 = vadd.f32 %v3407_v60, %v13436_v20 }
 0x422   : > { %v3409_v51 = vpop.f32.mrf.mxu1 }
 0x423   : > { %v3685_v57 = vpack.c.bf16 %v3599_v52, %v3597_v38  ;;  %v3410_v26 = vadd.f32 %v3409_v51, %v13432_v5  ;;  %v3600_v43 = vmax.f32 %v3408_v30, 0.0 }
 0x424   : > { %v3411_v50 = vpop.f32.mrf.mxu1 }
 0x425   : > { %v3412_v11 = vadd.f32 %v3411_v50, %v13436_v20  ;;  %4146 = vmatprep.mubr.bf16.mxu0 %v3685_v57  ;;  %v3601_v36 = vmax.f32 %v3410_v26, 0.0  ;;  %v10918_v57 = vld [vmem:[%s17296_s6 + $0x3] ss:$8 sm:$0x3] }
 0x426   : > { %v3413_v29 = vpop.f32.mrf.mxu1  ;;  %4147 = vmatmul.mubr.bf16.gmra.mxu0 %v3684_v12 }
 0x427   : > { %v3414_v18 = vadd.f32 %v3413_v29, %v13432_v5  ;;  %v3602_v25 = vmax.f32 %v3412_v11, 0.0  ;;  %v13629_v29 = vrot.slane %v10918_v57, %v12357_v31 }
 0x428   : > { %v3417_v4 = vpop.f32.mrf.mxu1 }
 0x429   : > { %v3603_v46 = vmax.f32 %v3414_v18, 0.0  ;;  %v3686_v21 = vpack.c.bf16 %v3602_v25, %v3600_v43  ;;  %v3418_v49 = vadd.f32 %v3417_v4, %v13436_v20  ;;  %v13633_v25 = vrot.slane %v10918_v57, %v12374_v39 }
 0x42a   : > { %v3419_v53 = vpop.f32.mrf.mxu1 }
 0x42b   : > { %v3687_v7 = vpack.c.bf16 %v3603_v46, %v3601_v36  ;;  %v3420_v28 = vadd.f32 %v3419_v53, %v13432_v5  ;;  %v3604_v54 = vmax.f32 %v3418_v49, 0.0 }
 0x42c   : > { %v3421_v45 = vpop.f32.mrf.mxu1 }
 0x42d   : > { %v3422_v58 = vadd.f32 %v3421_v45, %v13436_v20  ;;  %4156 = vmatprep.mubr.bf16.mxu0 %v3687_v7  ;;  %v3605_v17 = vmax.f32 %v3420_v28, 0.0 }
 0x42e   : > { %v3423_v34 = vpop.f32.mrf.mxu1  ;;  %4157 = vmatmul.mubr.bf16.gmra.mxu0 %v3686_v21 }
 0x42f   : > { %v3424_v27 = vadd.f32 %v3423_v34, %v13432_v5  ;;  %v3606_v48 = vmax.f32 %v3422_v58, 0.0 }
 0x430   : > { %v3427_v10 = vpop.f32.mrf.mxu1 }
 0x431   : > { %v3607_v0 = vmax.f32 %v3424_v27, 0.0  ;;  %v3688_v1 = vpack.c.bf16 %v3606_v48, %v3604_v54  ;;  %v3428_v13 = vadd.f32 %v3427_v10, %v13436_v20 }
 0x432   : > { %v3429_v47 = vpop.f32.mrf.mxu1 }
 0x433   : > { %v3689_v6 = vpack.c.bf16 %v3607_v0, %v3605_v17  ;;  %v3430_v9 = vadd.f32 %v3429_v47, %v13432_v5  ;;  %v3608_v16 = vmax.f32 %v3428_v13, 0.0 }
 0x434   : > { %v3431_v22 = vpop.f32.mrf.mxu1 }
 0x435   : > { %v3432_v56 = vadd.f32 %v3431_v22, %v13436_v20  ;;  %4166 = vmatprep.mubr.bf16.mxu0 %v3689_v6  ;;  %v3609_v41 = vmax.f32 %v3430_v9, 0.0 }
 0x436   : > { %v3433_v23 = vpop.f32.mrf.mxu1  ;;  %4167 = vmatmul.mubr.bf16.gmra.mxu0 %v3688_v1 }
 0x437   : > { %v3434_v63 = vadd.f32 %v3433_v23, %v13432_v5  ;;  %v3610_v14 = vmax.f32 %v3432_v56, 0.0 }
 0x438   : > { %v3437_v24 = vpop.f32.mrf.mxu1 }
 0x439   : > { %v3611_v32 = vmax.f32 %v3434_v63, 0.0  ;;  %v3690_v62 = vpack.c.bf16 %v3610_v14, %v3608_v16  ;;  %v3438_v15 = vadd.f32 %v3437_v24, %v13436_v20 }
 0x43a   : > { %v3439_v35 = vpop.f32.mrf.mxu1 }
 0x43b   : > { %v3691_v44 = vpack.c.bf16 %v3611_v32, %v3609_v41  ;;  %v3440_v8 = vadd.f32 %v3439_v35, %v13432_v5  ;;  %v3612_v60 = vmax.f32 %v3438_v15, 0.0  ;;  %v11782_v32 = vld [vmem:[%s17295_s5 + $0x570] ss:$8 sps:$4 sm:$0xff]  }
 0x43c   : > { %v3441_v59 = vpop.f32.mrf.mxu1 }
 0x43d   : > { %v3442_v55 = vadd.f32 %v3441_v59, %v13436_v20  ;;  %4176 = vmatprep.mubr.bf16.mxu0 %v3691_v44  ;;  %v3613_v19 = vmax.f32 %v3440_v8, 0.0  ;;  %v11787_v59 = vld [vmem:[%s17295_s5 + $0x564] ss:$8 sps:$4 sm:$0xff]  }
 0x43e   : > { %v3443_v61 = vpop.f32.mrf.mxu1  ;;  %4177 = vmatmul.mubr.bf16.gmra.mxu0 %v3690_v62 }
 0x43f   : > { %v3444_v40 = vadd.f32 %v3443_v61, %v13432_v5  ;;  %v3614_v37 = vmax.f32 %v3442_v55, 0.0 }
 0x440   : > { %v3447_v33 = vpop.f32.mrf.mxu1 }
 0x441   : > { %v3615_v42 = vmax.f32 %v3444_v40, 0.0  ;;  %v3692_v3 = vpack.c.bf16 %v3614_v37, %v3612_v60  ;;  %v3448_v11 = vadd.f32 %v3447_v33, %v13436_v20 }
 0x442   : > { %v3449_v38 = vpop.f32.mrf.mxu1 }
 0x443   : > { %v3693_v52 = vpack.c.bf16 %v3615_v42, %v3613_v19  ;;  %v3450_v12 = vadd.f32 %v3449_v38, %v13432_v5  ;;  %v3616_v21 = vmax.f32 %v3448_v11, 0.0  ;;  %v11785_v38 = vld [vmem:[%s17295_s5 + $0x560] ss:$8 sps:$4 sm:$0xff]  }
 0x444   : > { %v3451_v51 = vpop.f32.mrf.mxu1 }
 0x445   : > { %v3452_v50 = vadd.f32 %v3451_v51, %v13436_v20  ;;  %4186 = vmatprep.mubr.bf16.mxu0 %v3693_v52  ;;  %v3617_v43 = vmax.f32 %v3450_v12, 0.0  ;;  %v11790_v12 = vld [vmem:[%s17295_s5 + $0x554] ss:$8 sps:$4 sm:$0xff]  }
 0x446   : > { %v3948_v26 = vpop.f32.mrf.mxu0  ;;  %v3453_v30 = vpop.f32.mrf.mxu1  ;;  %4187 = vmatmul.mubr.bf16.gmra.mxu0 %v3692_v3 }
 0x447   : > { %v3454_v18 = vadd.f32 %v3453_v30, %v13432_v5  ;;  %v3618_v36 = vmax.f32 %v3452_v50, 0.0  ;;  %v3949_v49 = vadd.f32 %v3948_v26, %v13633_v25 }
 0x448   : > { %v3950_v4 = vpop.f32.mrf.mxu0  ;;  %v3457_v46 = vpop.f32.mrf.mxu1 }
 0x449   : > { %v3619_v53 = vmax.f32 %v3454_v18, 0.0  ;;  %v3951_v45 = vadd.f32 %v3950_v4, %v13629_v29  ;;  %v3694_v48 = vpack.c.bf16 %v3618_v36, %v3616_v21  ;;  %v3458_v1 = vadd.f32 %v3457_v46, %v13436_v20 }
 0x44a   : > { %v3952_v7 = vpop.f32.mrf.mxu0  ;;  %v3459_v28 = vpop.f32.mrf.mxu1  ;;  %v4267_v13 = vmax.f32 %v3949_v49, 0.0  ;;  %v11793_v49 = vld [vmem:[%s17295_s5 + $0x544] ss:$8 sps:$4 sm:$0xff]  }
 0x44b   : > { %v3953_v58 = vadd.f32 %v3952_v7, %v13633_v25  ;;  %v3695_v27 = vpack.c.bf16 %v3619_v53, %v3617_v43  ;;  %v3460_v0 = vadd.f32 %v3459_v28, %v13432_v5  ;;  %v4268_v22 = vmax.f32 %v3951_v45, 0.0  ;;  %v11788_v7 = vld [vmem:[%s17295_s5 + $0x550] ss:$8 sps:$4 sm:$0xff]  }
 0x44c   : > { %v3954_v34 = vpop.f32.mrf.mxu0  ;;  %v3461_v10 = vpop.f32.mrf.mxu1  ;;  %v3620_v8 = vmax.f32 %v3458_v1, 0.0 }
 0x44d   : > { %v3955_v17 = vadd.f32 %v3954_v34, %v13629_v29  ;;  %v4269_v54 = vmax.f32 %v3953_v58, 0.0  ;;  %v3462_v47 = vadd.f32 %v3461_v10, %v13436_v20  ;;  %4196 = vmatprep.mubr.bf16.mxu0 %v3695_v27  ;;  %v3621_v16 = vmax.f32 %v3460_v0, 0.0 }
 0x44e   : > { %v3958_v6 = vpop.f32.mrf.mxu0  ;;  %v3463_v56 = vpop.f32.mrf.mxu1  ;;  %4197 = vmatmul.mubr.bf16.gmra.mxu0 %v3694_v48 }
 0x44f   : > { %v4270_v9 = vmax.f32 %v3955_v17, 0.0  ;;  %v3464_v23 = vadd.f32 %v3463_v56, %v13432_v5  ;;  %v3622_v14 = vmax.f32 %v3462_v47, 0.0  ;;  %v4395_v35 = vpack.c.bf16 %v4269_v54, %v4267_v13 }
 0x450   : > { %v3960_v63 = vpop.f32.mrf.mxu0  ;;  %v3467_v24 = vpop.f32.mrf.mxu1  ;;  %v3959_v40 = vadd.f32 %v3958_v6, %v13633_v25 }
 0x451   : > { %v4396_v41 = vpack.c.bf16 %v4270_v9, %v4268_v22  ;;  %v3623_v44 = vmax.f32 %v3464_v23, 0.0  ;;  %v3961_v55 = vadd.f32 %v3960_v63, %v13629_v29  ;;  %v3696_v19 = vpack.c.bf16 %v3622_v14, %v3620_v8  ;;  %v11791_v22 = vld [vmem:[%s17295_s5 + $0x540] ss:$8 sps:$4 sm:$0xff]   ;;  %v11796_v63 = vld [vmem:[%s17295_s5 + $0x534] ss:$8 sps:$4 sm:$0xff]  }
 0x452   : > { %v3962_v62 = vpop.f32.mrf.mxu0  ;;  %v3469_v15 = vpop.f32.mrf.mxu1  ;;  %v3468_v50 = vadd.f32 %v3467_v24, %v13436_v20  ;;  %v4271_v18 = vmax.f32 %v3959_v40, 0.0 }
 0x453   : > { %v3963_v61 = vadd.f32 %v3962_v62, %v13633_v25  ;;  %4692 = vmatprep.mubr.bf16.mxu1 %v4396_v41  ;;  %v3697_v33 = vpack.c.bf16 %v3623_v44, %v3621_v16  ;;  %v3470_v52 = vadd.f32 %v3469_v15, %v13432_v5  ;;  %v4272_v26 = vmax.f32 %v3961_v55, 0.0  ;;  %v11794_v55 = vld [vmem:[%s17295_s5 + $0x530] ss:$8 sps:$4 sm:$0xff]  }
 0x454   : > { %v3964_v37 = vpop.f32.mrf.mxu0  ;;  %4693 = vmatmul.mubr.bf16.vlgmr.msra.gmra.mxu1 %v4395_v35  ;;  %v3471_v42 = vpop.f32.mrf.mxu1  ;;  %v3624_v34 = vmax.f32 %v3468_v50, 0.0 }
 0x455   : > { %v3965_v60 = vadd.f32 %v3964_v37, %v13629_v29  ;;  %5946 = vmatpush1.bf16.msra.mxu1 %v11782_v32  ;;  %v4273_v3 = vmax.f32 %v3963_v61, 0.0  ;;  %v3472_v51 = vadd.f32 %v3471_v42, %v13436_v20  ;;  %4206 = vmatprep.mubr.bf16.mxu0 %v3697_v33  ;;  %v3625_v21 = vmax.f32 %v3470_v52, 0.0  ;;  %v11799_v33 = vld [vmem:[%s17295_s5 + $0x524] ss:$8 sps:$4 sm:$0xff]  }
 0x456   : > { %v3968_v57 = vpop.f32.mrf.mxu0  ;;  %5947 = vmatprep.subr.bf16.mxu1 %v11787_v59  ;;  %v3473_v30 = vpop.f32.mrf.mxu1  ;;  %4207 = vmatmul.mubr.bf16.gmra.mxu0 %v3696_v19 }
 0x457   : > { %v4274_v11 = vmax.f32 %v3965_v60, 0.0  ;;  %v3474_v4 = vadd.f32 %v3473_v30, %v13432_v5  ;;  %v3626_v46 = vmax.f32 %v3472_v51, 0.0  ;;  %v4397_v45 = vpack.c.bf16 %v4273_v3, %v4271_v18 }
 0x458   : > { %v3970_v36 = vpop.f32.mrf.mxu0  ;;  %v3477_v43 = vpop.f32.mrf.mxu1  ;;  %v3969_v17 = vadd.f32 %v3968_v57, %v13633_v25 }
 0x459   : > { %v4398_v53 = vpack.c.bf16 %v4274_v11, %v4272_v26  ;;  %5948 = vmatpush1.bf16.msra.mxu1 %v11785_v38  ;;  %v3627_v28 = vmax.f32 %v3474_v4, 0.0  ;;  %v3971_v27 = vadd.f32 %v3970_v36, %v13629_v29  ;;  %v3698_v47 = vpack.c.bf16 %v3626_v46, %v3624_v34  ;;  %v11797_v26 = vld [vmem:[%s17295_s5 + $0x520] ss:$8 sps:$4 sm:$0xff]   ;;  %v11802_v36 = vld [vmem:[%s17295_s5 + $0x514] ss:$8 sps:$4 sm:$0xff]  }
 0x45a   : > { %v3972_v58 = vpop.f32.mrf.mxu0  ;;  %5949 = vmatprep.subr.bf16.mxu1 %v11790_v12  ;;  %v3479_v48 = vpop.f32.mrf.mxu1  ;;  %v3478_v14 = vadd.f32 %v3477_v43, %v13436_v20  ;;  %v4275_v16 = vmax.f32 %v3969_v17, 0.0 }
 0x45b   : > { %v3973_v10 = vadd.f32 %v3972_v58, %v13633_v25  ;;  %4702 = vmatprep.mubr.bf16.mxu1 %v4398_v53  ;;  %v3699_v54 = vpack.c.bf16 %v3627_v28, %v3625_v21  ;;  %v3480_v9 = vadd.f32 %v3479_v48, %v13432_v5  ;;  %v4276_v24 = vmax.f32 %v3971_v27, 0.0  ;;  %v11800_v27 = vld [vmem:[%s17295_s5 + $0x510] ss:$8 sps:$4 sm:$0xff]  }
 0x45c   : > { %v3974_v0 = vpop.f32.mrf.mxu0  ;;  %4703 = vmatmul.mubr.bf16.gmra.mxu1 %v4397_v45  ;;  %v3481_v6 = vpop.f32.mrf.mxu1  ;;  %v3628_v19 = vmax.f32 %v3478_v14, 0.0 }
 0x45d   : > { %v3975_v1 = vadd.f32 %v3974_v0, %v13629_v29  ;;  %5950 = vmatpush1.bf16.msra.mxu1 %v11788_v7  ;;  %v4277_v56 = vmax.f32 %v3973_v10, 0.0  ;;  %v3482_v13 = vadd.f32 %v3481_v6, %v13436_v20  ;;  %4216 = vmatprep.mubr.bf16.mxu0 %v3699_v54  ;;  %v3629_v15 = vmax.f32 %v3480_v9, 0.0  ;;  %v11805_v54 = vld [vmem:[%s17295_s5 + $0x504] ss:$8 sps:$4 sm:$0xff]  }
 0x45e   : > { %v3978_v23 = vpop.f32.mrf.mxu0  ;;  %5951 = vmatprep.subr.bf16.mxu1 %v11793_v49  ;;  %v3483_v32 = vpop.f32.mrf.mxu1  ;;  %4217 = vmatmul.mubr.bf16.gmra.mxu0 %v3698_v47 }
 0x45f   : > { %v4278_v41 = vmax.f32 %v3975_v1, 0.0  ;;  %v3484_v35 = vadd.f32 %v3483_v32, %v13432_v5  ;;  %v3630_v62 = vmax.f32 %v3482_v13, 0.0  ;;  %v4399_v61 = vpack.c.bf16 %v4277_v56, %v4275_v16 }
 0x460   : > { %v3980_v44 = vpop.f32.mrf.mxu0  ;;  %v3487_v59 = vpop.f32.mrf.mxu1  ;;  %v3979_v52 = vadd.f32 %v3978_v23, %v13633_v25 }
 0x461   : > { %v4400_v8 = vpack.c.bf16 %v4278_v41, %v4276_v24  ;;  %5952 = vmatpush1.bf16.msra.mxu1 %v11791_v22  ;;  %v3631_v40 = vmax.f32 %v3484_v35, 0.0  ;;  %v3981_v42 = vadd.f32 %v3980_v44, %v13629_v29  ;;  %v3700_v57 = vpack.c.bf16 %v3630_v62, %v3628_v19  ;;  %v11803_v24 = vld [vmem:[%s17295_s5 + $0x500] ss:$8 sps:$4 sm:$0xff]   ;;  %v11808_v35 = vld [vmem:[%s17295_s5 + $0x5f4] ss:$8 sps:$4 sm:$0xff]  }
 0x462   : > { %v3982_v37 = vpop.f32.mrf.mxu0  ;;  %5953 = vmatprep.subr.bf16.mxu1 %v11796_v63  ;;  %v3489_v60 = vpop.f32.mrf.mxu1  ;;  %v3488_v46 = vadd.f32 %v3487_v59, %v13436_v20  ;;  %v4279_v21 = vmax.f32 %v3979_v52, 0.0 }
 0x463   : > { %v3983_v38 = vadd.f32 %v3982_v37, %v13633_v25  ;;  %4712 = vmatprep.mubr.bf16.mxu1 %v4400_v8  ;;  %v3701_v51 = vpack.c.bf16 %v3631_v40, %v3629_v15  ;;  %v3490_v11 = vadd.f32 %v3489_v60, %v13432_v5  ;;  %v4280_v43 = vmax.f32 %v3981_v42, 0.0  ;;  %v11806_v42 = vld [vmem:[%s17295_s5 + $0x5f0] ss:$8 sps:$4 sm:$0xff]  }
 0x464   : > { %v3984_v3 = vpop.f32.mrf.mxu0  ;;  %4713 = vmatmul.mubr.bf16.gmra.mxu1 %v4399_v61  ;;  %v3491_v12 = vpop.f32.mrf.mxu1  ;;  %v3632_v47 = vmax.f32 %v3488_v46, 0.0  ;;  %v11809_v46 = vld [vmem:[%s17295_s5 + $0x5e0] ss:$8 sps:$4 sm:$0xff]  }
 0x465   : > { %v3985_v50 = vadd.f32 %v3984_v3, %v13629_v29  ;;  %5954 = vmatpush1.bf16.msra.mxu1 %v11794_v55  ;;  %v4281_v30 = vmax.f32 %v3983_v38, 0.0  ;;  %v3492_v18 = vadd.f32 %v3491_v12, %v13436_v20  ;;  %4226 = vmatprep.mubr.bf16.mxu0 %v3701_v51  ;;  %v3633_v48 = vmax.f32 %v3490_v11, 0.0  ;;  %v11811_v3 = vld [vmem:[%s17295_s5 + $0x5e4] ss:$8 sps:$4 sm:$0xff]  }
 0x466   : > { %v3988_v4 = vpop.f32.mrf.mxu0  ;;  %5955 = vmatprep.subr.bf16.mxu1 %v11799_v33  ;;  %v3493_v7 = vpop.f32.mrf.mxu1  ;;  %4227 = vmatmul.mubr.bf16.gmra.mxu0 %v3700_v57 }
 0x467   : > { %v4282_v53 = vmax.f32 %v3985_v50, 0.0  ;;  %v3494_v45 = vadd.f32 %v3493_v7, %v13432_v5  ;;  %v3634_v58 = vmax.f32 %v3492_v18, 0.0  ;;  %v4401_v10 = vpack.c.bf16 %v4281_v30, %v4279_v21 }
 0x468   : > { %v3990_v28 = vpop.f32.mrf.mxu0  ;;  %v3497_v49 = vpop.f32.mrf.mxu1  ;;  %v3989_v9 = vadd.f32 %v3988_v4, %v13633_v25 }
 0x469   : > { %v4402_v34 = vpack.c.bf16 %v4282_v53, %v4280_v43  ;;  %5956 = vmatpush1.bf16.msra.mxu1 %v11797_v26  ;;  %v3635_v17 = vmax.f32 %v3494_v45, 0.0  ;;  %v3991_v6 = vadd.f32 %v3990_v28, %v13629_v29  ;;  %v3702_v23 = vpack.c.bf16 %v3634_v58, %v3632_v47 }
 0x46a   : > { %v3992_v0 = vpop.f32.mrf.mxu0  ;;  %5957 = vmatprep.subr.bf16.mxu1 %v11802_v36  ;;  %v3499_v1 = vpop.f32.mrf.mxu1  ;;  %v3498_v44 = vadd.f32 %v3497_v49, %v13436_v20  ;;  %v4283_v15 = vmax.f32 %v3989_v9, 0.0 }
 0x46b   : > { %v3993_v22 = vadd.f32 %v3992_v0, %v13633_v25  ;;  %4722 = vmatprep.mubr.bf16.mxu1 %v4402_v34  ;;  %v3703_v13 = vpack.c.bf16 %v3635_v17, %v3633_v48  ;;  %v3500_v41 = vadd.f32 %v3499_v1, %v13432_v5  ;;  %v4284_v62 = vmax.f32 %v3991_v6, 0.0  ;;  %v11812_v6 = vld [vmem:[%s17295_s5 + $0x5d0] ss:$8 sps:$4 sm:$0xff]  }
 0x46c   : > { %v3994_v56 = vpop.f32.mrf.mxu0  ;;  %4723 = vmatmul.mubr.bf16.gmra.mxu1 %v4401_v10  ;;  %v3501_v63 = vpop.f32.mrf.mxu1  ;;  %v3636_v51 = vmax.f32 %v3498_v44, 0.0 }
 0x46d   : > { %v3995_v14 = vadd.f32 %v3994_v56, %v13629_v29  ;;  %5958 = vmatpush1.bf16.msra.mxu1 %v11800_v27  ;;  %v4285_v32 = vmax.f32 %v3993_v22, 0.0  ;;  %v3502_v16 = vadd.f32 %v3501_v63, %v13436_v20  ;;  %4236 = vmatprep.mubr.bf16.mxu0 %v3703_v13  ;;  %v3637_v60 = vmax.f32 %v3500_v41, 0.0 }
 0x46e   : > { %5959 = vmatprep.subr.bf16.mxu1 %v11805_v54  ;;  %v3503_v8 = vpop.f32.mrf.mxu1  ;;  %v3998_v55 = vpop.f32.mrf.mxu0  ;;  %4237 = vmatmul.mubr.bf16.gmra.mxu0 %v3702_v23 }
 0x46f   : > { %v4286_v59 = vmax.f32 %v3995_v14, 0.0  ;;  %v3504_v61 = vadd.f32 %v3503_v8, %v13432_v5  ;;  %v3638_v40 = vmax.f32 %v3502_v16, 0.0  ;;  %v4403_v38 = vpack.c.bf16 %v4285_v32, %v4283_v15 }
 0x470   : > { %v3507_v37 = vpop.f32.mrf.mxu1  ;;  %v4000_v33 = vpop.f32.mrf.mxu0  ;;  %v3999_v18 = vadd.f32 %v3998_v55, %v13633_v25 }
 0x471   : > { %v4404_v19 = vpack.c.bf16 %v4286_v59, %v4284_v62  ;;  %5960 = vmatpush1.bf16.msra.mxu1 %v11803_v24  ;;  %v3639_v52 = vmax.f32 %v3504_v61, 0.0  ;;  %v4001_v50 = vadd.f32 %v4000_v33, %v13629_v29  ;;  %v3704_v30 = vpack.c.bf16 %v3638_v40, %v3636_v51 }
 0x472   : > { %5961 = vmatprep.subr.bf16.mxu1 %v11808_v35  ;;  %v3509_v57 = vpop.f32.mrf.mxu1  ;;  %v4002_v12 = vpop.f32.mrf.mxu0  ;;  %v3508_v21 = vadd.f32 %v3507_v37, %v13436_v20  ;;  %v4287_v48 = vmax.f32 %v3999_v18, 0.0 }
 0x473   : > { %4732 = vmatprep.mubr.bf16.mxu1 %v4404_v19  ;;  %v4003_v26 = vadd.f32 %v4002_v12, %v13633_v25  ;;  %v3705_v11 = vpack.c.bf16 %v3639_v52, %v3637_v60  ;;  %v3510_v43 = vadd.f32 %v3509_v57, %v13432_v5  ;;  %v4288_v49 = vmax.f32 %v4001_v50, 0.0  ;;  %v11976_v60 = vld [vmem:[%s12134_s27] sm:$0xff]  }
 0x474   : > { %4733 = vmatmul.mubr.bf16.gmra.mxu1 %v4403_v38  ;;  %v3511_v4 = vpop.f32.mrf.mxu1  ;;  %v4004_v36 = vpop.f32.mrf.mxu0  ;;  %v3640_v1 = vmax.f32 %v3508_v21, 0.0  ;;  %v11815_v12 = vld [vmem:[%s17295_s5 + $0x5c0] ss:$8 sps:$4 sm:$0xff]   ;;  %v11817_v50 = vld [vmem:[%s17295_s5 + $0x5c4] ss:$8 sps:$4 sm:$0xff]  }
 0x475   : > { %5962 = vmatpush2.bf16.msra.mxu1 %v11806_v42  ;;  %v3512_v53 = vadd.f32 %v3511_v4, %v13436_v20  ;;  %v4005_v7 = vadd.f32 %v4004_v36, %v13629_v29  ;;  %4246 = vmatprep.mubr.bf16.mxu0 %v3705_v11  ;;  %v4289_v45 = vmax.f32 %v4003_v26, 0.0  ;;  %v3641_v0 = vmax.f32 %v3510_v43, 0.0  ;;  %v11814_v20 = vld [vmem:[%s17295_s5 + $0x5d4] ss:$8 sps:$4 sm:$0xff]  }
 0x476   : > { %5963 = vmatprep.subr.bf16.mxu1 %v11811_v3  ;;  %v3513_v28 = vpop.f32.mrf.mxu1  ;;  %v4008_v58 = vpop.f32.mrf.mxu0  ;;  %4247 = vmatmul.mubr.bf16.gmra.mxu0 %v3704_v30 }
 0x477   : > { %v4290_v34 = vmax.f32 %v4005_v7, 0.0  ;;  %v3514_v27 = vadd.f32 %v3513_v28, %v13432_v5  ;;  %v3642_v10 = vmax.f32 %v3512_v53, 0.0  ;;  %v4405_v22 = vpack.c.bf16 %v4289_v45, %v4287_v48  ;;  %v11977_v7 = vld [vmem:[%s12134_s27 + $0x8] sm:$0xff]  }
 0x478   : > { %v4010_v17 = vpop.f32.mrf.mxu0  ;;  %v4009_v63 = vadd.f32 %v4008_v58, %v13633_v25 }
 0x479   : > { %5964 = vmatpush2.bf16.msra.mxu1 %v11809_v46  ;;  %v3643_v54 = vmax.f32 %v3514_v27, 0.0  ;;  %v4406_v47 = vpack.c.bf16 %v4290_v34, %v4288_v49  ;;  %v4011_v5 = vadd.f32 %v4010_v17, %v13629_v29  ;;  %v3706_v23 = vpack.c.bf16 %v3642_v10, %v3640_v1 }
 0x47a   : > { %v4012_v9 = vpop.f32.mrf.mxu0  ;;  %5965 = vmatprep.subr.bf16.mxu1 %v11814_v20  ;;  %v4291_v44 = vmax.f32 %v4009_v63, 0.0  ;;  %v11978_v20 = vld [vmem:[%s12134_s27 + $0x10] sm:$0xff]  }
 0x47b   : > { %v4013_v56 = vadd.f32 %v4012_v9, %v13633_v25  ;;  %4742 = vmatprep.mubr.bf16.mxu1 %v4406_v47  ;;  %v3707_v13 = vpack.c.bf16 %v3643_v54, %v3641_v0  ;;  %v4292_v16 = vmax.f32 %v4011_v5, 0.0 }
 0x47c   : > { %v4014_v14 = vpop.f32.mrf.mxu0  ;;  %4743 = vmatmul.mubr.bf16.gmra.mxu1 %v4405_v22 }
 0x47d   : > { %v4015_v24 = vadd.f32 %v4014_v14, %v13629_v29  ;;  %4256 = vmatprep.mubr.bf16.mxu0 %v3707_v13  ;;  %5966 = vmatpush2.bf16.msra.mxu1 %v11812_v6  ;;  %v4293_v41 = vmax.f32 %v4013_v56, 0.0  ;;  %v11818_v13 = vld [vmem:[%s17295_s5 + $0x5b0] ss:$8 sps:$4 sm:$0xff]  }
 0x47e   : > { %v4018_v32 = vpop.f32.mrf.mxu0  ;;  %4257 = vmatmul.mubr.bf16.gmra.mxu0 %v3706_v23  ;;  %5967 = vmatprep.subr.bf16.mxu1 %v11817_v50  ;;  %v11820_v23 = vld [vmem:[%s17295_s5 + $0x5b4] ss:$8 sps:$4 sm:$0xff]  }
 0x47f   : > { %v4294_v35 = vmax.f32 %v4015_v24, 0.0  ;;  %5085 = vmatprep.mubr.bf16.mxu0 %v12028_v2  ;;  %v4407_v8 = vpack.c.bf16 %v4293_v41, %v4291_v44  ;;  %v4019_v40 = vadd.f32 %v4018_v32, %v13633_v25 }
 0x480   : > { %v4020_v62 = vpop.f32.mrf.mxu0 }
 0x481   : > { %v4408_v59 = vpack.c.bf16 %v4294_v35, %v4292_v16  ;;  %v4021_v15 = vadd.f32 %v4020_v62, %v13629_v29  ;;  %v4295_v3 = vmax.f32 %v4019_v40, 0.0  ;;  %5968 = vmatpush2.bf16.msra.mxu1 %v11815_v12 }
 0x482   : > { %v4022_v55 = vpop.f32.mrf.mxu0  ;;  %5969 = vmatprep.subr.bf16.mxu1 %v11820_v23  ;;  %v11982_v23 = vld [vmem:[%s12134_s27 + $0x30] sm:$0xff]  }
 0x483   : > { %v4023_v61 = vadd.f32 %v4022_v55, %v13633_v25  ;;  %4752 = vmatprep.mubr.bf16.mxu1 %v4408_v59  ;;  %v4296_v38 = vmax.f32 %v4021_v15, 0.0  ;;  %v11979_v59 = vld [vmem:[%s12134_s27 + $0x18] sm:$0xff]  }
 0x484   : > { %v4024_v37 = vpop.f32.mrf.mxu0  ;;  %4753 = vmatmul.mubr.bf16.gmra.mxu1 %v4407_v8 }
 0x485   : > { %v4025_v33 = vadd.f32 %v4024_v37, %v13629_v29  ;;  %v4297_v19 = vmax.f32 %v4023_v61, 0.0  ;;  %5970 = vmatpush2.bf16.msra.mxu1 %v11818_v13 }
 0x486   : > { %v4028_v42 = vpop.f32.mrf.mxu0  ;;  %11023 = vmatmul.mubr.msk.bf16.vlgmr.msra.gmra.mxu0 %vm815_vm0, %v11976_v60 }
 0x487   : > { %v4298_v52 = vmax.f32 %v4025_v33, 0.0  ;;  %5095 = vmatprep.mubr.bf16.mxu0 %v12028_v2  ;;  %v4409_v26 = vpack.c.bf16 %v4297_v19, %v4295_v3  ;;  %v4029_v4 = vadd.f32 %v4028_v42, %v13633_v25 }
 0x488   : > { %v4030_v51 = vpop.f32.mrf.mxu0 }
 0x489   : > { %v4410_v57 = vpack.c.bf16 %v4298_v52, %v4296_v38  ;;  %v4031_v30 = vadd.f32 %v4030_v51, %v13629_v29  ;;  %v4299_v28 = vmax.f32 %v4029_v4, 0.0 }
 0x48a   : > { %v4032_v11 = vpop.f32.mrf.mxu0 }
 0x48b   : > { %v4033_v18 = vadd.f32 %v4032_v11, %v13633_v25  ;;  %4762 = vmatprep.mubr.bf16.mxu1 %v4410_v57  ;;  %v4300_v21 = vmax.f32 %v4031_v30, 0.0  ;;  %v11980_v57 = vld [vmem:[%s12134_s27 + $0x20] sm:$0xff]   ;;  %v11823_v11 = vld [vmem:[%s17295_s5 + $0x674] ss:$8 sps:$4 sm:$0xff]  }
 0x48c   : > { %v4034_v36 = vpop.f32.mrf.mxu0  ;;  %4763 = vmatmul.mubr.bf16.gmra.mxu1 %v4409_v26  ;;  %v11821_v26 = vld [vmem:[%s17295_s5 + $0x670] ss:$8 sps:$4 sm:$0xff]   ;;  %6696 = vmatprep.subr.bf16.mxu0 %v11823_v11 }
 0x48d   : > { %v4035_v46 = vadd.f32 %v4034_v36, %v13629_v29  ;;  %v4301_v43 = vmax.f32 %v4033_v18, 0.0  ;;  %v11824_v36 = vld [vmem:[%s17295_s5 + $0x5a0] ss:$8 sps:$4 sm:$0xff]   ;;  %6697 = vmatpush1.bf16.msra.mxu0 %v11821_v26 }
 0x48e   : > { %v4038_v53 = vpop.f32.mrf.mxu0  ;;  %11024 = vmatmul.mubr.msk.bf16.gmra.mxu0 %vm815_vm0, %v11977_v7 }
 0x48f   : > { %v4302_v45 = vmax.f32 %v4035_v46, 0.0  ;;  %5105 = vmatprep.mubr.bf16.mxu0 %v12028_v2  ;;  %v4411_v34 = vpack.c.bf16 %v4301_v43, %v4299_v28  ;;  %v4039_v17 = vadd.f32 %v4038_v53, %v13633_v25  ;;  %v11826_v46 = vld [vmem:[%s17295_s5 + $0x5a4] ss:$8 sps:$4 sm:$0xff]  }
 0x490   : > { %v4040_v58 = vpop.f32.mrf.mxu0  ;;  %5971 = vmatprep.subr.bf16.mxu1 %v11826_v46  ;;  %v11984_v46 = vld [vmem:[%s12134_s27 + $0x40] sm:$0xff]  }
 0x491   : > { %v4412_v49 = vpack.c.bf16 %v4302_v45, %v4300_v21  ;;  %v4041_v48 = vadd.f32 %v4040_v58, %v13629_v29  ;;  %v4303_v9 = vmax.f32 %v4039_v17, 0.0  ;;  %5972 = vmatpush2.bf16.msra.mxu1 %v11824_v36 }
 0x492   : > { %v4042_v27 = vpop.f32.mrf.mxu0 }
 0x493   : > { %v4043_v10 = vadd.f32 %v4042_v27, %v13633_v25  ;;  %4772 = vmatprep.mubr.bf16.mxu1 %v4412_v49  ;;  %v4304_v1 = vmax.f32 %v4041_v48, 0.0  ;;  %v11981_v27 = vld [vmem:[%s12134_s27 + $0x28] sm:$0xff]  }
 0x494   : > { %v4044_v0 = vpop.f32.mrf.mxu0  ;;  %4773 = vmatmul.mubr.bf16.gmra.mxu1 %v4411_v34 }
 0x495   : > { %v4045_v54 = vadd.f32 %v4044_v0, %v13629_v29  ;;  %v4305_v47 = vmax.f32 %v4043_v10, 0.0 }
 0x496   : > { %v4048_v6 = vpop.f32.mrf.mxu0  ;;  %11025 = vmatmul.mubr.msk.bf16.gmra.mxu0 %vm815_vm0, %v11978_v20 }
 0x497   : > { %v4306_v22 = vmax.f32 %v4045_v54, 0.0  ;;  %5115 = vmatprep.mubr.bf16.mxu0 %v12028_v2  ;;  %v4413_v63 = vpack.c.bf16 %v4305_v47, %v4303_v9  ;;  %v4049_v32 = vadd.f32 %v4048_v6, %v13633_v25 }
 0x498   : > { %v4050_v5 = vpop.f32.mrf.mxu0 }
 0x499   : > { %v4414_v56 = vpack.c.bf16 %v4306_v22, %v4304_v1  ;;  %v4051_v24 = vadd.f32 %v4050_v5, %v13629_v29  ;;  %v4307_v15 = vmax.f32 %v4049_v32, 0.0 }
 0x49a   : > { %v4052_v14 = vpop.f32.mrf.mxu0 }
 0x49b   : > { %v4053_v41 = vadd.f32 %v4052_v14, %v13633_v25  ;;  %4782 = vmatprep.mubr.bf16.mxu1 %v4414_v56  ;;  %v4308_v8 = vmax.f32 %v4051_v24, 0.0  ;;  %v11827_v24 = vld [vmem:[%s17295_s5 + $0x660] ss:$8 sps:$4 sm:$0xff]  }
 0x49c   : > { %v4054_v16 = vpop.f32.mrf.mxu0  ;;  %4783 = vmatmul.mubr.bf16.gmra.mxu1 %v4413_v63 }
 0x49d   : > { %v4055_v35 = vadd.f32 %v4054_v16, %v13629_v29  ;;  %v4309_v44 = vmax.f32 %v4053_v41, 0.0  ;;  %v11829_v41 = vld [vmem:[%s17295_s5 + $0x664] ss:$8 sps:$4 sm:$0xff]  }
 0x49e   : > { %v4058_v62 = vpop.f32.mrf.mxu0  ;;  %11026 = vmatmul.mubr.msk.bf16.gmra.mxu0 %vm815_vm0, %v11979_v59  ;;  %6698 = vmatprep.subr.bf16.mxu0 %v11829_v41 }
 0x49f   : > { %v4310_v55 = vmax.f32 %v4055_v35, 0.0  ;;  %5125 = vmatprep.mubr.bf16.mxu0 %v12028_v2  ;;  %v4415_v37 = vpack.c.bf16 %v4309_v44, %v4307_v15  ;;  %v4059_v60 = vadd.f32 %v4058_v62, %v13633_v25  ;;  %v11830_v44 = vld [vmem:[%s17295_s5 + $0x590] ss:$8 sps:$4 sm:$0xff]   ;;  %v11832_v62 = vld [vmem:[%s17295_s5 + $0x594] ss:$8 sps:$4 sm:$0xff]   ;;  %6699 = vmatpush1.bf16.msra.mxu0 %v11827_v24 }
 0x4a0   : > { %v4060_v61 = vpop.f32.mrf.mxu0  ;;  %5973 = vmatprep.subr.bf16.mxu1 %v11832_v62  ;;  %v11986_v62 = vld [vmem:[%s12134_s27 + $0x50] sm:$0xff]  }
 0x4a1   : > { %v4416_v40 = vpack.c.bf16 %v4310_v55, %v4308_v8  ;;  %v4061_v19 = vadd.f32 %v4060_v61, %v13629_v29  ;;  %v4311_v30 = vmax.f32 %v4059_v60, 0.0  ;;  %5974 = vmatpush2.bf16.msra.mxu1 %v11830_v44 }
 0x4a2   : > { %v4062_v33 = vpop.f32.mrf.mxu0 }
 0x4a3   : > { %v4063_v42 = vadd.f32 %v4062_v33, %v13633_v25  ;;  %4792 = vmatprep.mubr.bf16.mxu1 %v4416_v40  ;;  %v4312_v12 = vmax.f32 %v4061_v19, 0.0 }
 0x4a4   : > { %v4064_v38 = vpop.f32.mrf.mxu0  ;;  %4793 = vmatmul.mubr.bf16.gmra.mxu1 %v4415_v37 }
 0x4a5   : > { %v4065_v52 = vadd.f32 %v4064_v38, %v13629_v29  ;;  %v4313_v3 = vmax.f32 %v4063_v42, 0.0  ;;  %v11983_v42 = vld [vmem:[%s12134_s27 + $0x38] sm:$0xff]  }
 0x4a6   : > { %v4068_v51 = vpop.f32.mrf.mxu0  ;;  %11027 = vmatmul.mubr.msk.bf16.gmra.mxu0 %vm815_vm0, %v11980_v57 }
 0x4a7   : > { %v4314_v50 = vmax.f32 %v4065_v52, 0.0  ;;  %5135 = vmatprep.mubr.bf16.mxu0 %v12028_v2  ;;  %v4417_v43 = vpack.c.bf16 %v4313_v3, %v4311_v30  ;;  %v4069_v45 = vadd.f32 %v4068_v51, %v13633_v25 }
 0x4a8   : > { %v4070_v18 = vpop.f32.mrf.mxu0 }
 0x4a9   : > { %v4418_v4 = vpack.c.bf16 %v4314_v50, %v4312_v12  ;;  %v4071_v7 = vadd.f32 %v4070_v18, %v13629_v29  ;;  %v4315_v17 = vmax.f32 %v4069_v45, 0.0 }
 0x4aa   : > { %v4072_v53 = vpop.f32.mrf.mxu0 }
 0x4ab   : > { %v4073_v21 = vadd.f32 %v4072_v53, %v13633_v25  ;;  %4802 = vmatprep.mubr.bf16.mxu1 %v4418_v4  ;;  %v4316_v48 = vmax.f32 %v4071_v7, 0.0  ;;  %v11833_v7 = vld [vmem:[%s17295_s5 + $0x650] ss:$8 sps:$4 sm:$0xff]  }
 0x4ac   : > { %v4074_v28 = vpop.f32.mrf.mxu0  ;;  %4803 = vmatmul.mubr.bf16.gmra.mxu1 %v4417_v43 }
 0x4ad   : > { %v4075_v58 = vadd.f32 %v4074_v28, %v13629_v29  ;;  %v4317_v49 = vmax.f32 %v4073_v21, 0.0  ;;  %v11835_v21 = vld [vmem:[%s17295_s5 + $0x654] ss:$8 sps:$4 sm:$0xff]  }
 0x4ae   : > { %v4078_v34 = vpop.f32.mrf.mxu0  ;;  %11028 = vmatmul.mubr.msk.bf16.gmra.mxu0 %vm815_vm0, %v11981_v27  ;;  %6700 = vmatprep.subr.bf16.mxu0 %v11835_v21 }
 0x4af   : > { %v4318_v10 = vmax.f32 %v4075_v58, 0.0  ;;  %5145 = vmatprep.mubr.bf16.mxu0 %v12028_v2  ;;  %v4419_v47 = vpack.c.bf16 %v4317_v49, %v4315_v17  ;;  %v4079_v22 = vadd.f32 %v4078_v34, %v13633_v25  ;;  %6701 = vmatpush1.bf16.msra.mxu0 %v11833_v7  ;;  %v11838_v17 = vld [vmem:[%s17295_s5 + $0x584] ss:$8 sps:$4 sm:$0xff]  }
 0x4b0   : > { %v4080_v0 = vpop.f32.mrf.mxu0  ;;  %5975 = vmatprep.subr.bf16.mxu1 %v11838_v17  ;;  %v11842_v17 = vld [vmem:[%s17295_s5 + $0x630] ss:$8 sps:$4 sm:$0xff]  }
 0x4b1   : > { %v4420_v54 = vpack.c.bf16 %v4318_v10, %v4316_v48  ;;  %v4081_v20 = vadd.f32 %v4080_v0, %v13629_v29  ;;  %v4319_v32 = vmax.f32 %v4079_v22, 0.0  ;;  %v11836_v10 = vld [vmem:[%s17295_s5 + $0x580] ss:$8 sps:$4 sm:$0xff]  }
 0x4b2   : > { %v4082_v6 = vpop.f32.mrf.mxu0  ;;  %5976 = vmatpush2.bf16.msra.mxu1 %v11836_v10 }
 0x4b3   : > { %v4083_v1 = vadd.f32 %v4082_v6, %v13633_v25  ;;  %4812 = vmatprep.mubr.bf16.mxu1 %v4420_v54  ;;  %v4320_v63 = vmax.f32 %v4081_v20, 0.0 }
 0x4b4   : > { %v4084_v9 = vpop.f32.mrf.mxu0  ;;  %4813 = vmatmul.mubr.bf16.gmra.mxu1 %v4419_v47 }
 0x4b5   : > { %v4085_v5 = vadd.f32 %v4084_v9, %v13629_v29  ;;  %v4321_v56 = vmax.f32 %v4083_v1, 0.0  ;;  %v11985_v1 = vld [vmem:[%s12134_s27 + $0x48] sm:$0xff]  }
 0x4b6   : > { %v4088_v13 = vpop.f32.mrf.mxu0  ;;  %11029 = vmatmul.mubr.msk.bf16.gmra.mxu0 %vm815_vm0, %v11982_v23 }
 0x4b7   : > { %v4322_v14 = vmax.f32 %v4085_v5, 0.0  ;;  %5155 = vmatprep.mubr.bf16.mxu0 %v12028_v2  ;;  %v4421_v59 = vpack.c.bf16 %v4321_v56, %v4319_v32  ;;  %v4089_v61 = vadd.f32 %v4088_v13, %v13633_v25 }
 0x4b8   : > { %v4090_v16 = vpop.f32.mrf.mxu0 }
 0x4b9   : > { %v4422_v35 = vpack.c.bf16 %v4322_v14, %v4320_v63  ;;  %v4091_v55 = vadd.f32 %v4090_v16, %v13629_v29  ;;  %v4323_v52 = vmax.f32 %v4089_v61, 0.0 }
 0x4ba   : > { %v4092_v8 = vpop.f32.mrf.mxu0 }
 0x4bb   : > { %v4093_v15 = vadd.f32 %v4092_v8, %v13633_v25  ;;  %4822 = vmatprep.mubr.bf16.mxu1 %v4422_v35  ;;  %v4324_v60 = vmax.f32 %v4091_v55, 0.0 }
 0x4bc   : > { %v4094_v40 = vpop.f32.mrf.mxu0  ;;  %4823 = vmatmul.mubr.bf16.gmra.mxu1 %v4421_v59 }
 0x4bd   : > { %v4095_v37 = vadd.f32 %v4094_v40, %v13629_v29  ;;  %v4325_v33 = vmax.f32 %v4093_v15, 0.0  ;;  %v11839_v40 = vld [vmem:[%s17295_s5 + $0x640] ss:$8 sps:$4 sm:$0xff]  }
 0x4be   : > { %v4098_v19 = vpop.f32.mrf.mxu0  ;;  %11030 = vmatmul.mubr.msk.bf16.gmra.mxu0 %vm815_vm0, %v11983_v42 }
 0x4bf   : > { %v4326_v38 = vmax.f32 %v4095_v37, 0.0  ;;  %5165 = vmatprep.mubr.bf16.mxu0 %v12028_v2  ;;  %v4423_v57 = vpack.c.bf16 %v4325_v33, %v4323_v52  ;;  %v4099_v11 = vadd.f32 %v4098_v19, %v13633_v25  ;;  %v11841_v37 = vld [vmem:[%s17295_s5 + $0x644] ss:$8 sps:$4 sm:$0xff]  }
 0x4c0   : > { %v4100_v3 = vpop.f32.mrf.mxu0  ;;  %6702 = vmatprep.subr.bf16.mxu0 %v11841_v37 }
 0x4c1   : > { %v4424_v51 = vpack.c.bf16 %v4326_v38, %v4324_v60  ;;  %v4101_v50 = vadd.f32 %v4100_v3, %v13629_v29  ;;  %v4327_v45 = vmax.f32 %v4099_v11, 0.0  ;;  %6703 = vmatpush1.bf16.msra.mxu0 %v11839_v40 }
 0x4c2   : > { %v4102_v12 = vpop.f32.mrf.mxu0 }
 0x4c3   : > { %v4103_v26 = vadd.f32 %v4102_v12, %v13633_v25  ;;  %4832 = vmatprep.mubr.bf16.mxu1 %v4424_v51  ;;  %v4328_v43 = vmax.f32 %v4101_v50, 0.0  ;;  %v11987_v12 = vld [vmem:[%s12134_s27 + $0x58] sm:$0xff]  }
 0x4c4   : > { %v4104_v30 = vpop.f32.mrf.mxu0  ;;  %4833 = vmatmul.mubr.bf16.gmra.mxu1 %v4423_v57 }
 0x4c5   : > { %v4105_v18 = vadd.f32 %v4104_v30, %v13629_v29  ;;  %v4329_v4 = vmax.f32 %v4103_v26, 0.0 }
 0x4c6   : > { %v4108_v36 = vpop.f32.mrf.mxu0  ;;  %11031 = vmatmul.mubr.msk.bf16.gmra.mxu0 %vm815_vm0, %v11984_v46 }
 0x4c7   : > { %v4330_v53 = vmax.f32 %v4105_v18, 0.0  ;;  %5175 = vmatprep.mubr.bf16.mxu0 %v12028_v2  ;;  %v4425_v49 = vpack.c.bf16 %v4329_v4, %v4327_v45  ;;  %v4109_v0 = vadd.f32 %v4108_v36, %v13633_v25 }
 0x4c8   : > { %v4110_v28 = vpop.f32.mrf.mxu0 }
 0x4c9   : > { %v4426_v58 = vpack.c.bf16 %v4330_v53, %v4328_v43  ;;  %v4111_v27 = vadd.f32 %v4110_v28, %v13629_v29  ;;  %v4331_v5 = vmax.f32 %v4109_v0, 0.0  ;;  %v11844_v0 = vld [vmem:[%s17295_s5 + $0x634] ss:$8 sps:$4 sm:$0xff]  }
 0x4ca   : > { %v4112_v34 = vpop.f32.mrf.mxu0  ;;  %6704 = vmatprep.subr.bf16.mxu0 %v11844_v0 }
 0x4cb   : > { %v4113_v48 = vadd.f32 %v4112_v34, %v13633_v25  ;;  %4842 = vmatprep.mubr.bf16.mxu1 %v4426_v58  ;;  %v4332_v22 = vmax.f32 %v4111_v27, 0.0  ;;  %v11988_v58 = vld [vmem:[%s12134_s27 + $0x60] sm:$0xff]   ;;  %6705 = vmatpush1.bf16.msra.mxu0 %v11842_v17 }
 0x4cc   : > { %v4114_v54 = vpop.f32.mrf.mxu0  ;;  %4843 = vmatmul.mubr.bf16.gmra.mxu1 %v4425_v49 }
 0x4cd   : > { %v4115_v47 = vadd.f32 %v4114_v54, %v13629_v29  ;;  %v4333_v6 = vmax.f32 %v4113_v48, 0.0 }
 0x4ce   : > { %v4118_v20 = vpop.f32.mrf.mxu0  ;;  %11032 = vmatmul.mubr.msk.bf16.gmra.mxu0 %vm815_vm0, %v11985_v1 }
 0x4cf   : > { %v4334_v9 = vmax.f32 %v4115_v47, 0.0  ;;  %5185 = vmatprep.mubr.bf16.mxu0 %v12028_v2  ;;  %v4427_v23 = vpack.c.bf16 %v4333_v6, %v4331_v5  ;;  %v4119_v41 = vadd.f32 %v4118_v20, %v13633_v25 }
 0x4d0   : > { %v4120_v56 = vpop.f32.mrf.mxu0 }
 0x4d1   : > { %v4428_v13 = vpack.c.bf16 %v4334_v9, %v4332_v22  ;;  %v4121_v14 = vadd.f32 %v4120_v56, %v13629_v29  ;;  %v4335_v55 = vmax.f32 %v4119_v41, 0.0 }
 0x4d2   : > { %v4122_v63 = vpop.f32.mrf.mxu0 }
 0x4d3   : > { %v4123_v24 = vadd.f32 %v4122_v63, %v13633_v25  ;;  %4852 = vmatprep.mubr.bf16.mxu1 %v4428_v13  ;;  %v4336_v59 = vmax.f32 %v4121_v14, 0.0  ;;  %v11989_v13 = vld [vmem:[%s12134_s27 + $0x68] sm:$0xff]  }
 0x4d4   : > { %v4124_v32 = vpop.f32.mrf.mxu0  ;;  %4853 = vmatmul.mubr.bf16.gmra.mxu1 %v4427_v23 }
 0x4d5   : > { %v4125_v16 = vadd.f32 %v4124_v32, %v13629_v29  ;;  %v4337_v35 = vmax.f32 %v4123_v24, 0.0 }
 0x4d6   : > { %v4128_v44 = vpop.f32.mrf.mxu0  ;;  %11033 = vmatmul.mubr.msk.bf16.gmra.mxu0 %vm815_vm0, %v11986_v62 }
 0x4d7   : > { %v4338_v8 = vmax.f32 %v4125_v16, 0.0  ;;  %5195 = vmatprep.mubr.bf16.mxu0 %v12028_v2  ;;  %v4429_v33 = vpack.c.bf16 %v4337_v35, %v4335_v55  ;;  %v4129_v38 = vadd.f32 %v4128_v44, %v13633_v25 }
 0x4d8   : > { %v4130_v15 = vpop.f32.mrf.mxu0 }
 0x4d9   : > { %v4430_v61 = vpack.c.bf16 %v4338_v8, %v4336_v59  ;;  %v4131_v42 = vadd.f32 %v4130_v15, %v13629_v29  ;;  %v4339_v11 = vmax.f32 %v4129_v38, 0.0  ;;  %v11847_v38 = vld [vmem:[%s17295_s5 + $0x624] ss:$8 sps:$4 sm:$0xff]  }
 0x4da   : > { %v4132_v19 = vpop.f32.mrf.mxu0  ;;  %6706 = vmatprep.subr.bf16.mxu0 %v11847_v38  ;;  %v11994_v38 = vld [vmem:[%s12134_s27 + $0x90] sm:$0xff]  }
 0x4db   : > { %v4133_v60 = vadd.f32 %v4132_v19, %v13633_v25  ;;  %4862 = vmatprep.mubr.bf16.mxu1 %v4430_v61  ;;  %v4340_v50 = vmax.f32 %v4131_v42, 0.0  ;;  %v11990_v61 = vld [vmem:[%s12134_s27 + $0x70] sm:$0xff]  }
 0x4dc   : > { %v4134_v52 = vpop.f32.mrf.mxu0  ;;  %4863 = vmatmul.mubr.bf16.gmra.mxu1 %v4429_v33 }
 0x4dd   : > { %v4135_v3 = vadd.f32 %v4134_v52, %v13629_v29  ;;  %v4341_v51 = vmax.f32 %v4133_v60, 0.0  ;;  %v11845_v60 = vld [vmem:[%s17295_s5 + $0x620] ss:$8 sps:$4 sm:$0xff]  }
 0x4de   : > { %v4138_v57 = vpop.f32.mrf.mxu0  ;;  %11034 = vmatmul.mubr.msk.bf16.gmra.mxu0 %vm815_vm0, %v11987_v12 }
 0x4df   : > { %v4342_v26 = vmax.f32 %v4135_v3, 0.0  ;;  %5205 = vmatprep.mubr.bf16.mxu0 %v12028_v2  ;;  %v4431_v4 = vpack.c.bf16 %v4341_v51, %v4339_v11  ;;  %v4139_v53 = vadd.f32 %v4138_v57, %v13633_v25  ;;  %6707 = vmatpush1.bf16.msra.mxu0 %v11845_v60 }
 0x4e0   : > { %v4140_v30 = vpop.f32.mrf.mxu0 }
 0x4e1   : > { %v4432_v18 = vpack.c.bf16 %v4342_v26, %v4340_v50  ;;  %v4141_v46 = vadd.f32 %v4140_v30, %v13629_v29  ;;  %v4343_v27 = vmax.f32 %v4139_v53, 0.0 }
 0x4e2   : > { %v4142_v36 = vpop.f32.mrf.mxu0 }
 0x4e3   : > { %v4143_v43 = vadd.f32 %v4142_v36, %v13633_v25  ;;  %4872 = vmatprep.mubr.bf16.mxu1 %v4432_v18  ;;  %v4344_v49 = vmax.f32 %v4141_v46, 0.0  ;;  %v11991_v18 = vld [vmem:[%s12134_s27 + $0x78] sm:$0xff]  }
 0x4e4   : > { %v4144_v7 = vpop.f32.mrf.mxu0  ;;  %4873 = vmatmul.mubr.bf16.gmra.mxu1 %v4431_v4 }
 0x4e5   : > { %v4145_v21 = vadd.f32 %v4144_v7, %v13629_v29  ;;  %v4345_v45 = vmax.f32 %v4143_v43, 0.0 }
 0x4e6   : > { %v4148_v28 = vpop.f32.mrf.mxu0  ;;  %11035 = vmatmul.mubr.msk.bf16.gmra.mxu0 %vm815_vm0, %v11988_v58 }
 0x4e7   : > { %v4346_v34 = vmax.f32 %v4145_v21, 0.0  ;;  %5215 = vmatprep.mubr.bf16.mxu0 %v12028_v2  ;;  %v4433_v54 = vpack.c.bf16 %v4345_v45, %v4343_v27  ;;  %v4149_v1 = vadd.f32 %v4148_v28, %v13633_v25 }
 0x4e8   : > { %v4150_v48 = vpop.f32.mrf.mxu0 }
 0x4e9   : > { %v4434_v10 = vpack.c.bf16 %v4346_v34, %v4344_v49  ;;  %v4151_v6 = vadd.f32 %v4150_v48, %v13629_v29  ;;  %v4347_v14 = vmax.f32 %v4149_v1, 0.0  ;;  %v11850_v1 = vld [vmem:[%s17295_s5 + $0x614] ss:$8 sps:$4 sm:$0xff]  }
 0x4ea   : > { %v4152_v47 = vpop.f32.mrf.mxu0  ;;  %6708 = vmatprep.subr.bf16.mxu0 %v11850_v1 }
 0x4eb   : > { %v4153_v20 = vadd.f32 %v4152_v47, %v13633_v25  ;;  %4882 = vmatprep.mubr.bf16.mxu1 %v4434_v10  ;;  %v4348_v23 = vmax.f32 %v4151_v6, 0.0  ;;  %v11992_v10 = vld [vmem:[%s12134_s27 + $0x80] sm:$0xff]  }
 0x4ec   : > { %v4154_v22 = vpop.f32.mrf.mxu0  ;;  %4883 = vmatmul.mubr.bf16.gmra.mxu1 %v4433_v54 }
 0x4ed   : > { %v4155_v9 = vadd.f32 %v4154_v22, %v13629_v29  ;;  %v4349_v5 = vmax.f32 %v4153_v20, 0.0  ;;  %v11848_v20 = vld [vmem:[%s17295_s5 + $0x610] ss:$8 sps:$4 sm:$0xff]  }
 0x4ee   : > { %v4158_v56 = vpop.f32.mrf.mxu0  ;;  %11036 = vmatmul.mubr.msk.bf16.gmra.mxu0 %vm815_vm0, %v11989_v13 }
 0x4ef   : > { %v4350_v63 = vmax.f32 %v4155_v9, 0.0  ;;  %5225 = vmatprep.mubr.bf16.mxu0 %v12028_v2  ;;  %v4435_v32 = vpack.c.bf16 %v4349_v5, %v4347_v14  ;;  %v4159_v62 = vadd.f32 %v4158_v56, %v13633_v25  ;;  %6709 = vmatpush1.bf16.msra.mxu0 %v11848_v20 }
 0x4f0   : > { %v4160_v24 = vpop.f32.mrf.mxu0 }
 0x4f1   : > { %v4436_v41 = vpack.c.bf16 %v4350_v63, %v4348_v23  ;;  %v4161_v35 = vadd.f32 %v4160_v24, %v13629_v29  ;;  %v4351_v33 = vmax.f32 %v4159_v62, 0.0 }
 0x4f2   : > { %v4162_v16 = vpop.f32.mrf.mxu0 }
 0x4f3   : > { %v4163_v44 = vadd.f32 %v4162_v16, %v13633_v25  ;;  %4892 = vmatprep.mubr.bf16.mxu1 %v4436_v41  ;;  %v4352_v40 = vmax.f32 %v4161_v35, 0.0  ;;  %v11993_v41 = vld [vmem:[%s12134_s27 + $0x88] sm:$0xff]  }
 0x4f4   : > { %v4164_v59 = vpop.f32.mrf.mxu0  ;;  %4893 = vmatmul.mubr.bf16.gmra.mxu1 %v4435_v32 }
 0x4f5   : > { %v4165_v8 = vadd.f32 %v4164_v59, %v13629_v29  ;;  %v4353_v55 = vmax.f32 %v4163_v44, 0.0 }
 0x4f6   : > { %v4168_v15 = vpop.f32.mrf.mxu0  ;;  %11037 = vmatmul.mubr.msk.bf16.gmra.mxu0 %vm815_vm0, %v11990_v61 }
 0x4f7   : > { %v4354_v37 = vmax.f32 %v4165_v8, 0.0  ;;  %5235 = vmatprep.mubr.bf16.mxu0 %v12028_v2  ;;  %v4437_v52 = vpack.c.bf16 %v4353_v55, %v4351_v33  ;;  %v4169_v12 = vadd.f32 %v4168_v15, %v13633_v25 }
 0x4f8   : > { %v4170_v19 = vpop.f32.mrf.mxu0 }
 0x4f9   : > { %v4438_v42 = vpack.c.bf16 %v4354_v37, %v4352_v40  ;;  %v4171_v51 = vadd.f32 %v4170_v19, %v13629_v29  ;;  %v4355_v46 = vmax.f32 %v4169_v12, 0.0 }
 0x4fa   : > { %v4172_v3 = vpop.f32.mrf.mxu0 }
 0x4fb   : > { %v4173_v57 = vadd.f32 %v4172_v3, %v13633_v25  ;;  %4902 = vmatprep.mubr.bf16.mxu1 %v4438_v42  ;;  %v4356_v4 = vmax.f32 %v4171_v51, 0.0 }
 0x4fc   : > { %v4174_v50 = vpop.f32.mrf.mxu0  ;;  %4903 = vmatmul.mubr.bf16.gmra.mxu1 %v4437_v52 }
 0x4fd   : > { %v4175_v26 = vadd.f32 %v4174_v50, %v13629_v29  ;;  %v4357_v11 = vmax.f32 %v4173_v57, 0.0 }
 0x4fe   : > { %v4178_v30 = vpop.f32.mrf.mxu0  ;;  %11038 = vmatmul.mubr.msk.bf16.gmra.mxu0 %vm815_vm0, %v11991_v18 }
 0x4ff   : > { %v4358_v36 = vmax.f32 %v4175_v26, 0.0  ;;  %5245 = vmatprep.mubr.bf16.mxu0 %v12028_v2  ;;  %v4439_v7 = vpack.c.bf16 %v4357_v11, %v4355_v46  ;;  %v4179_v58 = vadd.f32 %v4178_v30, %v13633_v25  ;;  %v11851_v11 = vld [vmem:[%s17295_s5 + $0x600] ss:$8 sps:$4 sm:$0xff]   ;;  %v11853_v30 = vld [vmem:[%s17295_s5 + $0x604] ss:$8 sps:$4 sm:$0xff]  }
 0x500   : > { %v4180_v43 = vpop.f32.mrf.mxu0  ;;  %6710 = vmatprep.subr.bf16.mxu0 %v11853_v30 }
 0x501   : > { %v4440_v53 = vpack.c.bf16 %v4358_v36, %v4356_v4  ;;  %v4181_v45 = vadd.f32 %v4180_v43, %v13629_v29  ;;  %v4359_v54 = vmax.f32 %v4179_v58, 0.0  ;;  %6711 = vmatpush1.bf16.msra.mxu0 %v11851_v11 }
 0x502   : > { %v4182_v21 = vpop.f32.mrf.mxu0 }
 0x503   : > { %v4183_v28 = vadd.f32 %v4182_v21, %v13633_v25  ;;  %4912 = vmatprep.mubr.bf16.mxu1 %v4440_v53  ;;  %v4360_v17 = vmax.f32 %v4181_v45, 0.0 }
 0x504   : > { %v4184_v49 = vpop.f32.mrf.mxu0  ;;  %4913 = vmatmul.mubr.bf16.gmra.mxu1 %v4439_v7 }
 0x505   : > { %v4185_v34 = vadd.f32 %v4184_v49, %v13629_v29  ;;  %v4361_v27 = vmax.f32 %v4183_v28, 0.0  ;;  %v11995_v49 = vld [vmem:[%s12134_s27 + $0x98] sm:$0xff]  }
 0x506   : > { %v4188_v48 = vpop.f32.mrf.mxu0  ;;  %11039 = vmatmul.mubr.msk.bf16.gmra.mxu0 %vm815_vm0, %v11992_v10 }
 0x507   : > { %v4362_v0 = vmax.f32 %v4185_v34, 0.0  ;;  %5255 = vmatprep.mubr.bf16.mxu0 %v12028_v2  ;;  %v4441_v22 = vpack.c.bf16 %v4361_v27, %v4359_v54  ;;  %v4189_v13 = vadd.f32 %v4188_v48, %v13633_v25 }
 0x508   : > { %v4190_v47 = vpop.f32.mrf.mxu0 }
 0x509   : > { %v4442_v6 = vpack.c.bf16 %v4362_v0, %v4360_v17  ;;  %v4191_v5 = vadd.f32 %v4190_v47, %v13629_v29  ;;  %v4363_v35 = vmax.f32 %v4189_v13, 0.0 }
 0x50a   : > { %v4192_v9 = vpop.f32.mrf.mxu0 }
 0x50b   : > { %v4193_v56 = vadd.f32 %v4192_v9, %v13633_v25  ;;  %4922 = vmatprep.mubr.bf16.mxu1 %v4442_v6  ;;  %v4364_v32 = vmax.f32 %v4191_v5, 0.0 }
 0x50c   : > { %v4194_v23 = vpop.f32.mrf.mxu0  ;;  %4923 = vmatmul.mubr.bf16.gmra.mxu1 %v4441_v22 }
 0x50d   : > { %v4195_v63 = vadd.f32 %v4194_v23, %v13629_v29  ;;  %v4365_v14 = vmax.f32 %v4193_v56, 0.0 }
 0x50e   : > { %v4198_v24 = vpop.f32.mrf.mxu0  ;;  %11040 = vmatmul.mubr.msk.bf16.gmra.mxu0 %vm815_vm0, %v11993_v41 }
 0x50f   : > { %v4366_v16 = vmax.f32 %v4195_v63, 0.0  ;;  %5265 = vmatprep.mubr.bf16.mxu0 %v12028_v2  ;;  %v4443_v59 = vpack.c.bf16 %v4365_v14, %v4363_v35  ;;  %v4199_v40 = vadd.f32 %v4198_v24, %v13633_v25  ;;  %v11996_v14 = vld [vmem:[%s12134_s27 + $0xa0] sm:$0xff]  }
 0x510   : > { %v4200_v44 = vpop.f32.mrf.mxu0 }
 0x511   : > { %v4444_v62 = vpack.c.bf16 %v4366_v16, %v4364_v32  ;;  %v4201_v55 = vadd.f32 %v4200_v44, %v13629_v29  ;;  %v4367_v57 = vmax.f32 %v4199_v40, 0.0 }
 0x512   : > { %v4202_v8 = vpop.f32.mrf.mxu0 }
 0x513   : > { %v4203_v15 = vadd.f32 %v4202_v8, %v13633_v25  ;;  %4932 = vmatprep.mubr.bf16.mxu1 %v4444_v62  ;;  %v4368_v52 = vmax.f32 %v4201_v55, 0.0  ;;  %v11856_v8 = vld [vmem:[%s17295_s5 + $0x6f4] ss:$8 sps:$4 sm:$0xff]  }
 0x514   : > { %v13951_v61 = vpop.f32.mrf.mxu1  ;;  %v4204_v37 = vpop.f32.mrf.mxu0  ;;  %4933 = vmatmul.mubr.bf16.gmra.mxu1 %v4443_v59  ;;  %v11854_v59 = vld [vmem:[%s17295_s5 + $0x6f0] ss:$8 sps:$4 sm:$0xff]   ;;  %6712 = vmatprep.subr.bf16.mxu0 %v11856_v8 }
 0x515   : > { %v4205_v33 = vadd.f32 %v4204_v37, %v13629_v29  ;;  %v4369_v42 = vmax.f32 %v4203_v15, 0.0  ;;  %6713 = vmatpush2.bf16.msra.mxu0 %v11854_v59 }
 0x516   : > { %v13955_v19 = vpop.f32.mrf.mxu1  ;;  %v4208_v60 = vpop.f32.mrf.mxu0  ;;  %11041 = vmatmul.mubr.msk.bf16.gmra.mxu0 %vm815_vm0, %v11994_v38 }
 0x517   : > { %v4370_v3 = vmax.f32 %v4205_v33, 0.0  ;;  %5275 = vmatprep.mubr.bf16.mxu0 %v12028_v2  ;;  %v4445_v18 = vpack.c.bf16 %v4369_v42, %v4367_v57  ;;  %v4209_v53 = vadd.f32 %v4208_v60, %v13633_v25 }
 0x518   : > { %v13959_v51 = vpop.f32.mrf.mxu1  ;;  %v4210_v12 = vpop.f32.mrf.mxu0 }
 0x519   : > { %v4446_v26 = vpack.c.bf16 %v4370_v3, %v4368_v52  ;;  %v4211_v36 = vadd.f32 %v4210_v12, %v13629_v29  ;;  %v4371_v10 = vmax.f32 %v4209_v53, 0.0  ;;  %v11997_v12 = vld [vmem:[%s12134_s27 + $0xa8] sm:$0xff]  }
 0x51a   : > { %v13962_v50 = vpop.f32.mrf.mxu1  ;;  %v4212_v4 = vpop.f32.mrf.mxu0 }
 0x51b   : > { %v4213_v46 = vadd.f32 %v4212_v4, %v13633_v25  ;;  %4942 = vmatprep.mubr.bf16.mxu1 %v4446_v26  ;;  %v4372_v34 = vmax.f32 %v4211_v36, 0.0 }
 0x51c   : > { %v13972_v43 = vpop.f32.mrf.mxu1  ;;  %v4214_v7 = vpop.f32.mrf.mxu0  ;;  %4943 = vmatmul.mubr.bf16.gmra.mxu1 %v4445_v18 }
 0x51d   : > { %v4215_v21 = vadd.f32 %v4214_v7, %v13629_v29  ;;  %v4373_v28 = vmax.f32 %v4213_v46, 0.0 }
 0x51e   : > { %v13976_v45 = vpop.f32.mrf.mxu1  ;;  %v4218_v58 = vpop.f32.mrf.mxu0  ;;  %11042 = vmatmul.mubr.msk.bf16.gmra.mxu0 %vm815_vm0, %v11995_v49 }
 0x51f   : > { %v4374_v27 = vmax.f32 %v4215_v21, 0.0  ;;  %5285 = vmatprep.mubr.bf16.mxu0 %v12028_v2  ;;  %v4447_v47 = vpack.c.bf16 %v4373_v28, %v4371_v10  ;;  %v4219_v9 = vadd.f32 %v4218_v58, %v13633_v25 }
 0x520   : > { %v13980_v48 = vpop.f32.mrf.mxu1  ;;  %v4220_v17 = vpop.f32.mrf.mxu0 }
 0x521   : > { %v4448_v54 = vpack.c.bf16 %v4374_v27, %v4372_v34  ;;  %v4221_v20 = vadd.f32 %v4220_v17, %v13629_v29  ;;  %v4375_v16 = vmax.f32 %v4219_v9, 0.0 }
 0x522   : > { %v13983_v0 = vpop.f32.mrf.mxu1  ;;  %v4222_v6 = vpop.f32.mrf.mxu0 }
 0x523   : > { %v4223_v1 = vadd.f32 %v4222_v6, %v13633_v25  ;;  %4952 = vmatprep.mubr.bf16.mxu1 %v4448_v54  ;;  %v4376_v24 = vmax.f32 %v4221_v20, 0.0 }
 0x524   : > { %v13987_v22 = vpop.f32.mrf.mxu1  ;;  %v4224_v5 = vpop.f32.mrf.mxu0  ;;  %4953 = vmatmul.mubr.bf16.gmra.mxu1 %v4447_v47  ;;  %v11998_v47 = vld [vmem:[%s12134_s27 + $0xb0] sm:$0xff]  }
 0x525   : > { %v4225_v56 = vadd.f32 %v4224_v5, %v13629_v29  ;;  %v4377_v23 = vmax.f32 %v4223_v1, 0.0 }
 0x526   : > { %v13991_v13 = vpop.f32.mrf.mxu1  ;;  %v4228_v63 = vpop.f32.mrf.mxu0  ;;  %11043 = vmatmul.mubr.msk.bf16.gmra.mxu0 %vm815_vm0, %v11996_v14  ;;  %v11859_v14 = vld [vmem:[%s17295_s5 + $0x6e4] ss:$8 sps:$4 sm:$0xff]  }
 0x527   : > { %v4378_v41 = vmax.f32 %v4225_v56, 0.0  ;;  %5295 = vmatprep.mubr.bf16.mxu0 %v12028_v2  ;;  %v4449_v55 = vpack.c.bf16 %v4377_v23, %v4375_v16  ;;  %v4229_v42 = vadd.f32 %v4228_v63, %v13633_v25  ;;  %v11857_v63 = vld [vmem:[%s17295_s5 + $0x6e0] ss:$8 sps:$4 sm:$0xff]   ;;  %6714 = vmatprep.subr.bf16.mxu0 %v11859_v14  ;;  %v11860_v14 = vld [vmem:[%s17295_s5 + $0x6d0] ss:$8 sps:$4 sm:$0xff]  }
 0x528   : > { %v13995_v32 = vpop.f32.mrf.mxu1  ;;  %v4230_v35 = vpop.f32.mrf.mxu0  ;;  %6715 = vmatpush2.bf16.msra.mxu0 %v11857_v63 }
 0x529   : > { %v4450_v62 = vpack.c.bf16 %v4378_v41, %v4376_v24  ;;  %v4231_v40 = vadd.f32 %v4230_v35, %v13629_v29  ;;  %v4379_v18 = vmax.f32 %v4229_v42, 0.0  ;;  %v11999_v42 = vld [vmem:[%s12134_s27 + $0xb8] sm:$0xff]  }
 0x52a   : > { %v13998_v44 = vpop.f32.mrf.mxu1  ;;  %v4232_v15 = vpop.f32.mrf.mxu0 }
 0x52b   : > { %v4233_v37 = vadd.f32 %v4232_v15, %v13633_v25  ;;  %4962 = vmatprep.mubr.bf16.mxu1 %v4450_v62  ;;  %v4380_v26 = vmax.f32 %v4231_v40, 0.0 }
 0x52c   : > { %v14008_v33 = vpop.f32.mrf.mxu1  ;;  %v4234_v60 = vpop.f32.mrf.mxu0  ;;  %4963 = vmatmul.mubr.bf16.gmra.mxu1 %v4449_v55 }
 0x52d   : > { %v4235_v38 = vadd.f32 %v4234_v60, %v13629_v29  ;;  %v4381_v3 = vmax.f32 %v4233_v37, 0.0 }
 0x52e   : > { %v14012_v52 = vpop.f32.mrf.mxu1  ;;  %v4238_v57 = vpop.f32.mrf.mxu0  ;;  %11044 = vmatmul.mubr.msk.bf16.gmra.mxu0 %vm815_vm0, %v11997_v12 }
 0x52f   : > { %v4382_v11 = vmax.f32 %v4235_v38, 0.0  ;;  %5305 = vmatprep.mubr.bf16.mxu0 %v12028_v2  ;;  %v4451_v53 = vpack.c.bf16 %v4381_v3, %v4379_v18  ;;  %v4239_v49 = vadd.f32 %v4238_v57, %v13633_v25 }
 0x530   : > { %v14016_v30 = vpop.f32.mrf.mxu1  ;;  %v4240_v4 = vpop.f32.mrf.mxu0 }
 0x531   : > { %v4452_v46 = vpack.c.bf16 %v4382_v11, %v4380_v26  ;;  %v4241_v21 = vadd.f32 %v4240_v4, %v13629_v29  ;;  %v4383_v9 = vmax.f32 %v4239_v49, 0.0 }
 0x532   : > { %v14019_v36 = vpop.f32.mrf.mxu1  ;;  %v4242_v7 = vpop.f32.mrf.mxu0 }
 0x533   : > { %v4243_v28 = vadd.f32 %v4242_v7, %v13633_v25  ;;  %4972 = vmatprep.mubr.bf16.mxu1 %v4452_v46  ;;  %v4384_v6 = vmax.f32 %v4241_v21, 0.0 }
 0x534   : > { %v14023_v58 = vpop.f32.mrf.mxu1  ;;  %v4244_v34 = vpop.f32.mrf.mxu0  ;;  %4973 = vmatmul.mubr.bf16.gmra.mxu1 %v4451_v53 }
 0x535   : > { %v4245_v27 = vadd.f32 %v4244_v34, %v13629_v29  ;;  %v4385_v17 = vmax.f32 %v4243_v28, 0.0 }
 0x536   : > { %v14027_v10 = vpop.f32.mrf.mxu1  ;;  %v4248_v54 = vpop.f32.mrf.mxu0  ;;  %11045 = vmatmul.mubr.msk.bf16.gmra.mxu0 %vm815_vm0, %v11998_v47 }
 0x537   : > { %v4386_v20 = vmax.f32 %v4245_v27, 0.0  ;;  %5315 = vmatprep.mubr.bf16.mxu0 %v12028_v2  ;;  %v4453_v24 = vpack.c.bf16 %v4385_v17, %v4383_v9  ;;  %v4249_v62 = vadd.f32 %v4248_v54, %v13633_v25  ;;  %v12000_v54 = vld [vmem:[%s12134_s27 + $0xc0] sm:$0xff]  }
 0x538   : > { %v14031_v1 = vpop.f32.mrf.mxu1  ;;  %v4250_v5 = vpop.f32.mrf.mxu0 }
 0x539   : > { %v4454_v23 = vpack.c.bf16 %v4386_v20, %v4384_v6  ;;  %v4251_v16 = vadd.f32 %v4250_v5, %v13629_v29  ;;  %v4387_v3 = vmax.f32 %v4249_v62, 0.0  ;;  %v11055_v20 = vld [vmem:[%s17296_s6 + $0x4] ss:$8 sm:$0x3] }
 0x53a   : > { %v14034_v56 = vpop.f32.mrf.mxu1  ;;  %v4252_v41 = vpop.f32.mrf.mxu0 }
 0x53b   : > { %v4253_v35 = vadd.f32 %v4252_v41, %v13633_v25  ;;  %4982 = vmatprep.mubr.bf16.mxu1 %v4454_v23  ;;  %v4388_v60 = vmax.f32 %v4251_v16, 0.0  ;;  %v14075_v23 = vrot.slane %v11055_v20, %v12357_v31 }
 0x53c   : > { %v4254_v59 = vpop.f32.mrf.mxu0  ;;  %v14045_v8 = vpop.f32.mrf.mxu1  ;;  %4983 = vmatmul.mubr.bf16.gmra.mxu1 %v4453_v24  ;;  %v11862_v24 = vld [vmem:[%s17295_s5 + $0x6d4] ss:$8 sps:$4 sm:$0xff]  }
 0x53d   : > { %v4255_v55 = vadd.f32 %v4254_v59, %v13629_v29  ;;  %v4389_v15 = vmax.f32 %v4253_v35, 0.0  ;;  %v14085_v35 = vrot.slane %v11055_v20, %v12374_v39  ;;  %6716 = vmatprep.subr.bf16.mxu0 %v11862_v24 }
 0x53e   : > { %v4258_v40 = vpop.f32.mrf.mxu0  ;;  %v14048_v37 = vpop.f32.mrf.mxu1  ;;  %11046 = vmatmul.mubr.msk.bf16.gmra.mxu0 %vm815_vm0, %v11999_v42 }
 0x53f   : > { %v4390_v38 = vmax.f32 %v4255_v55, 0.0  ;;  %5325 = vmatprep.mubr.bf16.mxu0 %v12028_v2  ;;  %v4455_v11 = vpack.c.bf16 %v4389_v15, %v4387_v3  ;;  %v4259_v7 = vadd.f32 %v4258_v40, %v13633_v25  ;;  %6717 = vmatpush2.bf16.msra.mxu0 %v11860_v14  ;;  %v12002_v14 = vld [vmem:[%s12134_s27 + $0xd0] sm:$0xff]  }
 0x540   : > { %v4260_v57 = vpop.f32.mrf.mxu0  ;;  %v14053_v12 = vpop.f32.mrf.mxu1 }
 0x541   : > { %v4456_v26 = vpack.c.bf16 %v4390_v38, %v4388_v60  ;;  %v4261_v46 = vadd.f32 %v4260_v57, %v13629_v29  ;;  %v12001_v57 = vld [vmem:[%s12134_s27 + $0xc8] sm:$0xff]  }
 0x542   : > { %v4262_v18 = vpop.f32.mrf.mxu0  ;;  %v14055_v4 = vpop.f32.mrf.mxu1 }
 0x543   : > { %v4263_v53 = vadd.f32 %v4262_v18, %v13633_v25  ;;  %4992 = vmatprep.mubr.bf16.mxu1 %v4456_v26  ;;  %v4392_v47 = vmax.f32 %v4261_v46, 0.0  ;;  %v4391_v25 = vmax.f32 %v4259_v7, 0.0 }
 0x544   : > { %v4264_v21 = vpop.f32.mrf.mxu0  ;;  %v14060_v28 = vpop.f32.mrf.mxu1  ;;  %4993 = vmatmul.mubr.bf16.gmra.mxu1 %v4455_v11 }
 0x545   : > { %v4265_v49 = vadd.f32 %v4264_v21, %v13629_v29  ;;  %v4393_v34 = vmax.f32 %v4263_v53, 0.0 }
 0x546   : > { %v14063_v27 = vpop.f32.mrf.mxu1  ;;  %v5087_v17 = vpop.f32.mrf.mxu0  ;;  %11047 = vmatmul.mubr.msk.bf16.gmra.mxu0 %vm815_vm0, %v12000_v54 }
 0x547   : > { %v4394_v6 = vmax.f32 %v4265_v49, 0.0  ;;  %5335 = vmatprep.mubr.bf16.mxu0 %v12028_v2  ;;  %v4457_v41 = vpack.c.bf16 %v4393_v34, %v4391_v25  ;;  %v5088_v16 = vadd.f32 %v5087_v17, %v13951_v61 }
 0x548   : > { %v14071_v9 = vpop.f32.mrf.mxu1  ;;  %v5089_v5 = vpop.f32.mrf.mxu0 }
 0x549   : > { %v5090_v29 = vadd.f32 %v5089_v5, %v13955_v19  ;;  %v4458_v63 = vpack.c.bf16 %v4394_v6, %v4392_v47  ;;  %v5419_v60 = vadd.f32 %v14085_v35, %v5088_v16 }
 0x54a   : > { %v14087_v19 = vpop.f32.mrf.mxu1  ;;  %v5091_v62 = vpop.f32.mrf.mxu0 }
 0x54b   : > { %v5092_v59 = vadd.f32 %v5091_v62, %v13959_v51  ;;  %5002 = vmatprep.mubr.bf16.mxu1 %v4458_v63  ;;  %v5420_v40 = vadd.f32 %v14075_v23, %v5090_v29  ;;  %v5547_v7 = vmax.f32 %v5419_v60, 0.0 }
 0x54c   : > { %v14090_v55 = vpop.f32.mrf.mxu1  ;;  %5003 = vmatmul.mubr.bf16.gmra.mxu1 %v4457_v41  ;;  %v5093_v15 = vpop.f32.mrf.mxu0 }
 0x54d   : > { %v5421_v61 = vadd.f32 %v14085_v35, %v5092_v59  ;;  %v5094_v42 = vadd.f32 %v5093_v15, %v13962_v50  ;;  %v5548_v46 = vmax.f32 %v5420_v40, 0.0  ;;  %v11863_v15 = vld [vmem:[%s17295_s5 + $0x6c0] ss:$8 sps:$4 sm:$0xff]   ;;  %v11865_v40 = vld [vmem:[%s17295_s5 + $0x6c4] ss:$8 sps:$4 sm:$0xff]  }
 0x54e   : > { %v14096_v38 = vpop.f32.mrf.mxu1  ;;  %v5097_v3 = vpop.f32.mrf.mxu0  ;;  %11048 = vmatmul.mubr.msk.bf16.gmra.mxu0 %vm815_vm0, %v12001_v57  ;;  %6718 = vmatprep.subr.bf16.mxu0 %v11865_v40 }
 0x54f   : > { %v5422_v51 = vadd.f32 %v14075_v23, %v5094_v42  ;;  %5345 = vmatprep.mubr.bf16.mxu0 %v12028_v2  ;;  %v5549_v26 = vmax.f32 %v5421_v61, 0.0  ;;  %v5098_v21 = vadd.f32 %v5097_v3, %v13972_v43  ;;  %6719 = vmatpush2.bf16.msra.mxu0 %v11863_v15 }
 0x550   : > { %v14102_v11 = vpop.f32.mrf.mxu1  ;;  %v5099_v18 = vpop.f32.mrf.mxu0 }
 0x551   : > { %v5550_v53 = vmax.f32 %v5422_v51, 0.0  ;;  %v5100_v50 = vadd.f32 %v5099_v18, %v13976_v45  ;;  %v5675_v47 = vpack.c.bf16 %v5549_v26, %v5547_v7  ;;  %v5423_v29 = vadd.f32 %v14085_v35, %v5098_v21 }
 0x552   : > { %v14106_v49 = vpop.f32.mrf.mxu1  ;;  %v5101_v34 = vpop.f32.mrf.mxu0 }
 0x553   : > { %v5102_v17 = vadd.f32 %v5101_v34, %v13980_v48  ;;  %v5676_v54 = vpack.c.bf16 %v5550_v53, %v5548_v46  ;;  %v5424_v25 = vadd.f32 %v14075_v23, %v5100_v50  ;;  %v5551_v61 = vmax.f32 %v5423_v29, 0.0 }
 0x554   : > { %v14109_v6 = vpop.f32.mrf.mxu1  ;;  %v5103_v20 = vpop.f32.mrf.mxu0 }
 0x555   : > { %v5425_v5 = vadd.f32 %v14085_v35, %v5102_v17  ;;  %v5104_v45 = vadd.f32 %v5103_v20, %v13983_v0  ;;  %5977 = vmatprep.mubr.bf16.mxu1 %v5676_v54  ;;  %v5552_v62 = vmax.f32 %v5424_v25, 0.0 }
 0x556   : > { %v14115_v43 = vpop.f32.mrf.mxu1  ;;  %v5107_v63 = vpop.f32.mrf.mxu0  ;;  %11049 = vmatmul.mubr.msk.bf16.gmra.mxu0 %vm815_vm0, %v12002_v14  ;;  %5978 = vmatmul.mubr.bf16.vlgmr.msra.gmra.mxu1 %v5675_v47 }
 0x557   : > { %v5426_v48 = vadd.f32 %v14075_v23, %v5104_v45  ;;  %5355 = vmatprep.mubr.bf16.mxu0 %v12028_v2  ;;  %v5553_v24 = vmax.f32 %v5425_v5, 0.0  ;;  %v5108_v42 = vadd.f32 %v5107_v63, %v13987_v22 }
 0x558   : > { %v14121_v41 = vpop.f32.mrf.mxu1  ;;  %v5109_v16 = vpop.f32.mrf.mxu0 }
 0x559   : > { %v5554_v0 = vmax.f32 %v5426_v48, 0.0  ;;  %v5110_v59 = vadd.f32 %v5109_v16, %v13991_v13  ;;  %v5677_v13 = vpack.c.bf16 %v5553_v24, %v5551_v61  ;;  %v5427_v22 = vadd.f32 %v14085_v35, %v5108_v42  ;;  %v12004_v61 = vld [vmem:[%s12134_s27 + $0xe0] sm:$0xff]  }
 0x55a   : > { %v14131_v60 = vpop.f32.mrf.mxu1  ;;  %v5111_v3 = vpop.f32.mrf.mxu0 }
 0x55b   : > { %v5112_v57 = vadd.f32 %v5111_v3, %v13995_v32  ;;  %v5678_v51 = vpack.c.bf16 %v5554_v0, %v5552_v62  ;;  %v5428_v46 = vadd.f32 %v14075_v23, %v5110_v59  ;;  %v12003_v32 = vld [vmem:[%s12134_s27 + $0xd8] sm:$0xff]   ;;  %v5555_v5 = vmax.f32 %v5427_v22, 0.0 }
 0x55c   : > { %v14134_v26 = vpop.f32.mrf.mxu1  ;;  %v5113_v18 = vpop.f32.mrf.mxu0 }
 0x55d   : > { %v5429_v53 = vadd.f32 %v14085_v35, %v5112_v57  ;;  %v5114_v50 = vadd.f32 %v5113_v18, %v13998_v44  ;;  %5987 = vmatprep.mubr.bf16.mxu1 %v5678_v51  ;;  %v5556_v20 = vmax.f32 %v5428_v46, 0.0  ;;  %v11866_v18 = vld [vmem:[%s17295_s5 + $0x6b0] ss:$8 sps:$4 sm:$0xff]   ;;  %v11868_v46 = vld [vmem:[%s17295_s5 + $0x6b4] ss:$8 sps:$4 sm:$0xff]  }
 0x55e   : > { %v14140_v7 = vpop.f32.mrf.mxu1  ;;  %v5117_v21 = vpop.f32.mrf.mxu0  ;;  %11050 = vmatmul.mubr.msk.bf16.gmra.mxu0 %vm815_vm0, %v12003_v32  ;;  %5988 = vmatmul.mubr.bf16.gmra.mxu1 %v5677_v13 }
 0x55f   : > { %v5430_v34 = vadd.f32 %v14075_v23, %v5114_v50  ;;  %5365 = vmatprep.mubr.bf16.mxu0 %v12028_v2  ;;  %v5557_v17 = vmax.f32 %v5429_v53, 0.0  ;;  %v5118_v45 = vadd.f32 %v5117_v21, %v14008_v33  ;;  %6720 = vmatprep.subr.bf16.mxu0 %v11868_v46 }
 0x560   : > { %v14146_v54 = vpop.f32.mrf.mxu1  ;;  %v5119_v47 = vpop.f32.mrf.mxu0  ;;  %6721 = vmatpush2.bf16.msra.mxu0 %v11866_v18 }
 0x561   : > { %v5558_v44 = vmax.f32 %v5430_v34, 0.0  ;;  %v5120_v25 = vadd.f32 %v5119_v47, %v14012_v52  ;;  %v5679_v24 = vpack.c.bf16 %v5557_v17, %v5555_v5  ;;  %v5431_v15 = vadd.f32 %v14085_v35, %v5118_v45 }
 0x562   : > { %v14150_v29 = vpop.f32.mrf.mxu1  ;;  %v5121_v63 = vpop.f32.mrf.mxu0 }
 0x563   : > { %v5122_v14 = vadd.f32 %v5121_v63, %v14016_v30  ;;  %v5680_v48 = vpack.c.bf16 %v5558_v44, %v5556_v20  ;;  %v5432_v0 = vadd.f32 %v14075_v23, %v5120_v25  ;;  %v5559_v53 = vmax.f32 %v5431_v15, 0.0 }
 0x564   : > { %v14153_v16 = vpop.f32.mrf.mxu1  ;;  %v5123_v62 = vpop.f32.mrf.mxu0 }
 0x565   : > { %v5433_v59 = vadd.f32 %v14085_v35, %v5122_v14  ;;  %v5124_v52 = vadd.f32 %v5123_v62, %v14019_v36  ;;  %5997 = vmatprep.mubr.bf16.mxu1 %v5680_v48  ;;  %v5560_v51 = vmax.f32 %v5432_v0, 0.0 }
 0x566   : > { %v14159_v33 = vpop.f32.mrf.mxu1  ;;  %v5127_v40 = vpop.f32.mrf.mxu0  ;;  %11051 = vmatmul.mubr.msk.bf16.gmra.mxu0 %vm815_vm0, %v12004_v61  ;;  %5998 = vmatmul.mubr.bf16.gmra.mxu1 %v5679_v24 }
 0x567   : > { %v5434_v30 = vadd.f32 %v14075_v23, %v5124_v52  ;;  %5375 = vmatprep.mubr.bf16.mxu0 %v12028_v2  ;;  %v5561_v42 = vmax.f32 %v5433_v59, 0.0  ;;  %v5128_v50 = vadd.f32 %v5127_v40, %v14023_v58 }
 0x568   : > { %v14165_v3 = vpop.f32.mrf.mxu1  ;;  %v5129_v57 = vpop.f32.mrf.mxu0 }
 0x569   : > { %v5562_v36 = vmax.f32 %v5434_v30, 0.0  ;;  %v5130_v13 = vadd.f32 %v5129_v57, %v14027_v10  ;;  %v5681_v10 = vpack.c.bf16 %v5561_v42, %v5559_v53  ;;  %v5435_v58 = vadd.f32 %v14085_v35, %v5128_v50  ;;  %v12006_v53 = vld [vmem:[%s12134_s27 + $0xf0] sm:$0xff]  }
 0x56a   : > { %v14175_v22 = vpop.f32.mrf.mxu1  ;;  %v5131_v21 = vpop.f32.mrf.mxu0 }
 0x56b   : > { %v5132_v32 = vadd.f32 %v5131_v21, %v14031_v1  ;;  %v5682_v34 = vpack.c.bf16 %v5562_v36, %v5560_v51  ;;  %v5436_v20 = vadd.f32 %v14075_v23, %v5130_v13  ;;  %v12005_v1 = vld [vmem:[%s12134_s27 + $0xe8] sm:$0xff]   ;;  %v5563_v59 = vmax.f32 %v5435_v58, 0.0 }
 0x56c   : > { %v14178_v17 = vpop.f32.mrf.mxu1  ;;  %v5133_v47 = vpop.f32.mrf.mxu0 }
 0x56d   : > { %v5437_v44 = vadd.f32 %v14085_v35, %v5132_v32  ;;  %v5134_v25 = vadd.f32 %v5133_v47, %v14034_v56  ;;  %6007 = vmatprep.mubr.bf16.mxu1 %v5682_v34  ;;  %v5564_v62 = vmax.f32 %v5436_v20, 0.0  ;;  %v11869_v47 = vld [vmem:[%s17295_s5 + $0x770] ss:$8 sps:$4 sm:$0xff]   ;;  %v11871_v20 = vld [vmem:[%s17295_s5 + $0x774] ss:$8 sps:$4 sm:$0xff]  }
 0x56e   : > { %v14184_v5 = vpop.f32.mrf.mxu1  ;;  %v5137_v45 = vpop.f32.mrf.mxu0  ;;  %11052 = vmatmul.mubr.msk.bf16.gmra.mxu0 %vm815_vm0, %v12005_v1  ;;  %6008 = vmatmul.mubr.bf16.gmra.mxu1 %v5681_v10  ;;  %v11872_v1 = vld [vmem:[%s17295_s5 + $0x6a0] ss:$8 sps:$4 sm:$0xff]  }
 0x56f   : > { %v5438_v63 = vadd.f32 %v14075_v23, %v5134_v25  ;;  %5385 = vmatprep.mubr.bf16.mxu0 %v12028_v2  ;;  %v5565_v14 = vmax.f32 %v5437_v44, 0.0  ;;  %v5138_v52 = vadd.f32 %v5137_v45, %v14045_v8  ;;  %7447 = vmatprep.subr.bf16.mxu1 %v11871_v20 }
 0x570   : > { %v14190_v48 = vpop.f32.mrf.mxu1  ;;  %v5139_v24 = vpop.f32.mrf.mxu0  ;;  %7448 = vmatpush1.bf16.msra.mxu1 %v11869_v47 }
 0x571   : > { %v5566_v56 = vmax.f32 %v5438_v63, 0.0  ;;  %v5140_v0 = vadd.f32 %v5139_v24, %v14048_v37  ;;  %v5683_v42 = vpack.c.bf16 %v5565_v14, %v5563_v59  ;;  %v5439_v18 = vadd.f32 %v14085_v35, %v5138_v52 }
 0x572   : > { %v14194_v15 = vpop.f32.mrf.mxu1  ;;  %v5141_v40 = vpop.f32.mrf.mxu0 }
 0x573   : > { %v5142_v61 = vadd.f32 %v5141_v40, %v14053_v12  ;;  %v5684_v30 = vpack.c.bf16 %v5566_v56, %v5564_v62  ;;  %v5440_v36 = vadd.f32 %v14075_v23, %v5140_v0  ;;  %v5567_v44 = vmax.f32 %v5439_v18, 0.0 }
 0x574   : > { %v14197_v57 = vpop.f32.mrf.mxu1  ;;  %v5143_v51 = vpop.f32.mrf.mxu0 }
 0x575   : > { %v5441_v13 = vadd.f32 %v14085_v35, %v5142_v61  ;;  %v5144_v37 = vadd.f32 %v5143_v51, %v14055_v4  ;;  %6017 = vmatprep.mubr.bf16.mxu1 %v5684_v30  ;;  %v5568_v34 = vmax.f32 %v5440_v36, 0.0  ;;  %v12007_v61 = vld [vmem:[%s12134_s27 + $0xf8] sm:$0xff]  }
 0x576   : > { %v14203_v8 = vpop.f32.mrf.mxu1  ;;  %v5147_v46 = vpop.f32.mrf.mxu0  ;;  %11053 = vmatmul.mubr.msk.bf16.gmra.mxu0 %vm815_vm0, %v12006_v53  ;;  %6018 = vmatmul.mubr.bf16.gmra.mxu1 %v5683_v42 }
 0x577   : > { %v5442_v12 = vadd.f32 %v14075_v23, %v5144_v37  ;;  %5395 = vmatprep.mubr.bf16.mxu0 %v12028_v2  ;;  %v5569_v50 = vmax.f32 %v5441_v13, 0.0  ;;  %v5148_v25 = vadd.f32 %v5147_v46, %v14060_v28 }
 0x578   : > { %v14209_v21 = vpop.f32.mrf.mxu1  ;;  %v5149_v32 = vpop.f32.mrf.mxu0 }
 0x579   : > { %v5570_v4 = vmax.f32 %v5442_v12, 0.0  ;;  %v5150_v10 = vadd.f32 %v5149_v32, %v14063_v27  ;;  %v11874_v27 = vld [vmem:[%s17295_s5 + $0x6a4] ss:$8 sps:$4 sm:$0xff]   ;;  %v5685_v24 = vpack.c.bf16 %v5569_v50, %v5567_v44  ;;  %v5443_v52 = vadd.f32 %v14085_v35, %v5148_v25 }
 0x57a   : > { %v14219_v58 = vpop.f32.mrf.mxu1  ;;  %v5151_v45 = vpop.f32.mrf.mxu0  ;;  %6722 = vmatprep.subr.bf16.mxu0 %v11874_v27 }
 0x57b   : > { %v5152_v63 = vadd.f32 %v5151_v45, %v14071_v9  ;;  %v5686_v14 = vpack.c.bf16 %v5570_v4, %v5568_v34  ;;  %v5444_v56 = vadd.f32 %v14075_v23, %v5150_v10  ;;  %6723 = vmatpush2.bf16.msra.mxu0 %v11872_v1  ;;  %v5571_v18 = vmax.f32 %v5443_v52, 0.0 }
 0x57c   : > { %v14228_v62 = vpop.f32.mrf.mxu1  ;;  %v5153_v28 = vpop.f32.mrf.mxu0 }
 0x57d   : > { %v5445_v0 = vadd.f32 %v14085_v35, %v5152_v63  ;;  %v5154_v59 = vadd.f32 %v5153_v28, %v14087_v19  ;;  %6027 = vmatprep.mubr.bf16.mxu1 %v5686_v14  ;;  %v5572_v13 = vmax.f32 %v5444_v56, 0.0  ;;  %v11877_v28 = vld [vmem:[%s17295_s5 + $0x764] ss:$8 sps:$4 sm:$0xff]  }
 0x57e   : > { %v14234_v9 = vpop.f32.mrf.mxu1  ;;  %v5157_v40 = vpop.f32.mrf.mxu0  ;;  %11054 = vmatmul.mubr.msk.bf16.gmra.mxu0 %vm815_vm0, %v12007_v61  ;;  %6028 = vmatmul.mubr.bf16.gmra.mxu1 %v5685_v24 }
 0x57f   : > { %v5446_v30 = vadd.f32 %v14075_v23, %v5154_v59  ;;  %v5573_v42 = vmax.f32 %v5445_v0, 0.0  ;;  %v5158_v46 = vadd.f32 %v5157_v40, %v14090_v55  ;;  %v11878_v40 = vld [vmem:[%s17295_s5 + $0x690] ss:$8 sps:$4 sm:$0xff]   ;;  %7449 = vmatprep.subr.bf16.mxu1 %v11877_v28 }
 0x580   : > { %v14239_v51 = vpop.f32.mrf.mxu1  ;;  %v5159_v36 = vpop.f32.mrf.mxu0 }
 0x581   : > { %v5574_v37 = vmax.f32 %v5446_v30, 0.0  ;;  %v5160_v19 = vadd.f32 %v5159_v36, %v14096_v38  ;;  %v5687_v34 = vpack.c.bf16 %v5573_v42, %v5571_v18  ;;  %v5447_v38 = vadd.f32 %v14085_v35, %v5158_v46 }
 0x582   : > { %v14243_v53 = vpop.f32.mrf.mxu1  ;;  %v5161_v12 = vpop.f32.mrf.mxu0 }
 0x583   : > { %v5162_v50 = vadd.f32 %v5161_v12, %v14102_v11  ;;  %v5688_v32 = vpack.c.bf16 %v5574_v37, %v5572_v13  ;;  %v5448_v47 = vadd.f32 %v14075_v23, %v5160_v19  ;;  %v5575_v56 = vmax.f32 %v5447_v38, 0.0 }
 0x584   : > { %v14246_v4 = vpop.f32.mrf.mxu1  ;;  %v5163_v10 = vpop.f32.mrf.mxu0 }
 0x585   : > { %v5449_v20 = vadd.f32 %v14085_v35, %v5162_v50  ;;  %v5164_v44 = vadd.f32 %v5163_v10, %v14106_v49  ;;  %6037 = vmatprep.mubr.bf16.mxu1 %v5688_v32  ;;  %v5576_v63 = vmax.f32 %v5448_v47, 0.0  ;;  %v11875_v49 = vld [vmem:[%s17295_s5 + $0x760] ss:$8 sps:$4 sm:$0xff]  }
 0x586   : > { %v14252_v55 = vpop.f32.mrf.mxu1  ;;  %v5167_v25 = vpop.f32.mrf.mxu0  ;;  %6038 = vmatmul.mubr.bf16.gmra.mxu1 %v5687_v34 }
 0x587   : > { %v5450_v11 = vadd.f32 %v14075_v23, %v5164_v44  ;;  %v5577_v45 = vmax.f32 %v5449_v20, 0.0  ;;  %v5168_v0 = vadd.f32 %v5167_v25, %v14109_v6  ;;  %7450 = vmatpush1.bf16.msra.mxu1 %v11875_v49 }
 0x588   : > { %v14255_v1 = vpop.f32.mrf.mxu1  ;;  %v5169_v27 = vpop.f32.mrf.mxu0 }
 0x589   : > { %v5578_v14 = vmax.f32 %v5450_v11, 0.0  ;;  %v5170_v24 = vadd.f32 %v5169_v27, %v14115_v43  ;;  %v11880_v43 = vld [vmem:[%s17295_s5 + $0x694] ss:$8 sps:$4 sm:$0xff]   ;;  %v5689_v42 = vpack.c.bf16 %v5577_v45, %v5575_v56  ;;  %v5451_v18 = vadd.f32 %v14085_v35, %v5168_v0 }
 0x58a   : > { %v14265_v59 = vpop.f32.mrf.mxu1  ;;  %v5171_v52 = vpop.f32.mrf.mxu0  ;;  %6724 = vmatprep.subr.bf16.mxu0 %v11880_v43 }
 0x58b   : > { %v5172_v61 = vadd.f32 %v5171_v52, %v14121_v41  ;;  %v5690_v30 = vpack.c.bf16 %v5578_v14, %v5576_v63  ;;  %v5452_v6 = vadd.f32 %v14075_v23, %v5170_v24  ;;  %6725 = vmatpush2.bf16.msra.mxu0 %v11878_v40  ;;  %v5579_v44 = vmax.f32 %v5451_v18, 0.0  ;;  %v11884_v18 = vld [vmem:[%s17295_s5 + $0x680] ss:$8 sps:$4 sm:$0xff]  }
 0x58c   : > { %v14274_v36 = vpop.f32.mrf.mxu1  ;;  %v5173_v13 = vpop.f32.mrf.mxu0 }
 0x58d   : > { %v5453_v37 = vadd.f32 %v14085_v35, %v5172_v61  ;;  %v5174_v19 = vadd.f32 %v5173_v13, %v14131_v60  ;;  %6047 = vmatprep.mubr.bf16.mxu1 %v5690_v30  ;;  %v5580_v10 = vmax.f32 %v5452_v6, 0.0 }
 0x58e   : > { %v14280_v46 = vpop.f32.mrf.mxu1  ;;  %v5177_v41 = vpop.f32.mrf.mxu0  ;;  %6048 = vmatmul.mubr.bf16.gmra.mxu1 %v5689_v42  ;;  %v11883_v42 = vld [vmem:[%s17295_s5 + $0x754] ss:$8 sps:$4 sm:$0xff]  }
 0x58f   : > { %v5454_v12 = vadd.f32 %v14075_v23, %v5174_v19  ;;  %v5581_v50 = vmax.f32 %v5453_v37, 0.0  ;;  %v5178_v60 = vadd.f32 %v5177_v41, %v14134_v26  ;;  %7451 = vmatprep.subr.bf16.mxu1 %v11883_v42 }
 0x590   : > { %v14283_v32 = vpop.f32.mrf.mxu1  ;;  %v5179_v34 = vpop.f32.mrf.mxu0 }
 0x591   : > { %v5582_v47 = vmax.f32 %v5454_v12, 0.0  ;;  %v5180_v20 = vadd.f32 %v5179_v34, %v14140_v7  ;;  %v5691_v27 = vpack.c.bf16 %v5581_v50, %v5579_v44  ;;  %v5455_v7 = vadd.f32 %v14085_v35, %v5178_v60 }
 0x592   : > { %v14287_v38 = vpop.f32.mrf.mxu1  ;;  %v5181_v25 = vpop.f32.mrf.mxu0 }
 0x593   : > { %v5182_v11 = vadd.f32 %v5181_v25, %v14146_v54  ;;  %v5692_v45 = vpack.c.bf16 %v5582_v47, %v5580_v10  ;;  %v5456_v24 = vadd.f32 %v14075_v23, %v5180_v20  ;;  %v5583_v13 = vmax.f32 %v5455_v7, 0.0 }
 0x594   : > { %v14290_v63 = vpop.f32.mrf.mxu1  ;;  %v5183_v14 = vpop.f32.mrf.mxu0 }
 0x595   : > { %v5457_v49 = vadd.f32 %v14085_v35, %v5182_v11  ;;  %v5184_v28 = vadd.f32 %v5183_v14, %v14150_v29  ;;  %6057 = vmatprep.mubr.bf16.mxu1 %v5692_v45  ;;  %v5584_v43 = vmax.f32 %v5456_v24, 0.0  ;;  %v11881_v29 = vld [vmem:[%s17295_s5 + $0x750] ss:$8 sps:$4 sm:$0xff]  }
 0x596   : > { %v14296_v26 = vpop.f32.mrf.mxu1  ;;  %v5187_v56 = vpop.f32.mrf.mxu0  ;;  %6058 = vmatmul.mubr.bf16.gmra.mxu1 %v5691_v27 }
 0x597   : > { %v5458_v54 = vadd.f32 %v14075_v23, %v5184_v28  ;;  %v5585_v0 = vmax.f32 %v5457_v49, 0.0  ;;  %v5188_v6 = vadd.f32 %v5187_v56, %v14153_v16  ;;  %7452 = vmatpush1.bf16.msra.mxu1 %v11881_v29 }
 0x598   : > { %v14299_v52 = vpop.f32.mrf.mxu1  ;;  %v5189_v40 = vpop.f32.mrf.mxu0 }
 0x599   : > { %v5586_v61 = vmax.f32 %v5458_v54, 0.0  ;;  %v5190_v30 = vadd.f32 %v5189_v40, %v14159_v33  ;;  %v11886_v33 = vld [vmem:[%s17295_s5 + $0x684] ss:$8 sps:$4 sm:$0xff]   ;;  %v5693_v50 = vpack.c.bf16 %v5585_v0, %v5583_v13  ;;  %v5459_v44 = vadd.f32 %v14085_v35, %v5188_v6 }
 0x59a   : > { %v14309_v37 = vpop.f32.mrf.mxu1  ;;  %v5191_v19 = vpop.f32.mrf.mxu0  ;;  %6726 = vmatprep.subr.bf16.mxu0 %v11886_v33 }
 0x59b   : > { %v5192_v41 = vadd.f32 %v5191_v19, %v14165_v3  ;;  %v5694_v12 = vpack.c.bf16 %v5586_v61, %v5584_v43  ;;  %v5460_v16 = vadd.f32 %v14075_v23, %v5190_v30  ;;  %6727 = vmatpush2.bf16.msra.mxu0 %v11884_v18  ;;  %v5587_v28 = vmax.f32 %v5459_v44, 0.0 }
 0x59c   : > { %v14318_v34 = vpop.f32.mrf.mxu1  ;;  %v5193_v10 = vpop.f32.mrf.mxu0 }
 0x59d   : > { %v5461_v47 = vadd.f32 %v14085_v35, %v5192_v41  ;;  %v5194_v20 = vadd.f32 %v5193_v10, %v14175_v22  ;;  %6067 = vmatprep.mubr.bf16.mxu1 %v5694_v12  ;;  %v5588_v14 = vmax.f32 %v5460_v16, 0.0 }
 0x59e   : > { %v14324_v60 = vpop.f32.mrf.mxu1  ;;  %v5197_v3 = vpop.f32.mrf.mxu0  ;;  %6068 = vmatmul.mubr.bf16.gmra.mxu1 %v5693_v50  ;;  %v11889_v50 = vld [vmem:[%s17295_s5 + $0x744] ss:$8 sps:$4 sm:$0xff]  }
 0x59f   : > { %v5462_v25 = vadd.f32 %v14075_v23, %v5194_v20  ;;  %v5589_v11 = vmax.f32 %v5461_v47, 0.0  ;;  %v5198_v22 = vadd.f32 %v5197_v3, %v14178_v17  ;;  %7453 = vmatprep.subr.bf16.mxu1 %v11889_v50 }
 0x5a0   : > { %v14327_v45 = vpop.f32.mrf.mxu1  ;;  %v5199_v27 = vpop.f32.mrf.mxu0 }
 0x5a1   : > { %v5590_v24 = vmax.f32 %v5462_v25, 0.0  ;;  %v5200_v49 = vadd.f32 %v5199_v27, %v14184_v5  ;;  %v5695_v40 = vpack.c.bf16 %v5589_v11, %v5587_v28  ;;  %v5463_v5 = vadd.f32 %v14085_v35, %v5198_v22 }
 0x5a2   : > { %v14331_v7 = vpop.f32.mrf.mxu1  ;;  %v5201_v56 = vpop.f32.mrf.mxu0 }
 0x5a3   : > { %v5202_v54 = vadd.f32 %v5201_v56, %v14190_v48  ;;  %v5696_v0 = vpack.c.bf16 %v5590_v24, %v5588_v14  ;;  %v5464_v30 = vadd.f32 %v14075_v23, %v5200_v49  ;;  %v5591_v10 = vmax.f32 %v5463_v5, 0.0 }
 0x5a4   : > { %v14334_v43 = vpop.f32.mrf.mxu1  ;;  %v5203_v61 = vpop.f32.mrf.mxu0 }
 0x5a5   : > { %v5465_v29 = vadd.f32 %v14085_v35, %v5202_v54  ;;  %v5204_v42 = vadd.f32 %v5203_v61, %v14194_v15  ;;  %6077 = vmatprep.mubr.bf16.mxu1 %v5696_v0  ;;  %v5592_v33 = vmax.f32 %v5464_v30, 0.0  ;;  %v11887_v15 = vld [vmem:[%s17295_s5 + $0x740] ss:$8 sps:$4 sm:$0xff]  }
 0x5a6   : > { %v14340_v17 = vpop.f32.mrf.mxu1  ;;  %v5207_v13 = vpop.f32.mrf.mxu0  ;;  %6078 = vmatmul.mubr.bf16.gmra.mxu1 %v5695_v40 }
 0x5a7   : > { %v5466_v48 = vadd.f32 %v14075_v23, %v5204_v42  ;;  %v5593_v6 = vmax.f32 %v5465_v29, 0.0  ;;  %v5208_v16 = vadd.f32 %v5207_v13, %v14197_v57  ;;  %7454 = vmatpush1.bf16.msra.mxu1 %v11887_v15 }
 0x5a8   : > { %v14343_v19 = vpop.f32.mrf.mxu1  ;;  %v5209_v18 = vpop.f32.mrf.mxu0 }
 0x5a9   : > { %v5594_v41 = vmax.f32 %v5466_v48, 0.0  ;;  %v5210_v12 = vadd.f32 %v5209_v18, %v14203_v8  ;;  %v5697_v25 = vpack.c.bf16 %v5593_v6, %v5591_v10  ;;  %v5467_v57 = vadd.f32 %v14085_v35, %v5208_v16 }
 0x5aa   : > { %v14353_v47 = vpop.f32.mrf.mxu1  ;;  %v5211_v20 = vpop.f32.mrf.mxu0 }
 0x5ab   : > { %v5212_v44 = vadd.f32 %v5211_v20, %v14209_v21  ;;  %v5698_v3 = vpack.c.bf16 %v5594_v41, %v5592_v33  ;;  %v5468_v27 = vadd.f32 %v14075_v23, %v5210_v12  ;;  %v5595_v30 = vmax.f32 %v5467_v57, 0.0 }
 0x5ac   : > { %v14356_v8 = vpop.f32.mrf.mxu1  ;;  %v5213_v11 = vpop.f32.mrf.mxu0 }
 0x5ad   : > { %v5469_v14 = vadd.f32 %v14085_v35, %v5212_v44  ;;  %v5214_v24 = vadd.f32 %v5213_v11, %v14219_v58  ;;  %6087 = vmatprep.mubr.bf16.mxu1 %v5698_v3  ;;  %v5596_v0 = vmax.f32 %v5468_v27, 0.0 }
 0x5ae   : > { %v14362_v49 = vpop.f32.mrf.mxu1  ;;  %v5217_v28 = vpop.f32.mrf.mxu0  ;;  %6088 = vmatmul.mubr.bf16.gmra.mxu1 %v5697_v25  ;;  %v11892_v25 = vld [vmem:[%s17295_s5 + $0x734] ss:$8 sps:$4 sm:$0xff]  }
 0x5af   : > { %v5470_v21 = vadd.f32 %v14075_v23, %v5214_v24  ;;  %v5597_v22 = vmax.f32 %v5469_v14, 0.0  ;;  %v5218_v58 = vadd.f32 %v5217_v28, %v14228_v62  ;;  %7455 = vmatprep.subr.bf16.mxu1 %v11892_v25 }
 0x5b0   : > { %v14365_v56 = vpop.f32.mrf.mxu1  ;;  %v5219_v54 = vpop.f32.mrf.mxu0 }
 0x5b1   : > { %v5598_v40 = vmax.f32 %v5470_v21, 0.0  ;;  %v5220_v61 = vadd.f32 %v5219_v54, %v14234_v9  ;;  %v5699_v48 = vpack.c.bf16 %v5597_v22, %v5595_v30  ;;  %v5471_v9 = vadd.f32 %v14085_v35, %v5218_v58 }
 0x5b2   : > { %v14369_v29 = vpop.f32.mrf.mxu1  ;;  %v5221_v42 = vpop.f32.mrf.mxu0 }
 0x5b3   : > { %v5222_v5 = vadd.f32 %v5221_v42, %v14239_v51  ;;  %v5700_v13 = vpack.c.bf16 %v5598_v40, %v5596_v0  ;;  %v5472_v33 = vadd.f32 %v14075_v23, %v5220_v61  ;;  %v5599_v11 = vmax.f32 %v5471_v9, 0.0 }
 0x5b4   : > { %v14372_v6 = vpop.f32.mrf.mxu1  ;;  %v5223_v18 = vpop.f32.mrf.mxu0 }
 0x5b5   : > { %v5473_v41 = vadd.f32 %v14085_v35, %v5222_v5  ;;  %v5224_v12 = vadd.f32 %v5223_v18, %v14243_v53  ;;  %6097 = vmatprep.mubr.bf16.mxu1 %v5700_v13  ;;  %v5600_v20 = vmax.f32 %v5472_v33, 0.0  ;;  %v11890_v53 = vld [vmem:[%s17295_s5 + $0x730] ss:$8 sps:$4 sm:$0xff]  }
 0x5b6   : > { %v14378_v62 = vpop.f32.mrf.mxu1  ;;  %v5227_v15 = vpop.f32.mrf.mxu0  ;;  %6098 = vmatmul.mubr.bf16.gmra.mxu1 %v5699_v48 }
 0x5b7   : > { %v5474_v51 = vadd.f32 %v14075_v23, %v5224_v12  ;;  %v5601_v50 = vmax.f32 %v5473_v41, 0.0  ;;  %v5228_v27 = vadd.f32 %v5227_v15, %v14246_v4  ;;  %7456 = vmatpush1.bf16.msra.mxu1 %v11890_v53 }
 0x5b8   : > { %v14381_v10 = vpop.f32.mrf.mxu1  ;;  %v5229_v16 = vpop.f32.mrf.mxu0 }
 0x5b9   : > { %v5602_v44 = vmax.f32 %v5474_v51, 0.0  ;;  %v5230_v3 = vadd.f32 %v5229_v16, %v14252_v55  ;;  %v5701_v21 = vpack.c.bf16 %v5601_v50, %v5599_v11  ;;  %v5475_v4 = vadd.f32 %v14085_v35, %v5228_v27 }
 0x5ba   : > { %v14391_v14 = vpop.f32.mrf.mxu1  ;;  %v5231_v24 = vpop.f32.mrf.mxu0 }
 0x5bb   : > { %v5232_v57 = vadd.f32 %v5231_v24, %v14255_v1  ;;  %v5702_v28 = vpack.c.bf16 %v5602_v44, %v5600_v20  ;;  %v5476_v54 = vadd.f32 %v14075_v23, %v5230_v3  ;;  %v5603_v33 = vmax.f32 %v5475_v4, 0.0 }
 0x5bc   : > { %v14394_v55 = vpop.f32.mrf.mxu1  ;;  %v5233_v22 = vpop.f32.mrf.mxu0 }
 0x5bd   : > { %v5477_v0 = vadd.f32 %v14085_v35, %v5232_v57  ;;  %v5234_v40 = vadd.f32 %v5233_v22, %v14265_v59  ;;  %6107 = vmatprep.mubr.bf16.mxu1 %v5702_v28  ;;  %v5604_v13 = vmax.f32 %v5476_v54, 0.0 }
 0x5be   : > { %v14400_v61 = vpop.f32.mrf.mxu1  ;;  %v5237_v30 = vpop.f32.mrf.mxu0  ;;  %6108 = vmatmul.mubr.bf16.gmra.mxu1 %v5701_v21  ;;  %v11895_v21 = vld [vmem:[%s17295_s5 + $0x724] ss:$8 sps:$4 sm:$0xff]  }
 0x5bf   : > { %v5478_v1 = vadd.f32 %v14075_v23, %v5234_v40  ;;  %v5605_v58 = vmax.f32 %v5477_v0, 0.0  ;;  %v5238_v59 = vadd.f32 %v5237_v30, %v14274_v36  ;;  %7457 = vmatprep.subr.bf16.mxu1 %v11895_v21  ;;  %v11896_v21 = vld [vmem:[%s17295_s5 + $0x710] ss:$8 sps:$4 sm:$0xff]  }
 0x5c0   : > { %v14403_v42 = vpop.f32.mrf.mxu1  ;;  %v5239_v5 = vpop.f32.mrf.mxu0 }
 0x5c1   : > { %v5606_v48 = vmax.f32 %v5478_v1, 0.0  ;;  %v5240_v18 = vadd.f32 %v5239_v5, %v14280_v46  ;;  %v5703_v51 = vpack.c.bf16 %v5605_v58, %v5603_v33  ;;  %v5479_v46 = vadd.f32 %v14085_v35, %v5238_v59 }
 0x5c2   : > { %v14407_v41 = vpop.f32.mrf.mxu1  ;;  %v5241_v12 = vpop.f32.mrf.mxu0 }
 0x5c3   : > { %v5242_v9 = vadd.f32 %v5241_v12, %v14283_v32  ;;  %v5704_v15 = vpack.c.bf16 %v5606_v48, %v5604_v13  ;;  %v5480_v20 = vadd.f32 %v14075_v23, %v5240_v18  ;;  %v5607_v22 = vmax.f32 %v5479_v46, 0.0 }
 0x5c4   : > { %v14410_v50 = vpop.f32.mrf.mxu1  ;;  %v5243_v16 = vpop.f32.mrf.mxu0 }
 0x5c5   : > { %v5481_v44 = vadd.f32 %v14085_v35, %v5242_v9  ;;  %v5244_v3 = vadd.f32 %v5243_v16, %v14287_v38  ;;  %6117 = vmatprep.mubr.bf16.mxu1 %v5704_v15  ;;  %v5608_v24 = vmax.f32 %v5480_v20, 0.0  ;;  %v11893_v38 = vld [vmem:[%s17295_s5 + $0x720] ss:$8 sps:$4 sm:$0xff]  }
 0x5c6   : > { %v14416_v36 = vpop.f32.mrf.mxu1  ;;  %v5247_v53 = vpop.f32.mrf.mxu0  ;;  %6118 = vmatmul.mubr.bf16.gmra.mxu1 %v5703_v51 }
 0x5c7   : > { %v5482_v32 = vadd.f32 %v14075_v23, %v5244_v3  ;;  %v5609_v25 = vmax.f32 %v5481_v44, 0.0  ;;  %v5248_v54 = vadd.f32 %v5247_v53, %v14290_v63  ;;  %7458 = vmatpush1.bf16.msra.mxu1 %v11893_v38 }
 0x5c8   : > { %v14419_v11 = vpop.f32.mrf.mxu1  ;;  %v5249_v27 = vpop.f32.mrf.mxu0 }
 0x5c9   : > { %v5610_v57 = vmax.f32 %v5482_v32, 0.0  ;;  %v5250_v28 = vadd.f32 %v5249_v27, %v14296_v26  ;;  %v5705_v1 = vpack.c.bf16 %v5609_v25, %v5607_v22  ;;  %v5483_v63 = vadd.f32 %v14085_v35, %v5248_v54  ;;  %v11898_v22 = vld [vmem:[%s17295_s5 + $0x714] ss:$8 sps:$4 sm:$0xff]  }
 0x5ca   : > { %v14429_v0 = vpop.f32.mrf.mxu1  ;;  %v5251_v40 = vpop.f32.mrf.mxu0  ;;  %7459 = vmatprep.subr.bf16.mxu1 %v11898_v22 }
 0x5cb   : > { %v5252_v4 = vadd.f32 %v5251_v40, %v14299_v52  ;;  %v5706_v30 = vpack.c.bf16 %v5610_v57, %v5608_v24  ;;  %v5484_v5 = vadd.f32 %v14075_v23, %v5250_v28  ;;  %v5611_v20 = vmax.f32 %v5483_v63, 0.0  ;;  %7460 = vmatpush1.bf16.msra.mxu1 %v11896_v21 }
 0x5cc   : > { %v14432_v26 = vpop.f32.mrf.mxu1  ;;  %v5253_v58 = vpop.f32.mrf.mxu0 }
 0x5cd   : > { %v5485_v13 = vadd.f32 %v14085_v35, %v5252_v4  ;;  %v5254_v48 = vadd.f32 %v5253_v58, %v14309_v37  ;;  %6127 = vmatprep.mubr.bf16.mxu1 %v5706_v30  ;;  %v5612_v15 = vmax.f32 %v5484_v5, 0.0 }
 0x5ce   : > { %v14438_v18 = vpop.f32.mrf.mxu1  ;;  %v5257_v33 = vpop.f32.mrf.mxu0  ;;  %6128 = vmatmul.mubr.bf16.gmra.mxu1 %v5705_v1 }
 0x5cf   : > { %v5486_v52 = vadd.f32 %v14075_v23, %v5254_v48  ;;  %v5613_v59 = vmax.f32 %v5485_v13, 0.0  ;;  %v5258_v37 = vadd.f32 %v5257_v33, %v14318_v34 }
 0x5d0   : > { %v14441_v12 = vpop.f32.mrf.mxu1  ;;  %v5259_v9 = vpop.f32.mrf.mxu0 }
 0x5d1   : > { %v5614_v51 = vmax.f32 %v5486_v52, 0.0  ;;  %v5260_v16 = vadd.f32 %v5259_v9, %v14324_v60  ;;  %v5707_v32 = vpack.c.bf16 %v5613_v59, %v5611_v20  ;;  %v5487_v60 = vadd.f32 %v14085_v35, %v5258_v37 }
 0x5d2   : > { %v14445_v44 = vpop.f32.mrf.mxu1  ;;  %v5261_v3 = vpop.f32.mrf.mxu0 }
 0x5d3   : > { %v5262_v46 = vadd.f32 %v5261_v3, %v14327_v45  ;;  %v5708_v53 = vpack.c.bf16 %v5614_v51, %v5612_v15  ;;  %v5488_v24 = vadd.f32 %v14075_v23, %v5260_v16  ;;  %v5615_v58 = vmax.f32 %v5487_v60, 0.0 }
 0x5d4   : > { %v14448_v25 = vpop.f32.mrf.mxu1  ;;  %v5263_v27 = vpop.f32.mrf.mxu0 }
 0x5d5   : > { %v5489_v57 = vadd.f32 %v14085_v35, %v5262_v46  ;;  %v5264_v28 = vadd.f32 %v5263_v27, %v14331_v7  ;;  %6137 = vmatprep.mubr.bf16.mxu1 %v5708_v53  ;;  %v5616_v4 = vmax.f32 %v5488_v24, 0.0 }
 0x5d6   : > { %v14454_v34 = vpop.f32.mrf.mxu1  ;;  %v5267_v38 = vpop.f32.mrf.mxu0  ;;  %6138 = vmatmul.mubr.bf16.gmra.mxu1 %v5707_v32 }
 0x5d7   : > { %v5490_v45 = vadd.f32 %v14075_v23, %v5264_v28  ;;  %v5617_v54 = vmax.f32 %v5489_v57, 0.0  ;;  %v5268_v5 = vadd.f32 %v5267_v38, %v14334_v43 }
 0x5d8   : > { %v14463_v40 = vpop.f32.mrf.mxu1  ;;  %v5269_v7 = vpop.f32.mrf.mxu0 }
 0x5d9   : > { %v5618_v30 = vmax.f32 %v5490_v45, 0.0  ;;  %v5270_v1 = vadd.f32 %v5269_v7, %v14340_v17  ;;  %v5709_v52 = vpack.c.bf16 %v5617_v54, %v5615_v58  ;;  %v5491_v43 = vadd.f32 %v14085_v35, %v5268_v5  ;;  %v11901_v58 = vld [vmem:[%s17295_s5 + $0x704] ss:$8 sps:$4 sm:$0xff]  }
 0x5da   : > { %v14467_v13 = vpop.f32.mrf.mxu1  ;;  %v5271_v48 = vpop.f32.mrf.mxu0  ;;  %7461 = vmatprep.subr.bf16.mxu1 %v11901_v58 }
 0x5db   : > { %v5272_v63 = vadd.f32 %v5271_v48, %v14343_v19  ;;  %v5710_v33 = vpack.c.bf16 %v5618_v30, %v5616_v4  ;;  %v5492_v15 = vadd.f32 %v14075_v23, %v5270_v1  ;;  %v5619_v24 = vmax.f32 %v5491_v43, 0.0  ;;  %v11899_v1 = vld [vmem:[%s17295_s5 + $0x700] ss:$8 sps:$4 sm:$0xff]  }
 0x5dc   : > { %v14470_v59 = vpop.f32.mrf.mxu1  ;;  %v5273_v9 = vpop.f32.mrf.mxu0  ;;  %7462 = vmatpush1.bf16.msra.mxu1 %v11899_v1 }
 0x5dd   : > { %v5493_v51 = vadd.f32 %v14085_v35, %v5272_v63  ;;  %v5274_v17 = vadd.f32 %v5273_v9, %v14353_v47  ;;  %6147 = vmatprep.mubr.bf16.mxu1 %v5710_v33  ;;  %v5620_v53 = vmax.f32 %v5492_v15, 0.0 }
 0x5de   : > { %v14476_v16 = vpop.f32.mrf.mxu1  ;;  %v5277_v20 = vpop.f32.mrf.mxu0  ;;  %6148 = vmatmul.mubr.bf16.gmra.mxu1 %v5709_v52 }
 0x5df   : > { %v5494_v19 = vadd.f32 %v14075_v23, %v5274_v17  ;;  %v5621_v37 = vmax.f32 %v5493_v51, 0.0  ;;  %v5278_v47 = vadd.f32 %v5277_v20, %v14356_v8 }
 0x5e0   : > { %v14479_v3 = vpop.f32.mrf.mxu1  ;;  %v5279_v46 = vpop.f32.mrf.mxu0 }
 0x5e1   : > { %v5622_v32 = vmax.f32 %v5494_v19, 0.0  ;;  %v5280_v27 = vadd.f32 %v5279_v46, %v14362_v49  ;;  %v5711_v45 = vpack.c.bf16 %v5621_v37, %v5619_v24  ;;  %v5495_v49 = vadd.f32 %v14085_v35, %v5278_v47 }
 0x5e2   : > { %v14483_v57 = vpop.f32.mrf.mxu1  ;;  %v5281_v28 = vpop.f32.mrf.mxu0 }
 0x5e3   : > { %v5282_v60 = vadd.f32 %v5281_v28, %v14365_v56  ;;  %v5712_v38 = vpack.c.bf16 %v5622_v32, %v5620_v53  ;;  %v5496_v54 = vadd.f32 %v14075_v23, %v5280_v27  ;;  %v5623_v9 = vmax.f32 %v5495_v49, 0.0 }
 0x5e4   : > { %v14486_v21 = vpop.f32.mrf.mxu1  ;;  %v5283_v22 = vpop.f32.mrf.mxu0 }
 0x5e5   : > { %v5497_v7 = vadd.f32 %v14085_v35, %v5282_v60  ;;  %v5284_v4 = vadd.f32 %v5283_v22, %v14369_v29  ;;  %6157 = vmatprep.mubr.bf16.mxu1 %v5712_v38  ;;  %v5624_v63 = vmax.f32 %v5496_v54, 0.0 }
 0x5e6   : > { %v14492_v8 = vpop.f32.mrf.mxu1  ;;  %v5287_v30 = vpop.f32.mrf.mxu0  ;;  %6158 = vmatmul.mubr.bf16.gmra.mxu1 %v5711_v45 }
 0x5e7   : > { %v5498_v56 = vadd.f32 %v14075_v23, %v5284_v4  ;;  %v5625_v5 = vmax.f32 %v5497_v7, 0.0  ;;  %v5288_v15 = vadd.f32 %v5287_v30, %v14372_v6 }
 0x5e8   : > { %v14501_v48 = vpop.f32.mrf.mxu1  ;;  %v5289_v29 = vpop.f32.mrf.mxu0 }
 0x5e9   : > { %v5626_v33 = vmax.f32 %v5498_v56, 0.0  ;;  %v5290_v52 = vadd.f32 %v5289_v29, %v14378_v62  ;;  %v5713_v19 = vpack.c.bf16 %v5625_v5, %v5623_v9  ;;  %v5499_v6 = vadd.f32 %v14085_v35, %v5288_v15  ;;  %v11904_v9 = vld [vmem:[%s17295_s5 + $0x7f4] ss:$8 sps:$4 sm:$0xff]  }
 0x5ea   : > { %v14505_v51 = vpop.f32.mrf.mxu1  ;;  %v5291_v17 = vpop.f32.mrf.mxu0  ;;  %7463 = vmatprep.subr.bf16.mxu1 %v11904_v9 }
 0x5eb   : > { %v5292_v43 = vadd.f32 %v5291_v17, %v14381_v10  ;;  %v5714_v20 = vpack.c.bf16 %v5626_v33, %v5624_v63  ;;  %v5500_v53 = vadd.f32 %v14075_v23, %v5290_v52  ;;  %v5627_v54 = vmax.f32 %v5499_v6, 0.0  ;;  %v11902_v52 = vld [vmem:[%s17295_s5 + $0x7f0] ss:$8 sps:$4 sm:$0xff]  }
 0x5ec   : > { %v14508_v37 = vpop.f32.mrf.mxu1  ;;  %v5293_v46 = vpop.f32.mrf.mxu0  ;;  %7464 = vmatpush2.bf16.msra.mxu1 %v11902_v52 }
 0x5ed   : > { %v5501_v32 = vadd.f32 %v14085_v35, %v5292_v43  ;;  %v5294_v62 = vadd.f32 %v5293_v46, %v14391_v14  ;;  %6167 = vmatprep.mubr.bf16.mxu1 %v5714_v20  ;;  %v5628_v38 = vmax.f32 %v5500_v53, 0.0 }
 0x5ee   : > { %v14514_v27 = vpop.f32.mrf.mxu1  ;;  %v5297_v24 = vpop.f32.mrf.mxu0  ;;  %6168 = vmatmul.mubr.bf16.gmra.mxu1 %v5713_v19 }
 0x5ef   : > { %v5502_v10 = vadd.f32 %v14075_v23, %v5294_v62  ;;  %v5629_v47 = vmax.f32 %v5501_v32, 0.0  ;;  %v5298_v14 = vadd.f32 %v5297_v24, %v14394_v55 }
 0x5f0   : > { %v14517_v28 = vpop.f32.mrf.mxu1  ;;  %v5299_v60 = vpop.f32.mrf.mxu0 }
 0x5f1   : > { %v5630_v45 = vmax.f32 %v5502_v10, 0.0  ;;  %v5300_v22 = vadd.f32 %v5299_v60, %v14400_v61  ;;  %v5715_v56 = vpack.c.bf16 %v5629_v47, %v5627_v54  ;;  %v5503_v61 = vadd.f32 %v14085_v35, %v5298_v14 }
 0x5f2   : > { %v14521_v7 = vpop.f32.mrf.mxu1  ;;  %v5301_v4 = vpop.f32.mrf.mxu0 }
 0x5f3   : > { %v5302_v49 = vadd.f32 %v5301_v4, %v14403_v42  ;;  %v5716_v30 = vpack.c.bf16 %v5630_v45, %v5628_v38  ;;  %v5504_v5 = vadd.f32 %v14075_v23, %v5300_v22  ;;  %v5631_v46 = vmax.f32 %v5503_v61, 0.0 }
 0x5f4   : > { %v14524_v1 = vpop.f32.mrf.mxu1  ;;  %v5303_v58 = vpop.f32.mrf.mxu0 }
 0x5f5   : > { %v5505_v29 = vadd.f32 %v14085_v35, %v5302_v49  ;;  %v5304_v63 = vadd.f32 %v5303_v58, %v14407_v41  ;;  %6177 = vmatprep.mubr.bf16.mxu1 %v5716_v30  ;;  %v5632_v43 = vmax.f32 %v5504_v5, 0.0 }
 0x5f6   : > { %v14530_v55 = vpop.f32.mrf.mxu1  ;;  %v5307_v33 = vpop.f32.mrf.mxu0  ;;  %6178 = vmatmul.mubr.bf16.gmra.mxu1 %v5715_v56 }
 0x5f7   : > { %v5506_v42 = vadd.f32 %v14075_v23, %v5304_v63  ;;  %v5633_v15 = vmax.f32 %v5505_v29, 0.0  ;;  %v5308_v53 = vadd.f32 %v5307_v33, %v14410_v50 }
 0x5f8   : > { %v14539_v17 = vpop.f32.mrf.mxu1  ;;  %v5309_v41 = vpop.f32.mrf.mxu0 }
 0x5f9   : > { %v5634_v20 = vmax.f32 %v5506_v42, 0.0  ;;  %v5310_v19 = vadd.f32 %v5309_v41, %v14416_v36  ;;  %v5717_v10 = vpack.c.bf16 %v5633_v15, %v5631_v46  ;;  %v5507_v50 = vadd.f32 %v14085_v35, %v5308_v53  ;;  %v11907_v46 = vld [vmem:[%s17295_s5 + $0x7e4] ss:$8 sps:$4 sm:$0xff]  }
 0x5fa   : > { %v14543_v32 = vpop.f32.mrf.mxu1  ;;  %v5311_v62 = vpop.f32.mrf.mxu0  ;;  %7465 = vmatprep.subr.bf16.mxu1 %v11907_v46 }
 0x5fb   : > { %v5312_v6 = vadd.f32 %v5311_v62, %v14419_v11  ;;  %v5718_v24 = vpack.c.bf16 %v5634_v20, %v5632_v43  ;;  %v5508_v38 = vadd.f32 %v14075_v23, %v5310_v19  ;;  %v5635_v5 = vmax.f32 %v5507_v50, 0.0  ;;  %v11905_v19 = vld [vmem:[%s17295_s5 + $0x7e0] ss:$8 sps:$4 sm:$0xff]  }
 0x5fc   : > { %v14546_v47 = vpop.f32.mrf.mxu1  ;;  %v5313_v60 = vpop.f32.mrf.mxu0  ;;  %7466 = vmatpush2.bf16.msra.mxu1 %v11905_v19 }
 0x5fd   : > { %v5509_v45 = vadd.f32 %v14085_v35, %v5312_v6  ;;  %v5314_v36 = vadd.f32 %v5313_v60, %v14429_v0  ;;  %6187 = vmatprep.mubr.bf16.mxu1 %v5718_v24  ;;  %v5636_v30 = vmax.f32 %v5508_v38, 0.0 }
 0x5fe   : > { %v14552_v22 = vpop.f32.mrf.mxu1  ;;  %v5317_v54 = vpop.f32.mrf.mxu0  ;;  %6188 = vmatmul.mubr.bf16.gmra.mxu1 %v5717_v10 }
 0x5ff   : > { %v5510_v11 = vadd.f32 %v14075_v23, %v5314_v36  ;;  %v5637_v14 = vmax.f32 %v5509_v45, 0.0  ;;  %v5318_v0 = vadd.f32 %v5317_v54, %v14432_v26 }
 0x600   : > { %v14555_v4 = vpop.f32.mrf.mxu1  ;;  %v5319_v49 = vpop.f32.mrf.mxu0 }
 0x601   : > { %v5638_v56 = vmax.f32 %v5510_v11, 0.0  ;;  %v5320_v58 = vadd.f32 %v5319_v49, %v14438_v18  ;;  %v5719_v42 = vpack.c.bf16 %v5637_v14, %v5635_v5  ;;  %v5511_v18 = vadd.f32 %v14085_v35, %v5318_v0 }
 0x602   : > { %v14559_v29 = vpop.f32.mrf.mxu1  ;;  %v5321_v63 = vpop.f32.mrf.mxu0 }
 0x603   : > { %v5322_v61 = vadd.f32 %v5321_v63, %v14441_v12  ;;  %v5720_v33 = vpack.c.bf16 %v5638_v56, %v5636_v30  ;;  %v5512_v15 = vadd.f32 %v14075_v23, %v5320_v58  ;;  %v5639_v60 = vmax.f32 %v5511_v18, 0.0 }
 0x604   : > { %v14562_v52 = vpop.f32.mrf.mxu1  ;;  %v5323_v9 = vpop.f32.mrf.mxu0 }
 0x605   : > { %v5513_v41 = vadd.f32 %v14085_v35, %v5322_v61  ;;  %v5324_v43 = vadd.f32 %v5323_v9, %v14445_v44  ;;  %6197 = vmatprep.mubr.bf16.mxu1 %v5720_v33  ;;  %v5640_v6 = vmax.f32 %v5512_v15, 0.0 }
 0x606   : > { %v14568_v26 = vpop.f32.mrf.mxu1  ;;  %v5327_v20 = vpop.f32.mrf.mxu0  ;;  %6198 = vmatmul.mubr.bf16.gmra.mxu1 %v5719_v42 }
 0x607   : > { %v5514_v12 = vadd.f32 %v14075_v23, %v5324_v43  ;;  %v5641_v53 = vmax.f32 %v5513_v41, 0.0  ;;  %v5328_v38 = vadd.f32 %v5327_v20, %v14448_v25 }
 0x608   : > { %v14577_v62 = vpop.f32.mrf.mxu1  ;;  %v5329_v44 = vpop.f32.mrf.mxu0 }
 0x609   : > { %v5642_v24 = vmax.f32 %v5514_v12, 0.0  ;;  %v5330_v10 = vadd.f32 %v5329_v44, %v14454_v34  ;;  %v5721_v11 = vpack.c.bf16 %v5641_v53, %v5639_v60  ;;  %v5515_v25 = vadd.f32 %v14085_v35, %v5328_v38 }
 0x60a   : > { %v14581_v45 = vpop.f32.mrf.mxu1  ;;  %v5331_v36 = vpop.f32.mrf.mxu0 }
 0x60b   : > { %v5332_v50 = vadd.f32 %v5331_v36, %v14463_v40  ;;  %v5722_v54 = vpack.c.bf16 %v5642_v24, %v5640_v6  ;;  %v5516_v30 = vadd.f32 %v14075_v23, %v5330_v10  ;;  %v5643_v15 = vmax.f32 %v5515_v25, 0.0  ;;  %v11908_v10 = vld [vmem:[%s17295_s5 + $0x7d0] ss:$8 sps:$4 sm:$0xff]  }
 0x60c   : > { %v14584_v14 = vpop.f32.mrf.mxu1  ;;  %v5333_v49 = vpop.f32.mrf.mxu0 }
 0x60d   : > { %v5517_v56 = vadd.f32 %v14085_v35, %v5332_v50  ;;  %v5334_v34 = vadd.f32 %v5333_v49, %v14467_v13  ;;  %6207 = vmatprep.mubr.bf16.mxu1 %v5722_v54  ;;  %v5644_v33 = vmax.f32 %v5516_v30, 0.0 }
 0x60e   : > { %v14590_v58 = vpop.f32.mrf.mxu1  ;;  %v5337_v5 = vpop.f32.mrf.mxu0  ;;  %6208 = vmatmul.mubr.bf16.gmra.mxu1 %v5721_v11 }
 0x60f   : > { %v5518_v40 = vadd.f32 %v14075_v23, %v5334_v34  ;;  %v5645_v0 = vmax.f32 %v5517_v56, 0.0  ;;  %v5338_v13 = vadd.f32 %v5337_v5, %v14470_v59  ;;  %v11088_v59 = vld [vmem:[%s17296_s6 + $0x5] ss:$8 sm:$0x3] }
 0x610   : > { %v14593_v63 = vpop.f32.mrf.mxu1  ;;  %v5339_v61 = vpop.f32.mrf.mxu0  ;;  %v14615_v36 = vrot.slane %v11088_v59, %v12357_v31  ;;  %v14618_v49 = vrot.slane %v11088_v59, %v12374_v39 }
 0x611   : > { %v5646_v42 = vmax.f32 %v5518_v40, 0.0  ;;  %v5340_v9 = vadd.f32 %v5339_v61, %v14476_v16  ;;  %v5723_v20 = vpack.c.bf16 %v5645_v0, %v5643_v15  ;;  %v5519_v16 = vadd.f32 %v14085_v35, %v5338_v13 }
 0x612   : > { %v5341_v41 = vpop.f32.mrf.mxu0  ;;  %v14598_v12 = vpop.f32.mrf.mxu1 }
 0x613   : > { %v5342_v43 = vadd.f32 %v5341_v41, %v14479_v3  ;;  %v5724_v18 = vpack.c.bf16 %v5646_v42, %v5644_v33  ;;  %v5520_v46 = vadd.f32 %v14075_v23, %v5340_v9  ;;  %v5647_v30 = vmax.f32 %v5519_v16, 0.0 }
 0x614   : > { %v5343_v19 = vpop.f32.mrf.mxu0 }
 0x615   : > { %v5521_v53 = vadd.f32 %v14085_v35, %v5342_v43  ;;  %v5344_v44 = vadd.f32 %v5343_v19, %v14483_v57  ;;  %6217 = vmatprep.mubr.bf16.mxu1 %v5724_v18  ;;  %v11910_v57 = vld [vmem:[%s17295_s5 + $0x7d4] ss:$8 sps:$4 sm:$0xff]   ;;  %v5648_v54 = vmax.f32 %v5520_v46, 0.0 }
 0x616   : > { %v5347_v6 = vpop.f32.mrf.mxu0  ;;  %v5979_v3 = vpop.f32.mrf.mxu1  ;;  %6218 = vmatmul.mubr.bf16.gmra.mxu1 %v5723_v20  ;;  %7467 = vmatprep.subr.bf16.mxu1 %v11910_v57 }
 0x617   : > { %v5522_v24 = vadd.f32 %v14075_v23, %v5344_v44  ;;  %v5649_v60 = vmax.f32 %v5521_v53, 0.0  ;;  %7468 = vmatpush2.bf16.msra.mxu1 %v11908_v10  ;;  %v5348_v5 = vadd.f32 %v5347_v6, %v14486_v21  ;;  %v5980_v13 = vadd.f32 %v5979_v3, %v14618_v49 }
 0x618   : > { %v5349_v38 = vpop.f32.mrf.mxu0  ;;  %v5981_v50 = vpop.f32.mrf.mxu1 }
 0x619   : > { %v5650_v11 = vmax.f32 %v5522_v24, 0.0  ;;  %v5350_v56 = vadd.f32 %v5349_v38, %v14492_v8  ;;  %v5725_v33 = vpack.c.bf16 %v5649_v60, %v5647_v30  ;;  %v5982_v42 = vadd.f32 %v5981_v50, %v14615_v36 }
 0x61a   : > { %v5351_v34 = vpop.f32.mrf.mxu0  ;;  %v5983_v25 = vpop.f32.mrf.mxu1  ;;  %v5523_v20 = vadd.f32 %v14085_v35, %v5348_v5  ;;  %v6298_v59 = vmax.f32 %v5980_v13, 0.0 }
 0x61b   : > { %v5352_v40 = vadd.f32 %v5351_v34, %v14501_v48  ;;  %v5984_v0 = vadd.f32 %v5983_v25, %v14618_v49  ;;  %v5726_v61 = vpack.c.bf16 %v5650_v11, %v5648_v54  ;;  %v5524_v21 = vadd.f32 %v14075_v23, %v5350_v56 }
 0x61c   : > { %v5353_v9 = vpop.f32.mrf.mxu0  ;;  %v5985_v15 = vpop.f32.mrf.mxu1  ;;  %v6299_v44 = vmax.f32 %v5982_v42, 0.0  ;;  %v5651_v54 = vmax.f32 %v5523_v20, 0.0 }
 0x61d   : > { %v5525_v41 = vadd.f32 %v14085_v35, %v5352_v40  ;;  %v5354_v8 = vadd.f32 %v5353_v9, %v14505_v51  ;;  %v5986_v43 = vadd.f32 %v5985_v15, %v14615_v36  ;;  %6227 = vmatprep.mubr.bf16.mxu1 %v5726_v61  ;;  %v6300_v19 = vmax.f32 %v5984_v0, 0.0 }
 0x61e   : > { %v5357_v48 = vpop.f32.mrf.mxu0  ;;  %v5989_v18 = vpop.f32.mrf.mxu1  ;;  %6228 = vmatmul.mubr.bf16.gmra.mxu1 %v5725_v33  ;;  %v5652_v24 = vmax.f32 %v5524_v21, 0.0 }
 0x61f   : > { %v5526_v46 = vadd.f32 %v14075_v23, %v5354_v8  ;;  %v6301_v53 = vmax.f32 %v5986_v43, 0.0  ;;  %v5653_v3 = vmax.f32 %v5525_v41, 0.0  ;;  %v5358_v10 = vadd.f32 %v5357_v48, %v14508_v37  ;;  %v11911_v8 = vld [vmem:[%s17295_s5 + $0x7c0] ss:$8 sps:$4 sm:$0xff]  }
 0x620   : > { %v5359_v16 = vpop.f32.mrf.mxu0  ;;  %v5991_v6 = vpop.f32.mrf.mxu1  ;;  %v6426_v11 = vpack.c.bf16 %v6300_v19, %v6298_v59  ;;  %v5990_v37 = vadd.f32 %v5989_v18, %v14618_v49 }
 0x621   : > { %v5654_v51 = vmax.f32 %v5526_v46, 0.0  ;;  %v5360_v57 = vadd.f32 %v5359_v16, %v14514_v27  ;;  %v6427_v50 = vpack.c.bf16 %v6301_v53, %v6299_v44  ;;  %v5992_v34 = vadd.f32 %v5991_v6, %v14615_v36 }
 0x622   : > { %v5361_v60 = vpop.f32.mrf.mxu0  ;;  %v5993_v38 = vpop.f32.mrf.mxu1  ;;  %v5727_v0 = vpack.c.bf16 %v5653_v3, %v5651_v54  ;;  %v5527_v33 = vadd.f32 %v14085_v35, %v5358_v10  ;;  %v6302_v20 = vmax.f32 %v5990_v37, 0.0 }
 0x623   : > { %v5362_v30 = vadd.f32 %v5361_v60, %v14517_v28  ;;  %v5994_v56 = vadd.f32 %v5993_v38, %v14618_v49  ;;  %6728 = vmatprep.mubr.bf16.mxu0 %v6427_v50  ;;  %v5728_v40 = vpack.c.bf16 %v5654_v51, %v5652_v24  ;;  %v5528_v28 = vadd.f32 %v14075_v23, %v5360_v57 }
 0x624   : > { %v5363_v25 = vpop.f32.mrf.mxu0  ;;  %v5995_v5 = vpop.f32.mrf.mxu1  ;;  %6729 = vmatmul.mubr.bf16.vlgmr.msra.gmra.mxu0 %v6426_v11  ;;  %v6303_v43 = vmax.f32 %v5992_v34, 0.0  ;;  %v5655_v53 = vmax.f32 %v5527_v33, 0.0 }
 0x625   : > { %v5529_v27 = vadd.f32 %v14085_v35, %v5362_v30  ;;  %v5364_v61 = vadd.f32 %v5363_v25, %v14521_v7  ;;  %v5996_v42 = vadd.f32 %v5995_v5, %v14615_v36  ;;  %6237 = vmatprep.mubr.bf16.mxu1 %v5728_v40  ;;  %v6304_v13 = vmax.f32 %v5994_v56, 0.0  ;;  %v11913_v7 = vld [vmem:[%s17295_s5 + $0x7c4] ss:$8 sps:$4 sm:$0xff]  }
 0x626   : > { %v5367_v9 = vpop.f32.mrf.mxu0  ;;  %v5999_v15 = vpop.f32.mrf.mxu1  ;;  %6238 = vmatmul.mubr.bf16.gmra.mxu1 %v5727_v0  ;;  %7469 = vmatprep.subr.bf16.mxu1 %v11913_v7  ;;  %v5656_v44 = vmax.f32 %v5528_v28, 0.0 }
 0x627   : > { %v5530_v41 = vadd.f32 %v14075_v23, %v5364_v61  ;;  %v6305_v21 = vmax.f32 %v5996_v42, 0.0  ;;  %v5657_v19 = vmax.f32 %v5529_v27, 0.0  ;;  %7470 = vmatpush2.bf16.msra.mxu1 %v11911_v8  ;;  %v6428_v51 = vpack.c.bf16 %v6304_v13, %v6302_v20 }
 0x628   : > { %v5369_v48 = vpop.f32.mrf.mxu0  ;;  %v6001_v18 = vpop.f32.mrf.mxu1  ;;  %v5368_v24 = vadd.f32 %v5367_v9, %v14524_v1 }
 0x629   : > { %v5658_v46 = vmax.f32 %v5530_v41, 0.0  ;;  %v5370_v16 = vadd.f32 %v5369_v48, %v14530_v55  ;;  %v6429_v3 = vpack.c.bf16 %v6305_v21, %v6303_v43  ;;  %v6002_v60 = vadd.f32 %v6001_v18, %v14615_v36 }
 0x62a   : > { %v5371_v6 = vpop.f32.mrf.mxu0  ;;  %v6003_v59 = vpop.f32.mrf.mxu1  ;;  %v5729_v11 = vpack.c.bf16 %v5657_v19, %v5655_v53  ;;  %v6000_v55 = vadd.f32 %v5999_v15, %v14618_v49  ;;  %v5531_v5 = vadd.f32 %v14085_v35, %v5368_v24 }
 0x62b   : > { %v5372_v10 = vadd.f32 %v5371_v6, %v14539_v17  ;;  %v6004_v57 = vadd.f32 %v6003_v59, %v14618_v49  ;;  %6738 = vmatprep.mubr.bf16.mxu0 %v6429_v3  ;;  %v5730_v54 = vpack.c.bf16 %v5658_v46, %v5656_v44  ;;  %v5532_v1 = vadd.f32 %v14075_v23, %v5370_v16 }
 0x62c   : > { %v5373_v38 = vpop.f32.mrf.mxu0  ;;  %v6005_v50 = vpop.f32.mrf.mxu1  ;;  %6739 = vmatmul.mubr.bf16.gmra.mxu0 %v6428_v51  ;;  %v6307_v37 = vmax.f32 %v6002_v60, 0.0  ;;  %v6306_v28 = vmax.f32 %v6000_v55, 0.0  ;;  %v5659_v43 = vmax.f32 %v5531_v5, 0.0 }
 0x62d   : > { %v5533_v30 = vadd.f32 %v14085_v35, %v5372_v10  ;;  %v5374_v56 = vadd.f32 %v5373_v38, %v14543_v32  ;;  %v6006_v17 = vadd.f32 %v6005_v50, %v14615_v36  ;;  %6247 = vmatprep.mubr.bf16.mxu1 %v5730_v54  ;;  %v6308_v40 = vmax.f32 %v6004_v57, 0.0  ;;  %v11914_v57 = vld [vmem:[%s17295_s5 + $0x7b0] ss:$8 sps:$4 sm:$0xff]  }
 0x62e   : > { %v5377_v34 = vpop.f32.mrf.mxu0  ;;  %v6009_v25 = vpop.f32.mrf.mxu1  ;;  %6248 = vmatmul.mubr.bf16.gmra.mxu1 %v5729_v11  ;;  %v5660_v9 = vmax.f32 %v5532_v1, 0.0 }
 0x62f   : > { %v5534_v0 = vadd.f32 %v14075_v23, %v5374_v56  ;;  %v6309_v27 = vmax.f32 %v6006_v17, 0.0  ;;  %v5661_v32 = vmax.f32 %v5533_v30, 0.0  ;;  %v5378_v15 = vadd.f32 %v5377_v34, %v14546_v47 }
 0x630   : > { %v5379_v61 = vpop.f32.mrf.mxu0  ;;  %v6011_v33 = vpop.f32.mrf.mxu1  ;;  %v6430_v21 = vpack.c.bf16 %v6308_v40, %v6306_v28  ;;  %v6010_v47 = vadd.f32 %v6009_v25, %v14618_v49 }
 0x631   : > { %v5662_v42 = vmax.f32 %v5534_v0, 0.0  ;;  %v5380_v13 = vadd.f32 %v5379_v61, %v14552_v22  ;;  %v6431_v7 = vpack.c.bf16 %v6309_v27, %v6307_v37  ;;  %v6012_v20 = vadd.f32 %v6011_v33, %v14615_v36 }
 0x632   : > { %v5381_v41 = vpop.f32.mrf.mxu0  ;;  %v6013_v8 = vpop.f32.mrf.mxu1  ;;  %v5731_v44 = vpack.c.bf16 %v5661_v32, %v5659_v43  ;;  %v5535_v6 = vadd.f32 %v14085_v35, %v5378_v15  ;;  %v6310_v11 = vmax.f32 %v6010_v47, 0.0 }
 0x633   : > { %v5382_v48 = vadd.f32 %v5381_v41, %v14555_v4  ;;  %v6014_v18 = vadd.f32 %v6013_v8, %v14618_v49  ;;  %6748 = vmatprep.mubr.bf16.mxu0 %v6431_v7  ;;  %v5732_v53 = vpack.c.bf16 %v5662_v42, %v5660_v9  ;;  %v5536_v4 = vadd.f32 %v14075_v23, %v5380_v13 }
 0x634   : > { %v5383_v19 = vpop.f32.mrf.mxu0  ;;  %v6015_v46 = vpop.f32.mrf.mxu1  ;;  %6749 = vmatmul.mubr.bf16.gmra.mxu0 %v6430_v21  ;;  %v6311_v60 = vmax.f32 %v6012_v20, 0.0  ;;  %v5663_v56 = vmax.f32 %v5535_v6, 0.0 }
 0x635   : > { %v5537_v22 = vadd.f32 %v14085_v35, %v5382_v48  ;;  %v5384_v16 = vadd.f32 %v5383_v19, %v14559_v29  ;;  %v6016_v59 = vadd.f32 %v6015_v46, %v14615_v36  ;;  %6257 = vmatprep.mubr.bf16.mxu1 %v5732_v53  ;;  %v6312_v24 = vmax.f32 %v6014_v18, 0.0  ;;  %v11916_v29 = vld [vmem:[%s17295_s5 + $0x7b4] ss:$8 sps:$4 sm:$0xff]  }
 0x636   : > { %v5387_v3 = vpop.f32.mrf.mxu0  ;;  %v6019_v51 = vpop.f32.mrf.mxu1  ;;  %6258 = vmatmul.mubr.bf16.gmra.mxu1 %v5731_v44  ;;  %7471 = vmatprep.subr.bf16.mxu1 %v11916_v29  ;;  %v5664_v1 = vmax.f32 %v5536_v4, 0.0 }
 0x637   : > { %v5538_v10 = vadd.f32 %v14075_v23, %v5384_v16  ;;  %v6313_v38 = vmax.f32 %v6016_v59, 0.0  ;;  %v5665_v55 = vmax.f32 %v5537_v22, 0.0  ;;  %7472 = vmatpush2.bf16.msra.mxu1 %v11914_v57  ;;  %v6432_v40 = vpack.c.bf16 %v6312_v24, %v6310_v11 }
 0x638   : > { %v5389_v50 = vpop.f32.mrf.mxu0  ;;  %v6021_v54 = vpop.f32.mrf.mxu1  ;;  %v5388_v0 = vadd.f32 %v5387_v3, %v14562_v52 }
 0x639   : > { %v5666_v30 = vmax.f32 %v5538_v10, 0.0  ;;  %v5390_v17 = vadd.f32 %v5389_v50, %v14568_v26  ;;  %v6433_v5 = vpack.c.bf16 %v6313_v38, %v6311_v60  ;;  %v6022_v61 = vadd.f32 %v6021_v54, %v14615_v36 }
 0x63a   : > { %v5391_v34 = vpop.f32.mrf.mxu0  ;;  %v6023_v25 = vpop.f32.mrf.mxu1  ;;  %v5733_v42 = vpack.c.bf16 %v5665_v55, %v5663_v56  ;;  %v6020_v26 = vadd.f32 %v6019_v51, %v14618_v49  ;;  %v5539_v8 = vadd.f32 %v14085_v35, %v5388_v0  ;;  %v11917_v56 = vld [vmem:[%s17295_s5 + $0x7a0] ss:$8 sps:$4 sm:$0xff]  }
 0x63b   : > { %v5392_v37 = vadd.f32 %v5391_v34, %v14577_v62  ;;  %v6024_v27 = vadd.f32 %v6023_v25, %v14618_v49  ;;  %6758 = vmatprep.mubr.bf16.mxu0 %v6433_v5  ;;  %v5734_v32 = vpack.c.bf16 %v5666_v30, %v5664_v1  ;;  %v5540_v52 = vadd.f32 %v14075_v23, %v5390_v17  ;;  %v11919_v1 = vld [vmem:[%s17295_s5 + $0x7a4] ss:$8 sps:$4 sm:$0xff]  }
 0x63c   : > { %v5393_v33 = vpop.f32.mrf.mxu0  ;;  %v6025_v28 = vpop.f32.mrf.mxu1  ;;  %6759 = vmatmul.mubr.bf16.gmra.mxu0 %v6432_v40  ;;  %v6315_v21 = vmax.f32 %v6022_v61, 0.0  ;;  %v6314_v19 = vmax.f32 %v6020_v26, 0.0  ;;  %v5667_v4 = vmax.f32 %v5539_v8, 0.0  ;;  %7473 = vmatprep.subr.bf16.mxu1 %v11919_v1 }
 0x63d   : > { %v5541_v9 = vadd.f32 %v14085_v35, %v5392_v37  ;;  %v5394_v15 = vadd.f32 %v5393_v33, %v14581_v45  ;;  %v6026_v62 = vadd.f32 %v6025_v28, %v14615_v36  ;;  %6267 = vmatprep.mubr.bf16.mxu1 %v5734_v32  ;;  %v6316_v7 = vmax.f32 %v6024_v27, 0.0  ;;  %7474 = vmatpush2.bf16.msra.mxu1 %v11917_v56 }
 0x63e   : > { %v5397_v13 = vpop.f32.mrf.mxu0  ;;  %v6029_v41 = vpop.f32.mrf.mxu1  ;;  %6268 = vmatmul.mubr.bf16.gmra.mxu1 %v5733_v42  ;;  %v5668_v44 = vmax.f32 %v5540_v52, 0.0 }
 0x63f   : > { %v5542_v43 = vadd.f32 %v14075_v23, %v5394_v15  ;;  %v6317_v48 = vmax.f32 %v6026_v62, 0.0  ;;  %v5669_v45 = vmax.f32 %v5541_v9, 0.0  ;;  %v5398_v47 = vadd.f32 %v5397_v13, %v14584_v14 }
 0x640   : > { %v5399_v18 = vpop.f32.mrf.mxu0  ;;  %v6031_v20 = vpop.f32.mrf.mxu1  ;;  %v6434_v59 = vpack.c.bf16 %v6316_v7, %v6314_v19  ;;  %v6030_v24 = vadd.f32 %v6029_v41, %v14618_v49 }
 0x641   : > { %v5670_v46 = vmax.f32 %v5542_v43, 0.0  ;;  %v5400_v53 = vadd.f32 %v5399_v18, %v14590_v58  ;;  %v6435_v6 = vpack.c.bf16 %v6317_v48, %v6315_v21  ;;  %v6032_v10 = vadd.f32 %v6031_v20, %v14615_v36 }
 0x642   : > { %v5401_v22 = vpop.f32.mrf.mxu0  ;;  %v6033_v16 = vpop.f32.mrf.mxu1  ;;  %v5735_v60 = vpack.c.bf16 %v5669_v45, %v5667_v4 }
 0x643   : > { %v5402_v3 = vadd.f32 %v5401_v22, %v14593_v63  ;;  %v6034_v51 = vadd.f32 %v6033_v16, %v14618_v49  ;;  %6768 = vmatprep.mubr.bf16.mxu0 %v6435_v6  ;;  %v5736_v58 = vpack.c.bf16 %v5670_v46, %v5668_v44  ;;  %v5544_v14 = vadd.f32 %v14075_v23, %v5400_v53  ;;  %v11920_v22 = vld [vmem:[%s17295_s5 + $0x790] ss:$8 sps:$4 sm:$0xff]   ;;  %v11922_v16 = vld [vmem:[%s17295_s5 + $0x794] ss:$8 sps:$4 sm:$0xff]  }
 0x644   : > { %v5403_v57 = vpop.f32.mrf.mxu0  ;;  %v6035_v29 = vpop.f32.mrf.mxu1  ;;  %6769 = vmatmul.mubr.bf16.gmra.mxu0 %v6434_v59  ;;  %v5543_v63 = vadd.f32 %v14085_v35, %v5398_v47  ;;  %7475 = vmatprep.subr.bf16.mxu1 %v11922_v16 }
 0x645   : > { %v5545_v38 = vadd.f32 %v14085_v35, %v5402_v3  ;;  %v5404_v50 = vadd.f32 %v5403_v57, %v14598_v12  ;;  %v6036_v54 = vadd.f32 %v6035_v29, %v14615_v36  ;;  %6277 = vmatprep.mubr.bf16.mxu1 %v5736_v58  ;;  %v6320_v55 = vmax.f32 %v6034_v51, 0.0  ;;  %7476 = vmatpush2.bf16.msra.mxu1 %v11920_v22 }
 0x646   : > { %v6039_v11 = vpop.f32.mrf.mxu1  ;;  %6278 = vmatmul.mubr.bf16.gmra.mxu1 %v5735_v60  ;;  %v6319_v12 = vmax.f32 %v6032_v10, 0.0  ;;  %v6318_v35 = vmax.f32 %v6030_v24, 0.0  ;;  %v5672_v25 = vmax.f32 %v5544_v14, 0.0  ;;  %v5671_v0 = vmax.f32 %v5543_v63, 0.0 }
 0x647   : > { %v5546_v30 = vadd.f32 %v14075_v23, %v5404_v50  ;;  %v6321_v17 = vmax.f32 %v6036_v54, 0.0  ;;  %v5673_v5 = vmax.f32 %v5545_v38, 0.0  ;;  %v6040_v26 = vadd.f32 %v6039_v11, %v14618_v49 }
 0x648   : > { %v6041_v34 = vpop.f32.mrf.mxu1  ;;  %v6436_v27 = vpack.c.bf16 %v6320_v55, %v6318_v35 }
 0x649   : > { %v5674_v40 = vmax.f32 %v5546_v30, 0.0  ;;  %v6437_v23 = vpack.c.bf16 %v6321_v17, %v6319_v12  ;;  %v6042_v61 = vadd.f32 %v6041_v34, %v14615_v36  ;;  %v5737_v42 = vpack.c.bf16 %v5673_v5, %v5671_v0  ;;  %v11923_v0 = vld [vmem:[%s17295_s5 + $0x780] ss:$8 sps:$4 sm:$0xff]  }
 0x64a   : > { %v6043_v37 = vpop.f32.mrf.mxu1  ;;  %v6322_v8 = vmax.f32 %v6040_v26, 0.0 }
 0x64b   : > { %v6044_v33 = vadd.f32 %v6043_v37, %v14618_v49  ;;  %v5738_v28 = vpack.c.bf16 %v5674_v40, %v5672_v25  ;;  %6778 = vmatprep.mubr.bf16.mxu0 %v6437_v23  ;;  %v6323_v52 = vmax.f32 %v6042_v61, 0.0  ;;  %v11925_v37 = vld [vmem:[%s17295_s5 + $0x784] ss:$8 sps:$4 sm:$0xff]  }
 0x64c   : > { %v6045_v32 = vpop.f32.mrf.mxu1  ;;  %6779 = vmatmul.mubr.bf16.gmra.mxu0 %v6436_v27  ;;  %7477 = vmatprep.subr.bf16.mxu1 %v11925_v37 }
 0x64d   : > { %v6046_v9 = vadd.f32 %v6045_v32, %v14615_v36  ;;  %6287 = vmatprep.mubr.bf16.mxu1 %v5738_v28  ;;  %v6324_v62 = vmax.f32 %v6044_v33, 0.0  ;;  %7478 = vmatpush2.bf16.msra.mxu1 %v11923_v0 }
 0x64e   : > { %v6049_v15 = vpop.f32.mrf.mxu1  ;;  %6288 = vmatmul.mubr.bf16.gmra.mxu1 %v5737_v42  ;;  %8554 = vmatprep.subr.bf16.mxu1 %v12028_v2 }
 0x64f   : > { %v6325_v13 = vmax.f32 %v6046_v9, 0.0  ;;  %v6438_v48 = vpack.c.bf16 %v6324_v62, %v6322_v8  ;;  %v6050_v19 = vadd.f32 %v6049_v15, %v14618_v49 }
 0x650   : > { %v6051_v41 = vpop.f32.mrf.mxu1 }
 0x651   : > { %v6439_v7 = vpack.c.bf16 %v6325_v13, %v6323_v52  ;;  %v6052_v43 = vadd.f32 %v6051_v41, %v14615_v36  ;;  %v6326_v4 = vmax.f32 %v6050_v19, 0.0 }
 0x652   : > { %v6053_v21 = vpop.f32.mrf.mxu1 }
 0x653   : > { %v6054_v18 = vadd.f32 %v6053_v21, %v14618_v49  ;;  %6788 = vmatprep.mubr.bf16.mxu0 %v6439_v7  ;;  %v6327_v46 = vmax.f32 %v6052_v43, 0.0 }
 0x654   : > { %v6055_v20 = vpop.f32.mrf.mxu1  ;;  %6789 = vmatmul.mubr.bf16.gmra.mxu0 %v6438_v48 }
 0x655   : > { %v6056_v45 = vadd.f32 %v6055_v20, %v14615_v36  ;;  %v6328_v44 = vmax.f32 %v6054_v18, 0.0 }
 0x656   : > { %v6059_v53 = vpop.f32.mrf.mxu1 }
 0x657   : > { %v6329_v47 = vmax.f32 %v6056_v45, 0.0  ;;  %v6440_v51 = vpack.c.bf16 %v6328_v44, %v6326_v4  ;;  %v6060_v29 = vadd.f32 %v6059_v53, %v14618_v49  ;;  %v11926_v44 = vld [vmem:[%s17298_s8 + $0x8] sm:$0xff]  }
 0x658   : > { %v6061_v6 = vpop.f32.mrf.mxu1  ;;  %11377 = vmatprep.subr.bf16.mxu0 %v11926_v44 }
 0x659   : > { %v6441_v59 = vpack.c.bf16 %v6329_v47, %v6327_v46  ;;  %v6062_v24 = vadd.f32 %v6061_v6, %v14615_v36  ;;  %v6330_v54 = vmax.f32 %v6060_v29, 0.0  ;;  %11378 = vmatpush3.bf16.msra.mxu0 %v11926_v44 }
 0x65a   : > { %v6063_v3 = vpop.f32.mrf.mxu1 }
 0x65b   : > { %v6064_v10 = vadd.f32 %v6063_v3, %v14618_v49  ;;  %6798 = vmatprep.mubr.bf16.mxu0 %v6441_v59  ;;  %v6331_v14 = vmax.f32 %v6062_v24, 0.0 }
 0x65c   : > { %v6065_v57 = vpop.f32.mrf.mxu1  ;;  %6799 = vmatmul.mubr.bf16.gmra.mxu0 %v6440_v51 }
 0x65d   : > { %v6066_v58 = vadd.f32 %v6065_v57, %v14615_v36  ;;  %v6332_v38 = vmax.f32 %v6064_v10, 0.0 }
 0x65e   : > { %v6069_v60 = vpop.f32.mrf.mxu1 }
 0x65f   : > { %v6333_v50 = vmax.f32 %v6066_v58, 0.0  ;;  %v6442_v56 = vpack.c.bf16 %v6332_v38, %v6330_v54  ;;  %v6070_v17 = vadd.f32 %v6069_v60, %v14618_v49 }
 0x660   : > { %v6071_v63 = vpop.f32.mrf.mxu1 }
 0x661   : > { %v6443_v11 = vpack.c.bf16 %v6333_v50, %v6331_v14  ;;  %v6072_v55 = vadd.f32 %v6071_v63, %v14615_v36  ;;  %v6334_v27 = vmax.f32 %v6070_v17, 0.0 }
 0x662   : > { %v6073_v30 = vpop.f32.mrf.mxu1 }
 0x663   : > { %v6074_v1 = vadd.f32 %v6073_v30, %v14618_v49  ;;  %6808 = vmatprep.mubr.bf16.mxu0 %v6443_v11  ;;  %v6335_v35 = vmax.f32 %v6072_v55, 0.0 }
 0x664   : > { %v6075_v12 = vpop.f32.mrf.mxu1  ;;  %6809 = vmatmul.mubr.bf16.gmra.mxu0 %v6442_v56 }
 0x665   : > { %v6076_v34 = vadd.f32 %v6075_v12, %v14615_v36  ;;  %v6336_v5 = vmax.f32 %v6074_v1, 0.0 }
 0x666   : > { %v6079_v25 = vpop.f32.mrf.mxu1 }
 0x667   : > { %v6337_v40 = vmax.f32 %v6076_v34, 0.0  ;;  %v6444_v28 = vpack.c.bf16 %v6336_v5, %v6334_v27  ;;  %v6080_v9 = vadd.f32 %v6079_v25, %v14618_v49 }
 0x668   : > { %v6081_v23 = vpop.f32.mrf.mxu1 }
 0x669   : > { %v6445_v61 = vpack.c.bf16 %v6337_v40, %v6335_v35  ;;  %v6082_v32 = vadd.f32 %v6081_v23, %v14615_v36  ;;  %v6338_v7 = vmax.f32 %v6080_v9, 0.0 }
 0x66a   : > { %v6083_v33 = vpop.f32.mrf.mxu1 }
 0x66b   : > { %v6084_v42 = vadd.f32 %v6083_v33, %v14618_v49  ;;  %6818 = vmatprep.mubr.bf16.mxu0 %v6445_v61  ;;  %v6339_v62 = vmax.f32 %v6082_v32, 0.0 }
 0x66c   : > { %v6085_v26 = vpop.f32.mrf.mxu1  ;;  %6819 = vmatmul.mubr.bf16.gmra.mxu0 %v6444_v28 }
 0x66d   : > { %v6086_v15 = vadd.f32 %v6085_v26, %v14615_v36  ;;  %v6340_v13 = vmax.f32 %v6084_v42, 0.0 }
 0x66e   : > { %v6089_v52 = vpop.f32.mrf.mxu1 }
 0x66f   : > { %v6341_v41 = vmax.f32 %v6086_v15, 0.0  ;;  %v6446_v48 = vpack.c.bf16 %v6340_v13, %v6338_v7  ;;  %v6090_v45 = vadd.f32 %v6089_v52, %v14618_v49 }
 0x670   : > { %v6091_v8 = vpop.f32.mrf.mxu1 }
 0x671   : > { %v6447_v43 = vpack.c.bf16 %v6341_v41, %v6339_v62  ;;  %v6092_v18 = vadd.f32 %v6091_v8, %v14615_v36  ;;  %v6342_v4 = vmax.f32 %v6090_v45, 0.0 }
 0x672   : > { %v6093_v21 = vpop.f32.mrf.mxu1 }
 0x673   : > { %v6094_v20 = vadd.f32 %v6093_v21, %v14618_v49  ;;  %6828 = vmatprep.mubr.bf16.mxu0 %v6447_v43  ;;  %v6343_v47 = vmax.f32 %v6092_v18, 0.0 }
 0x674   : > { %v6095_v19 = vpop.f32.mrf.mxu1  ;;  %6829 = vmatmul.mubr.bf16.gmra.mxu0 %v6446_v48 }
 0x675   : > { %v6096_v46 = vadd.f32 %v6095_v19, %v14615_v36  ;;  %v6344_v22 = vmax.f32 %v6094_v20, 0.0 }
 0x676   : > { %v6099_v53 = vpop.f32.mrf.mxu1 }
 0x677   : > { %v6345_v16 = vmax.f32 %v6096_v46, 0.0  ;;  %v6448_v51 = vpack.c.bf16 %v6344_v22, %v6342_v4  ;;  %v6100_v29 = vadd.f32 %v6099_v53, %v14618_v49 }
 0x678   : > { %v6101_v6 = vpop.f32.mrf.mxu1 }
 0x679   : > { %v6449_v59 = vpack.c.bf16 %v6345_v16, %v6343_v47  ;;  %v6102_v24 = vadd.f32 %v6101_v6, %v14615_v36  ;;  %v6346_v54 = vmax.f32 %v6100_v29, 0.0 }
 0x67a   : > { %v6103_v3 = vpop.f32.mrf.mxu1 }
 0x67b   : > { %v6104_v10 = vadd.f32 %v6103_v3, %v14618_v49  ;;  %6838 = vmatprep.mubr.bf16.mxu0 %v6449_v59  ;;  %v6347_v14 = vmax.f32 %v6102_v24, 0.0 }
 0x67c   : > { %v6105_v57 = vpop.f32.mrf.mxu1  ;;  %6839 = vmatmul.mubr.bf16.gmra.mxu0 %v6448_v51 }
 0x67d   : > { %v6106_v58 = vadd.f32 %v6105_v57, %v14615_v36  ;;  %v6348_v38 = vmax.f32 %v6104_v10, 0.0 }
 0x67e   : > { %v6109_v60 = vpop.f32.mrf.mxu1 }
 0x67f   : > { %v6349_v50 = vmax.f32 %v6106_v58, 0.0  ;;  %v6450_v30 = vpack.c.bf16 %v6348_v38, %v6346_v54  ;;  %v6110_v17 = vadd.f32 %v6109_v60, %v14618_v49 }
 0x680   : > { %v6111_v63 = vpop.f32.mrf.mxu1 }
 0x681   : > { %v6451_v11 = vpack.c.bf16 %v6349_v50, %v6347_v14  ;;  %v6112_v56 = vadd.f32 %v6111_v63, %v14615_v36  ;;  %v6350_v37 = vmax.f32 %v6110_v17, 0.0 }
 0x682   : > { %v6113_v55 = vpop.f32.mrf.mxu1 }
 0x683   : > { %v6114_v1 = vadd.f32 %v6113_v55, %v14618_v49  ;;  %6848 = vmatprep.mubr.bf16.mxu0 %v6451_v11  ;;  %v6351_v25 = vmax.f32 %v6112_v56, 0.0 }
 0x684   : > { %v6115_v12 = vpop.f32.mrf.mxu1  ;;  %6849 = vmatmul.mubr.bf16.gmra.mxu0 %v6450_v30 }
 0x685   : > { %v6116_v34 = vadd.f32 %v6115_v12, %v14615_v36  ;;  %v6352_v5 = vmax.f32 %v6114_v1, 0.0 }
 0x686   : > { %v6119_v35 = vpop.f32.mrf.mxu1 }
 0x687   : > { %v6353_v40 = vmax.f32 %v6116_v34, 0.0  ;;  %v6452_v61 = vpack.c.bf16 %v6352_v5, %v6350_v37  ;;  %v6120_v42 = vadd.f32 %v6119_v35, %v14618_v49 }
 0x688   : > { %v6121_v0 = vpop.f32.mrf.mxu1 }
 0x689   : > { %v6453_v23 = vpack.c.bf16 %v6353_v40, %v6351_v25  ;;  %v6122_v33 = vadd.f32 %v6121_v0, %v14615_v36  ;;  %v6354_v41 = vmax.f32 %v6120_v42, 0.0 }
 0x68a   : > { %v6123_v27 = vpop.f32.mrf.mxu1 }
 0x68b   : > { %v6124_v28 = vadd.f32 %v6123_v27, %v14618_v49  ;;  %6858 = vmatprep.mubr.bf16.mxu0 %v6453_v23  ;;  %v6355_v15 = vmax.f32 %v6122_v33, 0.0 }
 0x68c   : > { %v6125_v32 = vpop.f32.mrf.mxu1  ;;  %6859 = vmatmul.mubr.bf16.gmra.mxu0 %v6452_v61 }
 0x68d   : > { %v6126_v26 = vadd.f32 %v6125_v32, %v14615_v36  ;;  %v6356_v52 = vmax.f32 %v6124_v28, 0.0 }
 0x68e   : > { %v6129_v9 = vpop.f32.mrf.mxu1 }
 0x68f   : > { %v6357_v62 = vmax.f32 %v6126_v26, 0.0  ;;  %v6454_v43 = vpack.c.bf16 %v6356_v52, %v6354_v41  ;;  %v6130_v20 = vadd.f32 %v6129_v9, %v14618_v49 }
 0x690   : > { %v6131_v13 = vpop.f32.mrf.mxu1 }
 0x691   : > { %v6455_v8 = vpack.c.bf16 %v6357_v62, %v6355_v15  ;;  %v6132_v21 = vadd.f32 %v6131_v13, %v14615_v36  ;;  %v6358_v22 = vmax.f32 %v6130_v20, 0.0 }
 0x692   : > { %v6133_v7 = vpop.f32.mrf.mxu1 }
 0x693   : > { %v6134_v48 = vadd.f32 %v6133_v7, %v14618_v49  ;;  %6868 = vmatprep.mubr.bf16.mxu0 %v6455_v8  ;;  %v6359_v46 = vmax.f32 %v6132_v21, 0.0 }
 0x694   : > { %v6135_v18 = vpop.f32.mrf.mxu1  ;;  %6869 = vmatmul.mubr.bf16.gmra.mxu0 %v6454_v43 }
 0x695   : > { %v6136_v19 = vadd.f32 %v6135_v18, %v14615_v36  ;;  %v6360_v53 = vmax.f32 %v6134_v48, 0.0 }
 0x696   : > { %v6139_v45 = vpop.f32.mrf.mxu1 }
 0x697   : > { %v6361_v44 = vmax.f32 %v6136_v19, 0.0  ;;  %v6456_v4 = vpack.c.bf16 %v6360_v53, %v6358_v22  ;;  %v6140_v24 = vadd.f32 %v6139_v45, %v14618_v49 }
 0x698   : > { %v6141_v47 = vpop.f32.mrf.mxu1 }
 0x699   : > { %v6457_v16 = vpack.c.bf16 %v6361_v44, %v6359_v46  ;;  %v6142_v59 = vadd.f32 %v6141_v47, %v14615_v36  ;;  %v6362_v38 = vmax.f32 %v6140_v24, 0.0 }
 0x69a   : > { %v6143_v6 = vpop.f32.mrf.mxu1 }
 0x69b   : > { %v6144_v3 = vadd.f32 %v6143_v6, %v14618_v49  ;;  %6878 = vmatprep.mubr.bf16.mxu0 %v6457_v16  ;;  %v6363_v29 = vmax.f32 %v6142_v59, 0.0 }
 0x69c   : > { %v6145_v51 = vpop.f32.mrf.mxu1  ;;  %6879 = vmatmul.mubr.bf16.gmra.mxu0 %v6456_v4 }
 0x69d   : > { %v6146_v10 = vadd.f32 %v6145_v51, %v14615_v36  ;;  %v6364_v58 = vmax.f32 %v6144_v3, 0.0 }
 0x69e   : > { %v6149_v57 = vpop.f32.mrf.mxu1 }
 0x69f   : > { %v6365_v60 = vmax.f32 %v6146_v10, 0.0  ;;  %v6458_v54 = vpack.c.bf16 %v6364_v58, %v6362_v38  ;;  %v6150_v56 = vadd.f32 %v6149_v57, %v14618_v49 }
 0x6a0   : > { %v6151_v14 = vpop.f32.mrf.mxu1 }
 0x6a1   : > { %v6459_v50 = vpack.c.bf16 %v6365_v60, %v6363_v29  ;;  %v6152_v11 = vadd.f32 %v6151_v14, %v14615_v36  ;;  %v6366_v5 = vmax.f32 %v6150_v56, 0.0 }
 0x6a2   : > { %v6153_v63 = vpop.f32.mrf.mxu1 }
 0x6a3   : > { %v6154_v55 = vadd.f32 %v6153_v63, %v14618_v49  ;;  %6888 = vmatprep.mubr.bf16.mxu0 %v6459_v50  ;;  %v6367_v17 = vmax.f32 %v6152_v11, 0.0 }
 0x6a4   : > { %v6155_v30 = vpop.f32.mrf.mxu1  ;;  %6889 = vmatmul.mubr.bf16.gmra.mxu0 %v6458_v54 }
 0x6a5   : > { %v6156_v1 = vadd.f32 %v6155_v30, %v14615_v36  ;;  %v6368_v34 = vmax.f32 %v6154_v55, 0.0 }
 0x6a6   : > { %v6159_v12 = vpop.f32.mrf.mxu1 }
 0x6a7   : > { %v6369_v35 = vmax.f32 %v6156_v1, 0.0  ;;  %v6460_v37 = vpack.c.bf16 %v6368_v34, %v6366_v5  ;;  %v6160_v33 = vadd.f32 %v6159_v12, %v14618_v49 }
 0x6a8   : > { %v6161_v25 = vpop.f32.mrf.mxu1 }
 0x6a9   : > { %v6461_v40 = vpack.c.bf16 %v6369_v35, %v6367_v17  ;;  %v6162_v23 = vadd.f32 %v6161_v25, %v14615_v36  ;;  %v6370_v52 = vmax.f32 %v6160_v33, 0.0 }
 0x6aa   : > { %v6163_v0 = vpop.f32.mrf.mxu1 }
 0x6ab   : > { %v6164_v27 = vadd.f32 %v6163_v0, %v14618_v49  ;;  %6898 = vmatprep.mubr.bf16.mxu0 %v6461_v40  ;;  %v6371_v42 = vmax.f32 %v6162_v23, 0.0 }
 0x6ac   : > { %v6165_v61 = vpop.f32.mrf.mxu1  ;;  %6899 = vmatmul.mubr.bf16.gmra.mxu0 %v6460_v37 }
 0x6ad   : > { %v6166_v28 = vadd.f32 %v6165_v61, %v14615_v36  ;;  %v6372_v26 = vmax.f32 %v6164_v27, 0.0 }
 0x6ae   : > { %v6169_v32 = vpop.f32.mrf.mxu1 }
 0x6af   : > { %v6373_v9 = vmax.f32 %v6166_v28, 0.0  ;;  %v6462_v41 = vpack.c.bf16 %v6372_v26, %v6370_v52  ;;  %v6170_v21 = vadd.f32 %v6169_v32, %v14618_v49 }
 0x6b0   : > { %v6171_v15 = vpop.f32.mrf.mxu1 }
 0x6b1   : > { %v6463_v62 = vpack.c.bf16 %v6373_v9, %v6371_v42  ;;  %v6172_v8 = vadd.f32 %v6171_v15, %v14615_v36  ;;  %v6374_v53 = vmax.f32 %v6170_v21, 0.0 }
 0x6b2   : > { %v6173_v13 = vpop.f32.mrf.mxu1 }
 0x6b3   : > { %v6174_v7 = vadd.f32 %v6173_v13, %v14618_v49  ;;  %6908 = vmatprep.mubr.bf16.mxu0 %v6463_v62  ;;  %v6375_v20 = vmax.f32 %v6172_v8, 0.0 }
 0x6b4   : > { %v6175_v43 = vpop.f32.mrf.mxu1  ;;  %6909 = vmatmul.mubr.bf16.gmra.mxu0 %v6462_v41 }
 0x6b5   : > { %v6176_v48 = vadd.f32 %v6175_v43, %v14615_v36  ;;  %v6376_v19 = vmax.f32 %v6174_v7, 0.0 }
 0x6b6   : > { %v6179_v18 = vpop.f32.mrf.mxu1 }
 0x6b7   : > { %v6377_v45 = vmax.f32 %v6176_v48, 0.0  ;;  %v6464_v22 = vpack.c.bf16 %v6376_v19, %v6374_v53  ;;  %v6180_v59 = vadd.f32 %v6179_v18, %v14618_v49 }
 0x6b8   : > { %v6181_v46 = vpop.f32.mrf.mxu1 }
 0x6b9   : > { %v6465_v44 = vpack.c.bf16 %v6377_v45, %v6375_v20  ;;  %v6182_v16 = vadd.f32 %v6181_v46, %v14615_v36  ;;  %v6378_v58 = vmax.f32 %v6180_v59, 0.0 }
 0x6ba   : > { %v6183_v47 = vpop.f32.mrf.mxu1 }
 0x6bb   : > { %v6184_v6 = vadd.f32 %v6183_v47, %v14618_v49  ;;  %6918 = vmatprep.mubr.bf16.mxu0 %v6465_v44  ;;  %v6379_v24 = vmax.f32 %v6182_v16, 0.0 }
 0x6bc   : > { %v6185_v4 = vpop.f32.mrf.mxu1  ;;  %6919 = vmatmul.mubr.bf16.gmra.mxu0 %v6464_v22 }
 0x6bd   : > { %v6186_v3 = vadd.f32 %v6185_v4, %v14615_v36  ;;  %v6380_v10 = vmax.f32 %v6184_v6, 0.0 }
 0x6be   : > { %v6189_v51 = vpop.f32.mrf.mxu1 }
 0x6bf   : > { %v6381_v57 = vmax.f32 %v6186_v3, 0.0  ;;  %v6466_v38 = vpack.c.bf16 %v6380_v10, %v6378_v58  ;;  %v6190_v11 = vadd.f32 %v6189_v51, %v14618_v49  ;;  %v11153_v10 = vld [vmem:[%s17296_s6 + $0x6] ss:$8 sm:$0x3] }
 0x6c0   : > { %v6191_v29 = vpop.f32.mrf.mxu1 }
 0x6c1   : > { %v6467_v60 = vpack.c.bf16 %v6381_v57, %v6379_v24  ;;  %v6192_v50 = vadd.f32 %v6191_v29, %v14615_v36  ;;  %v6382_v34 = vmax.f32 %v6190_v11, 0.0 }
 0x6c2   : > { %v6193_v14 = vpop.f32.mrf.mxu1 }
 0x6c3   : > { %v6194_v63 = vadd.f32 %v6193_v14, %v14618_v49  ;;  %6928 = vmatprep.mubr.bf16.mxu0 %v6467_v60  ;;  %v6383_v56 = vmax.f32 %v6192_v50, 0.0  ;;  %v14808_v50 = vrot.slane %v11153_v10, %v12374_v39 }
 0x6c4   : > { %v6195_v54 = vpop.f32.mrf.mxu1  ;;  %6929 = vmatmul.mubr.bf16.gmra.mxu0 %v6466_v38 }
 0x6c5   : > { %v6196_v55 = vadd.f32 %v6195_v54, %v14615_v36  ;;  %v6384_v1 = vmax.f32 %v6194_v63, 0.0 }
 0x6c6   : > { %v6199_v30 = vpop.f32.mrf.mxu1 }
 0x6c7   : > { %v6385_v12 = vmax.f32 %v6196_v55, 0.0  ;;  %v6468_v5 = vpack.c.bf16 %v6384_v1, %v6382_v34  ;;  %v6200_v23 = vadd.f32 %v6199_v30, %v14618_v49  ;;  %v14813_v30 = vrot.slane %v11153_v10, %v12357_v31 }
 0x6c8   : > { %v6201_v17 = vpop.f32.mrf.mxu1 }
 0x6c9   : > { %v6469_v35 = vpack.c.bf16 %v6385_v12, %v6383_v56  ;;  %v6202_v40 = vadd.f32 %v6201_v17, %v14615_v36  ;;  %v6386_v26 = vmax.f32 %v6200_v23, 0.0 }
 0x6ca   : > { %v6203_v25 = vpop.f32.mrf.mxu1 }
 0x6cb   : > { %v6204_v0 = vadd.f32 %v6203_v25, %v14618_v49  ;;  %6938 = vmatprep.mubr.bf16.mxu0 %v6469_v35  ;;  %v6387_v33 = vmax.f32 %v6202_v40, 0.0 }
 0x6cc   : > { %v6205_v37 = vpop.f32.mrf.mxu1  ;;  %6939 = vmatmul.mubr.bf16.gmra.mxu0 %v6468_v5 }
 0x6cd   : > { %v6206_v27 = vadd.f32 %v6205_v37, %v14615_v36  ;;  %v6388_v28 = vmax.f32 %v6204_v0, 0.0 }
 0x6ce   : > { %v6209_v61 = vpop.f32.mrf.mxu1 }
 0x6cf   : > { %v6389_v32 = vmax.f32 %v6206_v27, 0.0  ;;  %v6470_v52 = vpack.c.bf16 %v6388_v28, %v6386_v26  ;;  %v6210_v8 = vadd.f32 %v6209_v61, %v14618_v49 }
 0x6d0   : > { %v6211_v42 = vpop.f32.mrf.mxu1 }
 0x6d1   : > { %v6471_v9 = vpack.c.bf16 %v6389_v32, %v6387_v33  ;;  %v6212_v62 = vadd.f32 %v6211_v42, %v14615_v36  ;;  %v6390_v19 = vmax.f32 %v6210_v8, 0.0 }
 0x6d2   : > { %v6213_v15 = vpop.f32.mrf.mxu1 }
 0x6d3   : > { %v6214_v13 = vadd.f32 %v6213_v15, %v14618_v49  ;;  %6948 = vmatprep.mubr.bf16.mxu0 %v6471_v9  ;;  %v6391_v21 = vmax.f32 %v6212_v62, 0.0 }
 0x6d4   : > { %v6215_v41 = vpop.f32.mrf.mxu1  ;;  %6949 = vmatmul.mubr.bf16.gmra.mxu0 %v6470_v52  ;;  %v10105_v52 = vld [vmem:[%s17301_s11] sm:$0x3] }
 0x6d5   : > { %v6216_v7 = vadd.f32 %v6215_v41, %v14615_v36  ;;  %v6392_v48 = vmax.f32 %v6214_v13, 0.0 }
 0x6d6   : > { %v6219_v43 = vpop.f32.mrf.mxu1 }
 0x6d7   : > { %v6393_v18 = vmax.f32 %v6216_v7, 0.0  ;;  %v6472_v53 = vpack.c.bf16 %v6392_v48, %v6390_v19  ;;  %v6220_v16 = vadd.f32 %v6219_v43, %v14618_v49  ;;  %v14828_v19 = vrot.slane %v10105_v52, %v12374_v39 }
 0x6d8   : > { %v6221_v20 = vpop.f32.mrf.mxu1 }
 0x6d9   : > { %v6473_v45 = vpack.c.bf16 %v6393_v18, %v6391_v21  ;;  %v6222_v44 = vadd.f32 %v6221_v20, %v14615_v36  ;;  %v6394_v57 = vmax.f32 %v6220_v16, 0.0 }
 0x6da   : > { %v6223_v46 = vpop.f32.mrf.mxu1 }
 0x6db   : > { %v6224_v47 = vadd.f32 %v6223_v46, %v14618_v49  ;;  %6958 = vmatprep.mubr.bf16.mxu0 %v6473_v45  ;;  %v6395_v59 = vmax.f32 %v6222_v44, 0.0  ;;  %v14831_v44 = vrot.slane %v10105_v52, %v12357_v31 }
 0x6dc   : > { %v6225_v22 = vpop.f32.mrf.mxu1  ;;  %6959 = vmatmul.mubr.bf16.gmra.mxu0 %v6472_v53 }
 0x6dd   : > { %v6226_v6 = vadd.f32 %v6225_v22, %v14615_v36  ;;  %v6396_v3 = vmax.f32 %v6224_v47, 0.0 }
 0x6de   : > { %v6229_v4 = vpop.f32.mrf.mxu1 }
 0x6df   : > { %v6397_v51 = vmax.f32 %v6226_v6, 0.0  ;;  %v6474_v60 = vpack.c.bf16 %v6396_v3, %v6394_v57  ;;  %v6230_v54 = vadd.f32 %v6229_v4, %v14618_v49  ;;  %v11927_v4 = vld [vmem:[%s17297_s7 + $0x38] sm:$0xff]  }
 0x6e0   : > { %v6231_v24 = vpop.f32.mrf.mxu1 }
 0x6e1   : > { %v6475_v29 = vpack.c.bf16 %v6397_v51, %v6395_v59  ;;  %v6232_v14 = vadd.f32 %v6231_v24, %v14615_v36  ;;  %v6398_v25 = vmax.f32 %v6230_v54, 0.0 }
 0x6e2   : > { %v6233_v58 = vpop.f32.mrf.mxu1 }
 0x6e3   : > { %v6234_v38 = vadd.f32 %v6233_v58, %v14618_v49  ;;  %6968 = vmatprep.mubr.bf16.mxu0 %v6475_v29  ;;  %v6399_v56 = vmax.f32 %v6232_v14, 0.0 }
 0x6e4   : > { %v6235_v63 = vpop.f32.mrf.mxu1  ;;  %v6730_v55 = vpop.f32.mrf.mxu0  ;;  %6969 = vmatmul.mubr.bf16.gmra.mxu0 %v6474_v60 }
 0x6e5   : > { %v6236_v11 = vadd.f32 %v6235_v63, %v14615_v36  ;;  %v6400_v1 = vmax.f32 %v6234_v38, 0.0  ;;  %v6731_v17 = vadd.f32 %v6730_v55, %v14808_v50 }
 0x6e6   : > { %v6239_v34 = vpop.f32.mrf.mxu1  ;;  %v6732_v35 = vpop.f32.mrf.mxu0 }
 0x6e7   : > { %v6401_v12 = vmax.f32 %v6236_v11, 0.0  ;;  %v6476_v23 = vpack.c.bf16 %v6400_v1, %v6398_v25  ;;  %v7049_v27 = vmax.f32 %v6731_v17, 0.0  ;;  %v6240_v61 = vadd.f32 %v6239_v34, %v14618_v49 }
 0x6e8   : > { %v6241_v5 = vpop.f32.mrf.mxu1  ;;  %v6734_v40 = vpop.f32.mrf.mxu0  ;;  %v6733_v33 = vadd.f32 %v6732_v35, %v14813_v30 }
 0x6e9   : > { %v6477_v0 = vpack.c.bf16 %v6401_v12, %v6399_v56  ;;  %v6735_v37 = vadd.f32 %v6734_v40, %v14808_v50  ;;  %v6242_v42 = vadd.f32 %v6241_v5, %v14615_v36  ;;  %v6402_v45 = vmax.f32 %v6240_v61, 0.0 }
 0x6ea   : > { %v6243_v28 = vpop.f32.mrf.mxu1  ;;  %v6736_v32 = vpop.f32.mrf.mxu0  ;;  %v7050_v21 = vmax.f32 %v6733_v33, 0.0 }
 0x6eb   : > { %6978 = vmatprep.mubr.bf16.mxu0 %v6477_v0  ;;  %v7051_v26 = vmax.f32 %v6735_v37, 0.0  ;;  %v6244_v9 = vadd.f32 %v6243_v28, %v14618_v49  ;;  %v6737_v15 = vadd.f32 %v6736_v32, %v14813_v30  ;;  %v6403_v46 = vmax.f32 %v6242_v42, 0.0 }
 0x6ec   : > { %v6245_v62 = vpop.f32.mrf.mxu1  ;;  %v6740_v13 = vpop.f32.mrf.mxu0  ;;  %6979 = vmatmul.mubr.bf16.gmra.mxu0 %v6476_v23  ;;  %v11928_v23 = vld [vmem:[%s17297_s7 + $0x30] sm:$0xff]  }
 0x6ed   : > { %v7177_v41 = vpack.c.bf16 %v7051_v26, %v7049_v27  ;;  %v6404_v8 = vmax.f32 %v6244_v9, 0.0  ;;  %v7052_v7 = vmax.f32 %v6737_v15, 0.0  ;;  %v6246_v43 = vadd.f32 %v6245_v62, %v14615_v36  ;;  %v11935_v27 = vld [vmem:[%s17298_s8] sm:$0xff]  }
 0x6ee   : > { %v6741_v48 = vadd.f32 %v6740_v13, %v14808_v50  ;;  %v6249_v18 = vpop.f32.mrf.mxu1  ;;  %v6742_v20 = vpop.f32.mrf.mxu0  ;;  %11379 = vmatprep.subr.bf16.mxu0 %v11935_v27 }
 0x6ef   : > { %v6405_v53 = vmax.f32 %v6246_v43, 0.0  ;;  %v6250_v47 = vadd.f32 %v6249_v18, %v14618_v49  ;;  %v7178_v6 = vpack.c.bf16 %v7052_v7, %v7050_v21  ;;  %v8980_v59 = vunpack.c.h.bf16 %v7177_v41  ;;  %v11929_v18 = vld [vmem:[%s17297_s7 + $0x28] sm:$0xff]   ;;  %11380 = vmatpush3.bf16.msra.mxu0 %v11935_v27 }
 0x6f0   : > { %v6251_v22 = vpop.f32.mrf.mxu1  ;;  %v6744_v16 = vpop.f32.mrf.mxu0  ;;  %v8978_v3 = vunpack.c.l.bf16 %v7177_v41  ;;  %v6478_v51 = vpack.c.bf16 %v6404_v8, %v6402_v45  ;;  %v7053_v24 = vmax.f32 %v6741_v48, 0.0  ;;  %v6743_v10 = vadd.f32 %v6742_v20, %v14813_v30 }
 0x6f1   : > { %v6745_v57 = vadd.f32 %v6744_v16, %v14808_v50  ;;  %v6252_v29 = vadd.f32 %v6251_v22, %v14615_v36  ;;  %7479 = vmatprep.mubr.bf16.mxu1 %v7178_v6  ;;  %v6479_v14 = vpack.c.bf16 %v6405_v53, %v6403_v46  ;;  %v8981_v38 = vunpack.c.h.bf16 %v7178_v6 }
 0x6f2   : > { %v6253_v58 = vpop.f32.mrf.mxu1  ;;  %v6746_v60 = vpop.f32.mrf.mxu0  ;;  %v8979_v63 = vunpack.c.l.bf16 %v7178_v6  ;;  %7480 = vmatmul.mubr.bf16.vlgmr.msra.gmra.mxu1 %v7177_v41  ;;  %v10119_v56 = vmul.f32 %v14828_v19, %v8980_v59  ;;  %v6406_v1 = vmax.f32 %v6250_v47, 0.0  ;;  %v10117_v35 = vmul.f32 %v14828_v19, %v8978_v3 }
 0x6f3   : > { %v7055_v54 = vmax.f32 %v6745_v57, 0.0  ;;  %v6254_v11 = vadd.f32 %v6253_v58, %v14618_v49  ;;  %v6747_v55 = vadd.f32 %v6746_v60, %v14813_v30  ;;  %6988 = vmatprep.mubr.bf16.mxu0 %v6479_v14  ;;  %8555 = vmatpush1.bf16.msra.mxu1 %v11927_v4  ;;  %v10120_v34 = vmul.f32 %v14831_v44, %v8981_v38 }
 0x6f4   : > { %v6255_v12 = vpop.f32.mrf.mxu1  ;;  %v6750_v17 = vpop.f32.mrf.mxu0  ;;  %v10118_v25 = vmul.f32 %v14831_v44, %v8979_v63  ;;  %6989 = vmatmul.mubr.bf16.gmra.mxu0 %v6478_v51  ;;  %8556 = vmatprep.subr.bf16.mxu1 %v12028_v2  ;;  %v7054_v61 = vmax.f32 %v6743_v10, 0.0  ;;  %v6407_v9 = vmax.f32 %v6252_v29, 0.0  ;;  %v11930_v63 = vld [vmem:[%s17297_s7 + $0x20] sm:$0xff]  }
 0x6f5   : > { %v7179_v5 = vpack.c.bf16 %v7055_v54, %v7053_v24  ;;  %v6408_v40 = vmax.f32 %v6254_v11, 0.0  ;;  %v7056_v0 = vmax.f32 %v6747_v55, 0.0  ;;  %v6256_v37 = vadd.f32 %v6255_v12, %v14615_v36 }
 0x6f6   : > { %v6751_v33 = vadd.f32 %v6750_v17, %v14808_v50  ;;  %v6259_v28 = vpop.f32.mrf.mxu1  ;;  %v6752_v32 = vpop.f32.mrf.mxu0  ;;  %v10248_v42 = vadd.f32 %v10120_v34, %v10119_v56  ;;  %v10245_v26 = vadd.f32 %v10118_v25, %v10117_v35 }
 0x6f7   : > { %v6409_v15 = vmax.f32 %v6256_v37, 0.0  ;;  %v6480_v52 = vpack.c.bf16 %v6408_v40, %v6406_v1  ;;  %v7180_v41 = vpack.c.bf16 %v7056_v0, %v7054_v61  ;;  %v8984_v8 = vunpack.c.h.bf16 %v7179_v5  ;;  %8557 = vmatpush1.bf16.msra.mxu1 %v11928_v23 }
 0x6f8   : > { %10249 = vadd.xlane.f32.xlu1 %v10248_v42  ;;  %10246 = vadd.xlane.f32.xlu0 %v10245_v26  ;;  %v6261_v62 = vpop.f32.mrf.mxu1  ;;  %v6754_v13 = vpop.f32.mrf.mxu0  ;;  %v8982_v7 = vunpack.c.l.bf16 %v7179_v5  ;;  %v6260_v43 = vadd.f32 %v6259_v28, %v14618_v49  ;;  %v6753_v21 = vadd.f32 %v6752_v32, %v14813_v30  ;;  %v7057_v20 = vmax.f32 %v6751_v33, 0.0  ;;  %v11931_v28 = vld [vmem:[%s17297_s7 + $0x18] sm:$0xff]  }
 0x6f9   : > { %v6755_v48 = vadd.f32 %v6754_v13, %v14808_v50  ;;  %7489 = vmatprep.mubr.bf16.mxu1 %v7180_v41  ;;  %v6481_v53 = vpack.c.bf16 %v6409_v15, %v6407_v9  ;;  %v8985_v47 = vunpack.c.h.bf16 %v7180_v41  ;;  %v8983_v22 = vunpack.c.l.bf16 %v7180_v41  ;;  %8558 = vmatprep.subr.bf16.mxu1 %v12028_v2 }
 0x6fa   : > { %v6263_v45 = vpop.f32.mrf.mxu1  ;;  %v6756_v46 = vpop.f32.mrf.mxu0  ;;  %v6262_v16 = vadd.f32 %v6261_v62, %v14615_v36  ;;  %7490 = vmatmul.mubr.bf16.gmra.mxu1 %v7179_v5  ;;  %v10123_v24 = vmul.f32 %v14828_v19, %v8984_v8  ;;  %v10121_v57 = vmul.f32 %v14828_v19, %v8982_v7  ;;  %v7058_v54 = vmax.f32 %v6753_v21, 0.0 }
 0x6fb   : > { %v7059_v6 = vmax.f32 %v6755_v48, 0.0  ;;  %v6264_v4 = vadd.f32 %v6263_v45, %v14618_v49  ;;  %v6757_v59 = vadd.f32 %v6756_v46, %v14813_v30  ;;  %6998 = vmatprep.mubr.bf16.mxu0 %v6481_v53  ;;  %v10124_v10 = vmul.f32 %v14831_v44, %v8985_v47  ;;  %8559 = vmatpush1.bf16.msra.mxu1 %v11929_v18 }
 0x6fc   : > { %v6265_v3 = vpop.f32.mrf.mxu1  ;;  %v6760_v51 = vpop.f32.mrf.mxu0  ;;  %v10122_v29 = vmul.f32 %v14831_v44, %v8983_v22  ;;  %6999 = vmatmul.mubr.bf16.gmra.mxu0 %v6480_v52  ;;  %8560 = vmatprep.subr.bf16.mxu1 %v12028_v2  ;;  %v6410_v17 = vmax.f32 %v6260_v43, 0.0  ;;  %v6411_v35 = vmax.f32 %v6262_v16, 0.0  ;;  %v11932_v22 = vld [vmem:[%s17297_s7 + $0x10] sm:$0xff]  }
 0x6fd   : > { %v7181_v58 = vpack.c.bf16 %v7059_v6, %v7057_v20  ;;  %v6412_v60 = vmax.f32 %v6264_v4, 0.0  ;;  %v7060_v14 = vmax.f32 %v6757_v59, 0.0  ;;  %v6266_v38 = vadd.f32 %v6265_v3, %v14615_v36 }
 0x6fe   : > { %v6761_v11 = vadd.f32 %v6760_v51, %v14808_v50  ;;  %v6269_v55 = vpop.f32.mrf.mxu1  ;;  %v6762_v56 = vpop.f32.mrf.mxu0  ;;  %v10254_v1 = vadd.f32 %v10124_v10, %v10123_v24  ;;  %v10251_v12 = vadd.f32 %v10122_v29, %v10121_v57 }
 0x6ff   : > { %v6413_v34 = vmax.f32 %v6266_v38, 0.0  ;;  %v7182_v40 = vpack.c.bf16 %v7060_v14, %v7058_v54  ;;  %v8988_v0 = vunpack.c.h.bf16 %v7181_v58  ;;  %v8986_v37 = vunpack.c.l.bf16 %v7181_v58  ;;  %8561 = vmatpush1.bf16.msra.mxu1 %v11930_v63 }
 0x700   : > { %10255 = vadd.xlane.f32.xlu1 %v10254_v1  ;;  %10252 = vadd.xlane.f32.xlu0 %v10251_v12  ;;  %v6271_v25 = vpop.f32.mrf.mxu1  ;;  %v6764_v5 = vpop.f32.mrf.mxu0  ;;  %v6482_v23 = vpack.c.bf16 %v6412_v60, %v6410_v17  ;;  %v6270_v27 = vadd.f32 %v6269_v55, %v14618_v49  ;;  %v6763_v61 = vadd.f32 %v6762_v56, %v14813_v30  ;;  %v7061_v32 = vmax.f32 %v6761_v11, 0.0  ;;  %v11933_v56 = vld [vmem:[%s17297_s7 + $0x8] sm:$0xff]  }
 0x701   : > { %v6765_v33 = vadd.f32 %v6764_v5, %v14808_v50  ;;  %7499 = vmatprep.mubr.bf16.mxu1 %v7182_v40  ;;  %v6483_v9 = vpack.c.bf16 %v6413_v34, %v6411_v35  ;;  %v8989_v15 = vunpack.c.h.bf16 %v7182_v40  ;;  %v8987_v52 = vunpack.c.l.bf16 %v7182_v40  ;;  %8562 = vmatprep.subr.bf16.mxu1 %v12028_v2 }
 0x702   : > { %v6273_v42 = vpop.f32.mrf.mxu1  ;;  %v6766_v26 = vpop.f32.mrf.mxu0  ;;  %v6272_v62 = vadd.f32 %v6271_v25, %v14615_v36  ;;  %7500 = vmatmul.mubr.bf16.gmra.mxu1 %v7181_v58  ;;  %v10127_v21 = vmul.f32 %v14828_v19, %v8988_v0  ;;  %v10125_v18 = vmul.f32 %v14828_v19, %v8986_v37  ;;  %v7062_v16 = vmax.f32 %v6763_v61, 0.0 }
 0x703   : > { %v7063_v13 = vmax.f32 %v6765_v33, 0.0  ;;  %v6274_v41 = vadd.f32 %v6273_v42, %v14618_v49  ;;  %v6767_v8 = vadd.f32 %v6766_v26, %v14813_v30  ;;  %7008 = vmatprep.mubr.bf16.mxu0 %v6483_v9  ;;  %v10128_v48 = vmul.f32 %v14831_v44, %v8989_v15  ;;  %8563 = vmatpush1.bf16.msra.mxu1 %v11931_v28 }
 0x704   : > { %v6275_v7 = vpop.f32.mrf.mxu1  ;;  %v6770_v43 = vpop.f32.mrf.mxu0  ;;  %v10126_v20 = vmul.f32 %v14831_v44, %v8987_v52  ;;  %7009 = vmatmul.mubr.bf16.gmra.mxu0 %v6482_v23  ;;  %8564 = vmatprep.subr.bf16.mxu1 %v12028_v2  ;;  %v6414_v24 = vmax.f32 %v6270_v27, 0.0  ;;  %v6415_v57 = vmax.f32 %v6272_v62, 0.0  ;;  %v11934_v52 = vld [vmem:[%s17297_s7] sm:$0xff]  }
 0x705   : > { %v7183_v45 = vpack.c.bf16 %v7063_v13, %v7061_v32  ;;  %v6416_v46 = vmax.f32 %v6274_v41, 0.0  ;;  %v7064_v53 = vmax.f32 %v6767_v8, 0.0  ;;  %v6276_v47 = vadd.f32 %v6275_v7, %v14615_v36 }
 0x706   : > { %v6771_v6 = vadd.f32 %v6770_v43, %v14808_v50  ;;  %v6279_v4 = vpop.f32.mrf.mxu1  ;;  %v6772_v59 = vpop.f32.mrf.mxu0  ;;  %v10260_v3 = vadd.f32 %v10128_v48, %v10127_v21  ;;  %v10257_v51 = vadd.f32 %v10126_v20, %v10125_v18 }
 0x707   : > { %v6417_v10 = vmax.f32 %v6276_v47, 0.0  ;;  %v7184_v60 = vpack.c.bf16 %v7064_v53, %v7062_v16  ;;  %v8992_v14 = vunpack.c.h.bf16 %v7183_v45  ;;  %v8990_v38 = vunpack.c.l.bf16 %v7183_v45  ;;  %8565 = vmatpush1.bf16.msra.mxu1 %v11932_v22 }
 0x708   : > { %10261 = vadd.xlane.f32.xlu1 %v10260_v3  ;;  %10258 = vadd.xlane.f32.xlu0 %v10257_v51  ;;  %v6281_v29 = vpop.f32.mrf.mxu1  ;;  %v6774_v58 = vpop.f32.mrf.mxu0  ;;  %v6484_v63 = vpack.c.bf16 %v6416_v46, %v6414_v24  ;;  %v6280_v54 = vadd.f32 %v6279_v4, %v14618_v49  ;;  %v6773_v11 = vadd.f32 %v6772_v59, %v14813_v30  ;;  %v7065_v1 = vmax.f32 %v6771_v6, 0.0  ;;  %v11936_v59 = vld [vmem:[%s17297_s7 + $0x78] sm:$0xff]  }
 0x709   : > { %v6775_v55 = vadd.f32 %v6774_v58, %v14808_v50  ;;  %7509 = vmatprep.mubr.bf16.mxu1 %v7184_v60  ;;  %v6485_v34 = vpack.c.bf16 %v6417_v10, %v6415_v57  ;;  %v8993_v35 = vunpack.c.h.bf16 %v7184_v60  ;;  %v8991_v25 = vunpack.c.l.bf16 %v7184_v60  ;;  %8566 = vmatprep.subr.bf16.mxu1 %v12028_v2 }
 0x70a   : > { %v6283_v12 = vpop.f32.mrf.mxu1  ;;  %v6776_v17 = vpop.f32.mrf.mxu0  ;;  %v6282_v5 = vadd.f32 %v6281_v29, %v14615_v36  ;;  %7510 = vmatmul.mubr.bf16.gmra.mxu1 %v7183_v45  ;;  %v10131_v61 = vmul.f32 %v14828_v19, %v8992_v14  ;;  %v10129_v28 = vmul.f32 %v14828_v19, %v8990_v38  ;;  %v7066_v62 = vmax.f32 %v6773_v11, 0.0 }
 0x70b   : > { %v7067_v40 = vmax.f32 %v6775_v55, 0.0  ;;  %v6284_v0 = vadd.f32 %v6283_v12, %v14618_v49  ;;  %v6777_v37 = vadd.f32 %v6776_v17, %v14813_v30  ;;  %7018 = vmatprep.mubr.bf16.mxu0 %v6485_v34  ;;  %v10132_v33 = vmul.f32 %v14831_v44, %v8993_v35  ;;  %8567 = vmatpush1.bf16.msra.mxu1 %v11933_v56 }
 0x70c   : > { %v6285_v23 = vpop.f32.mrf.mxu1  ;;  %v6780_v27 = vpop.f32.mrf.mxu0  ;;  %v10130_v32 = vmul.f32 %v14831_v44, %v8991_v25  ;;  %7019 = vmatmul.mubr.bf16.gmra.mxu0 %v6484_v63  ;;  %8568 = vmatprep.subr.bf16.mxu1 %v12028_v2  ;;  %v6418_v21 = vmax.f32 %v6280_v54, 0.0  ;;  %v6419_v18 = vmax.f32 %v6282_v5, 0.0 }
 0x70d   : > { %v7185_v42 = vpack.c.bf16 %v7067_v40, %v7065_v1  ;;  %v6420_v26 = vmax.f32 %v6284_v0, 0.0  ;;  %v7068_v9 = vmax.f32 %v6777_v37, 0.0  ;;  %v6286_v15 = vadd.f32 %v6285_v23, %v14615_v36 }
 0x70e   : > { %v6781_v13 = vadd.f32 %v6780_v27, %v14808_v50  ;;  %v6289_v41 = vpop.f32.mrf.mxu1  ;;  %v6782_v8 = vpop.f32.mrf.mxu0  ;;  %v10266_v7 = vadd.f32 %v10132_v33, %v10131_v61  ;;  %v10263_v43 = vadd.f32 %v10130_v32, %v10129_v28 }
 0x70f   : > { %v6421_v48 = vmax.f32 %v6286_v15, 0.0  ;;  %v7186_v46 = vpack.c.bf16 %v7068_v9, %v7066_v62  ;;  %v8996_v53 = vunpack.c.h.bf16 %v7185_v42  ;;  %v8994_v47 = vunpack.c.l.bf16 %v7185_v42  ;;  %8569 = vmatpush1.bf16.msra.mxu1 %v11934_v52  ;;  %v11938_v52 = vld [vmem:[%s17297_s7 + $0x68] sm:$0xff]  }
 0x710   : > { %10267 = vadd.xlane.f32.xlu1 %v10266_v7  ;;  %10264 = vadd.xlane.f32.xlu0 %v10263_v43  ;;  %v6291_v20 = vpop.f32.mrf.mxu1  ;;  %v6784_v45 = vpop.f32.mrf.mxu0  ;;  %v6486_v22 = vpack.c.bf16 %v6420_v26, %v6418_v21  ;;  %v6290_v16 = vadd.f32 %v6289_v41, %v14618_v49  ;;  %v6783_v6 = vadd.f32 %v6782_v8, %v14813_v30  ;;  %v7069_v3 = vmax.f32 %v6781_v13, 0.0 }
 0x711   : > { %v6785_v4 = vadd.f32 %v6784_v45, %v14808_v50  ;;  %7519 = vmatprep.mubr.bf16.mxu1 %v7186_v46  ;;  %v6487_v10 = vpack.c.bf16 %v6421_v48, %v6419_v18  ;;  %v8997_v57 = vunpack.c.h.bf16 %v7186_v46  ;;  %v8995_v29 = vunpack.c.l.bf16 %v7186_v46  ;;  %8570 = vmatprep.subr.bf16.mxu1 %v12028_v2 }
 0x712   : > { %v6293_v51 = vpop.f32.mrf.mxu1  ;;  %v6786_v24 = vpop.f32.mrf.mxu0  ;;  %v6292_v58 = vadd.f32 %v6291_v20, %v14615_v36  ;;  %7520 = vmatmul.mubr.bf16.gmra.mxu1 %v7185_v42  ;;  %v10135_v11 = vmul.f32 %v14828_v19, %v8996_v53  ;;  %v10133_v56 = vmul.f32 %v14828_v19, %v8994_v47  ;;  %v7070_v12 = vmax.f32 %v6783_v6, 0.0 }
 0x713   : > { %v7071_v60 = vmax.f32 %v6785_v4, 0.0  ;;  %v6294_v14 = vadd.f32 %v6293_v51, %v14618_v49  ;;  %v6787_v38 = vadd.f32 %v6786_v24, %v14813_v30  ;;  %7028 = vmatprep.mubr.bf16.mxu0 %v6487_v10  ;;  %v10136_v55 = vmul.f32 %v14831_v44, %v8997_v57  ;;  %8571 = vmatpush2.bf16.msra.mxu1 %v11936_v59  ;;  %v11937_v49 = vld [vmem:[%s17297_s7 + $0x70] sm:$0xff]  }
 0x714   : > { %v6295_v63 = vpop.f32.mrf.mxu1  ;;  %v6790_v54 = vpop.f32.mrf.mxu0  ;;  %v10134_v1 = vmul.f32 %v14831_v44, %v8995_v29  ;;  %7029 = vmatmul.mubr.bf16.gmra.mxu0 %v6486_v22  ;;  %8572 = vmatprep.subr.bf16.mxu1 %v12028_v2  ;;  %v6423_v23 = vmax.f32 %v6292_v58, 0.0  ;;  %v6422_v33 = vmax.f32 %v6290_v16, 0.0 }
 0x715   : > { %v7187_v17 = vpack.c.bf16 %v7071_v60, %v7069_v3  ;;  %v7072_v34 = vmax.f32 %v6787_v38, 0.0  ;;  %v6296_v35 = vadd.f32 %v6295_v63, %v14615_v36  ;;  %v6424_v25 = vmax.f32 %v6294_v14, 0.0 }
 0x716   : > { %v6791_v5 = vadd.f32 %v6790_v54, %v14808_v50  ;;  %v6792_v40 = vpop.f32.mrf.mxu0  ;;  %v10272_v0 = vadd.f32 %v10136_v55, %v10135_v11  ;;  %v10269_v37 = vadd.f32 %v10134_v1, %v10133_v56 }
 0x717   : > { %v6425_v27 = vmax.f32 %v6296_v35, 0.0  ;;  %v7188_v61 = vpack.c.bf16 %v7072_v34, %v7070_v12  ;;  %v9000_v28 = vunpack.c.h.bf16 %v7187_v17  ;;  %v8998_v32 = vunpack.c.l.bf16 %v7187_v17  ;;  %8573 = vmatpush2.bf16.msra.mxu1 %v11937_v49 }
 0x718   : > { %10273 = vadd.xlane.f32.xlu1 %v10272_v0  ;;  %10270 = vadd.xlane.f32.xlu0 %v10269_v37  ;;  %v6794_v36 = vpop.f32.mrf.mxu0  ;;  %v6793_v42 = vadd.f32 %v6792_v40, %v14813_v30  ;;  %v6488_v62 = vpack.c.bf16 %v6424_v25, %v6422_v33  ;;  %v7073_v13 = vmax.f32 %v6791_v5, 0.0  ;;  %v11939_v37 = vld [vmem:[%s17297_s7 + $0x60] sm:$0xff]  }
 0x719   : > { %v6795_v26 = vadd.f32 %v6794_v36, %v14808_v50  ;;  %7529 = vmatprep.mubr.bf16.mxu1 %v7188_v61  ;;  %v6489_v9 = vpack.c.bf16 %v6425_v27, %v6423_v23  ;;  %v9001_v15 = vunpack.c.h.bf16 %v7188_v61  ;;  %v8999_v8 = vunpack.c.l.bf16 %v7188_v61  ;;  %8574 = vmatprep.subr.bf16.mxu1 %v12028_v2 }
 0x71a   : > { %v6796_v41 = vpop.f32.mrf.mxu0  ;;  %7530 = vmatmul.mubr.bf16.gmra.mxu1 %v7187_v17  ;;  %v10139_v21 = vmul.f32 %v14828_v19, %v9000_v28  ;;  %v10137_v20 = vmul.f32 %v14828_v19, %v8998_v32  ;;  %v7074_v46 = vmax.f32 %v6793_v42, 0.0 }
 0x71b   : > { %v7075_v7 = vmax.f32 %v6795_v26, 0.0  ;;  %v6797_v43 = vadd.f32 %v6796_v41, %v14813_v30  ;;  %7038 = vmatprep.mubr.bf16.mxu0 %v6489_v9  ;;  %v10140_v48 = vmul.f32 %v14831_v44, %v9001_v15  ;;  %v10138_v45 = vmul.f32 %v14831_v44, %v8999_v8  ;;  %8575 = vmatpush2.bf16.msra.mxu1 %v11938_v52 }
 0x71c   : > { %v6800_v18 = vpop.f32.mrf.mxu0  ;;  %7039 = vmatmul.mubr.bf16.gmra.mxu0 %v6488_v62  ;;  %8576 = vmatprep.subr.bf16.mxu1 %v12028_v2 }
 0x71d   : > { %v7189_v53 = vpack.c.bf16 %v7075_v7, %v7073_v13  ;;  %v7076_v47 = vmax.f32 %v6797_v43, 0.0  ;;  %v10278_v22 = vadd.f32 %v10140_v48, %v10139_v21  ;;  %v6801_v16 = vadd.f32 %v6800_v18, %v14808_v50 }
 0x71e   : > { %v6802_v6 = vpop.f32.mrf.mxu0  ;;  %v10275_v4 = vadd.f32 %v10138_v45, %v10137_v20 }
 0x71f   : > { %10279 = vadd.xlane.f32.xlu1 %v10278_v22  ;;  %v7190_v59 = vpack.c.bf16 %v7076_v47, %v7074_v46  ;;  %v9004_v3 = vunpack.c.h.bf16 %v7189_v53  ;;  %v9002_v24 = vunpack.c.l.bf16 %v7189_v53  ;;  %v6803_v10 = vadd.f32 %v6802_v6, %v14813_v30  ;;  %8577 = vmatpush2.bf16.msra.mxu1 %v11939_v37 }
 0x720   : > { %10276 = vadd.xlane.f32.xlu0 %v10275_v4  ;;  %v6804_v51 = vpop.f32.mrf.mxu0  ;;  %v7077_v58 = vmax.f32 %v6801_v16, 0.0  ;;  %8578 = vmatprep.subr.bf16.mxu1 %v12028_v2 }
 0x721   : > { %v6805_v57 = vadd.f32 %v6804_v51, %v14808_v50  ;;  %7539 = vmatprep.mubr.bf16.mxu1 %v7190_v59  ;;  %v9005_v29 = vunpack.c.h.bf16 %v7190_v59  ;;  %v9003_v14 = vunpack.c.l.bf16 %v7190_v59  ;;  %v10143_v54 = vmul.f32 %v14828_v19, %v9004_v3 }
 0x722   : > { %v6806_v60 = vpop.f32.mrf.mxu0  ;;  %7540 = vmatmul.mubr.bf16.gmra.mxu1 %v7189_v53  ;;  %v10141_v56 = vmul.f32 %v14828_v19, %v9002_v24  ;;  %v7078_v12 = vmax.f32 %v6803_v10, 0.0 }
 0x723   : > { %v7079_v38 = vmax.f32 %v6805_v57, 0.0  ;;  %v6807_v63 = vadd.f32 %v6806_v60, %v14813_v30  ;;  %v10144_v11 = vmul.f32 %v14831_v44, %v9005_v29  ;;  %v10142_v1 = vmul.f32 %v14831_v44, %v9003_v14 }
 0x724   : > { %v6810_v55 = vpop.f32.mrf.mxu0 }
 0x725   : > { %v7191_v17 = vpack.c.bf16 %v7079_v38, %v7077_v58  ;;  %v7080_v34 = vmax.f32 %v6807_v63, 0.0  ;;  %v10284_v35 = vadd.f32 %v10144_v11, %v10143_v54  ;;  %v6811_v49 = vadd.f32 %v6810_v55, %v14808_v50 }
 0x726   : > { %v6812_v25 = vpop.f32.mrf.mxu0  ;;  %v10281_v5 = vadd.f32 %v10142_v1, %v10141_v56 }
 0x727   : > { %10285 = vadd.xlane.f32.xlu1 %v10284_v35  ;;  %v7192_v40 = vpack.c.bf16 %v7080_v34, %v7078_v12  ;;  %v9008_v0 = vunpack.c.h.bf16 %v7191_v17  ;;  %v9006_v27 = vunpack.c.l.bf16 %v7191_v17  ;;  %v6813_v61 = vadd.f32 %v6812_v25, %v14813_v30 }
 0x728   : > { %10282 = vadd.xlane.f32.xlu0 %v10281_v5  ;;  %v6814_v23 = vpop.f32.mrf.mxu0  ;;  %v7081_v28 = vmax.f32 %v6811_v49, 0.0 }
 0x729   : > { %v6815_v33 = vadd.f32 %v6814_v23, %v14808_v50  ;;  %7549 = vmatprep.mubr.bf16.mxu1 %v7192_v40  ;;  %v9009_v36 = vunpack.c.h.bf16 %v7192_v40  ;;  %v9007_v42 = vunpack.c.l.bf16 %v7192_v40  ;;  %v10147_v15 = vmul.f32 %v14828_v19, %v9008_v0 }
 0x72a   : > { %v6816_v32 = vpop.f32.mrf.mxu0  ;;  %7550 = vmatmul.mubr.bf16.gmra.mxu1 %v7191_v17  ;;  %v10145_v13 = vmul.f32 %v14828_v19, %v9006_v27  ;;  %v7082_v8 = vmax.f32 %v6813_v61, 0.0  ;;  %v11940_v17 = vld [vmem:[%s17297_s7 + $0x58] sm:$0xff]  }
 0x72b   : > { %v7083_v26 = vmax.f32 %v6815_v33, 0.0  ;;  %v6817_v9 = vadd.f32 %v6816_v32, %v14813_v30  ;;  %v10148_v52 = vmul.f32 %v14831_v44, %v9009_v36  ;;  %v10146_v41 = vmul.f32 %v14831_v44, %v9007_v42  ;;  %8579 = vmatpush2.bf16.msra.mxu1 %v11940_v17 }
 0x72c   : > { %v6820_v62 = vpop.f32.mrf.mxu0  ;;  %8580 = vmatprep.subr.bf16.mxu1 %v12028_v2 }
 0x72d   : > { %v7193_v7 = vpack.c.bf16 %v7083_v26, %v7081_v28  ;;  %v7084_v43 = vmax.f32 %v6817_v9, 0.0  ;;  %v10290_v21 = vadd.f32 %v10148_v52, %v10147_v15  ;;  %v6821_v48 = vadd.f32 %v6820_v62, %v14808_v50 }
 0x72e   : > { %v6822_v18 = vpop.f32.mrf.mxu0  ;;  %v10287_v20 = vadd.f32 %v10146_v41, %v10145_v13 }
 0x72f   : > { %10291 = vadd.xlane.f32.xlu1 %v10290_v21  ;;  %v7194_v45 = vpack.c.bf16 %v7084_v43, %v7082_v8  ;;  %v9012_v46 = vunpack.c.h.bf16 %v7193_v7  ;;  %v9010_v47 = vunpack.c.l.bf16 %v7193_v7  ;;  %v6823_v22 = vadd.f32 %v6822_v18, %v14813_v30 }
 0x730   : > { %10288 = vadd.xlane.f32.xlu0 %v10287_v20  ;;  %v6824_v53 = vpop.f32.mrf.mxu0  ;;  %v7085_v4 = vmax.f32 %v6821_v48, 0.0 }
 0x731   : > { %v6825_v16 = vadd.f32 %v6824_v53, %v14808_v50  ;;  %7559 = vmatprep.mubr.bf16.mxu1 %v7194_v45  ;;  %v9013_v6 = vunpack.c.h.bf16 %v7194_v45  ;;  %v9011_v3 = vunpack.c.l.bf16 %v7194_v45  ;;  %v10151_v10 = vmul.f32 %v14828_v19, %v9012_v46 }
 0x732   : > { %v6826_v59 = vpop.f32.mrf.mxu0  ;;  %7560 = vmatmul.mubr.bf16.gmra.mxu1 %v7193_v7  ;;  %v10149_v58 = vmul.f32 %v14828_v19, %v9010_v47  ;;  %v7086_v14 = vmax.f32 %v6823_v22, 0.0 }
 0x733   : > { %v7087_v51 = vmax.f32 %v6825_v16, 0.0  ;;  %v6827_v24 = vadd.f32 %v6826_v59, %v14813_v30  ;;  %v10152_v57 = vmul.f32 %v14831_v44, %v9013_v6  ;;  %v10150_v60 = vmul.f32 %v14831_v44, %v9011_v3 }
 0x734   : > { %v6830_v29 = vpop.f32.mrf.mxu0 }
 0x735   : > { %v7195_v38 = vpack.c.bf16 %v7087_v51, %v7085_v4  ;;  %v7088_v63 = vmax.f32 %v6827_v24, 0.0  ;;  %v10296_v54 = vadd.f32 %v10152_v57, %v10151_v10  ;;  %v6831_v11 = vadd.f32 %v6830_v29, %v14808_v50 }
 0x736   : > { %v6832_v55 = vpop.f32.mrf.mxu0  ;;  %v10293_v56 = vadd.f32 %v10150_v60, %v10149_v58 }
 0x737   : > { %10297 = vadd.xlane.f32.xlu1 %v10296_v54  ;;  %v7196_v1 = vpack.c.bf16 %v7088_v63, %v7086_v14  ;;  %v9016_v12 = vunpack.c.h.bf16 %v7195_v38  ;;  %v9014_v35 = vunpack.c.l.bf16 %v7195_v38  ;;  %v6833_v49 = vadd.f32 %v6832_v55, %v14813_v30  ;;  %v11941_v54 = vld [vmem:[%s17297_s7 + $0x50] sm:$0xff]  }
 0x738   : > { %10294 = vadd.xlane.f32.xlu0 %v10293_v56  ;;  %v6834_v34 = vpop.f32.mrf.mxu0  ;;  %v7089_v40 = vmax.f32 %v6831_v11, 0.0  ;;  %8581 = vmatpush2.bf16.msra.mxu1 %v11941_v54 }
 0x739   : > { %v6835_v25 = vadd.f32 %v6834_v34, %v14808_v50  ;;  %7569 = vmatprep.mubr.bf16.mxu1 %v7196_v1  ;;  %v9017_v5 = vunpack.c.h.bf16 %v7196_v1  ;;  %v9015_v37 = vunpack.c.l.bf16 %v7196_v1  ;;  %v10155_v61 = vmul.f32 %v14828_v19, %v9016_v12  ;;  %8582 = vmatprep.subr.bf16.mxu1 %v12028_v2 }
 0x73a   : > { %v6836_v0 = vpop.f32.mrf.mxu0  ;;  %7570 = vmatmul.mubr.bf16.gmra.mxu1 %v7195_v38  ;;  %v10153_v28 = vmul.f32 %v14828_v19, %v9014_v35  ;;  %v7090_v42 = vmax.f32 %v6833_v49, 0.0 }
 0x73b   : > { %v7091_v23 = vmax.f32 %v6835_v25, 0.0  ;;  %v6837_v27 = vadd.f32 %v6836_v0, %v14813_v30  ;;  %v10156_v33 = vmul.f32 %v14831_v44, %v9017_v5  ;;  %v10154_v32 = vmul.f32 %v14831_v44, %v9015_v37 }
 0x73c   : > { %v6840_v36 = vpop.f32.mrf.mxu0 }
 0x73d   : > { %v7197_v26 = vpack.c.bf16 %v7091_v23, %v7089_v40  ;;  %v7092_v9 = vmax.f32 %v6837_v27, 0.0  ;;  %v10302_v15 = vadd.f32 %v10156_v33, %v10155_v61  ;;  %v6841_v52 = vadd.f32 %v6840_v36, %v14808_v50 }
 0x73e   : > { %v6842_v62 = vpop.f32.mrf.mxu0  ;;  %v10299_v13 = vadd.f32 %v10154_v32, %v10153_v28 }
 0x73f   : > { %10303 = vadd.xlane.f32.xlu1 %v10302_v15  ;;  %v7198_v41 = vpack.c.bf16 %v7092_v9, %v7090_v42  ;;  %v9020_v8 = vunpack.c.h.bf16 %v7197_v26  ;;  %v9018_v43 = vunpack.c.l.bf16 %v7197_v26  ;;  %v6843_v21 = vadd.f32 %v6842_v62, %v14813_v30 }
 0x740   : > { %10300 = vadd.xlane.f32.xlu0 %v10299_v13  ;;  %v6844_v7 = vpop.f32.mrf.mxu0  ;;  %v7093_v20 = vmax.f32 %v6841_v52, 0.0 }
 0x741   : > { %v6845_v48 = vadd.f32 %v6844_v7, %v14808_v50  ;;  %7579 = vmatprep.mubr.bf16.mxu1 %v7198_v41  ;;  %v9021_v18 = vunpack.c.h.bf16 %v7198_v41  ;;  %v9019_v46 = vunpack.c.l.bf16 %v7198_v41  ;;  %v10159_v22 = vmul.f32 %v14828_v19, %v9020_v8 }
 0x742   : > { %v6846_v45 = vpop.f32.mrf.mxu0  ;;  %7580 = vmatmul.mubr.bf16.gmra.mxu1 %v7197_v26  ;;  %v10157_v4 = vmul.f32 %v14828_v19, %v9018_v43  ;;  %v7094_v3 = vmax.f32 %v6843_v21, 0.0 }
 0x743   : > { %v7095_v53 = vmax.f32 %v6845_v48, 0.0  ;;  %v6847_v47 = vadd.f32 %v6846_v45, %v14813_v30  ;;  %v10160_v16 = vmul.f32 %v14831_v44, %v9021_v18  ;;  %v10158_v59 = vmul.f32 %v14831_v44, %v9019_v46 }
 0x744   : > { %v6850_v6 = vpop.f32.mrf.mxu0 }
 0x745   : > { %v7199_v51 = vpack.c.bf16 %v7095_v53, %v7093_v20  ;;  %v7096_v24 = vmax.f32 %v6847_v47, 0.0  ;;  %v10308_v10 = vadd.f32 %v10160_v16, %v10159_v22  ;;  %v6851_v57 = vadd.f32 %v6850_v6, %v14808_v50 }
 0x746   : > { %v6852_v29 = vpop.f32.mrf.mxu0  ;;  %v10305_v58 = vadd.f32 %v10158_v59, %v10157_v4 }
 0x747   : > { %10309 = vadd.xlane.f32.xlu1 %v10308_v10  ;;  %v7200_v60 = vpack.c.bf16 %v7096_v24, %v7094_v3  ;;  %v9024_v14 = vunpack.c.h.bf16 %v7199_v51  ;;  %v9022_v63 = vunpack.c.l.bf16 %v7199_v51  ;;  %v6853_v11 = vadd.f32 %v6852_v29, %v14813_v30  ;;  %v11942_v10 = vld [vmem:[%s17297_s7 + $0x48] sm:$0xff]  }
 0x748   : > { %10306 = vadd.xlane.f32.xlu0 %v10305_v58  ;;  %v6854_v38 = vpop.f32.mrf.mxu0  ;;  %v7097_v1 = vmax.f32 %v6851_v57, 0.0  ;;  %8583 = vmatpush2.bf16.msra.mxu1 %v11942_v10 }
 0x749   : > { %v6855_v55 = vadd.f32 %v6854_v38, %v14808_v50  ;;  %7589 = vmatprep.mubr.bf16.mxu1 %v7200_v60  ;;  %v9025_v56 = vunpack.c.h.bf16 %v7200_v60  ;;  %v9023_v17 = vunpack.c.l.bf16 %v7200_v60  ;;  %v10163_v49 = vmul.f32 %v14828_v19, %v9024_v14  ;;  %8584 = vmatprep.subr.bf16.mxu1 %v12028_v2 }
 0x74a   : > { %v6856_v12 = vpop.f32.mrf.mxu0  ;;  %7590 = vmatmul.mubr.bf16.gmra.mxu1 %v7199_v51  ;;  %v10161_v40 = vmul.f32 %v14828_v19, %v9022_v63  ;;  %v7098_v37 = vmax.f32 %v6853_v11, 0.0 }
 0x74b   : > { %v7099_v34 = vmax.f32 %v6855_v55, 0.0  ;;  %v6857_v35 = vadd.f32 %v6856_v12, %v14813_v30  ;;  %v10164_v25 = vmul.f32 %v14831_v44, %v9025_v56  ;;  %v10162_v0 = vmul.f32 %v14831_v44, %v9023_v17 }
 0x74c   : > { %v6860_v5 = vpop.f32.mrf.mxu0 }
 0x74d   : > { %v7201_v23 = vpack.c.bf16 %v7099_v34, %v7097_v1  ;;  %v7100_v27 = vmax.f32 %v6857_v35, 0.0  ;;  %v10314_v61 = vadd.f32 %v10164_v25, %v10163_v49  ;;  %v6861_v33 = vadd.f32 %v6860_v5, %v14808_v50 }
 0x74e   : > { %v6862_v36 = vpop.f32.mrf.mxu0  ;;  %v10311_v28 = vadd.f32 %v10162_v0, %v10161_v40 }
 0x74f   : > { %10315 = vadd.xlane.f32.xlu1 %v10314_v61  ;;  %v7202_v32 = vpack.c.bf16 %v7100_v27, %v7098_v37  ;;  %v9028_v42 = vunpack.c.h.bf16 %v7201_v23  ;;  %v9026_v9 = vunpack.c.l.bf16 %v7201_v23  ;;  %v6863_v15 = vadd.f32 %v6862_v36, %v14813_v30 }
 0x750   : > { %10312 = vadd.xlane.f32.xlu0 %v10311_v28  ;;  %v6864_v26 = vpop.f32.mrf.mxu0  ;;  %v7101_v13 = vmax.f32 %v6861_v33, 0.0 }
 0x751   : > { %v6865_v52 = vadd.f32 %v6864_v26, %v14808_v50  ;;  %7599 = vmatprep.mubr.bf16.mxu1 %v7202_v32  ;;  %v9029_v62 = vunpack.c.h.bf16 %v7202_v32  ;;  %v9027_v8 = vunpack.c.l.bf16 %v7202_v32  ;;  %v10167_v21 = vmul.f32 %v14828_v19, %v9028_v42 }
 0x752   : > { %v6866_v41 = vpop.f32.mrf.mxu0  ;;  %7600 = vmatmul.mubr.bf16.gmra.mxu1 %v7201_v23  ;;  %v10165_v20 = vmul.f32 %v14828_v19, %v9026_v9  ;;  %v7102_v46 = vmax.f32 %v6863_v15, 0.0 }
 0x753   : > { %v7103_v7 = vmax.f32 %v6865_v52, 0.0  ;;  %v6867_v43 = vadd.f32 %v6866_v41, %v14813_v30  ;;  %v10168_v48 = vmul.f32 %v14831_v44, %v9029_v62  ;;  %v10166_v45 = vmul.f32 %v14831_v44, %v9027_v8 }
 0x754   : > { %v6870_v18 = vpop.f32.mrf.mxu0 }
 0x755   : > { %v7203_v53 = vpack.c.bf16 %v7103_v7, %v7101_v13  ;;  %v7104_v47 = vmax.f32 %v6867_v43, 0.0  ;;  %v10320_v22 = vadd.f32 %v10168_v48, %v10167_v21  ;;  %v6871_v16 = vadd.f32 %v6870_v18, %v14808_v50 }
 0x756   : > { %v6872_v6 = vpop.f32.mrf.mxu0  ;;  %v10317_v4 = vadd.f32 %v10166_v45, %v10165_v20 }
 0x757   : > { %10321 = vadd.xlane.f32.xlu1 %v10320_v22  ;;  %v7204_v59 = vpack.c.bf16 %v7104_v47, %v7102_v46  ;;  %v9032_v3 = vunpack.c.h.bf16 %v7203_v53  ;;  %v9030_v24 = vunpack.c.l.bf16 %v7203_v53  ;;  %v6873_v57 = vadd.f32 %v6872_v6, %v14813_v30 }
 0x758   : > { %10318 = vadd.xlane.f32.xlu0 %v10317_v4  ;;  %v6874_v51 = vpop.f32.mrf.mxu0  ;;  %v7105_v60 = vmax.f32 %v6871_v16, 0.0 }
 0x759   : > { %v6875_v29 = vadd.f32 %v6874_v51, %v14808_v50  ;;  %7609 = vmatprep.mubr.bf16.mxu1 %v7204_v59  ;;  %v9033_v58 = vunpack.c.h.bf16 %v7204_v59  ;;  %v9031_v38 = vunpack.c.l.bf16 %v7204_v59  ;;  %v10171_v11 = vmul.f32 %v14828_v19, %v9032_v3 }
 0x75a   : > { %v6876_v14 = vpop.f32.mrf.mxu0  ;;  %7610 = vmatmul.mubr.bf16.gmra.mxu1 %v7203_v53  ;;  %v10169_v1 = vmul.f32 %v14828_v19, %v9030_v24  ;;  %v7106_v17 = vmax.f32 %v6873_v57, 0.0  ;;  %v11943_v24 = vld [vmem:[%s17297_s7 + $0x40] sm:$0xff]  }
 0x75b   : > { %v7107_v63 = vmax.f32 %v6875_v29, 0.0  ;;  %v6877_v54 = vadd.f32 %v6876_v14, %v14813_v30  ;;  %v10172_v55 = vmul.f32 %v14831_v44, %v9033_v58  ;;  %v10170_v12 = vmul.f32 %v14831_v44, %v9031_v38  ;;  %v11944_v58 = vld [vmem:[%s15043_s18] sm:$0xff]   ;;  %8585 = vmatpush2.bf16.msra.mxu1 %v11943_v24 }
 0x75c   : > { %v6880_v56 = vpop.f32.mrf.mxu0  ;;  %11381 = vmatprep.mubr.msk.bf16.mxu0 %vm8072_vm1, %v11944_v58 }
 0x75d   : > { %v7205_v34 = vpack.c.bf16 %v7107_v63, %v7105_v60  ;;  %v7108_v35 = vmax.f32 %v6877_v54, 0.0  ;;  %v10326_v49 = vadd.f32 %v10172_v55, %v10171_v11  ;;  %v6881_v25 = vadd.f32 %v6880_v56, %v14808_v50  ;;  %v11945_v60 = vld [vmem:[%s15043_s18 + $0x8] sm:$0xff]  }
 0x75e   : > { %v6882_v5 = vpop.f32.mrf.mxu0  ;;  %v10323_v40 = vadd.f32 %v10170_v12, %v10169_v1  ;;  %11382 = vmatmul.mubr.msk.bf16.vlgmr.msra.gmra.mxu0 %vm8072_vm1, %v11945_v60 }
 0x75f   : > { %10327 = vadd.xlane.f32.xlu1 %v10326_v49  ;;  %v7206_v0 = vpack.c.bf16 %v7108_v35, %v7106_v17  ;;  %v9036_v37 = vunpack.c.h.bf16 %v7205_v34  ;;  %v6883_v23 = vadd.f32 %v6882_v5, %v14813_v30  ;;  %v9034_v27 = vunpack.c.l.bf16 %v7205_v34 }
 0x760   : > { %10324 = vadd.xlane.f32.xlu0 %v10323_v40  ;;  %v6884_v2 = vpop.f32.mrf.mxu0  ;;  %v7109_v36 = vmax.f32 %v6881_v25, 0.0 }
 0x761   : > { %v6885_v61 = vadd.f32 %v6884_v2, %v14808_v50  ;;  %7619 = vmatprep.mubr.bf16.mxu1 %v7206_v0  ;;  %v9037_v33 = vunpack.c.h.bf16 %v7206_v0  ;;  %v9035_v32 = vunpack.c.l.bf16 %v7206_v0  ;;  %v10175_v9 = vmul.f32 %v14828_v19, %v9036_v37 }
 0x762   : > { %v6886_v28 = vpop.f32.mrf.mxu0  ;;  %7620 = vmatmul.mubr.bf16.gmra.mxu1 %v7205_v34  ;;  %v7110_v52 = vmax.f32 %v6883_v23, 0.0  ;;  %v10173_v13 = vmul.f32 %v14828_v19, %v9034_v27 }
 0x763   : > { %v7111_v42 = vmax.f32 %v6885_v61, 0.0  ;;  %v6887_v26 = vadd.f32 %v6886_v28, %v14813_v30  ;;  %v10176_v15 = vmul.f32 %v14831_v44, %v9037_v33  ;;  %v10174_v41 = vmul.f32 %v14831_v44, %v9035_v32 }
 0x764   : > { %v6890_v62 = vpop.f32.mrf.mxu0 }
 0x765   : > { %v7207_v8 = vpack.c.bf16 %v7111_v42, %v7109_v36  ;;  %v7112_v7 = vmax.f32 %v6887_v26, 0.0  ;;  %v6891_v43 = vadd.f32 %v6890_v62, %v14808_v50  ;;  %v10332_v21 = vadd.f32 %v10176_v15, %v10175_v9 }
 0x766   : > { %v6892_v48 = vpop.f32.mrf.mxu0  ;;  %v10329_v18 = vadd.f32 %v10174_v41, %v10173_v13 }
 0x767   : > { %v6893_v20 = vadd.f32 %v6892_v48, %v14813_v30  ;;  %10333 = vadd.xlane.f32.xlu1 %v10332_v21  ;;  %v7208_v45 = vpack.c.bf16 %v7112_v7, %v7110_v52  ;;  %v9040_v46 = vunpack.c.h.bf16 %v7207_v8  ;;  %v9038_v47 = vunpack.c.l.bf16 %v7207_v8 }
 0x768   : > { %10330 = vadd.xlane.f32.xlu0 %v10329_v18  ;;  %v6894_v53 = vpop.f32.mrf.mxu0  ;;  %v7113_v22 = vmax.f32 %v6891_v43, 0.0 }
 0x769   : > { %v6895_v16 = vadd.f32 %v6894_v53, %v14808_v50  ;;  %7629 = vmatprep.mubr.bf16.mxu1 %v7208_v45  ;;  %v9041_v6 = vunpack.c.h.bf16 %v7208_v45  ;;  %v7114_v4 = vmax.f32 %v6893_v20, 0.0  ;;  %v10179_v3 = vmul.f32 %v14828_v19, %v9040_v46 }
 0x76a   : > { %v6896_v59 = vpop.f32.mrf.mxu0  ;;  %v9039_v51 = vunpack.c.l.bf16 %v7208_v45  ;;  %7630 = vmatmul.mubr.bf16.gmra.mxu1 %v7207_v8  ;;  %v10177_v38 = vmul.f32 %v14828_v19, %v9038_v47 }
 0x76b   : > { %v7115_v10 = vmax.f32 %v6895_v16, 0.0  ;;  %v6897_v57 = vadd.f32 %v6896_v59, %v14813_v30  ;;  %v10180_v29 = vmul.f32 %v14831_v44, %v9041_v6 }
 0x76c   : > { %v6900_v14 = vpop.f32.mrf.mxu0  ;;  %v10178_v63 = vmul.f32 %v14831_v44, %v9039_v51 }
 0x76d   : > { %v7209_v54 = vpack.c.bf16 %v7115_v10, %v7113_v22  ;;  %v7116_v11 = vmax.f32 %v6897_v57, 0.0  ;;  %v6901_v55 = vadd.f32 %v6900_v14, %v14808_v50  ;;  %v10338_v56 = vadd.f32 %v10180_v29, %v10179_v3 }
 0x76e   : > { %v6902_v1 = vpop.f32.mrf.mxu0  ;;  %v10335_v12 = vadd.f32 %v10178_v63, %v10177_v38 }
 0x76f   : > { %v6903_v17 = vadd.f32 %v6902_v1, %v14813_v30  ;;  %10339 = vadd.xlane.f32.xlu1 %v10338_v56  ;;  %v7210_v34 = vpack.c.bf16 %v7116_v11, %v7114_v4  ;;  %v9044_v35 = vunpack.c.h.bf16 %v7209_v54  ;;  %v9042_v25 = vunpack.c.l.bf16 %v7209_v54 }
 0x770   : > { %10336 = vadd.xlane.f32.xlu0 %v10335_v12  ;;  %v6904_v49 = vpop.f32.mrf.mxu0  ;;  %v7117_v5 = vmax.f32 %v6901_v55, 0.0  ;;  %v11947_v12 = vld [vmem:[%s15043_s18 + $0x18] sm:$0xff]  }
 0x771   : > { %v7118_v40 = vmax.f32 %v6903_v17, 0.0  ;;  %v6905_v0 = vadd.f32 %v6904_v49, %v14808_v50  ;;  %7639 = vmatprep.mubr.bf16.mxu1 %v7210_v34  ;;  %v9045_v37 = vunpack.c.h.bf16 %v7210_v34  ;;  %v9043_v2 = vunpack.c.l.bf16 %v7210_v34 }
 0x772   : > { %v6906_v23 = vpop.f32.mrf.mxu0  ;;  %7640 = vmatmul.mubr.bf16.gmra.mxu1 %v7209_v54  ;;  %v10183_v33 = vmul.f32 %v14828_v19, %v9044_v35  ;;  %v10181_v32 = vmul.f32 %v14828_v19, %v9042_v25  ;;  %v11946_v54 = vld [vmem:[%s15043_s18 + $0x10] sm:$0xff]  }
 0x773   : > { %v7119_v27 = vmax.f32 %v6905_v0, 0.0  ;;  %v6907_v61 = vadd.f32 %v6906_v23, %v14813_v30  ;;  %v10184_v36 = vmul.f32 %v14831_v44, %v9045_v37  ;;  %v10182_v42 = vmul.f32 %v14831_v44, %v9043_v2  ;;  %11385 = vmatprep.mubr.msk.bf16.mxu0 %vm8072_vm1, %v11946_v54 }
 0x774   : > { %v6910_v28 = vpop.f32.mrf.mxu0  ;;  %11386 = vmatmul.mubr.msk.bf16.gmra.mxu0 %vm8072_vm1, %v11947_v12 }
 0x775   : > { %v7211_v26 = vpack.c.bf16 %v7119_v27, %v7117_v5  ;;  %v7120_v9 = vmax.f32 %v6907_v61, 0.0  ;;  %v6911_v15 = vadd.f32 %v6910_v28, %v14808_v50  ;;  %v10344_v52 = vadd.f32 %v10184_v36, %v10183_v33 }
 0x776   : > { %v6912_v62 = vpop.f32.mrf.mxu0  ;;  %v10341_v13 = vadd.f32 %v10182_v42, %v10181_v32 }
 0x777   : > { %v6913_v41 = vadd.f32 %v6912_v62, %v14813_v30  ;;  %10345 = vadd.xlane.f32.xlu1 %v10344_v52  ;;  %v7212_v8 = vpack.c.bf16 %v7120_v9, %v7118_v40  ;;  %v9048_v7 = vunpack.c.h.bf16 %v7211_v26  ;;  %v9046_v21 = vunpack.c.l.bf16 %v7211_v26 }
 0x778   : > { %10342 = vadd.xlane.f32.xlu0 %v10341_v13  ;;  %v6914_v43 = vpop.f32.mrf.mxu0  ;;  %v7121_v48 = vmax.f32 %v6911_v15, 0.0 }
 0x779   : > { %v7122_v18 = vmax.f32 %v6913_v41, 0.0  ;;  %v6915_v20 = vadd.f32 %v6914_v43, %v14808_v50  ;;  %7649 = vmatprep.mubr.bf16.mxu1 %v7212_v8  ;;  %v9049_v45 = vunpack.c.h.bf16 %v7212_v8  ;;  %v9047_v53 = vunpack.c.l.bf16 %v7212_v8 }
 0x77a   : > { %v6916_v46 = vpop.f32.mrf.mxu0  ;;  %7650 = vmatmul.mubr.bf16.gmra.mxu1 %v7211_v26  ;;  %v10187_v16 = vmul.f32 %v14828_v19, %v9048_v7  ;;  %v10185_v59 = vmul.f32 %v14828_v19, %v9046_v21 }
 0x77b   : > { %v7123_v47 = vmax.f32 %v6915_v20, 0.0  ;;  %v6917_v22 = vadd.f32 %v6916_v46, %v14813_v30  ;;  %v10188_v6 = vmul.f32 %v14831_v44, %v9049_v45  ;;  %v10186_v3 = vmul.f32 %v14831_v44, %v9047_v53 }
 0x77c   : > { %v6920_v4 = vpop.f32.mrf.mxu0 }
 0x77d   : > { %v7213_v51 = vpack.c.bf16 %v7123_v47, %v7121_v48  ;;  %v7124_v24 = vmax.f32 %v6917_v22, 0.0  ;;  %v6921_v10 = vadd.f32 %v6920_v4, %v14808_v50  ;;  %v10350_v57 = vadd.f32 %v10188_v6, %v10187_v16 }
 0x77e   : > { %v6922_v29 = vpop.f32.mrf.mxu0  ;;  %v10347_v58 = vadd.f32 %v10186_v3, %v10185_v59 }
 0x77f   : > { %10351 = vadd.xlane.f32.xlu1 %v10350_v57  ;;  %v7214_v60 = vpack.c.bf16 %v7124_v24, %v7122_v18  ;;  %v9052_v14 = vunpack.c.h.bf16 %v7213_v51  ;;  %v9050_v63 = vunpack.c.l.bf16 %v7213_v51  ;;  %v7125_v11 = vmax.f32 %v6921_v10, 0.0  ;;  %v11948_v10 = vld [vmem:[%s15043_s18 + $0x20] sm:$0xff]  }
 0x780   : > { %10348 = vadd.xlane.f32.xlu0 %v10347_v58  ;;  %v6924_v38 = vpop.f32.mrf.mxu0  ;;  %v6923_v55 = vadd.f32 %v6922_v29, %v14813_v30  ;;  %11389 = vmatprep.mubr.msk.bf16.mxu0 %vm8072_vm1, %v11948_v10 }
 0x781   : > { %v6925_v56 = vadd.f32 %v6924_v38, %v14808_v50  ;;  %7659 = vmatprep.mubr.bf16.mxu1 %v7214_v60  ;;  %v9053_v1 = vunpack.c.h.bf16 %v7214_v60  ;;  %v9051_v34 = vunpack.c.l.bf16 %v7214_v60  ;;  %v10191_v25 = vmul.f32 %v14828_v19, %v9052_v14  ;;  %v11949_v60 = vld [vmem:[%s15043_s18 + $0x28] sm:$0xff]  }
 0x782   : > { %v6926_v17 = vpop.f32.mrf.mxu0  ;;  %7660 = vmatmul.mubr.bf16.gmra.mxu1 %v7213_v51  ;;  %v10189_v0 = vmul.f32 %v14828_v19, %v9050_v63  ;;  %v7126_v23 = vmax.f32 %v6923_v55, 0.0  ;;  %11390 = vmatmul.mubr.msk.bf16.gmra.mxu0 %vm8072_vm1, %v11949_v60 }
 0x783   : > { %v7127_v35 = vmax.f32 %v6925_v56, 0.0  ;;  %v6927_v49 = vadd.f32 %v6926_v17, %v14813_v30  ;;  %v10192_v5 = vmul.f32 %v14831_v44, %v9053_v1  ;;  %v10190_v37 = vmul.f32 %v14831_v44, %v9051_v34 }
 0x784   : > { %v6930_v40 = vpop.f32.mrf.mxu0 }
 0x785   : > { %v7215_v2 = vpack.c.bf16 %v7127_v35, %v7125_v11  ;;  %v7128_v27 = vmax.f32 %v6927_v49, 0.0  ;;  %v10356_v61 = vadd.f32 %v10192_v5, %v10191_v25  ;;  %v6931_v33 = vadd.f32 %v6930_v40, %v14808_v50 }
 0x786   : > { %v6932_v36 = vpop.f32.mrf.mxu0  ;;  %v10353_v28 = vadd.f32 %v10190_v37, %v10189_v0 }
 0x787   : > { %10357 = vadd.xlane.f32.xlu1 %v10356_v61  ;;  %v7216_v32 = vpack.c.bf16 %v7128_v27, %v7126_v23  ;;  %v9056_v42 = vunpack.c.h.bf16 %v7215_v2  ;;  %v9054_v9 = vunpack.c.l.bf16 %v7215_v2  ;;  %v6933_v15 = vadd.f32 %v6932_v36, %v14813_v30 }
 0x788   : > { %10354 = vadd.xlane.f32.xlu0 %v10353_v28  ;;  %v6934_v26 = vpop.f32.mrf.mxu0  ;;  %v7129_v13 = vmax.f32 %v6931_v33, 0.0 }
 0x789   : > { %v6935_v52 = vadd.f32 %v6934_v26, %v14808_v50  ;;  %7669 = vmatprep.mubr.bf16.mxu1 %v7216_v32  ;;  %v9057_v62 = vunpack.c.h.bf16 %v7216_v32  ;;  %v9055_v8 = vunpack.c.l.bf16 %v7216_v32  ;;  %v10195_v21 = vmul.f32 %v14828_v19, %v9056_v42 }
 0x78a   : > { %v6936_v41 = vpop.f32.mrf.mxu0  ;;  %7670 = vmatmul.mubr.bf16.gmra.mxu1 %v7215_v2  ;;  %v10193_v20 = vmul.f32 %v14828_v19, %v9054_v9  ;;  %v7130_v46 = vmax.f32 %v6933_v15, 0.0 }
 0x78b   : > { %v7131_v7 = vmax.f32 %v6935_v52, 0.0  ;;  %v6937_v43 = vadd.f32 %v6936_v41, %v14813_v30  ;;  %v10196_v48 = vmul.f32 %v14831_v44, %v9057_v62  ;;  %v10194_v45 = vmul.f32 %v14831_v44, %v9055_v8 }
 0x78c   : > { %v6940_v18 = vpop.f32.mrf.mxu0 }
 0x78d   : > { %v7217_v53 = vpack.c.bf16 %v7131_v7, %v7129_v13  ;;  %v7132_v47 = vmax.f32 %v6937_v43, 0.0  ;;  %v10362_v22 = vadd.f32 %v10196_v48, %v10195_v21  ;;  %v6941_v16 = vadd.f32 %v6940_v18, %v14808_v50 }
 0x78e   : > { %v6942_v6 = vpop.f32.mrf.mxu0  ;;  %v10359_v4 = vadd.f32 %v10194_v45, %v10193_v20 }
 0x78f   : > { %v7218_v59 = vpack.c.bf16 %v7132_v47, %v7130_v46  ;;  %10363 = vadd.xlane.f32.xlu1 %v10362_v22  ;;  %v9060_v3 = vunpack.c.h.bf16 %v7217_v53  ;;  %v9058_v24 = vunpack.c.l.bf16 %v7217_v53  ;;  %v6943_v57 = vadd.f32 %v6942_v6, %v14813_v30  ;;  %v11950_v22 = vld [vmem:[%s15043_s18 + $0x30] sm:$0xff]  }
 0x790   : > { %10360 = vadd.xlane.f32.xlu0 %v10359_v4  ;;  %v6944_v51 = vpop.f32.mrf.mxu0  ;;  %v7133_v14 = vmax.f32 %v6941_v16, 0.0  ;;  %11393 = vmatprep.mubr.msk.bf16.mxu0 %vm8072_vm1, %v11950_v22 }
 0x791   : > { %v6945_v29 = vadd.f32 %v6944_v51, %v14808_v50  ;;  %7679 = vmatprep.mubr.bf16.mxu1 %v7218_v59  ;;  %v9061_v58 = vunpack.c.h.bf16 %v7218_v59  ;;  %v9059_v63 = vunpack.c.l.bf16 %v7218_v59  ;;  %v10199_v55 = vmul.f32 %v14828_v19, %v9060_v3  ;;  %v11951_v59 = vld [vmem:[%s15043_s18 + $0x38] sm:$0xff]  }
 0x792   : > { %v6946_v38 = vpop.f32.mrf.mxu0  ;;  %7680 = vmatmul.mubr.bf16.gmra.mxu1 %v7217_v53  ;;  %v10197_v12 = vmul.f32 %v14828_v19, %v9058_v24  ;;  %v7134_v34 = vmax.f32 %v6943_v57, 0.0  ;;  %11394 = vmatmul.mubr.msk.bf16.gmra.mxu0 %vm8072_vm1, %v11951_v59 }
 0x793   : > { %v7135_v54 = vmax.f32 %v6945_v29, 0.0  ;;  %v6947_v11 = vadd.f32 %v6946_v38, %v14813_v30  ;;  %v10200_v56 = vmul.f32 %v14831_v44, %v9061_v58  ;;  %v10198_v17 = vmul.f32 %v14831_v44, %v9059_v63 }
 0x794   : > { %v6950_v1 = vpop.f32.mrf.mxu0 }
 0x795   : > { %v7219_v35 = vpack.c.bf16 %v7135_v54, %v7133_v14  ;;  %v7136_v49 = vmax.f32 %v6947_v11, 0.0  ;;  %v10368_v25 = vadd.f32 %v10200_v56, %v10199_v55  ;;  %v6951_v5 = vadd.f32 %v6950_v1, %v14808_v50 }
 0x796   : > { %v6952_v40 = vpop.f32.mrf.mxu0  ;;  %v10365_v0 = vadd.f32 %v10198_v17, %v10197_v12 }
 0x797   : > { %v7220_v37 = vpack.c.bf16 %v7136_v49, %v7134_v34  ;;  %10369 = vadd.xlane.f32.xlu1 %v10368_v25  ;;  %v9064_v23 = vunpack.c.h.bf16 %v7219_v35  ;;  %v9062_v27 = vunpack.c.l.bf16 %v7219_v35  ;;  %v6953_v61 = vadd.f32 %v6952_v40, %v14813_v30 }
 0x798   : > { %10366 = vadd.xlane.f32.xlu0 %v10365_v0  ;;  %v6954_v2 = vpop.f32.mrf.mxu0  ;;  %v7137_v28 = vmax.f32 %v6951_v5, 0.0 }
 0x799   : > { %v6955_v33 = vadd.f32 %v6954_v2, %v14808_v50  ;;  %7689 = vmatprep.mubr.bf16.mxu1 %v7220_v37  ;;  %v9065_v36 = vunpack.c.h.bf16 %v7220_v37  ;;  %v9063_v42 = vunpack.c.l.bf16 %v7220_v37  ;;  %v10203_v15 = vmul.f32 %v14828_v19, %v9064_v23 }
 0x79a   : > { %v6956_v32 = vpop.f32.mrf.mxu0  ;;  %7690 = vmatmul.mubr.bf16.gmra.mxu1 %v7219_v35  ;;  %v10201_v13 = vmul.f32 %v14828_v19, %v9062_v27  ;;  %v7138_v8 = vmax.f32 %v6953_v61, 0.0 }
 0x79b   : > { %v7139_v26 = vmax.f32 %v6955_v33, 0.0  ;;  %v6957_v9 = vadd.f32 %v6956_v32, %v14813_v30  ;;  %v10204_v52 = vmul.f32 %v14831_v44, %v9065_v36  ;;  %v10202_v41 = vmul.f32 %v14831_v44, %v9063_v42 }
 0x79c   : > { %v6960_v62 = vpop.f32.mrf.mxu0 }
 0x79d   : > { %v7221_v7 = vpack.c.bf16 %v7139_v26, %v7137_v28  ;;  %v7140_v43 = vmax.f32 %v6957_v9, 0.0  ;;  %v10374_v21 = vadd.f32 %v10204_v52, %v10203_v15  ;;  %v6961_v48 = vadd.f32 %v6960_v62, %v14808_v50 }
 0x79e   : > { %v6962_v18 = vpop.f32.mrf.mxu0  ;;  %v10371_v20 = vadd.f32 %v10202_v41, %v10201_v13 }
 0x79f   : > { %v7222_v45 = vpack.c.bf16 %v7140_v43, %v7138_v8  ;;  %10375 = vadd.xlane.f32.xlu1 %v10374_v21  ;;  %v9068_v46 = vunpack.c.h.bf16 %v7221_v7  ;;  %v9066_v47 = vunpack.c.l.bf16 %v7221_v7  ;;  %v6963_v16 = vadd.f32 %v6962_v18, %v14813_v30  ;;  %v11952_v21 = vld [vmem:[%s15043_s18 + $0x40] sm:$0xff]  }
 0x7a0   : > { %10372 = vadd.xlane.f32.xlu0 %v10371_v20  ;;  %v6964_v53 = vpop.f32.mrf.mxu0  ;;  %v7141_v3 = vmax.f32 %v6961_v48, 0.0  ;;  %11397 = vmatprep.mubr.msk.bf16.mxu0 %vm8072_vm1, %v11952_v21  ;;  %v11955_v21 = vld [vmem:[%s15043_s18 + $0x58] sm:$0xff]  }
 0x7a1   : > { %v6965_v6 = vadd.f32 %v6964_v53, %v14808_v50  ;;  %7699 = vmatprep.mubr.bf16.mxu1 %v7222_v45  ;;  %v9069_v4 = vunpack.c.h.bf16 %v7222_v45  ;;  %v9067_v24 = vunpack.c.l.bf16 %v7222_v45  ;;  %v10207_v29 = vmul.f32 %v14828_v19, %v9068_v46  ;;  %v11953_v45 = vld [vmem:[%s15043_s18 + $0x48] sm:$0xff]  }
 0x7a2   : > { %v6966_v51 = vpop.f32.mrf.mxu0  ;;  %7700 = vmatmul.mubr.bf16.gmra.mxu1 %v7221_v7  ;;  %v10205_v14 = vmul.f32 %v14828_v19, %v9066_v47  ;;  %v7142_v63 = vmax.f32 %v6963_v16, 0.0  ;;  %11398 = vmatmul.mubr.msk.bf16.gmra.mxu0 %vm8072_vm1, %v11953_v45 }
 0x7a3   : > { %v7143_v10 = vmax.f32 %v6965_v6, 0.0  ;;  %v6967_v57 = vadd.f32 %v6966_v51, %v14813_v30  ;;  %v10208_v58 = vmul.f32 %v14831_v44, %v9069_v4  ;;  %v10206_v38 = vmul.f32 %v14831_v44, %v9067_v24 }
 0x7a4   : > { %v6970_v60 = vpop.f32.mrf.mxu0 }
 0x7a5   : > { %v7223_v54 = vpack.c.bf16 %v7143_v10, %v7141_v3  ;;  %v7144_v11 = vmax.f32 %v6967_v57, 0.0  ;;  %v10380_v55 = vadd.f32 %v10208_v58, %v10207_v29  ;;  %v6971_v56 = vadd.f32 %v6970_v60, %v14808_v50 }
 0x7a6   : > { %v6972_v1 = vpop.f32.mrf.mxu0  ;;  %v10377_v12 = vadd.f32 %v10206_v38, %v10205_v14 }
 0x7a7   : > { %v7224_v17 = vpack.c.bf16 %v7144_v11, %v7142_v63  ;;  %10381 = vadd.xlane.f32.xlu1 %v10380_v55  ;;  %v9072_v34 = vunpack.c.h.bf16 %v7223_v54  ;;  %v9070_v49 = vunpack.c.l.bf16 %v7223_v54  ;;  %v6973_v25 = vadd.f32 %v6972_v1, %v14813_v30 }
 0x7a8   : > { %10378 = vadd.xlane.f32.xlu0 %v10377_v12  ;;  %v6974_v35 = vpop.f32.mrf.mxu0  ;;  %v7145_v0 = vmax.f32 %v6971_v56, 0.0 }
 0x7a9   : > { %v6975_v5 = vadd.f32 %v6974_v35, %v14808_v50  ;;  %7709 = vmatprep.mubr.bf16.mxu1 %v7224_v17  ;;  %v9073_v40 = vunpack.c.h.bf16 %v7224_v17  ;;  %v9071_v23 = vunpack.c.l.bf16 %v7224_v17  ;;  %v10211_v61 = vmul.f32 %v14828_v19, %v9072_v34 }
 0x7aa   : > { %v6976_v37 = vpop.f32.mrf.mxu0  ;;  %7710 = vmatmul.mubr.bf16.gmra.mxu1 %v7223_v54  ;;  %v10209_v28 = vmul.f32 %v14828_v19, %v9070_v49  ;;  %v7146_v42 = vmax.f32 %v6973_v25, 0.0 }
 0x7ab   : > { %v7147_v2 = vmax.f32 %v6975_v5, 0.0  ;;  %v6977_v27 = vadd.f32 %v6976_v37, %v14813_v30  ;;  %v10212_v33 = vmul.f32 %v14831_v44, %v9073_v40  ;;  %v10210_v32 = vmul.f32 %v14831_v44, %v9071_v23 }
 0x7ac   : > { %v6980_v36 = vpop.f32.mrf.mxu0 }
 0x7ad   : > { %v7225_v26 = vpack.c.bf16 %v7147_v2, %v7145_v0  ;;  %v7148_v9 = vmax.f32 %v6977_v27, 0.0  ;;  %v10386_v15 = vadd.f32 %v10212_v33, %v10211_v61  ;;  %v6981_v52 = vadd.f32 %v6980_v36, %v14808_v50 }
 0x7ae   : > { %v6982_v62 = vpop.f32.mrf.mxu0  ;;  %v10383_v13 = vadd.f32 %v10210_v32, %v10209_v28 }
 0x7af   : > { %v7226_v41 = vpack.c.bf16 %v7148_v9, %v7146_v42  ;;  %10387 = vadd.xlane.f32.xlu1 %v10386_v15  ;;  %v9076_v8 = vunpack.c.h.bf16 %v7225_v26  ;;  %v9074_v43 = vunpack.c.l.bf16 %v7225_v26  ;;  %v6983_v48 = vadd.f32 %v6982_v62, %v14813_v30 }
 0x7b0   : > { %10384 = vadd.xlane.f32.xlu0 %v10383_v13  ;;  %v6984_v7 = vpop.f32.mrf.mxu0  ;;  %v7149_v46 = vmax.f32 %v6981_v52, 0.0 }
 0x7b1   : > { %v6985_v18 = vadd.f32 %v6984_v7, %v14808_v50  ;;  %7719 = vmatprep.mubr.bf16.mxu1 %v7226_v41  ;;  %v9077_v20 = vunpack.c.h.bf16 %v7226_v41  ;;  %v9075_v47 = vunpack.c.l.bf16 %v7226_v41  ;;  %v10215_v4 = vmul.f32 %v14828_v19, %v9076_v8  ;;  %v11954_v8 = vld [vmem:[%s15043_s18 + $0x50] sm:$0xff]  }
 0x7b2   : > { %v6986_v53 = vpop.f32.mrf.mxu0  ;;  %v15140_v6 = vpop.f32.mrf.mxu1  ;;  %7720 = vmatmul.mubr.bf16.gmra.mxu1 %v7225_v26  ;;  %v10213_v3 = vmul.f32 %v14828_v19, %v9074_v43  ;;  %v7150_v24 = vmax.f32 %v6983_v48, 0.0  ;;  %11401 = vmatprep.mubr.msk.bf16.mxu0 %vm8072_vm1, %v11954_v8 }
 0x7b3   : > { %v7151_v22 = vmax.f32 %v6985_v18, 0.0  ;;  %v6987_v16 = vadd.f32 %v6986_v53, %v14813_v30  ;;  %v10216_v59 = vmul.f32 %v14831_v44, %v9077_v20  ;;  %v10214_v51 = vmul.f32 %v14831_v44, %v9075_v47  ;;  %11402 = vmatmul.mubr.msk.bf16.gmra.mxu0 %vm8072_vm1, %v11955_v21 }
 0x7b4   : > { %v6990_v29 = vpop.f32.mrf.mxu0  ;;  %v15147_v58 = vpop.f32.mrf.mxu1 }
 0x7b5   : > { %v7227_v10 = vpack.c.bf16 %v7151_v22, %v7149_v46  ;;  %v7152_v57 = vmax.f32 %v6987_v16, 0.0  ;;  %v10392_v60 = vadd.f32 %v10216_v59, %v10215_v4  ;;  %v10389_v14 = vadd.f32 %v10214_v51, %v10213_v3 }
 0x7b6   : > { %v6992_v63 = vpop.f32.mrf.mxu0  ;;  %v15149_v54 = vpop.f32.mrf.mxu1  ;;  %v6991_v56 = vadd.f32 %v6990_v29, %v14808_v50 }
 0x7b7   : > { %v7228_v38 = vpack.c.bf16 %v7152_v57, %v7150_v24  ;;  %10393 = vadd.xlane.f32.xlu1 %v10392_v60  ;;  %v9080_v11 = vunpack.c.h.bf16 %v7227_v10  ;;  %v9078_v55 = vunpack.c.l.bf16 %v7227_v10  ;;  %10390 = vadd.xlane.f32.xlu0 %v10389_v14  ;;  %v6993_v34 = vadd.f32 %v6992_v63, %v14813_v30 }
 0x7b8   : > { %v6994_v1 = vpop.f32.mrf.mxu0  ;;  %v15154_v49 = vpop.f32.mrf.mxu1  ;;  %v7153_v23 = vmax.f32 %v6991_v56, 0.0 }
 0x7b9   : > { %7729 = vmatprep.mubr.bf16.mxu1 %v7228_v38  ;;  %v9081_v12 = vunpack.c.h.bf16 %v7228_v38  ;;  %v9079_v17 = vunpack.c.l.bf16 %v7228_v38  ;;  %v6995_v35 = vadd.f32 %v6994_v1, %v14808_v50  ;;  %v10219_v5 = vmul.f32 %v14828_v19, %v9080_v11 }
 0x7ba   : > { %v6996_v25 = vpop.f32.mrf.mxu0  ;;  %7730 = vmatmul.mubr.bf16.gmra.mxu1 %v7227_v10  ;;  %v10217_v0 = vmul.f32 %v14828_v19, %v9078_v55  ;;  %v15161_v61 = vpop.f32.mrf.mxu1  ;;  %v7154_v32 = vmax.f32 %v6993_v34, 0.0 }
 0x7bb   : > { %v10220_v40 = vmul.f32 %v14831_v44, %v9081_v12  ;;  %v10218_v37 = vmul.f32 %v14831_v44, %v9079_v17  ;;  %v7155_v2 = vmax.f32 %v6995_v35, 0.0  ;;  %v6997_v27 = vadd.f32 %v6996_v25, %v14813_v30 }
 0x7bc   : > { %v7000_v33 = vpop.f32.mrf.mxu0  ;;  %v15163_v9 = vpop.f32.mrf.mxu1 }
 0x7bd   : > { %v10398_v36 = vadd.f32 %v10220_v40, %v10219_v5  ;;  %v10395_v28 = vadd.f32 %v10218_v37, %v10217_v0  ;;  %v7229_v42 = vpack.c.bf16 %v7155_v2, %v7153_v23  ;;  %v7156_v26 = vmax.f32 %v6997_v27, 0.0 }
 0x7be   : > { %v7001_v15 = vadd.f32 %v7000_v33, %v14808_v50  ;;  %v7002_v52 = vpop.f32.mrf.mxu0  ;;  %v15166_v13 = vpop.f32.mrf.mxu1 }
 0x7bf   : > { %10399 = vadd.xlane.f32.xlu1 %v10398_v36  ;;  %10396 = vadd.xlane.f32.xlu0 %v10395_v28  ;;  %v7230_v62 = vpack.c.bf16 %v7156_v26, %v7154_v32  ;;  %v9084_v41 = vunpack.c.h.bf16 %v7229_v42  ;;  %v9082_v43 = vunpack.c.l.bf16 %v7229_v42  ;;  %v7003_v48 = vadd.f32 %v7002_v52, %v14813_v30 }
 0x7c0   : > { %v7004_v7 = vpop.f32.mrf.mxu0  ;;  %v15172_v20 = vpop.f32.mrf.mxu1  ;;  %v7157_v46 = vmax.f32 %v7001_v15, 0.0 }
 0x7c1   : > { %v7005_v18 = vadd.f32 %v7004_v7, %v14808_v50  ;;  %7739 = vmatprep.mubr.bf16.mxu1 %v7230_v62  ;;  %v9085_v45 = vunpack.c.h.bf16 %v7230_v62  ;;  %v9083_v47 = vunpack.c.l.bf16 %v7230_v62  ;;  %v10223_v59 = vmul.f32 %v14828_v19, %v9084_v41 }
 0x7c2   : > { %v7006_v53 = vpop.f32.mrf.mxu0  ;;  %7740 = vmatmul.mubr.bf16.gmra.mxu1 %v7229_v42  ;;  %v15177_v4 = vpop.f32.mrf.mxu1  ;;  %v10221_v24 = vmul.f32 %v14828_v19, %v9082_v43  ;;  %v7158_v57 = vmax.f32 %v7003_v48, 0.0 }
 0x7c3   : > { %v7159_v22 = vmax.f32 %v7005_v18, 0.0  ;;  %v7007_v16 = vadd.f32 %v7006_v53, %v14813_v30  ;;  %v10224_v3 = vmul.f32 %v14831_v44, %v9085_v45  ;;  %v10222_v10 = vmul.f32 %v14831_v44, %v9083_v47 }
 0x7c4   : > { %v7010_v51 = vpop.f32.mrf.mxu0  ;;  %v15183_v14 = vpop.f32.mrf.mxu1 }
 0x7c5   : > { %v7231_v29 = vpack.c.bf16 %v7159_v22, %v7157_v46  ;;  %v7160_v60 = vmax.f32 %v7007_v16, 0.0  ;;  %v10404_v38 = vadd.f32 %v10224_v3, %v10223_v59  ;;  %v7011_v63 = vadd.f32 %v7010_v51, %v14808_v50  ;;  %v11956_v46 = vld [vmem:[%s15043_s18 + $0x60] sm:$0xff]   ;;  %v11957_v22 = vld [vmem:[%s15043_s18 + $0x68] sm:$0xff]  }
 0x7c6   : > { %v7012_v11 = vpop.f32.mrf.mxu0  ;;  %v10401_v55 = vadd.f32 %v10222_v10, %v10221_v24  ;;  %v15186_v1 = vpop.f32.mrf.mxu1  ;;  %11405 = vmatprep.mubr.msk.bf16.mxu0 %vm8072_vm1, %v11956_v46 }
 0x7c7   : > { %v7232_v56 = vpack.c.bf16 %v7160_v60, %v7158_v57  ;;  %10405 = vadd.xlane.f32.xlu1 %v10404_v38  ;;  %v9088_v12 = vunpack.c.h.bf16 %v7231_v29  ;;  %v9086_v34 = vunpack.c.l.bf16 %v7231_v29  ;;  %v7013_v35 = vadd.f32 %v7012_v11, %v14813_v30  ;;  %11406 = vmatmul.mubr.msk.bf16.gmra.mxu0 %vm8072_vm1, %v11957_v22 }
 0x7c8   : > { %10402 = vadd.xlane.f32.xlu0 %v10401_v55  ;;  %v7014_v17 = vpop.f32.mrf.mxu0  ;;  %v15190_v5 = vpop.f32.mrf.mxu1  ;;  %v7161_v0 = vmax.f32 %v7011_v63, 0.0 }
 0x7c9   : > { %v7015_v25 = vadd.f32 %v7014_v17, %v14808_v50  ;;  %7749 = vmatprep.mubr.bf16.mxu1 %v7232_v56  ;;  %v9089_v40 = vunpack.c.h.bf16 %v7232_v56  ;;  %v9087_v23 = vunpack.c.l.bf16 %v7232_v56  ;;  %v10227_v36 = vmul.f32 %v14828_v19, %v9088_v12 }
 0x7ca   : > { %v7016_v37 = vpop.f32.mrf.mxu0  ;;  %7750 = vmatmul.mubr.bf16.gmra.mxu1 %v7231_v29  ;;  %v15193_v33 = vpop.f32.mrf.mxu1  ;;  %v10225_v42 = vmul.f32 %v14828_v19, %v9086_v34  ;;  %v7162_v15 = vmax.f32 %v7013_v35, 0.0 }
 0x7cb   : > { %v7163_v2 = vmax.f32 %v7015_v25, 0.0  ;;  %v7017_v27 = vadd.f32 %v7016_v37, %v14813_v30  ;;  %v10228_v28 = vmul.f32 %v14831_v44, %v9089_v40  ;;  %v10226_v26 = vmul.f32 %v14831_v44, %v9087_v23 }
 0x7cc   : > { %v7020_v32 = vpop.f32.mrf.mxu0  ;;  %v15199_v41 = vpop.f32.mrf.mxu1 }
 0x7cd   : > { %v7233_v52 = vpack.c.bf16 %v7163_v2, %v7161_v0  ;;  %v7164_v62 = vmax.f32 %v7017_v27, 0.0  ;;  %v10410_v8 = vadd.f32 %v10228_v28, %v10227_v36  ;;  %v7021_v7 = vadd.f32 %v7020_v32, %v14808_v50 }
 0x7ce   : > { %v7022_v43 = vpop.f32.mrf.mxu0  ;;  %v10407_v21 = vadd.f32 %v10226_v26, %v10225_v42  ;;  %v15202_v18 = vpop.f32.mrf.mxu1 }
 0x7cf   : > { %v7234_v48 = vpack.c.bf16 %v7164_v62, %v7162_v15  ;;  %10411 = vadd.xlane.f32.xlu1 %v10410_v8  ;;  %v9092_v45 = vunpack.c.h.bf16 %v7233_v52  ;;  %v9090_v47 = vunpack.c.l.bf16 %v7233_v52  ;;  %v7023_v16 = vadd.f32 %v7022_v43, %v14813_v30 }
 0x7d0   : > { %10408 = vadd.xlane.f32.xlu0 %v10407_v21  ;;  %v7024_v53 = vpop.f32.mrf.mxu0  ;;  %v15208_v3 = vpop.f32.mrf.mxu1  ;;  %v7165_v24 = vmax.f32 %v7021_v7, 0.0 }
 0x7d1   : > { %v7025_v59 = vadd.f32 %v7024_v53, %v14808_v50  ;;  %7759 = vmatprep.mubr.bf16.mxu1 %v7234_v48  ;;  %v9093_v51 = vunpack.c.h.bf16 %v7234_v48  ;;  %v9091_v57 = vunpack.c.l.bf16 %v7234_v48  ;;  %v10231_v63 = vmul.f32 %v14828_v19, %v9092_v45 }
 0x7d2   : > { %v7026_v10 = vpop.f32.mrf.mxu0  ;;  %7760 = vmatmul.mubr.bf16.gmra.mxu1 %v7233_v52  ;;  %v15213_v38 = vpop.f32.mrf.mxu1  ;;  %v10229_v56 = vmul.f32 %v14828_v19, %v9090_v47  ;;  %v7166_v17 = vmax.f32 %v7023_v16, 0.0 }
 0x7d3   : > { %v7167_v29 = vmax.f32 %v7025_v59, 0.0  ;;  %v7027_v60 = vadd.f32 %v7026_v10, %v14813_v30  ;;  %v10232_v11 = vmul.f32 %v14831_v44, %v9093_v51  ;;  %v10230_v12 = vmul.f32 %v14831_v44, %v9091_v57 }
 0x7d4   : > { %v7030_v55 = vpop.f32.mrf.mxu0  ;;  %v15219_v25 = vpop.f32.mrf.mxu1 }
 0x7d5   : > { %v7235_v34 = vpack.c.bf16 %v7167_v29, %v7165_v24  ;;  %v7168_v35 = vmax.f32 %v7027_v60, 0.0  ;;  %v10416_v40 = vadd.f32 %v10232_v11, %v10231_v63  ;;  %v7031_v0 = vadd.f32 %v7030_v55, %v14808_v50 }
 0x7d6   : > { %v7032_v37 = vpop.f32.mrf.mxu0  ;;  %v10413_v23 = vadd.f32 %v10230_v12, %v10229_v56  ;;  %v15222_v27 = vpop.f32.mrf.mxu1  ;;  %v11958_v56 = vld [vmem:[%s15043_s18 + $0x70] sm:$0xff]  }
 0x7d7   : > { %v7236_v2 = vpack.c.bf16 %v7168_v35, %v7166_v17  ;;  %10417 = vadd.xlane.f32.xlu1 %v10416_v40  ;;  %v9096_v36 = vunpack.c.h.bf16 %v7235_v34  ;;  %v9094_v32 = vunpack.c.l.bf16 %v7235_v34  ;;  %v7033_v42 = vadd.f32 %v7032_v37, %v14813_v30  ;;  %v11218_v35 = vld [vmem:[%s17296_s6 + $0x7] ss:$8 sm:$0x3]  ;;  %11409 = vmatprep.mubr.msk.bf16.mxu0 %vm8072_vm1, %v11958_v56 }
 0x7d8   : > { %10414 = vadd.xlane.f32.xlu0 %v10413_v23  ;;  %v7034_v28 = vpop.f32.mrf.mxu0  ;;  %v15226_v15 = vpop.f32.mrf.mxu1  ;;  %v7169_v62 = vmax.f32 %v7031_v0, 0.0 }
 0x7d9   : > { %v7035_v26 = vadd.f32 %v7034_v28, %v14808_v50  ;;  %7769 = vmatprep.mubr.bf16.mxu1 %v7236_v2  ;;  %v9097_v52 = vunpack.c.h.bf16 %v7236_v2  ;;  %v9095_v7 = vunpack.c.l.bf16 %v7236_v2  ;;  %v10235_v45 = vmul.f32 %v14828_v19, %v9096_v36 }
 0x7da   : > { %v7036_v8 = vpop.f32.mrf.mxu0  ;;  %7770 = vmatmul.mubr.bf16.gmra.mxu1 %v7235_v34  ;;  %v15229_v48 = vpop.f32.mrf.mxu1  ;;  %v10233_v47 = vmul.f32 %v14828_v19, %v9094_v32  ;;  %v7170_v16 = vmax.f32 %v7033_v42, 0.0  ;;  %v11959_v34 = vld [vmem:[%s15043_s18 + $0x78] sm:$0xff]   ;;  %v15251_v2 = vrot.slane %v11218_v35, %v12357_v31 }
 0x7db   : > { %v7171_v43 = vmax.f32 %v7035_v26, 0.0  ;;  %v7037_v21 = vadd.f32 %v7036_v8, %v14813_v30  ;;  %v10236_v46 = vmul.f32 %v14831_v44, %v9097_v52  ;;  %v10234_v22 = vmul.f32 %v14831_v44, %v9095_v7  ;;  %11410 = vmatmul.mubr.msk.bf16.gmra.mxu0 %vm8072_vm1, %v11959_v34 }
 0x7dc   : > { %v7040_v53 = vpop.f32.mrf.mxu0  ;;  %v15235_v24 = vpop.f32.mrf.mxu1  ;;  %v7488_v8 = vadd.f32 %v15154_v49, %v15251_v2 }
 0x7dd   : > { %v7237_v59 = vpack.c.bf16 %v7171_v43, %v7169_v62  ;;  %v7172_v51 = vmax.f32 %v7037_v21, 0.0  ;;  %v10422_v10 = vadd.f32 %v10236_v46, %v10235_v45  ;;  %v7041_v57 = vadd.f32 %v7040_v53, %v14808_v50 }
 0x7de   : > { %v7042_v29 = vpop.f32.mrf.mxu0  ;;  %v10419_v60 = vadd.f32 %v10234_v22, %v10233_v47  ;;  %v15238_v11 = vpop.f32.mrf.mxu1  ;;  %v7484_v47 = vadd.f32 %v15147_v58, %v15251_v2 }
 0x7df   : > { %v7238_v63 = vpack.c.bf16 %v7172_v51, %v7170_v16  ;;  %10423 = vadd.xlane.f32.xlu1 %v10422_v10  ;;  %v9100_v55 = vunpack.c.h.bf16 %v7237_v59  ;;  %v9098_v17 = vunpack.c.l.bf16 %v7237_v59  ;;  %v7043_v40 = vadd.f32 %v7042_v29, %v14813_v30 }
 0x7e0   : > { %10420 = vadd.xlane.f32.xlu0 %v10419_v60  ;;  %v7044_v12 = vpop.f32.mrf.mxu0  ;;  %v15247_v37 = vpop.f32.mrf.mxu1  ;;  %v7173_v36 = vmax.f32 %v7041_v57, 0.0  ;;  %v7801_v49 = vpack.c.bf16 %v7488_v8, %v7484_v47  ;;  %v15272_v60 = vrot.slane %v11218_v35, %v12374_v39  ;;  %v7498_v39 = vadd.f32 %v15172_v20, %v15251_v2  ;;  %v11963_v47 = vld [vmem:[%s15043_s18 + $0x98] sm:$0xff]  }
 0x7e1   : > { %v7045_v0 = vadd.f32 %v7044_v12, %v14808_v50  ;;  %7779 = vmatprep.mubr.bf16.mxu1 %v7238_v63  ;;  %v9101_v23 = vunpack.c.h.bf16 %v7238_v63  ;;  %v9099_v32 = vunpack.c.l.bf16 %v7238_v63  ;;  %v10239_v50 = vmul.f32 %v14828_v19, %v9100_v55 }
 0x7e2   : > { %v7046_v28 = vpop.f32.mrf.mxu0  ;;  %7780 = vmatmul.mubr.bf16.gmra.mxu1 %v7237_v59  ;;  %v15255_v52 = vpop.f32.mrf.mxu1  ;;  %v10237_v31 = vmul.f32 %v14828_v19, %v9098_v17  ;;  %v7174_v43 = vmax.f32 %v7043_v40, 0.0  ;;  %v7486_v17 = vadd.f32 %v15149_v54, %v15272_v60  ;;  %v11961_v54 = vld [vmem:[%s15043_s18 + $0x88] sm:$0xff]  }
 0x7e3   : > { %v7175_v42 = vmax.f32 %v7045_v0, 0.0  ;;  %v7047_v26 = vadd.f32 %v7046_v28, %v14813_v30  ;;  %v10240_v62 = vmul.f32 %v14831_v44, %v9101_v23  ;;  %v10238_v7 = vmul.f32 %v14831_v44, %v9099_v32 }
 0x7e4   : > { %v15263_v46 = vpop.f32.mrf.mxu1  ;;  %v7482_v0 = vadd.f32 %v15140_v6, %v15272_v60  ;;  %v7496_v6 = vadd.f32 %v15166_v13, %v15272_v60 }
 0x7e5   : > { %v7239_v21 = vpack.c.bf16 %v7175_v42, %v7173_v36  ;;  %v7176_v45 = vmax.f32 %v7047_v26, 0.0  ;;  %v10428_v53 = vadd.f32 %v10240_v62, %v10239_v50  ;;  %v10425_v30 = vadd.f32 %v10238_v7, %v10237_v31 }
 0x7e6   : > { %v15267_v51 = vpop.f32.mrf.mxu1  ;;  %v7800_v36 = vpack.c.bf16 %v7486_v17, %v7482_v0  ;;  %v7492_v26 = vadd.f32 %v15161_v61, %v15272_v60  ;;  %v7504_v50 = vadd.f32 %v15183_v14, %v15251_v2  ;;  %v7518_v61 = vadd.f32 %v15208_v3, %v15251_v2 }
 0x7e7   : > { %v9102_v22 = vunpack.c.l.bf16 %v7239_v21  ;;  %v9104_v16 = vunpack.c.h.bf16 %v7239_v21  ;;  %v7240_v59 = vpack.c.bf16 %v7176_v45, %v7174_v43  ;;  %10429 = vadd.xlane.f32.xlu1 %v10428_v53  ;;  %10426 = vadd.xlane.f32.xlu0 %v10425_v30  ;;  %v7502_v14 = vadd.f32 %v15177_v4, %v15272_v60  ;;  %v11962_v53 = vld [vmem:[%s15043_s18 + $0x90] sm:$0xff]  }
 0x7e8   : > { %v15269_v29 = vpop.f32.mrf.mxu1  ;;  %v7802_v8 = vpack.c.bf16 %v7496_v6, %v7492_v26  ;;  %v7516_v4 = vadd.f32 %v15202_v18, %v15272_v60 }
 0x7e9   : > { %v9103_v10 = vunpack.c.l.bf16 %v7240_v59  ;;  %v9105_v57 = vunpack.c.h.bf16 %v7240_v59  ;;  %7789 = vmatprep.mubr.bf16.mxu1 %v7240_v59  ;;  %v10241_v58 = vmul.f32 %v14828_v19, %v9102_v22  ;;  %v10243_v56 = vmul.f32 %v14828_v19, %v9104_v16 }
 0x7ea   : > { %7790 = vmatmul.mubr.bf16.gmra.mxu1 %v7239_v21  ;;  %v15274_v63 = vpop.f32.mrf.mxu1  ;;  %v7494_v19 = vadd.f32 %v15163_v9, %v15251_v2  ;;  %v7508_v9 = vadd.f32 %v15190_v5, %v15251_v2  ;;  %v7506_v5 = vadd.f32 %v15186_v1, %v15272_v60  ;;  %v7514_v21 = vadd.f32 %v15199_v41, %v15251_v2 }
 0x7eb   : > { %8586 = vmatprep.mubr.bf16.mxu1 %v7801_v49  ;;  %v10242_v55 = vmul.f32 %v14831_v44, %v9103_v10  ;;  %v10244_v12 = vmul.f32 %v14831_v44, %v9105_v57  ;;  %v11960_v44 = vld [vmem:[%s15043_s18 + $0x80] sm:$0xff]   ;;  %v7528_v41 = vadd.f32 %v15226_v15, %v15251_v2  ;;  %v7512_v59 = vadd.f32 %v15193_v33, %v15272_v60 }
 0x7ec   : > { %v15284_v34 = vpop.f32.mrf.mxu1  ;;  %v7803_v28 = vpack.c.bf16 %v7498_v39, %v7494_v19  ;;  %11413 = vmatprep.mubr.msk.bf16.mxu0 %vm8072_vm1, %v11960_v44  ;;  %v7805_v31 = vpack.c.bf16 %v7508_v9, %v7504_v50  ;;  %v7804_v30 = vpack.c.bf16 %v7506_v5, %v7502_v14  ;;  %v7807_v22 = vpack.c.bf16 %v7518_v61, %v7514_v21  ;;  %v11964_v39 = vld [vmem:[%s15043_s18 + $0xa0] sm:$0xff]   ;;  %v11965_v19 = vld [vmem:[%s15043_s18 + $0xa8] sm:$0xff]   ;;  %v11966_v61 = vld [vmem:[%s15043_s18 + $0xb0] sm:$0xff]  }
 0x7ed   : > { %v15286_v35 = vadd.f32 %v10242_v55, %v10241_v58  ;;  %v15288_v40 = vadd.f32 %v10244_v12, %v10243_v56  ;;  %11414 = vmatmul.mubr.msk.bf16.gmra.mxu0 %vm8072_vm1, %v11961_v54  ;;  %v7524_v49 = vadd.f32 %v15219_v25, %v15251_v2  ;;  %v7806_v57 = vpack.c.bf16 %v7516_v4, %v7512_v59  ;;  %v11967_v21 = vld [vmem:[%s15043_s18 + $0xb8] sm:$0xff]  }
 0x7ee   : > { %v15294_v23 = vpop.f32.mrf.mxu1  ;;  %11417 = vmatprep.mubr.msk.bf16.mxu0 %vm8072_vm1, %v11962_v53  ;;  %v7526_v15 = vadd.f32 %v15222_v27, %v15272_v60  ;;  %v7538_v33 = vadd.f32 %v15247_v37, %v15251_v2  ;;  %v7522_v25 = vadd.f32 %v15213_v38, %v15272_v60  ;;  %v7534_v12 = vadd.f32 %v15235_v24, %v15251_v2 }
 0x7ef   : > { %17304 = vst [vmem:[#allocation2_spill] sm:$0xff] %v15286_v35  ;;  %17305 = vst [vmem:[#allocation3_spill] sm:$0xff] %v15288_v40  ;;  %v7809_v58 = vpack.c.bf16 %v7528_v41, %v7524_v49  ;;  %v7536_v38 = vadd.f32 %v15238_v11, %v15272_v60  ;;  %v7548_v24 = vadd.f32 %v15269_v29, %v15251_v2 }
 0x7f0   : > { %v15298_v32 = vpop.f32.mrf.mxu1  ;;  %v7808_v0 = vpack.c.bf16 %v7526_v15, %v7522_v25  ;;  %v7811_v44 = vpack.c.bf16 %v7538_v33, %v7534_v12  ;;  %v7532_v54 = vadd.f32 %v15229_v48, %v15272_v60  ;;  %v7546_v29 = vadd.f32 %v15267_v51, %v15272_v60  ;;  %v11968_v33 = vld [vmem:[%s15043_s18 + $0xc0] sm:$0xff]   ;;  %v11969_v12 = vld [vmem:[%s15043_s18 + $0xc8] sm:$0xff]  }
 0x7f1   : > { %v7558_v48 = vadd.f32 %v15298_v32, %v15251_v2 }
 0x7f2   : > { %8587 = vmatmul.mubr.bf16.vlgmr.msra.gmra.mxu1 %v7800_v36  ;;  %v15302_v20 = vpop.f32.mrf.mxu1  ;;  %v7810_v9 = vpack.c.bf16 %v7536_v38, %v7532_v54 }
 0x7f3   : > { %8594 = vmatprep.mubr.bf16.mxu1 %v7803_v28  ;;  %v7544_v28 = vadd.f32 %v15263_v46, %v15251_v2  ;;  %v7542_v46 = vadd.f32 %v15255_v52, %v15272_v60  ;;  %v7556_v52 = vadd.f32 %v15294_v23, %v15272_v60 }
 0x7f4   : > { %v15308_v42 = vpop.f32.mrf.mxu1 }
 0x7f5   : > { %11418 = vmatmul.mubr.msk.bf16.gmra.mxu0 %vm8072_vm1, %v11963_v47  ;;  %v7813_v26 = vpack.c.bf16 %v7548_v24, %v7544_v28  ;;  %v7812_v14 = vpack.c.bf16 %v7546_v29, %v7542_v46  ;;  %v7552_v47 = vadd.f32 %v15274_v63, %v15272_v60 }
 0x7f6   : > { %v15314_v62 = vpop.f32.mrf.mxu1  ;;  %11421 = vmatprep.mubr.msk.bf16.mxu0 %vm8072_vm1, %v11964_v39 }
 0x7f7   : > { %v7814_v41 = vpack.c.bf16 %v7556_v52, %v7552_v47 }
 0x7f8   : > { %v15316_v7 = vpop.f32.mrf.mxu1 }
 0x7fa   : > { %8595 = vmatmul.mubr.bf16.gmra.mxu1 %v7802_v8  ;;  %v15318_v13 = vpop.f32.mrf.mxu1 }
 0x7fb   : > { %8602 = vmatprep.mubr.bf16.mxu1 %v7805_v31  ;;  %v7554_v31 = vadd.f32 %v15284_v34, %v15251_v2  ;;  %v7568_v34 = vadd.f32 %v15316_v7, %v15251_v2  ;;  %v7566_v7 = vadd.f32 %v15314_v62, %v15272_v60 }
 0x7fc   : > { %v15324_v43 = vpop.f32.mrf.mxu1 }
 0x7fd   : > { %11422 = vmatmul.mubr.msk.bf16.gmra.mxu0 %vm8072_vm1, %v11965_v19  ;;  %v7815_v53 = vpack.c.bf16 %v7558_v48, %v7554_v31  ;;  %v7572_v19 = vadd.f32 %v15318_v13, %v15272_v60  ;;  %v11970_v48 = vld [vmem:[%s15043_s18 + $0xd0] sm:$0xff]   ;;  %v11971_v31 = vld [vmem:[%s15043_s18 + $0xd8] sm:$0xff]  }
 0x7fe   : > { %v15330_v45 = vpop.f32.mrf.mxu1  ;;  %11425 = vmatprep.mubr.msk.bf16.mxu0 %vm8072_vm1, %v11966_v61 }
 0x800   : > { %v15334_v16 = vpop.f32.mrf.mxu1 }
 0x801   : > { %v7578_v63 = vadd.f32 %v15334_v16, %v15251_v2 }
 0x802   : > { %8603 = vmatmul.mubr.bf16.gmra.mxu1 %v7804_v30  ;;  %v15338_v1 = vpop.f32.mrf.mxu1 }
 0x803   : > { %8610 = vmatprep.mubr.bf16.mxu1 %v7807_v22  ;;  %v7564_v22 = vadd.f32 %v15308_v42, %v15251_v2  ;;  %v7562_v42 = vadd.f32 %v15302_v20, %v15272_v60  ;;  %v7576_v20 = vadd.f32 %v15330_v45, %v15272_v60 }
 0x804   : > { %v15344_v3 = vpop.f32.mrf.mxu1 }
 0x805   : > { %11426 = vmatmul.mubr.msk.bf16.gmra.mxu0 %vm8072_vm1, %v11967_v21  ;;  %v7817_v59 = vpack.c.bf16 %v7568_v34, %v7564_v22  ;;  %v7816_v25 = vpack.c.bf16 %v7566_v7, %v7562_v42  ;;  %v7818_v24 = vpack.c.bf16 %v7576_v20, %v7572_v19 }
 0x806   : > { %v15350_v10 = vpop.f32.mrf.mxu1  ;;  %11429 = vmatprep.mubr.msk.bf16.mxu0 %vm8072_vm1, %v11968_v33 }
 0x808   : > { %v15352_v55 = vpop.f32.mrf.mxu1 }
 0x80a   : > { %8611 = vmatmul.mubr.bf16.gmra.mxu1 %v7806_v57  ;;  %v15354_v18 = vpop.f32.mrf.mxu1 }
 0x80b   : > { %8618 = vmatprep.mubr.bf16.mxu1 %v7809_v58  ;;  %v7574_v58 = vadd.f32 %v15324_v43, %v15251_v2  ;;  %v7588_v43 = vadd.f32 %v15352_v55, %v15251_v2  ;;  %v7586_v55 = vadd.f32 %v15350_v10, %v15272_v60  ;;  %v7592_v21 = vadd.f32 %v15354_v18, %v15272_v60 }
 0x80c   : > { %v15360_v56 = vpop.f32.mrf.mxu1 }
 0x80d   : > { %v7819_v39 = vpack.c.bf16 %v7578_v63, %v7574_v58  ;;  %11430 = vmatmul.mubr.msk.bf16.gmra.mxu0 %vm8072_vm1, %v11969_v12  ;;  %v11972_v63 = vld [vmem:[%s15043_s18 + $0xe0] sm:$0xff]   ;;  %v11973_v58 = vld [vmem:[%s15043_s18 + $0xe8] sm:$0xff]  }
 0x80e   : > { %v15366_v17 = vpop.f32.mrf.mxu1  ;;  %11433 = vmatprep.mubr.msk.bf16.mxu0 %vm8072_vm1, %v11970_v48 }
 0x810   : > { %v15370_v36 = vpop.f32.mrf.mxu1 }
 0x811   : > { %v7598_v13 = vadd.f32 %v15370_v36, %v15251_v2 }
 0x812   : > { %8619 = vmatmul.mubr.bf16.gmra.mxu1 %v7808_v0  ;;  %v15374_v27 = vpop.f32.mrf.mxu1 }
 0x813   : > { %8626 = vmatprep.mubr.bf16.mxu1 %v7811_v44  ;;  %v7584_v44 = vadd.f32 %v15344_v3, %v15251_v2  ;;  %v7582_v3 = vadd.f32 %v15338_v1, %v15272_v60  ;;  %v7596_v1 = vadd.f32 %v15366_v17, %v15272_v60 }
 0x814   : > { %v15380_v37 = vpop.f32.mrf.mxu1 }
 0x815   : > { %v7821_v54 = vpack.c.bf16 %v7588_v43, %v7584_v44  ;;  %v7820_v46 = vpack.c.bf16 %v7586_v55, %v7582_v3  ;;  %11434 = vmatmul.mubr.msk.bf16.gmra.mxu0 %vm8072_vm1, %v11971_v31  ;;  %v7822_v34 = vpack.c.bf16 %v7596_v1, %v7592_v21 }
 0x816   : > { %v15386_v6 = vpop.f32.mrf.mxu1  ;;  %11437 = vmatprep.mubr.msk.bf16.mxu0 %vm8072_vm1, %v11972_v63 }
 0x818   : > { %v15388_v50 = vpop.f32.mrf.mxu1 }
 0x81a   : > { %8627 = vmatmul.mubr.bf16.gmra.mxu1 %v7810_v9  ;;  %v15390_v11 = vpop.f32.mrf.mxu1 }
 0x81b   : > { %8634 = vmatprep.mubr.bf16.mxu1 %v7813_v26  ;;  %v7594_v26 = vadd.f32 %v15360_v56, %v15251_v2  ;;  %v7608_v56 = vadd.f32 %v15388_v50, %v15251_v2  ;;  %v7606_v50 = vadd.f32 %v15386_v6, %v15272_v60  ;;  %v7612_v12 = vadd.f32 %v15390_v11, %v15272_v60 }
 0x81c   : > { %v15396_v8 = vpop.f32.mrf.mxu1 }
 0x81d   : > { %v7823_v61 = vpack.c.bf16 %v7598_v13, %v7594_v26  ;;  %11438 = vmatmul.mubr.msk.bf16.gmra.mxu0 %vm8072_vm1, %v11973_v58  ;;  %v11974_v13 = vld [vmem:[%s15043_s18 + $0xf0] sm:$0xff]   ;;  %v11975_v26 = vld [vmem:[%s15043_s18 + $0xf8] sm:$0xff]  }
 0x81e   : > { %v15402_v5 = vpop.f32.mrf.mxu1  ;;  %11441 = vmatprep.mubr.msk.bf16.mxu0 %vm8072_vm1, %v11974_v13 }
 0x820   : > { %v15406_v30 = vpop.f32.mrf.mxu1 }
 0x821   : > { %v7618_v18 = vadd.f32 %v15406_v30, %v15251_v2 }
 0x822   : > { %8635 = vmatmul.mubr.bf16.gmra.mxu1 %v7812_v14  ;;  %v15410_v51 = vpop.f32.mrf.mxu1 }
 0x823   : > { %8642 = vmatprep.mubr.bf16.mxu1 %v7815_v53  ;;  %v7604_v53 = vadd.f32 %v15380_v37, %v15251_v2  ;;  %v7602_v37 = vadd.f32 %v15374_v27, %v15272_v60  ;;  %v7616_v27 = vadd.f32 %v15402_v5, %v15272_v60 }
 0x824   : > { %v15416_v32 = vpop.f32.mrf.mxu1 }
 0x825   : > { %v7825_v47 = vpack.c.bf16 %v7608_v56, %v7604_v53  ;;  %v7824_v42 = vpack.c.bf16 %v7606_v50, %v7602_v37  ;;  %v7826_v43 = vpack.c.bf16 %v7616_v27, %v7612_v12  ;;  %11442 = vmatmul.mubr.msk.bf16.gmra.mxu0 %vm8072_vm1, %v11975_v26 }
 0x826   : > { %v15422_v4 = vpop.f32.mrf.mxu1 }
 0x828   : > { %v15424_v49 = vpop.f32.mrf.mxu1 }
 0x82a   : > { %8643 = vmatmul.mubr.bf16.gmra.mxu1 %v7814_v41  ;;  %v15426_v23 = vpop.f32.mrf.mxu1 }
 0x82b   : > { %8650 = vmatprep.mubr.bf16.mxu1 %v7817_v59  ;;  %v7614_v59 = vadd.f32 %v15396_v8, %v15251_v2  ;;  %v7628_v8 = vadd.f32 %v15424_v49, %v15251_v2  ;;  %v7626_v49 = vadd.f32 %v15422_v4, %v15272_v60  ;;  %v7632_v31 = vadd.f32 %v15426_v23, %v15272_v60 }
 0x82c   : > { %v15432_v57 = vpop.f32.mrf.mxu1 }
 0x82d   : > { %v7827_v33 = vpack.c.bf16 %v7618_v18, %v7614_v59 }
 0x82e   : > { %v15438_v15 = vpop.f32.mrf.mxu1 }
 0x830   : > { %v15442_v0 = vpop.f32.mrf.mxu1 }
 0x831   : > { %v7638_v11 = vadd.f32 %v15442_v0, %v15251_v2 }
 0x832   : > { %8651 = vmatmul.mubr.bf16.gmra.mxu1 %v7816_v25  ;;  %v15446_v62 = vpop.f32.mrf.mxu1 }
 0x833   : > { %8658 = vmatprep.mubr.bf16.mxu1 %v7819_v39  ;;  %v7624_v39 = vadd.f32 %v15416_v32, %v15251_v2  ;;  %v7622_v32 = vadd.f32 %v15410_v51, %v15272_v60  ;;  %v7636_v51 = vadd.f32 %v15438_v15, %v15272_v60 }
 0x834   : > { %v15452_v16 = vpop.f32.mrf.mxu1 }
 0x835   : > { %v7829_v19 = vpack.c.bf16 %v7628_v8, %v7624_v39  ;;  %v7828_v3 = vpack.c.bf16 %v7626_v49, %v7622_v32  ;;  %v7830_v56 = vpack.c.bf16 %v7636_v51, %v7632_v31 }
 0x836   : > { %v15458_v38 = vpop.f32.mrf.mxu1 }
 0x837   : > { %v7646_v15 = vadd.f32 %v15458_v38, %v15272_v60 }
 0x838   : > { %v15460_v28 = vpop.f32.mrf.mxu1 }
 0x83a   : > { %8659 = vmatmul.mubr.bf16.gmra.mxu1 %v7818_v24  ;;  %v15462_v45 = vpop.f32.mrf.mxu1 }
 0x83b   : > { %8666 = vmatprep.mubr.bf16.mxu1 %v7821_v54  ;;  %v7634_v54 = vadd.f32 %v15432_v57, %v15251_v2  ;;  %v7648_v57 = vadd.f32 %v15460_v28, %v15251_v2 }
 0x83c   : > { %v15468_v9 = vpop.f32.mrf.mxu1 }
 0x83d   : > { %v7831_v48 = vpack.c.bf16 %v7638_v11, %v7634_v54 }
 0x83e   : > { %v15474_v29 = vpop.f32.mrf.mxu1 }
 0x83f   : > { %v7656_v38 = vadd.f32 %v15474_v29, %v15272_v60 }
 0x840   : > { %v15478_v14 = vpop.f32.mrf.mxu1 }
 0x841   : > { %v7658_v28 = vadd.f32 %v15478_v14, %v15251_v2 }
 0x842   : > { %8667 = vmatmul.mubr.bf16.gmra.mxu1 %v7820_v46  ;;  %v15482_v10 = vpop.f32.mrf.mxu1 }
 0x843   : > { %8674 = vmatprep.mubr.bf16.mxu1 %v7823_v61  ;;  %v7644_v61 = vadd.f32 %v15452_v16, %v15251_v2  ;;  %v7642_v16 = vadd.f32 %v15446_v62, %v15272_v60 }
 0x844   : > { %v15488_v36 = vpop.f32.mrf.mxu1 }
 0x845   : > { %v7833_v21 = vpack.c.bf16 %v7648_v57, %v7644_v61  ;;  %v7832_v18 = vpack.c.bf16 %v7646_v15, %v7642_v16 }
 0x846   : > { %v15494_v52 = vpop.f32.mrf.mxu1 }
 0x847   : > { %v7666_v29 = vadd.f32 %v15494_v52, %v15272_v60 }
 0x848   : > { %v15496_v22 = vpop.f32.mrf.mxu1 }
 0x849   : > { %v7668_v14 = vadd.f32 %v15496_v22, %v15251_v2 }
 0x84a   : > { %8675 = vmatmul.mubr.bf16.gmra.mxu1 %v7822_v34  ;;  %v15498_v17 = vpop.f32.mrf.mxu1 }
 0x84b   : > { %8682 = vmatprep.mubr.bf16.mxu1 %v7825_v47  ;;  %v7654_v47 = vadd.f32 %v15468_v9, %v15251_v2  ;;  %v7652_v9 = vadd.f32 %v15462_v45, %v15272_v60 }
 0x84c   : > { %v15504_v41 = vpop.f32.mrf.mxu1 }
 0x84d   : > { %v7835_v37 = vpack.c.bf16 %v7658_v28, %v7654_v47  ;;  %v7674_v39 = vadd.f32 %v15504_v41, %v15251_v2  ;;  %v7672_v41 = vadd.f32 %v15498_v17, %v15272_v60 }
 0x84e   : > { %v15510_v7 = vpop.f32.mrf.mxu1 }
 0x84f   : > { %v7676_v52 = vadd.f32 %v15510_v7, %v15272_v60 }
 0x850   : > { %v15514_v25 = vpop.f32.mrf.mxu1 }
 0x851   : > { %v7678_v22 = vadd.f32 %v15514_v25, %v15251_v2 }
 0x852   : > { %8683 = vmatmul.mubr.bf16.gmra.mxu1 %v7824_v42  ;;  %v15518_v6 = vpop.f32.mrf.mxu1  ;;  %v7664_v42 = vadd.f32 %v15488_v36, %v15251_v2  ;;  %v7662_v36 = vadd.f32 %v15482_v10, %v15272_v60 }
 0x853   : > { %8690 = vmatprep.mubr.bf16.mxu1 %v7827_v33  ;;  %v7834_v33 = vpack.c.bf16 %v7656_v38, %v7652_v9  ;;  %v7839_v49 = vpack.c.bf16 %v7678_v22, %v7674_v39 }
 0x854   : > { %v15524_v30 = vpop.f32.mrf.mxu1  ;;  %v7837_v27 = vpack.c.bf16 %v7668_v14, %v7664_v42 }
 0x855   : > { %v7684_v54 = vadd.f32 %v15524_v30, %v15251_v2  ;;  %v7682_v30 = vadd.f32 %v15518_v6, %v15272_v60 }
 0x856   : > { %v15530_v20 = vpop.f32.mrf.mxu1 }
 0x857   : > { %v7686_v7 = vadd.f32 %v15530_v20, %v15272_v60 }
 0x858   : > { %v15532_v44 = vpop.f32.mrf.mxu1 }
 0x859   : > { %v7688_v25 = vadd.f32 %v15532_v44, %v15251_v2  ;;  %v7840_v61 = vpack.c.bf16 %v7686_v7, %v7682_v30 }
 0x85a   : > { %8691 = vmatmul.mubr.bf16.gmra.mxu1 %v7826_v43  ;;  %v15534_v5 = vpop.f32.mrf.mxu1 }
 0x85b   : > { %8698 = vmatprep.mubr.bf16.mxu1 %v7829_v19  ;;  %v7836_v19 = vpack.c.bf16 %v7666_v29, %v7662_v36  ;;  %v7841_v26 = vpack.c.bf16 %v7688_v25, %v7684_v54 }
 0x85c   : > { %v15540_v24 = vpop.f32.mrf.mxu1 }
 0x85d   : > { %v7694_v57 = vadd.f32 %v15540_v24, %v15251_v2  ;;  %v7692_v24 = vadd.f32 %v15534_v5, %v15272_v60 }
 0x85e   : > { %v15546_v55 = vpop.f32.mrf.mxu1 }
 0x85f   : > { %v7696_v20 = vadd.f32 %v15546_v55, %v15272_v60 }
 0x860   : > { %v15550_v46 = vpop.f32.mrf.mxu1 }
 0x861   : > { %v7698_v44 = vadd.f32 %v15550_v46, %v15251_v2  ;;  %v7842_v47 = vpack.c.bf16 %v7696_v20, %v7692_v24 }
 0x862   : > { %8699 = vmatmul.mubr.bf16.gmra.mxu1 %v7828_v3  ;;  %v15554_v4 = vpop.f32.mrf.mxu1  ;;  %v7838_v3 = vpack.c.bf16 %v7676_v52, %v7672_v41 }
 0x863   : > { %8706 = vmatprep.mubr.bf16.mxu1 %v7831_v48 }
 0x864   : > { %v15560_v0 = vpop.f32.mrf.mxu1 }
 0x865   : > { %v7704_v28 = vadd.f32 %v15560_v0, %v15251_v2  ;;  %v7702_v0 = vadd.f32 %v15554_v4, %v15272_v60 }
 0x866   : > { %v15566_v1 = vpop.f32.mrf.mxu1 }
 0x867   : > { %v7706_v55 = vadd.f32 %v15566_v1, %v15272_v60 }
 0x868   : > { %v15568_v53 = vpop.f32.mrf.mxu1 }
 0x869   : > { %v7708_v46 = vadd.f32 %v15568_v53, %v15251_v2  ;;  %v7844_v42 = vpack.c.bf16 %v7706_v55, %v7702_v0 }
 0x86a   : > { %8707 = vmatmul.mubr.bf16.gmra.mxu1 %v7830_v56  ;;  %v15570_v34 = vpop.f32.mrf.mxu1  ;;  %v7843_v56 = vpack.c.bf16 %v7698_v44, %v7694_v57 }
 0x86b   : > { %8714 = vmatprep.mubr.bf16.mxu1 %v7833_v21 }
 0x86c   : > { %v15576_v23 = vpop.f32.mrf.mxu1 }
 0x86d   : > { %v7714_v14 = vadd.f32 %v15576_v23, %v15251_v2  ;;  %v7712_v23 = vadd.f32 %v15570_v34, %v15272_v60 }
 0x86e   : > { %v15582_v50 = vpop.f32.mrf.mxu1 }
 0x86f   : > { %v7716_v1 = vadd.f32 %v15582_v50, %v15272_v60  ;;  %v11383_v50 = vpop.f32.mrf.mxu0 }
 0x870   : > { %v15584_v59 = vpop.f32.mrf.mxu1 }
 0x871   : > { %v7718_v53 = vadd.f32 %v15584_v59, %v15251_v2  ;;  %v7846_v39 = vpack.c.bf16 %v7716_v1, %v7712_v23  ;;  %v8203_v54 = vpop.f32.mrf.mxu0 }
 0x872   : > { %8715 = vmatmul.mubr.bf16.gmra.mxu1 %v7832_v18  ;;  %v15586_v63 = vpop.f32.mrf.mxu1  ;;  %v7845_v18 = vpack.c.bf16 %v7708_v46, %v7704_v28 }
 0x873   : > { %8722 = vmatprep.mubr.bf16.mxu1 %v7835_v37 }
 0x874   : > { %v15592_v62 = vpop.f32.mrf.mxu1 }
 0x875   : > { %v7724_v22 = vadd.f32 %v15592_v62, %v15251_v2  ;;  %v7722_v62 = vadd.f32 %v15586_v63, %v15272_v60 }
 0x876   : > { %v15598_v58 = vpop.f32.mrf.mxu1 }
 0x878   : > { %v15600_v8 = vpop.f32.mrf.mxu1 }
 0x879   : > { %v7728_v59 = vadd.f32 %v15600_v8, %v15251_v2  ;;  %v7726_v8 = vadd.f32 %v15598_v58, %v15272_v60  ;;  %v11384_v58 = vpop.f32.mrf.mxu0 }
 0x87a   : > { %8723 = vmatmul.mubr.bf16.gmra.mxu1 %v7834_v33  ;;  %v15602_v12 = vpop.f32.mrf.mxu1  ;;  %v7847_v33 = vpack.c.bf16 %v7718_v53, %v7714_v14 }
 0x87b   : > { %8730 = vmatprep.mubr.bf16.mxu1 %v7837_v27  ;;  %v8206_v24 = vpop.f32.mrf.mxu0 }
 0x87c   : > { %v15608_v45 = vpop.f32.mrf.mxu1 }
 0x87d   : > { %v7734_v41 = vadd.f32 %v15608_v45, %v15251_v2 }
 0x87e   : > { %v15614_v43 = vpop.f32.mrf.mxu1 }
 0x87f   : > { %v7736_v63 = vadd.f32 %v15614_v43, %v15272_v60 }
 0x880   : > { %v15616_v11 = vpop.f32.mrf.mxu1 }
 0x881   : > { %v7738_v34 = vadd.f32 %v15616_v11, %v15251_v2  ;;  %v15717_v11 = vld [vmem:[%s17299_s9] ss:$0 sm:$0xff] }
 0x882   : > { %8731 = vmatmul.mubr.bf16.gmra.mxu1 %v7836_v19  ;;  %v15618_v32 = vpop.f32.mrf.mxu1  ;;  %v7849_v19 = vpack.c.bf16 %v7728_v59, %v7724_v22 }
 0x883   : > { %8738 = vmatprep.mubr.bf16.mxu1 %v7839_v49  ;;  %v7851_v7 = vpack.c.bf16 %v7738_v34, %v7734_v41 }
 0x884   : > { %v15624_v10 = vpop.f32.mrf.mxu1 }
 0x885   : > { %v7744_v46 = vadd.f32 %v15624_v10, %v15251_v2  ;;  %v15738_v10 = vld [vmem:[%s17300_s10 + $0x1] ss:$0 sm:$0xff] }
 0x886   : > { %v15630_v13 = vpop.f32.mrf.mxu1 }
 0x888   : > { %v15632_v48 = vpop.f32.mrf.mxu1 }
 0x889   : > { %v7748_v57 = vadd.f32 %v15632_v48, %v15251_v2 }
 0x88a   : > { %8739 = vmatmul.mubr.bf16.gmra.mxu1 %v7838_v3  ;;  %v15634_v51 = vpop.f32.mrf.mxu1 }
 0x88b   : > { %8746 = vmatprep.mubr.bf16.mxu1 %v7841_v26  ;;  %v7848_v26 = vpack.c.bf16 %v7726_v8, %v7722_v62  ;;  %v7853_v48 = vpack.c.bf16 %v7748_v57, %v7744_v46 }
 0x88c   : > { %v15640_v17 = vpop.f32.mrf.mxu1 }
 0x88d   : > { %v7754_v62 = vadd.f32 %v15640_v17, %v15251_v2 }
 0x88e   : > { %v15646_v31 = vpop.f32.mrf.mxu1 }
 0x890   : > { %v15648_v21 = vpop.f32.mrf.mxu1 }
 0x891   : > { %v7758_v23 = vadd.f32 %v15648_v21, %v15251_v2 }
 0x892   : > { %8747 = vmatmul.mubr.bf16.gmra.mxu1 %v7840_v61  ;;  %v15650_v15 = vpop.f32.mrf.mxu1 }
 0x893   : > { %8754 = vmatprep.mubr.bf16.mxu1 %v7843_v56  ;;  %v7732_v56 = vadd.f32 %v15602_v12, %v15272_v60 }
 0x894   : > { %v15656_v6 = vpop.f32.mrf.mxu1 }
 0x895   : > { %v7850_v43 = vpack.c.bf16 %v7736_v63, %v7732_v56 }
 0x896   : > { %v15662_v16 = vpop.f32.mrf.mxu1 }
 0x898   : > { %v15664_v37 = vpop.f32.mrf.mxu1 }
 0x899   : > { %v7768_v56 = vadd.f32 %v15664_v37, %v15251_v2 }
 0x89a   : > { %8755 = vmatmul.mubr.bf16.gmra.mxu1 %v7842_v47  ;;  %v15666_v38 = vpop.f32.mrf.mxu1  ;;  %v15731_v47 = vld [vmem:[%s17300_s10] ss:$0 sm:$0xff] }
 0x89b   : > { %8762 = vmatprep.mubr.bf16.mxu1 %v7845_v18 }
 0x89c   : > { %v15672_v5 = vpop.f32.mrf.mxu1 }
 0x89e   : > { %v15678_v9 = vpop.f32.mrf.mxu1 }
 0x8a0   : > { %v15680_v27 = vpop.f32.mrf.mxu1 }
 0x8a2   : > { %8763 = vmatmul.mubr.bf16.gmra.mxu1 %v7844_v42  ;;  %v15682_v29 = vpop.f32.mrf.mxu1  ;;  %v15740_v42 = vpop.f32.mrf.mxu0 }
 0x8a3   : > { %8770 = vmatprep.mubr.bf16.mxu1 %v7847_v33  ;;  %v7746_v33 = vadd.f32 %v15630_v13, %v15272_v60 }
 0x8a4   : > { %v15688_v4 = vpop.f32.mrf.mxu1  ;;  %v8219_v41 = vpop.f32.mrf.mxu0 }
 0x8a6   : > { %v15694_v36 = vpop.f32.mrf.mxu1  ;;  %v15761_v57 = vpop.f32.mrf.mxu0 }
 0x8a8   : > { %v15696_v49 = vpop.f32.mrf.mxu1 }
 0x8aa   : > { %8771 = vmatmul.mubr.bf16.gmra.mxu1 %v7846_v39  ;;  %v15698_v52 = vpop.f32.mrf.mxu1  ;;  %v7742_v39 = vadd.f32 %v15618_v32, %v15272_v60  ;;  %v7855_v32 = vpack.c.bf16 %v7758_v23, %v7754_v62 }
 0x8ab   : > { %8778 = vmatprep.mubr.bf16.mxu1 %v7849_v19 }
 0x8ac   : > { %v15704_v25 = vpop.f32.mrf.mxu1  ;;  %v7852_v21 = vpack.c.bf16 %v7746_v33, %v7742_v39  ;;  %v7778_v39 = vadd.f32 %v15680_v27, %v15251_v2 }
 0x8ae   : > { %v15710_v3 = vpop.f32.mrf.mxu1 }
 0x8b0   : > { %v15712_v44 = vpop.f32.mrf.mxu1 }
 0x8b2   : > { %8779 = vmatmul.mubr.bf16.gmra.mxu1 %v7848_v26  ;;  %v8588_v30 = vpop.f32.mrf.mxu1 }
 0x8b3   : > { %8786 = vmatprep.mubr.bf16.mxu1 %v7851_v7  ;;  %v8589_v45 = vadd.f32 %v8588_v30, %v8203_v54 }
 0x8b4   : > { %v8590_v61 = vpop.f32.mrf.mxu1 }
 0x8b5   : > { %v8850_v20 = vadd.f32 %v15717_v11, %v8589_v45  ;;  %v7756_v61 = vadd.f32 %v15646_v31, %v15272_v60 }
 0x8b6   : > { %v8591_v28 = vpop.f32.mrf.mxu1 }
 0x8b7   : > { %v8914_v18 = vmax.f32 %v8850_v20, 0.0  ;;  %v8592_v55 = vadd.f32 %v8591_v28, %v8206_v24 }
 0x8b8   : > { %v8593_v53 = vpop.f32.mrf.mxu1 }
 0x8b9   : > { %v8851_v0 = vadd.f32 %v15717_v11, %v8592_v55  ;;  %v9111_v12 = vmul.f32 %v15731_v47, %v8914_v18  ;;  %v9444_v34 = vmul.f32 %v15738_v10, %v8914_v18  ;;  %v8222_v55 = vpop.f32.mrf.mxu0  ;;  %v15773_v53 = vpop.xlane.xlu0 %10246 }
 0x8ba   : > { %8787 = vmatmul.mubr.bf16.gmra.mxu1 %v7850_v43  ;;  %v8596_v14 = vpop.f32.mrf.mxu1 }
 0x8bb   : > { %8794 = vmatprep.mubr.bf16.mxu1 %v7853_v48  ;;  %v8915_v1 = vmax.f32 %v8851_v0, 0.0  ;;  %v8597_v59 = vadd.f32 %v11383_v50, %v8596_v14  ;;  %9175 = vadd.xlane.f32.xlu0 %v9111_v12  ;;  %v15756_v50 = vld [vmem:[%s17300_s10 + $0x2] ss:$0 sm:$0xff] }
 0x8bc   : > { %v8598_v22 = vpop.f32.mrf.mxu1  ;;  %v9777_v17 = vmul.f32 %v15756_v50, %v8914_v18  ;;  %v7764_v18 = vadd.f32 %v15656_v6, %v15251_v2  ;;  %v15778_v6 = vpop.xlane.xlu1 %10249 }
 0x8bd   : > { %v8852_v19 = vadd.f32 %v15717_v11, %v8597_v59  ;;  %v9445_v8 = vmul.f32 %v15738_v10, %v8915_v1  ;;  %v9778_v63 = vmul.f32 %v15756_v50, %v8915_v1  ;;  %v9112_v43 = vmul.f32 %v15731_v47, %v8915_v1  ;;  %v15782_v23 = vpop.xlane.xlu0 %10252 }
 0x8be   : > { %v8599_v13 = vpop.f32.mrf.mxu1  ;;  %v7766_v59 = vadd.f32 %v15662_v16, %v15272_v60  ;;  %v7762_v22 = vadd.f32 %v15650_v15, %v15272_v60  ;;  %v7774_v16 = vadd.f32 %v15672_v5, %v15251_v2 }
 0x8bf   : > { %v8600_v54 = vadd.f32 %v11384_v58, %v8599_v13  ;;  %9510 = vadd.xlane.f32.xlu1 %v9445_v8  ;;  %9508 = vadd.xlane.f32.xlu0 %v9444_v34  ;;  %v8916_v7 = vmax.f32 %v8852_v19, 0.0  ;;  %v7752_v58 = vadd.f32 %v15634_v51, %v15272_v60  ;;  %v7857_v51 = vpack.c.bf16 %v7768_v56, %v7764_v18 }
 0x8c0   : > { %v8601_v26 = vpop.f32.mrf.mxu1  ;;  %v7859_v27 = vpack.c.bf16 %v7778_v39, %v7774_v16  ;;  %v7788_v56 = vadd.f32 %v15696_v49, %v15251_v2  ;;  %v7798_v39 = vadd.f32 %v15712_v44, %v15251_v2 }
 0x8c1   : > { %v8853_v30 = vadd.f32 %v15717_v11, %v8600_v54  ;;  %v9113_v28 = vmul.f32 %v15731_v47, %v8916_v7  ;;  %v7854_v48 = vpack.c.bf16 %v7756_v61, %v7752_v58  ;;  %v9446_v33 = vmul.f32 %v15738_v10, %v8916_v7  ;;  %v15795_v15 = vpop.xlane.xlu0 %10258 }
 0x8c2   : > { %8795 = vmatmul.mubr.bf16.gmra.mxu1 %v7852_v21  ;;  %v8604_v45 = vpop.f32.mrf.mxu1  ;;  %v9779_v13 = vmul.f32 %v15756_v50, %v8916_v7  ;;  %v15793_v21 = vpop.xlane.xlu1 %10255  ;;  %v7856_v54 = vpack.c.bf16 %v7766_v59, %v7762_v22  ;;  %v7776_v61 = vadd.f32 %v15678_v9, %v15272_v60  ;;  %v7784_v9 = vadd.f32 %v15688_v4, %v15251_v2 }
 0x8c3   : > { %8802 = vmatprep.mubr.bf16.mxu1 %v7855_v32  ;;  %9843 = vadd.xlane.f32.xlu1 %v9778_v63  ;;  %v8917_v46 = vmax.f32 %v8853_v30, 0.0  ;;  %v8605_v24 = vadd.f32 %v8604_v45, %v8219_v41  ;;  %v7782_v22 = vadd.f32 %v15682_v29, %v15272_v60 }
 0x8c4   : > { %9841 = vadd.xlane.f32.xlu0 %v9777_v17  ;;  %v8606_v20 = vpop.f32.mrf.mxu1  ;;  %v15800_v17 = vpop.f32.mrf.mxu0 }
 0x8c5   : > { %v8854_v37 = vadd.f32 %v15717_v11, %v8605_v24  ;;  %v9114_v14 = vmul.f32 %v15731_v47, %v8917_v46  ;;  %v9447_v62 = vmul.f32 %v15738_v10, %v8917_v46  ;;  %v9780_v63 = vmul.f32 %v15756_v50, %v8917_v46  ;;  %v15806_v58 = vpop.xlane.xlu0 %10264 }
 0x8c6   : > { %v8607_v31 = vpop.f32.mrf.mxu1  ;;  %v15802_v45 = vpop.xlane.xlu1 %10261 }
 0x8c7   : > { %9179 = vadd.xlane.f32.xlu1 %v9113_v28  ;;  %v8608_v12 = vadd.f32 %v8607_v31, %v8222_v55  ;;  %v8918_v8 = vmax.f32 %v8854_v37, 0.0  ;;  %v8235_v18 = vpop.f32.mrf.mxu0 }
 0x8c8   : > { %9177 = vadd.xlane.f32.xlu0 %v9112_v43  ;;  %v8609_v0 = vpop.f32.mrf.mxu1 }
 0x8c9   : > { %v8855_v34 = vadd.f32 %v15717_v11, %v8608_v12  ;;  %v9115_v7 = vmul.f32 %v15731_v47, %v8918_v8  ;;  %v9448_v43 = vmul.f32 %v15738_v10, %v8918_v8  ;;  %v15820_v49 = vpop.xlane.xlu0 %10270  ;;  %v9781_v12 = vmul.f32 %v15756_v50, %v8918_v8  ;;  %v15825_v4 = vpop.f32.mrf.mxu0 }
 0x8ca   : > { %8803 = vmatmul.mubr.bf16.gmra.mxu1 %v7854_v48  ;;  %v8612_v1 = vpop.f32.mrf.mxu1  ;;  %v15818_v31 = vpop.xlane.xlu1 %10267  ;;  %v7861_v48 = vpack.c.bf16 %v7788_v56, %v7784_v9 }
 0x8cb   : > { %8810 = vmatprep.mubr.bf16.mxu1 %v7857_v51  ;;  %9181 = vadd.xlane.f32.xlu1 %v9114_v14  ;;  %v8919_v26 = vmax.f32 %v8855_v34, 0.0  ;;  %v8613_v30 = vadd.f32 %v15740_v42, %v8612_v1  ;;  %v7772_v42 = vadd.f32 %v15666_v38, %v15272_v60  ;;  %v7786_v1 = vadd.f32 %v15694_v36, %v15272_v60  ;;  %v8238_v16 = vpop.f32.mrf.mxu0 }
 0x8cc   : > { %9512 = vadd.xlane.f32.xlu0 %v9446_v33  ;;  %v8614_v19 = vpop.f32.mrf.mxu1  ;;  %v7794_v36 = vadd.f32 %v15704_v25, %v15251_v2 }
 0x8cd   : > { %v8856_v46 = vadd.f32 %v15717_v11, %v8613_v30  ;;  %v9116_v28 = vmul.f32 %v15731_v47, %v8919_v26  ;;  %v7858_v38 = vpack.c.bf16 %v7776_v61, %v7772_v42  ;;  %v9449_v37 = vmul.f32 %v15738_v10, %v8919_v26  ;;  %v15831_v59 = vpop.xlane.xlu0 %10276 }
 0x8ce   : > { %v8615_v41 = vpop.f32.mrf.mxu1  ;;  %v15827_v33 = vpop.xlane.xlu1 %10273  ;;  %v7863_v44 = vpack.c.bf16 %v7798_v39, %v7794_v36  ;;  %v7792_v42 = vadd.f32 %v15698_v52, %v15272_v60 }
 0x8cf   : > { %9514 = vadd.xlane.f32.xlu1 %v9447_v62  ;;  %v8616_v24 = vadd.f32 %v15761_v57, %v8615_v41  ;;  %v8920_v0 = vmax.f32 %v8856_v46, 0.0  ;;  %v9782_v62 = vmul.f32 %v15756_v50, %v8919_v26 }
 0x8d0   : > { %9845 = vadd.xlane.f32.xlu0 %v9779_v13  ;;  %v8617_v32 = vpop.f32.mrf.mxu1 }
 0x8d1   : > { %v8857_v57 = vadd.f32 %v15717_v11, %v8616_v24  ;;  %v9117_v13 = vmul.f32 %v15731_v47, %v8920_v0  ;;  %v15843_v29 = vpop.xlane.xlu0 %10282 }
 0x8d2   : > { %8811 = vmatmul.mubr.bf16.gmra.mxu1 %v7856_v54  ;;  %v8620_v5 = vpop.f32.mrf.mxu1  ;;  %v15841_v54 = vpop.xlane.xlu1 %10279 }
 0x8d3   : > { %8818 = vmatprep.mubr.bf16.mxu1 %v7859_v27  ;;  %9847 = vadd.xlane.f32.xlu1 %v9780_v63  ;;  %v8921_v8 = vmax.f32 %v8857_v57, 0.0  ;;  %v8621_v34 = vadd.f32 %v8620_v5, %v8235_v18  ;;  %v7860_v27 = vpack.c.bf16 %v7786_v1, %v7782_v22  ;;  %v7796_v5 = vadd.f32 %v15710_v3, %v15272_v60 }
 0x8d4   : > { %9183 = vadd.xlane.f32.xlu0 %v9115_v7  ;;  %v8622_v20 = vpop.f32.mrf.mxu1  ;;  %v9450_v7 = vmul.f32 %v15738_v10, %v8920_v0 }
 0x8d5   : > { %v8858_v30 = vadd.f32 %v15717_v11, %v8621_v34  ;;  %v9118_v26 = vmul.f32 %v15731_v47, %v8921_v8  ;;  %v15852_v61 = vpop.xlane.xlu0 %10288  ;;  %v9451_v24 = vmul.f32 %v15738_v10, %v8921_v8  ;;  %v7862_v18 = vpack.c.bf16 %v7796_v5, %v7792_v42 }
 0x8d6   : > { %v8623_v55 = vpop.f32.mrf.mxu1  ;;  %v15848_v25 = vpop.xlane.xlu1 %10285  ;;  %v9784_v52 = vmul.f32 %v15756_v50, %v8921_v8 }
 0x8d7   : > { %9185 = vadd.xlane.f32.xlu1 %v9116_v28  ;;  %v8624_v63 = vadd.f32 %v8623_v55, %v8238_v16  ;;  %v8922_v20 = vmax.f32 %v8858_v30, 0.0  ;;  %v9783_v28 = vmul.f32 %v15756_v50, %v8920_v0 }
 0x8d8   : > { %9516 = vadd.xlane.f32.xlu0 %v9448_v43  ;;  %v8625_v51 = vpop.f32.mrf.mxu1 }
 0x8d9   : > { %v8859_v46 = vadd.f32 %v15717_v11, %v8624_v63  ;;  %v15861_v3 = vpop.xlane.xlu0 %10294  ;;  %v11395_v51 = vpop.f32.mrf.mxu0 }
 0x8da   : > { %8819 = vmatmul.mubr.bf16.gmra.mxu1 %v7858_v38  ;;  %v8628_v14 = vpop.f32.mrf.mxu1  ;;  %v15859_v9 = vpop.xlane.xlu1 %10291 }
 0x8db   : > { %8826 = vmatprep.mubr.bf16.mxu1 %v7861_v48  ;;  %9518 = vadd.xlane.f32.xlu1 %v9449_v37  ;;  %v8923_v38 = vmax.f32 %v8859_v46, 0.0  ;;  %v8629_v60 = vadd.f32 %v15800_v17, %v8628_v14  ;;  %v9119_v48 = vmul.f32 %v15731_v47, %v8922_v20  ;;  %v9452_v14 = vmul.f32 %v15738_v10, %v8922_v20  ;;  %v8251_v39 = vpop.f32.mrf.mxu0 }
 0x8dc   : > { %9849 = vadd.xlane.f32.xlu0 %v9781_v12  ;;  %v8630_v19 = vpop.f32.mrf.mxu1 }
 0x8dd   : > { %v15868_v37 = vpop.xlane.xlu0 %10300  ;;  %v8860_v1 = vadd.f32 %v15717_v11, %v8629_v60  ;;  %v9120_v17 = vmul.f32 %v15731_v47, %v8923_v38  ;;  %v9453_v16 = vmul.f32 %v15738_v10, %v8923_v38 }
 0x8de   : > { %v8631_v41 = vpop.f32.mrf.mxu1  ;;  %v15866_v0 = vpop.xlane.xlu1 %10297 }
 0x8df   : > { %9851 = vadd.xlane.f32.xlu1 %v9782_v62  ;;  %v8632_v22 = vadd.f32 %v15825_v4, %v8631_v41  ;;  %v9785_v4 = vmul.f32 %v15756_v50, %v8922_v20  ;;  %v11396_v41 = vpop.f32.mrf.mxu0 }
 0x8e0   : > { %9187 = vadd.xlane.f32.xlu0 %v9117_v13  ;;  %v8633_v32 = vpop.f32.mrf.mxu1  ;;  %v8924_v13 = vmax.f32 %v8860_v1, 0.0 }
 0x8e1   : > { %v15876_v34 = vpop.xlane.xlu0 %10306  ;;  %v8861_v36 = vadd.f32 %v15717_v11, %v8632_v22  ;;  %v8254_v42 = vpop.f32.mrf.mxu0 }
 0x8e2   : > { %8827 = vmatmul.mubr.bf16.gmra.mxu1 %v7860_v27  ;;  %v8636_v2 = vpop.f32.mrf.mxu1  ;;  %v15874_v8 = vpop.xlane.xlu1 %10303  ;;  %v9121_v5 = vmul.f32 %v15731_v47, %v8924_v13 }
 0x8e3   : > { %8834 = vmatprep.mubr.bf16.mxu1 %v7863_v44  ;;  %9189 = vadd.xlane.f32.xlu1 %v9118_v26  ;;  %v8925_v63 = vmax.f32 %v8861_v36, 0.0  ;;  %v8637_v26 = vadd.f32 %v8636_v2, %v8251_v39  ;;  %v9454_v2 = vmul.f32 %v15738_v10, %v8924_v13 }
 0x8e4   : > { %9520 = vadd.xlane.f32.xlu0 %v9450_v7  ;;  %v8638_v56 = vpop.f32.mrf.mxu1  ;;  %v9786_v7 = vmul.f32 %v15756_v50, %v8923_v38 }
 0x8e5   : > { %v15885_v32 = vpop.xlane.xlu0 %10312  ;;  %v9455_v22 = vmul.f32 %v15738_v10, %v8925_v63 }
 0x8e6   : > { %v8639_v43 = vpop.f32.mrf.mxu1  ;;  %v15883_v44 = vpop.xlane.xlu1 %10309 }
 0x8e7   : > { %9522 = vadd.xlane.f32.xlu1 %v9451_v24 }
 0x8e8   : > { %9853 = vadd.xlane.f32.xlu0 %v9783_v28  ;;  %v8641_v55 = vpop.f32.mrf.mxu1  ;;  %v8862_v28 = vadd.f32 %v15717_v11, %v8637_v26  ;;  %v11399_v26 = vpop.f32.mrf.mxu0 }
 0x8e9   : > { %v15893_v46 = vpop.xlane.xlu0 %10318  ;;  %v9122_v55 = vmul.f32 %v15731_v47, %v8925_v63 }
 0x8ea   : > { %8835 = vmatmul.mubr.bf16.gmra.mxu1 %v7862_v18  ;;  %v8644_v57 = vpop.f32.mrf.mxu1  ;;  %v15891_v20 = vpop.xlane.xlu1 %10315  ;;  %v8640_v18 = vadd.f32 %v8639_v43, %v8254_v42  ;;  %v9787_v43 = vmul.f32 %v15756_v50, %v8924_v13 }
 0x8eb   : > { %9855 = vadd.xlane.f32.xlu1 %v9784_v52 }
 0x8ec   : > { %9191 = vadd.xlane.f32.xlu0 %v9119_v48  ;;  %v8646_v12 = vpop.f32.mrf.mxu1  ;;  %v8863_v1 = vadd.f32 %v15717_v11, %v8640_v18 }
 0x8ed   : > { %v15902_v52 = vpop.xlane.xlu0 %10324  ;;  %v8926_v12 = vmax.f32 %v8862_v28, 0.0 }
 0x8ee   : > { %v8647_v19 = vpop.f32.mrf.mxu1  ;;  %v15900_v60 = vpop.xlane.xlu1 %10321  ;;  %v8927_v36 = vmax.f32 %v8863_v1, 0.0 }
 0x8ef   : > { %9193 = vadd.xlane.f32.xlu1 %v9120_v17  ;;  %v8648_v28 = vadd.f32 %v11396_v41, %v8647_v19  ;;  %v9789_v19 = vmul.f32 %v15756_v50, %v8926_v12 }
 0x8f0   : > { %9524 = vadd.xlane.f32.xlu0 %v9452_v14  ;;  %v8649_v62 = vpop.f32.mrf.mxu1  ;;  %v9124_v18 = vmul.f32 %v15731_v47, %v8927_v36 }
 0x8f1   : > { %v15911_v39 = vpop.xlane.xlu0 %10330 }
 0x8f2   : > { %v15881_v27 = vpop.f32.mrf.mxu1  ;;  %v15909_v14 = vpop.xlane.xlu1 %10327  ;;  %17307 = vst [vmem:[#allocation5_spill] sm:$0xff] %v15911_v39 }
 0x8f3   : > { %9526 = vadd.xlane.f32.xlu1 %v9453_v16  ;;  %17306 = vst [vmem:[#allocation4_spill] sm:$0xff] %v15909_v14  ;;  %v8645_v16 = vadd.f32 %v11395_v51, %v8644_v57  ;;  %v9456_v51 = vmul.f32 %v15738_v10, %v8926_v12  ;;  %v8267_v57 = vpop.f32.mrf.mxu0 }
 0x8f4   : > { %9857 = vadd.xlane.f32.xlu0 %v9785_v4  ;;  %v8654_v30 = vpop.f32.mrf.mxu1  ;;  %v9788_v4 = vmul.f32 %v15756_v50, %v8925_v63 }
 0x8f5   : > { %v9123_v30 = vmul.f32 %v15731_v47, %v8926_v12  ;;  %v15919_v13 = vpop.xlane.xlu0 %10336  ;;  %v11400_v41 = vpop.f32.mrf.mxu0 }
 0x8f6   : > { %v15889_v56 = vpop.f32.mrf.mxu1  ;;  %17309 = vst [vmem:[#allocation7_spill] sm:$0xff] %v15919_v13 }
 0x8f7   : > { %9859 = vadd.xlane.f32.xlu1 %v9786_v7 }
 0x8f8   : > { %9195 = vadd.xlane.f32.xlu0 %v9121_v5  ;;  %v8657_v24 = vpop.f32.mrf.mxu1  ;;  %v15917_v5 = vpop.xlane.xlu1 %10333 }
 0x8f9   : > { %17308 = vst [vmem:[#allocation6_spill] sm:$0xff] %v15917_v5  ;;  %v8864_v24 = vadd.f32 %v15717_v11, %v8645_v16 }
 0x8fa   : > { %v15898_v38 = vpop.f32.mrf.mxu1 }
 0x8fb   : > { %9197 = vadd.xlane.f32.xlu1 %v9122_v55  ;;  %v8928_v1 = vmax.f32 %v8864_v24, 0.0  ;;  %v9790_v24 = vmul.f32 %v15756_v50, %v8927_v36 }
 0x8fc   : > { %9528 = vadd.xlane.f32.xlu0 %v9454_v2  ;;  %v8662_v48 = vpop.f32.mrf.mxu1  ;;  %v15926_v55 = vpop.xlane.xlu1 %10339 }
 0x8fd   : > { %17310 = vst [vmem:[#allocation8_spill] sm:$0xff] %v15926_v55  ;;  %v15928_v2 = vpop.xlane.xlu0 %10342 }
 0x8fe   : > { %v15907_v17 = vpop.f32.mrf.mxu1  ;;  %17311 = vst [vmem:[#allocation9_spill] sm:$0xff] %v15928_v2 }
 0x8ff   : > { %9530 = vadd.xlane.f32.xlu1 %v9455_v22  ;;  %v8865_v22 = vadd.f32 %v15717_v11, %v8648_v28  ;;  %v9125_v28 = vmul.f32 %v15731_v47, %v8928_v1 }
 0x900   : > { %9861 = vadd.xlane.f32.xlu0 %v9787_v43  ;;  %v8665_v62 = vpop.f32.mrf.mxu1  ;;  %v9457_v43 = vmul.f32 %v15738_v10, %v8927_v36  ;;  %v15935_v16 = vpop.xlane.xlu1 %10345  ;;  %v9458_v36 = vmul.f32 %v15738_v10, %v8928_v1 }
 0x901   : > { %17312 = vst [vmem:[#allocation10_spill] sm:$0xff] %v15935_v16 }
 0x902   : > { %v15915_v7 = vpop.f32.mrf.mxu1 }
 0x903   : > { %9863 = vadd.xlane.f32.xlu1 %v9788_v4  ;;  %v15937_v4 = vpop.xlane.xlu0 %10348 }
 0x904   : > { %9199 = vadd.xlane.f32.xlu0 %v9123_v30  ;;  %v8670_v42 = vpop.f32.mrf.mxu1  ;;  %17313 = vst [vmem:[#allocation11_spill] sm:$0xff] %v15937_v4  ;;  %v15944_v12 = vpop.xlane.xlu1 %10351 }
 0x905   : > { %v8929_v42 = vmax.f32 %v8865_v22, 0.0  ;;  %17314 = vst [vmem:[#allocation12_spill] sm:$0xff] %v15944_v12 }
 0x906   : > { %v15924_v63 = vpop.f32.mrf.mxu1 }
 0x907   : > { %9201 = vadd.xlane.f32.xlu1 %v9124_v18  ;;  %v8653_v18 = vadd.f32 %v15881_v27, %v8267_v57  ;;  %v15946_v40 = vpop.xlane.xlu0 %10354  ;;  %v9126_v27 = vmul.f32 %v15731_v47, %v8929_v42 }
 0x908   : > { %9532 = vadd.xlane.f32.xlu0 %v9456_v51  ;;  %v8673_v48 = vpop.f32.mrf.mxu1  ;;  %v8270_v51 = vpop.f32.mrf.mxu0  ;;  %17315 = vst [vmem:[#allocation13_spill] sm:$0xff] %v15946_v40 }
 0x909   : > { %v8656_v22 = vadd.f32 %v15889_v56, %v8270_v51  ;;  %v9791_v56 = vmul.f32 %v15756_v50, %v8928_v1 }
 0x90a   : > { %v15933_v62 = vpop.f32.mrf.mxu1 }
 0x90b   : > { %9534 = vadd.xlane.f32.xlu1 %v9457_v43  ;;  %v15956_v35 = vpop.xlane.xlu0 %10360 }
 0x90c   : > { %9865 = vadd.xlane.f32.xlu0 %v9789_v19  ;;  %v8678_v30 = vpop.f32.mrf.mxu1  ;;  %v8866_v19 = vadd.f32 %v15717_v11, %v8653_v18  ;;  %17317 = vst [vmem:[#allocation15_spill] sm:$0xff] %v15956_v35  ;;  %v9459_v18 = vmul.f32 %v15738_v10, %v8929_v42  ;;  %v8661_v35 = vadd.f32 %v11399_v26, %v15898_v38 }
 0x90d   : > { %v15954_v30 = vpop.xlane.xlu1 %10357 }
 0x90e   : > { %v15942_v48 = vpop.f32.mrf.mxu1  ;;  %17316 = vst [vmem:[#allocation14_spill] sm:$0xff] %v15954_v30 }
 0x90f   : > { %9867 = vadd.xlane.f32.xlu1 %v9790_v24  ;;  %v15965_v12 = vpop.xlane.xlu0 %10366 }
 0x910   : > { %9203 = vadd.xlane.f32.xlu0 %v9125_v28  ;;  %v8681_v43 = vpop.f32.mrf.mxu1  ;;  %v8930_v28 = vmax.f32 %v8866_v19, 0.0  ;;  %17319 = vst [vmem:[#allocation17_spill] sm:$0xff] %v15965_v12  ;;  %v9792_v19 = vmul.f32 %v15756_v50, %v8929_v42 }
 0x911   : > { %v8867_v43 = vadd.f32 %v15717_v11, %v8656_v22  ;;  %v15963_v40 = vpop.xlane.xlu1 %10363 }
 0x912   : > { %v15952_v57 = vpop.f32.mrf.mxu1  ;;  %17318 = vst [vmem:[#allocation16_spill] sm:$0xff] %v15963_v40  ;;  %v9127_v22 = vmul.f32 %v15731_v47, %v8930_v28  ;;  %v9460_v26 = vmul.f32 %v15738_v10, %v8930_v28 }
 0x913   : > { %9205 = vadd.xlane.f32.xlu1 %v9126_v27  ;;  %v15974_v40 = vpop.xlane.xlu0 %10372 }
 0x914   : > { %9536 = vadd.xlane.f32.xlu0 %v9458_v36  ;;  %v8686_v24 = vpop.f32.mrf.mxu1  ;;  %v8931_v36 = vmax.f32 %v8867_v43, 0.0  ;;  %17321 = vst [vmem:[#allocation19_spill] sm:$0xff] %v15974_v40  ;;  %v8664_v43 = vadd.f32 %v11400_v41, %v15907_v17  ;;  %v9793_v17 = vmul.f32 %v15756_v50, %v8930_v28 }
 0x915   : > { %v11403_v24 = vpop.f32.mrf.mxu0  ;;  %v15972_v1 = vpop.xlane.xlu1 %10369 }
 0x916   : > { %v15961_v51 = vpop.f32.mrf.mxu1  ;;  %17320 = vst [vmem:[#allocation18_spill] sm:$0xff] %v15972_v1  ;;  %v9128_v38 = vmul.f32 %v15731_v47, %v8931_v36 }
 0x917   : > { %9538 = vadd.xlane.f32.xlu1 %v9459_v18  ;;  %v8283_v42 = vpop.f32.mrf.mxu0 }
 0x918   : > { %9869 = vadd.xlane.f32.xlu0 %v9791_v56  ;;  %v8689_v27 = vpop.f32.mrf.mxu1  ;;  %v8868_v56 = vadd.f32 %v15717_v11, %v8661_v35  ;;  %v9461_v35 = vmul.f32 %v15738_v10, %v8931_v36 }
 0x919   : > { %v15982_v12 = vpop.xlane.xlu1 %10375  ;;  %v11404_v41 = vpop.f32.mrf.mxu0 }
 0x91a   : > { %v15970_v30 = vpop.f32.mrf.mxu1  ;;  %17322 = vst [vmem:[#allocation20_spill] sm:$0xff] %v15982_v12  ;;  %v8932_v40 = vmax.f32 %v8868_v56, 0.0  ;;  %v9794_v56 = vmul.f32 %v15756_v50, %v8931_v36 }
 0x91b   : > { %9871 = vadd.xlane.f32.xlu1 %v9792_v19  ;;  %v15984_v19 = vpop.xlane.xlu0 %10378 }
 0x91c   : > { %9207 = vadd.xlane.f32.xlu0 %v9127_v22  ;;  %v8694_v18 = vpop.f32.mrf.mxu1  ;;  %17323 = vst [vmem:[#allocation21_spill] sm:$0xff] %v15984_v19  ;;  %v8286_v19 = vpop.f32.mrf.mxu0  ;;  %v9462_v36 = vmul.f32 %v15738_v10, %v8932_v40 }
 0x91d   : > { %v8869_v18 = vadd.f32 %v15717_v11, %v8664_v43  ;;  %v15991_v4 = vpop.xlane.xlu1 %10381  ;;  %v9129_v43 = vmul.f32 %v15731_v47, %v8932_v40 }
 0x91e   : > { %v15980_v27 = vpop.f32.mrf.mxu1  ;;  %17324 = vst [vmem:[#allocation22_spill] sm:$0xff] %v15991_v4 }
 0x91f   : > { %9209 = vadd.xlane.f32.xlu1 %v9128_v38  ;;  %v15993_v12 = vpop.xlane.xlu0 %10384 }
 0x920   : > { %9540 = vadd.xlane.f32.xlu0 %v9460_v26  ;;  %v8697_v22 = vpop.f32.mrf.mxu1  ;;  %17325 = vst [vmem:[#allocation23_spill] sm:$0xff] %v15993_v12  ;;  %v8933_v26 = vmax.f32 %v8869_v18, 0.0  ;;  %v8672_v18 = vadd.f32 %v15924_v63, %v8286_v19  ;;  %v9795_v63 = vmul.f32 %v15756_v50, %v8932_v40 }
 0x921   : > { %v8669_v22 = vadd.f32 %v15915_v7, %v8283_v42  ;;  %v16000_v28 = vpop.xlane.xlu1 %10387 }
 0x922   : > { %v15989_v1 = vpop.f32.mrf.mxu1  ;;  %17326 = vst [vmem:[#allocation24_spill] sm:$0xff] %v16000_v28  ;;  %v9130_v7 = vmul.f32 %v15731_v47, %v8933_v26 }
 0x923   : > { %9542 = vadd.xlane.f32.xlu1 %v9461_v35  ;;  %v16002_v4 = vpop.xlane.xlu0 %10390 }
 0x924   : > { %9873 = vadd.xlane.f32.xlu0 %v9793_v17  ;;  %v8702_v38 = vpop.f32.mrf.mxu1  ;;  %17327 = vst [vmem:[#allocation25_spill] sm:$0xff] %v16002_v4  ;;  %v8870_v17 = vadd.f32 %v15717_v11, %v8669_v22  ;;  %v9463_v22 = vmul.f32 %v15738_v10, %v8933_v26 }
 0x925   : > { %v16010_v38 = vpop.xlane.xlu1 %10393 }
 0x926   : > { %v15998_v16 = vpop.f32.mrf.mxu1  ;;  %17328 = vst [vmem:[#allocation26_spill] sm:$0xff] %v16010_v38 }
 0x927   : > { %9875 = vadd.xlane.f32.xlu1 %v9794_v56  ;;  %v16012_v28 = vpop.xlane.xlu0 %10396 }
 0x928   : > { %9211 = vadd.xlane.f32.xlu0 %v9129_v43  ;;  %v8705_v35 = vpop.f32.mrf.mxu1  ;;  %17329 = vst [vmem:[#allocation27_spill] sm:$0xff] %v16012_v28  ;;  %v8934_v43 = vmax.f32 %v8870_v17, 0.0  ;;  %v8677_v28 = vadd.f32 %v11403_v24, %v15933_v62  ;;  %v9796_v17 = vmul.f32 %v15756_v50, %v8933_v26 }
 0x929   : > { %v8871_v35 = vadd.f32 %v15717_v11, %v8672_v18  ;;  %v16019_v4 = vpop.xlane.xlu1 %10399 }
 0x92a   : > { %v16008_v42 = vpop.f32.mrf.mxu1  ;;  %17330 = vst [vmem:[#allocation28_spill] sm:$0xff] %v16019_v4  ;;  %v9131_v18 = vmul.f32 %v15731_v47, %v8934_v43  ;;  %v9464_v24 = vmul.f32 %v15738_v10, %v8934_v43 }
 0x92b   : > { %9213 = vadd.xlane.f32.xlu1 %v9130_v7  ;;  %v16021_v12 = vpop.xlane.xlu0 %10402 }
 0x92c   : > { %9544 = vadd.xlane.f32.xlu0 %v9462_v36  ;;  %v8710_v56 = vpop.f32.mrf.mxu1  ;;  %17331 = vst [vmem:[#allocation29_spill] sm:$0xff] %v16021_v12  ;;  %v8935_v36 = vmax.f32 %v8871_v35, 0.0  ;;  %v8680_v35 = vadd.f32 %v11404_v41, %v15942_v48  ;;  %v9797_v48 = vmul.f32 %v15756_v50, %v8934_v43 }
 0x92d   : > { %v16026_v56 = vpop.f32.mrf.mxu0  ;;  %v16030_v40 = vpop.xlane.xlu1 %10405 }
 0x92e   : > { %v16017_v19 = vpop.f32.mrf.mxu1  ;;  %17332 = vst [vmem:[#allocation30_spill] sm:$0xff] %v16030_v40  ;;  %v9132_v62 = vmul.f32 %v15731_v47, %v8935_v36 }
 0x92f   : > { %9546 = vadd.xlane.f32.xlu1 %v9463_v22  ;;  %v16032_v22 = vpop.xlane.xlu0 %10408  ;;  %v8299_v26 = vpop.f32.mrf.mxu0 }
 0x930   : > { %9877 = vadd.xlane.f32.xlu0 %v9795_v63  ;;  %v8713_v7 = vpop.f32.mrf.mxu1  ;;  %17333 = vst [vmem:[#allocation31_spill] sm:$0xff] %v16032_v22 }
 0x931   : > { %v8872_v7 = vadd.f32 %v15717_v11, %v8677_v28  ;;  %v16040_v4 = vpop.xlane.xlu1 %10411  ;;  %v9465_v28 = vmul.f32 %v15738_v10, %v8935_v36  ;;  %v11408_v41 = vpop.f32.mrf.mxu0 }
 0x932   : > { %v16028_v38 = vpop.f32.mrf.mxu1  ;;  %17334 = vst [vmem:[#allocation32_spill] sm:$0xff] %v16040_v4 }
 0x933   : > { %9879 = vadd.xlane.f32.xlu1 %v9796_v17  ;;  %v16042_v17 = vpop.xlane.xlu0 %10414  ;;  %v8936_v22 = vmax.f32 %v8872_v7, 0.0  ;;  %v8685_v7 = vadd.f32 %v15952_v57, %v8299_v26 }
 0x934   : > { %9215 = vadd.xlane.f32.xlu0 %v9131_v18  ;;  %v8718_v63 = vpop.f32.mrf.mxu1  ;;  %17335 = vst [vmem:[#allocation33_spill] sm:$0xff] %v16042_v17  ;;  %v8302_v17 = vpop.f32.mrf.mxu0 }
 0x935   : > { %v8873_v63 = vadd.f32 %v15717_v11, %v8680_v35  ;;  %v16049_v2 = vpop.xlane.xlu1 %10417  ;;  %v9798_v35 = vmul.f32 %v15756_v50, %v8935_v36  ;;  %v9466_v36 = vmul.f32 %v15738_v10, %v8936_v22 }
 0x936   : > { %v16038_v12 = vpop.f32.mrf.mxu1  ;;  %17336 = vst [vmem:[#allocation34_spill] sm:$0xff] %v16049_v2  ;;  %v16093_v2 = vpop.f32.mrf.mxu0 }
 0x937   : > { %9217 = vadd.xlane.f32.xlu1 %v9132_v62  ;;  %v16051_v4 = vpop.xlane.xlu0 %10420 }
 0x938   : > { %9548 = vadd.xlane.f32.xlu0 %v9464_v24  ;;  %v8721_v18 = vpop.f32.mrf.mxu1  ;;  %17337 = vst [vmem:[#allocation35_spill] sm:$0xff] %v16051_v4  ;;  %v8937_v24 = vmax.f32 %v8873_v63, 0.0  ;;  %v8688_v63 = vadd.f32 %v15961_v51, %v8302_v17  ;;  %v9799_v17 = vmul.f32 %v15756_v50, %v8936_v22 }
 0x939   : > { %v9133_v18 = vmul.f32 %v15731_v47, %v8936_v22  ;;  %v16058_v55 = vpop.xlane.xlu1 %10423  ;;  %v8693_v22 = vadd.f32 %v16026_v56, %v15970_v30 }
 0x93a   : > { %v16047_v40 = vpop.f32.mrf.mxu1  ;;  %17338 = vst [vmem:[#allocation36_spill] sm:$0xff] %v16058_v55  ;;  %v9134_v57 = vmul.f32 %v15731_v47, %v8937_v24  ;;  %v16072_v55 = vld [vmem:[%s17302_s12] ss:$0 sm:$0xff] }
 0x93b   : > { %9550 = vadd.xlane.f32.xlu1 %v9465_v28  ;;  %v16060_v28 = vpop.xlane.xlu0 %10426 }
 0x93c   : > { %9881 = vadd.xlane.f32.xlu0 %v9797_v48  ;;  %v8726_v62 = vpop.f32.mrf.mxu1  ;;  %17339 = vst [vmem:[#allocation37_spill] sm:$0xff] %v16060_v28 }
 0x93d   : > { %v8874_v62 = vadd.f32 %v15717_v11, %v8685_v7 }
 0x93e   : > { %v16056_v43 = vpop.f32.mrf.mxu1 }
 0x93f   : > { %9883 = vadd.xlane.f32.xlu1 %v9798_v35  ;;  %v16074_v35 = vpop.xlane.xlu1 %10429  ;;  %v8938_v7 = vmax.f32 %v8874_v62, 0.0 }
 0x940   : > { %9219 = vadd.xlane.f32.xlu0 %v9133_v18  ;;  %v8729_v48 = vpop.f32.mrf.mxu1  ;;  %17340 = vst [vmem:[#allocation38_spill] sm:$0xff] %v16074_v35  ;;  %v9467_v35 = vmul.f32 %v15738_v10, %v8937_v24 }
 0x941   : > { %v8875_v48 = vadd.f32 %v15717_v11, %v8688_v63  ;;  %v9800_v63 = vmul.f32 %v15756_v50, %v8937_v24  ;;  %v8876_v24 = vadd.f32 %v15717_v11, %v8693_v22  ;;  %v9801_v22 = vmul.f32 %v15756_v50, %v8938_v7 }
 0x942   : > { %v16067_v26 = vpop.f32.mrf.mxu1 }
 0x943   : > { %9221 = vadd.xlane.f32.xlu1 %v9134_v57  ;;  %v8939_v4 = vmax.f32 %v8875_v48, 0.0 }
 0x944   : > { %9552 = vadd.xlane.f32.xlu0 %v9466_v36  ;;  %v8734_v18 = vpop.f32.mrf.mxu1  ;;  %v9176_v51 = vpop.xlane.xlu0 %9175 }
 0x945   : > { %v9310_v28 = vadd.f32 %v16072_v55, %v9176_v51  ;;  %v9135_v51 = vmul.f32 %v15731_v47, %v8938_v7 }
 0x946   : > { %v16085_v57 = vpop.f32.mrf.mxu1 }
 0x947   : > { %9375 = vst.msk [vmem:[%s16079_s21] sm:$0xff] %vm9374_vm2, %v9310_v28  ;;  %9554 = vadd.xlane.f32.xlu1 %v9467_v35  ;;  %v16101_v35 = vld [vmem:[%s17302_s12] ss:$0 sm:$0xff] }
 0x948   : > { %9885 = vadd.xlane.f32.xlu0 %v9799_v17  ;;  %v8737_v36 = vpop.f32.mrf.mxu1  ;;  %v9511_v18 = vpop.xlane.xlu1 %9510  ;;  %v8696_v17 = vadd.f32 %v11408_v41, %v15980_v27 }
 0x949   : > { %v9509_v62 = vpop.xlane.xlu0 %9508  ;;  %v9136_v36 = vmul.f32 %v15731_v47, %v8939_v4 }
 0x94a   : > { %v9643_v13 = vadd.f32 %v16072_v55, %v9509_v62  ;;  %v16096_v28 = vpop.f32.mrf.mxu1  ;;  %v9468_v62 = vmul.f32 %v15738_v10, %v8938_v7  ;;  %v8877_v39 = vadd.f32 %v15717_v11, %v8696_v17  ;;  %v9644_v7 = vadd.f32 %v16072_v55, %v9511_v18 }
 0x94b   : > { %9887 = vadd.xlane.f32.xlu1 %v9800_v63  ;;  %v8315_v63 = vpop.f32.mrf.mxu0  ;;  %v10445_v11 = vadd.f32 %v16101_v35, %v15778_v6 }
 0x94c   : > { %9223 = vadd.xlane.f32.xlu0 %v9135_v51  ;;  %9708 = vst.msk [vmem:[%s16079_s21] sm:$0xff] %vm9707_vm3, %v9643_v13  ;;  %v8742_v30 = vpop.f32.mrf.mxu1  ;;  %v9844_v56 = vpop.xlane.xlu1 %9843  ;;  %v10444_v13 = vadd.f32 %v16101_v35, %v15773_v53  ;;  %v9469_v53 = vmul.f32 %v15738_v10, %v8939_v4  ;;  %v8941_v18 = vmax.f32 %v8877_v39, 0.0 }
 0x94d   : > { %v9842_v48 = vpop.xlane.xlu0 %9841  ;;  %v8940_v30 = vmax.f32 %v8876_v24, 0.0  ;;  %v9977_v24 = vadd.f32 %v16072_v55, %v9844_v56 }
 0x94e   : > { %v9976_v51 = vadd.f32 %v16072_v55, %v9842_v48  ;;  %v16110_v5 = vpop.f32.mrf.mxu1 }
 0x94f   : > { %9225 = vadd.xlane.f32.xlu1 %v9136_v36  ;;  %v16122_v36 = vpop.f32.mrf.mxu0  ;;  %v9137_v6 = vmul.f32 %v15731_v47, %v8940_v30 }
 0x950   : > { %9556 = vadd.xlane.f32.xlu0 %v9468_v62  ;;  %10041 = vst.msk [vmem:[%s16079_s21] sm:$0xff] %vm10040_vm4, %v9976_v51  ;;  %v8745_v27 = vpop.f32.mrf.mxu1  ;;  %v9180_v41 = vpop.xlane.xlu1 %9179 }
 0x951   : > { %10509 = vst.msk [vmem:[%s16079_s21] sm:$0xff] %vm10508_vm5, %v10444_v13  ;;  %v9312_v48 = vadd.f32 %v16072_v55, %v9180_v41  ;;  %v9178_v14 = vpop.xlane.xlu0 %9177  ;;  %v9802_v13 = vmul.f32 %v15756_v50, %v8939_v4  ;;  %v8701_v27 = vadd.f32 %v15989_v1, %v8315_v63  ;;  %v9470_v1 = vmul.f32 %v15738_v10, %v8940_v30  ;;  %v16156_v63 = vld [vmem:[%s17299_s9] ss:$0 sm:$0xff] }
 0x952   : > { %v9311_v62 = vadd.f32 %v16072_v55, %v9178_v14  ;;  %v16125_v51 = vpop.f32.mrf.mxu1  ;;  %v10446_v10 = vadd.f32 %v16101_v35, %v15782_v23 }
 0x953   : > { %9377 = vst.msk [vmem:[%s16079_s21 + $0x10] sm:$0xff] %vm9374_vm2, %v9312_v48  ;;  %9558 = vadd.xlane.f32.xlu1 %v9469_v53  ;;  %v8318_v48 = vpop.f32.mrf.mxu0 }
 0x954   : > { %9889 = vadd.xlane.f32.xlu0 %v9801_v22  ;;  %9376 = vst.msk [vmem:[%s16079_s21 + $0x8] sm:$0xff] %vm9374_vm2, %v9311_v62  ;;  %v8750_v17 = vpop.f32.mrf.mxu1  ;;  %v9182_v14 = vpop.xlane.xlu1 %9181  ;;  %v8878_v62 = vadd.f32 %v16156_v63, %v8701_v27 }
 0x955   : > { %9709 = vst.msk [vmem:[%s16079_s21 + $0x8] sm:$0xff] %vm9707_vm3, %v9644_v7  ;;  %v9313_v41 = vadd.f32 %v16072_v55, %v9182_v14  ;;  %v9513_v22 = vpop.xlane.xlu0 %9512  ;;  %v8704_v7 = vadd.f32 %v15998_v16, %v8318_v48  ;;  %v9138_v17 = vmul.f32 %v15731_v47, %v8941_v18  ;;  %v9803_v47 = vmul.f32 %v15756_v50, %v8940_v30  ;;  %v16179_v48 = vld [vmem:[%s17300_s10 + $0x1] ss:$0 sm:$0xff] }
 0x956   : > { %10042 = vst.msk [vmem:[%s16079_s21 + $0x8] sm:$0xff] %vm10040_vm4, %v9977_v24  ;;  %v9645_v56 = vadd.f32 %v16072_v55, %v9513_v22  ;;  %v16144_v53 = vpop.f32.mrf.mxu1 }
 0x957   : > { %10510 = vst.msk [vmem:[%s16079_s21 + $0x8] sm:$0xff] %vm10508_vm5, %v10445_v11  ;;  %9891 = vadd.xlane.f32.xlu1 %v9802_v13  ;;  %v8879_v22 = vadd.f32 %v16156_v63, %v8704_v7  ;;  %v9804_v7 = vmul.f32 %v15756_v50, %v8941_v18 }
 0x958   : > { %9378 = vst.msk [vmem:[%s16079_s21 + $0x18] sm:$0xff] %vm9374_vm2, %v9313_v41  ;;  %9227 = vadd.xlane.f32.xlu0 %v9137_v6  ;;  %v8753_v39 = vpop.f32.mrf.mxu1  ;;  %v9515_v4 = vpop.xlane.xlu1 %9514  ;;  %v8942_v41 = vmax.f32 %v8878_v62, 0.0 }
 0x959   : > { %9710 = vst.msk [vmem:[%s16079_s21 + $0x10] sm:$0xff] %vm9707_vm3, %v9645_v56  ;;  %v9646_v11 = vadd.f32 %v16072_v55, %v9515_v4  ;;  %v9846_v24 = vpop.xlane.xlu0 %9845  ;;  %v9471_v56 = vmul.f32 %v16179_v48, %v8941_v18  ;;  %v10447_v39 = vadd.f32 %v16101_v35, %v15793_v21  ;;  %v8709_v21 = vadd.f32 %v16093_v2, %v16008_v42 }
 0x95a   : > { %v9978_v14 = vadd.f32 %v16072_v55, %v9846_v24  ;;  %v16163_v13 = vpop.f32.mrf.mxu1  ;;  %v9472_v42 = vmul.f32 %v16179_v48, %v8942_v41 }
 0x95b   : > { %9711 = vst.msk [vmem:[%s16079_s21 + $0x18] sm:$0xff] %vm9707_vm3, %v9646_v11  ;;  %9229 = vadd.xlane.f32.xlu1 %v9138_v17  ;;  %v8943_v11 = vmax.f32 %v8879_v22, 0.0  ;;  %v8880_v18 = vadd.f32 %v16156_v63, %v8709_v21  ;;  %v8712_v22 = vadd.f32 %v16122_v36, %v16017_v19 }
 0x95c   : > { %9560 = vadd.xlane.f32.xlu0 %v9470_v1  ;;  %10043 = vst.msk [vmem:[%s16079_s21 + $0x10] sm:$0xff] %vm10040_vm4, %v9978_v14  ;;  %v8758_v16 = vpop.f32.mrf.mxu1  ;;  %v9848_v27 = vpop.xlane.xlu1 %9847  ;;  %v16200_v14 = vld [vmem:[%s17300_s10] ss:$0 sm:$0xff] }
 0x95d   : > { %10511 = vst.msk [vmem:[%s16079_s21 + $0x10] sm:$0xff] %vm10508_vm5, %v10446_v10  ;;  %v9979_v23 = vadd.f32 %v16072_v55, %v9848_v27  ;;  %v9184_v6 = vpop.xlane.xlu0 %9183  ;;  %v9139_v10 = vmul.f32 %v16200_v14, %v8942_v41  ;;  %v16203_v16 = vpop.f32.mrf.mxu0 }
 0x95e   : > { %v9314_v30 = vadd.f32 %v16072_v55, %v9184_v6  ;;  %v16185_v4 = vpop.f32.mrf.mxu1 }
 0x95f   : > { %10044 = vst.msk [vmem:[%s16079_s21 + $0x18] sm:$0xff] %vm10040_vm4, %v9979_v23  ;;  %9562 = vadd.xlane.f32.xlu1 %v9471_v56  ;;  %v9140_v56 = vmul.f32 %v16200_v14, %v8943_v11 }
 0x960   : > { %9893 = vadd.xlane.f32.xlu0 %v9803_v47  ;;  %10512 = vst.msk [vmem:[%s16079_s21 + $0x18] sm:$0xff] %vm10508_vm5, %v10447_v39  ;;  %v8761_v1 = vpop.f32.mrf.mxu1  ;;  %v9186_v62 = vpop.xlane.xlu1 %9185 }
 0x961   : > { %9379 = vst.msk [vmem:[%s16079_s21 + $0x20] sm:$0xff] %vm9374_vm2, %v9314_v30  ;;  %v9315_v24 = vadd.f32 %v16072_v55, %v9186_v62  ;;  %v9517_v17 = vpop.xlane.xlu0 %9516  ;;  %v8331_v39 = vpop.f32.mrf.mxu0  ;;  %v10448_v62 = vadd.f32 %v16101_v35, %v15795_v15  ;;  %v8881_v15 = vadd.f32 %v16156_v63, %v8712_v22 }
 0x962   : > { %v9647_v27 = vadd.f32 %v16072_v55, %v9517_v17  ;;  %v16206_v47 = vpop.f32.mrf.mxu1 }
 0x963   : > { %9380 = vst.msk [vmem:[%s16079_s21 + $0x28] sm:$0xff] %vm9374_vm2, %v9315_v24  ;;  %9895 = vadd.xlane.f32.xlu1 %v9804_v7  ;;  %v16230_v7 = vld [vmem:[%s17300_s10 + $0x2] ss:$0 sm:$0xff]  ;;  %v8944_v24 = vmax.f32 %v8880_v18, 0.0  ;;  %v8945_v22 = vmax.f32 %v8881_v15, 0.0 }
 0x964   : > { %9231 = vadd.xlane.f32.xlu0 %v9139_v10  ;;  %9712 = vst.msk [vmem:[%s16079_s21 + $0x20] sm:$0xff] %vm9707_vm3, %v9647_v27  ;;  %v8766_v50 = vpop.f32.mrf.mxu1  ;;  %v9519_v2 = vpop.xlane.xlu1 %9518  ;;  %v9805_v21 = vmul.f32 %v16230_v7, %v8942_v41  ;;  %v9473_v27 = vmul.f32 %v16179_v48, %v8943_v11 }
 0x965   : > { %v9648_v23 = vadd.f32 %v16072_v55, %v9519_v2  ;;  %v9850_v6 = vpop.xlane.xlu0 %9849  ;;  %v10449_v50 = vadd.f32 %v16101_v35, %v15802_v45  ;;  %v16240_v2 = vpop.f32.mrf.mxu0  ;;  %v9806_v45 = vmul.f32 %v16230_v7, %v8943_v11 }
 0x966   : > { %v9980_v30 = vadd.f32 %v16072_v55, %v9850_v6  ;;  %v16219_v1 = vpop.f32.mrf.mxu1  ;;  %v8717_v6 = vadd.f32 %v16028_v38, %v8331_v39  ;;  %v9474_v39 = vmul.f32 %v16179_v48, %v8944_v24 }
 0x967   : > { %9713 = vst.msk [vmem:[%s16079_s21 + $0x28] sm:$0xff] %vm9707_vm3, %v9648_v23  ;;  %9233 = vadd.xlane.f32.xlu1 %v9140_v56 }
 0x968   : > { %9564 = vadd.xlane.f32.xlu0 %v9472_v42  ;;  %10045 = vst.msk [vmem:[%s16079_s21 + $0x20] sm:$0xff] %vm10040_vm4, %v9980_v30  ;;  %v8769_v19 = vpop.f32.mrf.mxu1  ;;  %v9852_v36 = vpop.xlane.xlu1 %9851  ;;  %v8882_v15 = vadd.f32 %v16156_v63, %v8717_v6  ;;  %v9807_v6 = vmul.f32 %v16230_v7, %v8944_v24 }
 0x969   : > { %10513 = vst.msk [vmem:[%s16079_s21 + $0x20] sm:$0xff] %vm10508_vm5, %v10448_v62  ;;  %v9981_v17 = vadd.f32 %v16072_v55, %v9852_v36  ;;  %v9188_v10 = vpop.xlane.xlu0 %9187  ;;  %v9141_v62 = vmul.f32 %v16200_v14, %v8944_v24  ;;  %v8334_v19 = vpop.f32.mrf.mxu0 }
 0x96a   : > { %v9316_v42 = vadd.f32 %v16072_v55, %v9188_v10  ;;  %v16243_v23 = vpop.f32.mrf.mxu1 }
 0x96b   : > { %10046 = vst.msk [vmem:[%s16079_s21 + $0x28] sm:$0xff] %vm10040_vm4, %v9981_v17  ;;  %9566 = vadd.xlane.f32.xlu1 %v9473_v27  ;;  %v8720_v17 = vadd.f32 %v16038_v12, %v8334_v19  ;;  %v9475_v19 = vmul.f32 %v16179_v48, %v8945_v22 }
 0x96c   : > { %9897 = vadd.xlane.f32.xlu0 %v9805_v21  ;;  %10514 = vst.msk [vmem:[%s16079_s21 + $0x28] sm:$0xff] %vm10508_vm5, %v10449_v50  ;;  %v8774_v41 = vpop.f32.mrf.mxu1  ;;  %v9190_v18 = vpop.xlane.xlu1 %9189  ;;  %v9142_v50 = vmul.f32 %v16200_v14, %v8945_v22 }
 0x96d   : > { %9381 = vst.msk [vmem:[%s16079_s21 + $0x30] sm:$0xff] %vm9374_vm2, %v9316_v42  ;;  %v9317_v56 = vadd.f32 %v16072_v55, %v9190_v18  ;;  %v9521_v30 = vpop.xlane.xlu0 %9520  ;;  %v10450_v18 = vadd.f32 %v16101_v35, %v15806_v58 }
 0x96e   : > { %v9649_v36 = vadd.f32 %v16072_v55, %v9521_v30  ;;  %v16256_v21 = vpop.f32.mrf.mxu1  ;;  %v8883_v30 = vadd.f32 %v16156_v63, %v8720_v17 }
 0x96f   : > { %9382 = vst.msk [vmem:[%s16079_s21 + $0x38] sm:$0xff] %vm9374_vm2, %v9317_v56  ;;  %9899 = vadd.xlane.f32.xlu1 %v9806_v45  ;;  %v8946_v56 = vmax.f32 %v8882_v15, 0.0  ;;  %v9808_v15 = vmul.f32 %v16230_v7, %v8945_v22 }
 0x970   : > { %9235 = vadd.xlane.f32.xlu0 %v9141_v62  ;;  %9714 = vst.msk [vmem:[%s16079_s21 + $0x30] sm:$0xff] %vm9707_vm3, %v9649_v36  ;;  %v8777_v11 = vpop.f32.mrf.mxu1  ;;  %v9523_v38 = vpop.xlane.xlu1 %9522  ;;  %v10451_v36 = vadd.f32 %v16101_v35, %v15818_v31  ;;  %v8947_v17 = vmax.f32 %v8883_v30, 0.0  ;;  %v8725_v31 = vadd.f32 %v16203_v16, %v16047_v40 }
 0x971   : > { %v9650_v10 = vadd.f32 %v16072_v55, %v9523_v38  ;;  %v9854_v27 = vpop.xlane.xlu0 %9853  ;;  %v9476_v22 = vmul.f32 %v16179_v48, %v8946_v56 }
 0x972   : > { %v9982_v42 = vadd.f32 %v16072_v55, %v9854_v27  ;;  %v16268_v41 = vpop.f32.mrf.mxu1 }
 0x973   : > { %9715 = vst.msk [vmem:[%s16079_s21 + $0x38] sm:$0xff] %vm9707_vm3, %v9650_v10  ;;  %9237 = vadd.xlane.f32.xlu1 %v9142_v50  ;;  %v9143_v50 = vmul.f32 %v16200_v14, %v8946_v56 }
 0x974   : > { %9568 = vadd.xlane.f32.xlu0 %v9474_v39  ;;  %10047 = vst.msk [vmem:[%s16079_s21 + $0x30] sm:$0xff] %vm10040_vm4, %v9982_v42  ;;  %v8782_v12 = vpop.f32.mrf.mxu1  ;;  %v9856_v45 = vpop.xlane.xlu1 %9855 }
 0x975   : > { %10515 = vst.msk [vmem:[%s16079_s21 + $0x30] sm:$0xff] %vm10508_vm5, %v10450_v18  ;;  %v9983_v58 = vadd.f32 %v16072_v55, %v9856_v45  ;;  %v9192_v62 = vpop.xlane.xlu0 %9191  ;;  %v16298_v42 = vpop.f32.mrf.mxu0  ;;  %v8884_v45 = vadd.f32 %v16156_v63, %v8725_v31 }
 0x976   : > { %v9318_v11 = vadd.f32 %v16072_v55, %v9192_v62  ;;  %v16285_v38 = vpop.f32.mrf.mxu1  ;;  %v9144_v62 = vmul.f32 %v16200_v14, %v8947_v17 }
 0x977   : > { %10048 = vst.msk [vmem:[%s16079_s21 + $0x38] sm:$0xff] %vm10040_vm4, %v9983_v58  ;;  %9570 = vadd.xlane.f32.xlu1 %v9475_v19  ;;  %v8347_v19 = vpop.f32.mrf.mxu0 }
 0x978   : > { %9901 = vadd.xlane.f32.xlu0 %v9807_v6  ;;  %10516 = vst.msk [vmem:[%s16079_s21 + $0x38] sm:$0xff] %vm10508_vm5, %v10451_v36  ;;  %v8785_v24 = vpop.f32.mrf.mxu1  ;;  %v9194_v39 = vpop.xlane.xlu1 %9193  ;;  %v8728_v6 = vadd.f32 %v16240_v2, %v16056_v43 }
 0x979   : > { %9383 = vst.msk [vmem:[%s16079_s21 + $0x40] sm:$0xff] %vm9374_vm2, %v9318_v11  ;;  %v9319_v10 = vadd.f32 %v16072_v55, %v9194_v39  ;;  %v9525_v27 = vpop.xlane.xlu0 %9524  ;;  %v10452_v24 = vadd.f32 %v16101_v35, %v15820_v49  ;;  %v9809_v39 = vmul.f32 %v16230_v7, %v8946_v56 }
 0x97a   : > { %v9651_v18 = vadd.f32 %v16072_v55, %v9525_v27  ;;  %v16301_v12 = vpop.f32.mrf.mxu1  ;;  %v8885_v31 = vadd.f32 %v16156_v63, %v8728_v6  ;;  %v9477_v27 = vmul.f32 %v16179_v48, %v8947_v17  ;;  %v8733_v6 = vadd.f32 %v16067_v26, %v8347_v19 }
 0x97b   : > { %9384 = vst.msk [vmem:[%s16079_s21 + $0x48] sm:$0xff] %vm9374_vm2, %v9319_v10  ;;  %9903 = vadd.xlane.f32.xlu1 %v9808_v15  ;;  %v8948_v15 = vmax.f32 %v8884_v45, 0.0 }
 0x97c   : > { %9239 = vadd.xlane.f32.xlu0 %v9143_v50  ;;  %9716 = vst.msk [vmem:[%s16079_s21 + $0x40] sm:$0xff] %vm9707_vm3, %v9651_v18  ;;  %v8790_v40 = vpop.f32.mrf.mxu1  ;;  %v9527_v16 = vpop.xlane.xlu1 %9526  ;;  %v10453_v50 = vadd.f32 %v16101_v35, %v15827_v33  ;;  %v9810_v33 = vmul.f32 %v16230_v7, %v8947_v17  ;;  %v8949_v45 = vmax.f32 %v8885_v31, 0.0 }
 0x97d   : > { %v9652_v30 = vadd.f32 %v16072_v55, %v9527_v16  ;;  %v9858_v58 = vpop.xlane.xlu0 %9857  ;;  %v16330_v18 = vpop.f32.mrf.mxu0  ;;  %v9478_v19 = vmul.f32 %v16179_v48, %v8948_v15 }
 0x97e   : > { %v9984_v36 = vadd.f32 %v16072_v55, %v9858_v58  ;;  %v16314_v11 = vpop.f32.mrf.mxu1 }
 0x97f   : > { %9717 = vst.msk [vmem:[%s16079_s21 + $0x48] sm:$0xff] %vm9707_vm3, %v9652_v30  ;;  %9241 = vadd.xlane.f32.xlu1 %v9144_v62  ;;  %v9145_v62 = vmul.f32 %v16200_v14, %v8948_v15 }
 0x980   : > { %9572 = vadd.xlane.f32.xlu0 %v9476_v22  ;;  %10049 = vst.msk [vmem:[%s16079_s21 + $0x40] sm:$0xff] %vm10040_vm4, %v9984_v36  ;;  %v8793_v43 = vpop.f32.mrf.mxu1  ;;  %v9860_v2 = vpop.xlane.xlu1 %9859 }
 0x981   : > { %10517 = vst.msk [vmem:[%s16079_s21 + $0x40] sm:$0xff] %vm10508_vm5, %v10452_v24  ;;  %v9985_v49 = vadd.f32 %v16072_v55, %v9860_v2  ;;  %v9196_v10 = vpop.xlane.xlu0 %9195  ;;  %v8350_v36 = vpop.f32.mrf.mxu0  ;;  %v8886_v2 = vadd.f32 %v16156_v63, %v8733_v6 }
 0x982   : > { %v9320_v40 = vadd.f32 %v16072_v55, %v9196_v10  ;;  %v16333_v16 = vpop.f32.mrf.mxu1  ;;  %v9146_v10 = vmul.f32 %v16200_v14, %v8949_v45 }
 0x983   : > { %10050 = vst.msk [vmem:[%s16079_s21 + $0x48] sm:$0xff] %vm10040_vm4, %v9985_v49  ;;  %9574 = vadd.xlane.f32.xlu1 %v9477_v27 }
 0x984   : > { %9905 = vadd.xlane.f32.xlu0 %v9809_v39  ;;  %10518 = vst.msk [vmem:[%s16079_s21 + $0x48] sm:$0xff] %vm10508_vm5, %v10453_v50  ;;  %v8798_v56 = vpop.f32.mrf.mxu1  ;;  %v9198_v22 = vpop.xlane.xlu1 %9197  ;;  %v8736_v39 = vadd.f32 %v16085_v57, %v8350_v36 }
 0x985   : > { %9385 = vst.msk [vmem:[%s16079_s21 + $0x50] sm:$0xff] %vm9374_vm2, %v9320_v40  ;;  %v9321_v30 = vadd.f32 %v16072_v55, %v9198_v22  ;;  %v9529_v58 = vpop.xlane.xlu0 %9528  ;;  %v10454_v40 = vadd.f32 %v16101_v35, %v15831_v59  ;;  %v9811_v22 = vmul.f32 %v16230_v7, %v8948_v15 }
 0x986   : > { %v9653_v24 = vadd.f32 %v16072_v55, %v9529_v58  ;;  %v16346_v43 = vpop.f32.mrf.mxu1  ;;  %v8887_v6 = vadd.f32 %v16156_v63, %v8736_v39  ;;  %v9479_v58 = vmul.f32 %v16179_v48, %v8949_v45 }
 0x987   : > { %9386 = vst.msk [vmem:[%s16079_s21 + $0x58] sm:$0xff] %vm9374_vm2, %v9321_v30  ;;  %9907 = vadd.xlane.f32.xlu1 %v9810_v33  ;;  %v8950_v33 = vmax.f32 %v8886_v2, 0.0 }
 0x988   : > { %9243 = vadd.xlane.f32.xlu0 %v9145_v62  ;;  %9718 = vst.msk [vmem:[%s16079_s21 + $0x50] sm:$0xff] %vm9707_vm3, %v9653_v24  ;;  %v8801_v17 = vpop.f32.mrf.mxu1  ;;  %v9531_v26 = vpop.xlane.xlu1 %9530  ;;  %v10455_v62 = vadd.f32 %v16101_v35, %v15841_v54  ;;  %v8741_v54 = vadd.f32 %v16298_v42, %v16096_v28 }
 0x989   : > { %v9654_v31 = vadd.f32 %v16072_v55, %v9531_v26  ;;  %v9862_v49 = vpop.xlane.xlu0 %9861  ;;  %v9812_v26 = vmul.f32 %v16230_v7, %v8949_v45  ;;  %v9480_v45 = vmul.f32 %v16179_v48, %v8950_v33 }
 0x98a   : > { %v9986_v27 = vadd.f32 %v16072_v55, %v9862_v49  ;;  %v16358_v50 = vpop.f32.mrf.mxu1  ;;  %v16388_v49 = vpop.f32.mrf.mxu0 }
 0x98b   : > { %9719 = vst.msk [vmem:[%s16079_s21 + $0x58] sm:$0xff] %vm9707_vm3, %v9654_v31  ;;  %9245 = vadd.xlane.f32.xlu1 %v9146_v10  ;;  %v9147_v31 = vmul.f32 %v16200_v14, %v8950_v33 }
 0x98c   : > { %9576 = vadd.xlane.f32.xlu0 %v9478_v19  ;;  %10051 = vst.msk [vmem:[%s16079_s21 + $0x50] sm:$0xff] %vm10040_vm4, %v9986_v27  ;;  %v8806_v57 = vpop.f32.mrf.mxu1  ;;  %v9864_v56 = vpop.xlane.xlu1 %9863  ;;  %v8951_v19 = vmax.f32 %v8887_v6, 0.0 }
 0x98d   : > { %10519 = vst.msk [vmem:[%s16079_s21 + $0x50] sm:$0xff] %vm10508_vm5, %v10454_v40  ;;  %v9987_v59 = vadd.f32 %v16072_v55, %v9864_v56  ;;  %v9200_v30 = vpop.xlane.xlu0 %9199  ;;  %v8888_v40 = vadd.f32 %v16156_v63, %v8741_v54  ;;  %v8744_v57 = vadd.f32 %v16330_v18, %v16110_v5 }
 0x98e   : > { %v9322_v36 = vadd.f32 %v16072_v55, %v9200_v30  ;;  %v16375_v24 = vpop.f32.mrf.mxu1  ;;  %v9148_v6 = vmul.f32 %v16200_v14, %v8951_v19  ;;  %v9481_v54 = vmul.f32 %v16179_v48, %v8951_v19 }
 0x98f   : > { %10052 = vst.msk [vmem:[%s16079_s21 + $0x58] sm:$0xff] %vm10040_vm4, %v9987_v59  ;;  %9578 = vadd.xlane.f32.xlu1 %v9479_v58  ;;  %v8363_v59 = vpop.f32.mrf.mxu0 }
 0x990   : > { %9909 = vadd.xlane.f32.xlu0 %v9811_v22  ;;  %10520 = vst.msk [vmem:[%s16079_s21 + $0x58] sm:$0xff] %vm10508_vm5, %v10455_v62  ;;  %v8809_v15 = vpop.f32.mrf.mxu1  ;;  %v9202_v17 = vpop.xlane.xlu1 %9201  ;;  %v10456_v62 = vadd.f32 %v16101_v35, %v15843_v29 }
 0x991   : > { %9387 = vst.msk [vmem:[%s16079_s21 + $0x60] sm:$0xff] %vm9374_vm2, %v9322_v36  ;;  %v9323_v2 = vadd.f32 %v16072_v55, %v9202_v17  ;;  %v9533_v39 = vpop.xlane.xlu0 %9532  ;;  %v9813_v36 = vmul.f32 %v16230_v7, %v8950_v33  ;;  %v8952_v15 = vmax.f32 %v8888_v40, 0.0  ;;  %v8889_v17 = vadd.f32 %v16156_v63, %v8744_v57 }
 0x992   : > { %v9655_v10 = vadd.f32 %v16072_v55, %v9533_v39  ;;  %v16391_v27 = vpop.f32.mrf.mxu1  ;;  %v16420_v39 = vpop.f32.mrf.mxu0 }
 0x993   : > { %9388 = vst.msk [vmem:[%s16079_s21 + $0x68] sm:$0xff] %vm9374_vm2, %v9323_v2  ;;  %9911 = vadd.xlane.f32.xlu1 %v9812_v26  ;;  %v10457_v2 = vadd.f32 %v16101_v35, %v15848_v25  ;;  %v9814_v25 = vmul.f32 %v16230_v7, %v8951_v19 }
 0x994   : > { %9247 = vadd.xlane.f32.xlu0 %v9147_v31  ;;  %9720 = vst.msk [vmem:[%s16079_s21 + $0x60] sm:$0xff] %vm9707_vm3, %v9655_v10  ;;  %v8814_v28 = vpop.f32.mrf.mxu1  ;;  %v9535_v42 = vpop.xlane.xlu1 %9534 }
 0x995   : > { %v9656_v56 = vadd.f32 %v16072_v55, %v9535_v42  ;;  %v9866_v22 = vpop.xlane.xlu0 %9865  ;;  %v8953_v42 = vmax.f32 %v8889_v17, 0.0 }
 0x996   : > { %v9988_v30 = vadd.f32 %v16072_v55, %v9866_v22  ;;  %v16404_v58 = vpop.f32.mrf.mxu1  ;;  %v8366_v22 = vpop.f32.mrf.mxu0 }
 0x997   : > { %9721 = vst.msk [vmem:[%s16079_s21 + $0x68] sm:$0xff] %vm9707_vm3, %v9656_v56  ;;  %9249 = vadd.xlane.f32.xlu1 %v9148_v6  ;;  %v9149_v56 = vmul.f32 %v16200_v14, %v8952_v15  ;;  %v9150_v17 = vmul.f32 %v16200_v14, %v8953_v42 }
 0x998   : > { %9580 = vadd.xlane.f32.xlu0 %v9480_v45  ;;  %10053 = vst.msk [vmem:[%s16079_s21 + $0x60] sm:$0xff] %vm10040_vm4, %v9988_v30  ;;  %v8817_v5 = vpop.f32.mrf.mxu1  ;;  %v9868_v18 = vpop.xlane.xlu1 %9867  ;;  %v8749_v45 = vadd.f32 %v16125_v51, %v8363_v59  ;;  %v9482_v59 = vmul.f32 %v16179_v48, %v8952_v15 }
 0x999   : > { %10521 = vst.msk [vmem:[%s16079_s21 + $0x60] sm:$0xff] %vm10508_vm5, %v10456_v62  ;;  %v9989_v29 = vadd.f32 %v16072_v55, %v9868_v18  ;;  %v9204_v26 = vpop.xlane.xlu0 %9203  ;;  %v8752_v5 = vadd.f32 %v16144_v53, %v8366_v22 }
 0x99a   : > { %v9324_v31 = vadd.f32 %v16072_v55, %v9204_v26  ;;  %v16423_v10 = vpop.f32.mrf.mxu1  ;;  %v8890_v62 = vadd.f32 %v16156_v63, %v8749_v45  ;;  %v9483_v45 = vmul.f32 %v16179_v48, %v8953_v42 }
 0x99b   : > { %10054 = vst.msk [vmem:[%s16079_s21 + $0x68] sm:$0xff] %vm10040_vm4, %v9989_v29  ;;  %9582 = vadd.xlane.f32.xlu1 %v9481_v54  ;;  %v10458_v54 = vadd.f32 %v16101_v35, %v15852_v61 }
 0x99c   : > { %9913 = vadd.xlane.f32.xlu0 %v9813_v36  ;;  %10522 = vst.msk [vmem:[%s16079_s21 + $0x68] sm:$0xff] %vm10508_vm5, %v10457_v2  ;;  %v8822_v33 = vpop.f32.mrf.mxu1  ;;  %v9206_v28 = vpop.xlane.xlu1 %9205 }
 0x99d   : > { %9389 = vst.msk [vmem:[%s16079_s21 + $0x70] sm:$0xff] %vm9374_vm2, %v9324_v31  ;;  %v9325_v40 = vadd.f32 %v16072_v55, %v9206_v28  ;;  %v9537_v57 = vpop.xlane.xlu0 %9536  ;;  %v9815_v31 = vmul.f32 %v16230_v7, %v8952_v15  ;;  %v8954_v33 = vmax.f32 %v8890_v62, 0.0  ;;  %v8891_v28 = vadd.f32 %v16156_v63, %v8752_v5  ;;  %v16478_v5 = vpop.f32.mrf.mxu0 }
 0x99e   : > { %v9657_v6 = vadd.f32 %v16072_v55, %v9537_v57  ;;  %v16436_v30 = vpop.f32.mrf.mxu1 }
 0x99f   : > { %9390 = vst.msk [vmem:[%s16079_s21 + $0x78] sm:$0xff] %vm9374_vm2, %v9325_v40  ;;  %9915 = vadd.xlane.f32.xlu1 %v9814_v25  ;;  %v10459_v40 = vadd.f32 %v16101_v35, %v15859_v9  ;;  %v8757_v9 = vadd.f32 %v16388_v49, %v16163_v13  ;;  %v9151_v62 = vmul.f32 %v16200_v14, %v8954_v33 }
 0x9a0   : > { %9251 = vadd.xlane.f32.xlu0 %v9149_v56  ;;  %9722 = vst.msk [vmem:[%s16079_s21 + $0x70] sm:$0xff] %vm9707_vm3, %v9657_v6  ;;  %v8825_v19 = vpop.f32.mrf.mxu1  ;;  %v9539_v51 = vpop.xlane.xlu1 %9538  ;;  %v9816_v6 = vmul.f32 %v16230_v7, %v8953_v42  ;;  %v9484_v42 = vmul.f32 %v16179_v48, %v8954_v33 }
 0x9a1   : > { %v9658_v18 = vadd.f32 %v16072_v55, %v9539_v51  ;;  %v9870_v36 = vpop.xlane.xlu0 %9869  ;;  %v8955_v19 = vmax.f32 %v8891_v28, 0.0 }
 0x9a2   : > { %v9990_v29 = vadd.f32 %v16072_v55, %v9870_v36  ;;  %v16448_v26 = vpop.f32.mrf.mxu1 }
 0x9a3   : > { %9723 = vst.msk [vmem:[%s16079_s21 + $0x78] sm:$0xff] %vm9707_vm3, %v9658_v18  ;;  %9253 = vadd.xlane.f32.xlu1 %v9150_v17  ;;  %v8892_v17 = vadd.f32 %v16156_v63, %v8757_v9 }
 0x9a4   : > { %9584 = vadd.xlane.f32.xlu0 %v9482_v59  ;;  %10055 = vst.msk [vmem:[%s16079_s21 + $0x70] sm:$0xff] %vm10040_vm4, %v9990_v29  ;;  %v8830_v53 = vpop.f32.mrf.mxu1  ;;  %v9872_v2 = vpop.xlane.xlu1 %9871  ;;  %v8760_v29 = vadd.f32 %v16420_v39, %v16185_v4 }
 0x9a5   : > { %10523 = vst.msk [vmem:[%s16079_s21 + $0x70] sm:$0xff] %vm10508_vm5, %v10458_v54  ;;  %v9991_v61 = vadd.f32 %v16072_v55, %v9872_v2  ;;  %v9208_v25 = vpop.xlane.xlu0 %9207  ;;  %v9152_v2 = vmul.f32 %v16200_v14, %v8955_v19 }
 0x9a6   : > { %v9326_v57 = vadd.f32 %v16072_v55, %v9208_v25  ;;  %v16465_v56 = vpop.f32.mrf.mxu1  ;;  %v10460_v25 = vadd.f32 %v16101_v35, %v15861_v3 }
 0x9a7   : > { %10056 = vst.msk [vmem:[%s16079_s21 + $0x78] sm:$0xff] %vm10040_vm4, %v9991_v61  ;;  %9586 = vadd.xlane.f32.xlu1 %v9483_v45  ;;  %v9817_v45 = vmul.f32 %v16230_v7, %v8954_v33 }
 0x9a8   : > { %9917 = vadd.xlane.f32.xlu0 %v9815_v31  ;;  %10524 = vst.msk [vmem:[%s16079_s21 + $0x78] sm:$0xff] %vm10508_vm5, %v10459_v40  ;;  %v8833_v15 = vpop.f32.mrf.mxu1  ;;  %v9210_v22 = vpop.xlane.xlu1 %9209  ;;  %v8956_v40 = vmax.f32 %v8892_v17, 0.0 }
 0x9a9   : > { %9391 = vst.msk [vmem:[%s16079_s21 + $0x80] sm:$0xff] %vm9374_vm2, %v9326_v57  ;;  %v9327_v51 = vadd.f32 %v16072_v55, %v9210_v22  ;;  %v9541_v59 = vpop.xlane.xlu0 %9540  ;;  %v8379_v31 = vpop.f32.mrf.mxu0  ;;  %v8893_v57 = vadd.f32 %v16156_v63, %v8760_v29  ;;  %v9485_v22 = vmul.f32 %v16179_v48, %v8955_v19 }
 0x9aa   : > { %v9659_v18 = vadd.f32 %v16072_v55, %v9541_v59  ;;  %v16481_v36 = vpop.f32.mrf.mxu1  ;;  %v9818_v59 = vmul.f32 %v16230_v7, %v8955_v19  ;;  %v9486_v29 = vmul.f32 %v16179_v48, %v8956_v40 }
 0x9ab   : > { %9392 = vst.msk [vmem:[%s16079_s21 + $0x88] sm:$0xff] %vm9374_vm2, %v9327_v51  ;;  %9919 = vadd.xlane.f32.xlu1 %v9816_v6  ;;  %v10461_v6 = vadd.f32 %v16101_v35, %v15866_v0  ;;  %v16510_v9 = vpop.f32.mrf.mxu0  ;;  %v8765_v0 = vadd.f32 %v16206_v47, %v8379_v31 }
 0x9ac   : > { %9255 = vadd.xlane.f32.xlu0 %v9151_v62  ;;  %9724 = vst.msk [vmem:[%s16079_s21 + $0x80] sm:$0xff] %vm9707_vm3, %v9659_v18  ;;  %v9543_v13 = vpop.xlane.xlu1 %9542  ;;  %v8838_v49 = vpop.f32.mrf.mxu1  ;;  %v8957_v62 = vmax.f32 %v8893_v57, 0.0 }
 0x9ad   : > { %v9660_v54 = vadd.f32 %v16072_v55, %v9543_v13  ;;  %v9874_v53 = vpop.xlane.xlu0 %9873  ;;  %v9153_v49 = vmul.f32 %v16200_v14, %v8956_v40  ;;  %v8894_v47 = vadd.f32 %v16156_v63, %v8765_v0 }
 0x9ae   : > { %v9992_v28 = vadd.f32 %v16072_v55, %v9874_v53  ;;  %v16494_v61 = vpop.f32.mrf.mxu1  ;;  %v9154_v31 = vmul.f32 %v16200_v14, %v8957_v62 }
 0x9af   : > { %9725 = vst.msk [vmem:[%s16079_s21 + $0x88] sm:$0xff] %vm9707_vm3, %v9660_v54  ;;  %9257 = vadd.xlane.f32.xlu1 %v9152_v2 }
 0x9b0   : > { %9588 = vadd.xlane.f32.xlu0 %v9484_v42  ;;  %10057 = vst.msk [vmem:[%s16079_s21 + $0x80] sm:$0xff] %vm10040_vm4, %v9992_v28  ;;  %v9876_v4 = vpop.xlane.xlu1 %9875  ;;  %v8841_v39 = vpop.f32.mrf.mxu1 }
 0x9b1   : > { %10525 = vst.msk [vmem:[%s16079_s21 + $0x80] sm:$0xff] %vm10508_vm5, %v10460_v25  ;;  %v9993_v3 = vadd.f32 %v16072_v55, %v9876_v4  ;;  %v9212_v15 = vpop.xlane.xlu0 %9211  ;;  %v8382_v42 = vpop.f32.mrf.mxu0  ;;  %v10462_v25 = vadd.f32 %v16101_v35, %v15868_v37  ;;  %v9819_v4 = vmul.f32 %v16230_v7, %v8956_v40  ;;  %v8958_v39 = vmax.f32 %v8894_v47, 0.0  ;;  %v16576_v47 = vld [vmem:[%s17302_s12] ss:$0 sm:$0xff] }
 0x9b2   : > { %v9328_v51 = vadd.f32 %v16072_v55, %v9212_v15  ;;  %v8768_v54 = vadd.f32 %v16219_v1, %v8382_v42  ;;  %v9487_v37 = vmul.f32 %v16179_v48, %v8957_v62  ;;  %v10463_v15 = vadd.f32 %v16101_v35, %v15874_v8 }
 0x9b3   : > { %10058 = vst.msk [vmem:[%s16079_s21 + $0x88] sm:$0xff] %vm10040_vm4, %v9993_v3  ;;  %9590 = vadd.xlane.f32.xlu1 %v9485_v22  ;;  %v9155_v0 = vmul.f32 %v16200_v14, %v8958_v39 }
 0x9b4   : > { %9921 = vadd.xlane.f32.xlu0 %v9817_v45  ;;  %10526 = vst.msk [vmem:[%s16079_s21 + $0x88] sm:$0xff] %vm10508_vm5, %v10461_v6  ;;  %v9214_v33 = vpop.xlane.xlu1 %9213  ;;  %v8895_v45 = vadd.f32 %v16156_v63, %v8768_v54  ;;  %v9820_v6 = vmul.f32 %v16230_v7, %v8957_v62 }
 0x9b5   : > { %9393 = vst.msk [vmem:[%s16079_s21 + $0x90] sm:$0xff] %vm9374_vm2, %v9328_v51  ;;  %v9329_v18 = vadd.f32 %v16072_v55, %v9214_v33  ;;  %v9545_v13 = vpop.xlane.xlu0 %9544  ;;  %v8773_v33 = vadd.f32 %v16478_v5, %v16243_v23  ;;  %v9488_v23 = vmul.f32 %v16179_v48, %v8958_v39 }
 0x9b6   : > { %v9661_v17 = vadd.f32 %v16072_v55, %v9545_v13  ;;  %v8959_v51 = vmax.f32 %v8895_v45, 0.0 }
 0x9b7   : > { %9394 = vst.msk [vmem:[%s16079_s21 + $0x98] sm:$0xff] %vm9374_vm2, %v9329_v18  ;;  %9923 = vadd.xlane.f32.xlu1 %v9818_v59  ;;  %v16560_v18 = vpop.f32.mrf.mxu0  ;;  %v8896_v5 = vadd.f32 %v16156_v63, %v8773_v33 }
 0x9b8   : > { %9259 = vadd.xlane.f32.xlu0 %v9153_v49  ;;  %9726 = vst.msk [vmem:[%s16079_s21 + $0x90] sm:$0xff] %vm9707_vm3, %v9661_v17  ;;  %v9547_v19 = vpop.xlane.xlu1 %9546  ;;  %v8776_v49 = vadd.f32 %v16510_v9, %v16256_v21  ;;  %v9821_v21 = vmul.f32 %v16230_v7, %v8958_v39  ;;  %v9822_v45 = vmul.f32 %v16230_v7, %v8959_v51 }
 0x9b9   : > { %v9662_v53 = vadd.f32 %v16072_v55, %v9547_v19  ;;  %v9878_v2 = vpop.xlane.xlu0 %9877  ;;  %v9156_v19 = vmul.f32 %v16200_v14, %v8959_v51  ;;  %v8960_v9 = vmax.f32 %v8896_v5, 0.0 }
 0x9ba   : > { %v9994_v28 = vadd.f32 %v16072_v55, %v9878_v2  ;;  %v8897_v2 = vadd.f32 %v16156_v63, %v8776_v49 }
 0x9bb   : > { %9727 = vst.msk [vmem:[%s16079_s21 + $0x98] sm:$0xff] %vm9707_vm3, %v9662_v53  ;;  %9261 = vadd.xlane.f32.xlu1 %v9154_v31  ;;  %v10464_v53 = vadd.f32 %v16101_v35, %v15876_v34 }
 0x9bc   : > { %9592 = vadd.xlane.f32.xlu0 %v9486_v29  ;;  %10059 = vst.msk [vmem:[%s16079_s21 + $0x90] sm:$0xff] %vm10040_vm4, %v9994_v28  ;;  %v9880_v1 = vpop.xlane.xlu1 %9879  ;;  %v8395_v29 = vpop.f32.mrf.mxu0  ;;  %v9489_v28 = vmul.f32 %v16179_v48, %v8959_v51 }
 0x9bd   : > { %10527 = vst.msk [vmem:[%s16079_s21 + $0x90] sm:$0xff] %vm10508_vm5, %v10462_v25  ;;  %v9995_v57 = vadd.f32 %v16072_v55, %v9880_v1  ;;  %v9216_v3 = vpop.xlane.xlu0 %9215  ;;  %v10465_v25 = vadd.f32 %v16101_v35, %v15883_v44  ;;  %v8781_v44 = vadd.f32 %v16268_v41, %v8395_v29 }
 0x9be   : > { %v9330_v22 = vadd.f32 %v16072_v55, %v9216_v3  ;;  %v16593_v1 = vpop.f32.mrf.mxu0 }
 0x9bf   : > { %10060 = vst.msk [vmem:[%s16079_s21 + $0x98] sm:$0xff] %vm10040_vm4, %v9995_v57  ;;  %9594 = vadd.xlane.f32.xlu1 %v9487_v37  ;;  %v8961_v57 = vmax.f32 %v8897_v2, 0.0  ;;  %v9157_v37 = vmul.f32 %v16200_v14, %v8960_v9  ;;  %v8898_v41 = vadd.f32 %v16156_v63, %v8781_v44 }
 0x9c0   : > { %9925 = vadd.xlane.f32.xlu0 %v9819_v4  ;;  %10528 = vst.msk [vmem:[%s16079_s21 + $0x98] sm:$0xff] %vm10508_vm5, %v10463_v15  ;;  %v9218_v40 = vpop.xlane.xlu1 %9217  ;;  %v8398_v15 = vpop.f32.mrf.mxu0 }
 0x9c1   : > { %9395 = vst.msk [vmem:[%s16079_s21 + $0xa0] sm:$0xff] %vm9374_vm2, %v9330_v22  ;;  %v9331_v8 = vadd.f32 %v16072_v55, %v9218_v40  ;;  %v9549_v59 = vpop.xlane.xlu0 %9548  ;;  %v8784_v51 = vadd.f32 %v16285_v38, %v8398_v15  ;;  %v8962_v5 = vmax.f32 %v8898_v41, 0.0 }
 0x9c2   : > { %v9663_v13 = vadd.f32 %v16072_v55, %v9549_v59  ;;  %v9158_v59 = vmul.f32 %v16200_v14, %v8961_v57 }
 0x9c3   : > { %9396 = vst.msk [vmem:[%s16079_s21 + $0xa8] sm:$0xff] %vm9374_vm2, %v9331_v8  ;;  %9927 = vadd.xlane.f32.xlu1 %v9820_v6  ;;  %v9490_v6 = vmul.f32 %v16179_v48, %v8960_v9  ;;  %v8899_v49 = vadd.f32 %v16156_v63, %v8784_v51  ;;  %v9159_v2 = vmul.f32 %v16200_v14, %v8962_v5 }
 0x9c4   : > { %9263 = vadd.xlane.f32.xlu0 %v9155_v0  ;;  %9728 = vst.msk [vmem:[%s16079_s21 + $0xa0] sm:$0xff] %vm9707_vm3, %v9663_v13  ;;  %v9551_v62 = vpop.xlane.xlu1 %9550  ;;  %v16620_v13 = vld [vmem:[%s17302_s12] ss:$0 sm:$0xff] }
 0x9c5   : > { %v9664_v42 = vadd.f32 %v16072_v55, %v9551_v62  ;;  %v9882_v17 = vpop.xlane.xlu0 %9881  ;;  %v10466_v62 = vadd.f32 %v16620_v13, %v15885_v32  ;;  %v9491_v32 = vmul.f32 %v16179_v48, %v8961_v57 }
 0x9c6   : > { %v9996_v54 = vadd.f32 %v16576_v47, %v9882_v17 }
 0x9c7   : > { %9729 = vst.msk [vmem:[%s16079_s21 + $0xa8] sm:$0xff] %vm9707_vm3, %v9664_v42  ;;  %9265 = vadd.xlane.f32.xlu1 %v9156_v19  ;;  %v10467_v19 = vadd.f32 %v16620_v13, %v15891_v20 }
 0x9c8   : > { %9596 = vadd.xlane.f32.xlu0 %v9488_v23  ;;  %10061 = vst.msk [vmem:[%s16079_s21 + $0xa0] sm:$0xff] %vm10040_vm4, %v9996_v54  ;;  %v9884_v55 = vpop.xlane.xlu1 %9883  ;;  %v9823_v23 = vmul.f32 %v16230_v7, %v8960_v9 }
 0x9c9   : > { %10529 = vst.msk [vmem:[%s16079_s21 + $0xa0] sm:$0xff] %vm10508_vm5, %v10464_v53  ;;  %v9997_v31 = vadd.f32 %v16576_v47, %v9884_v55  ;;  %v9220_v34 = vpop.xlane.xlu0 %9219  ;;  %v9824_v53 = vmul.f32 %v16230_v7, %v8961_v57  ;;  %v8963_v55 = vmax.f32 %v8899_v49, 0.0 }
 0x9ca   : > { %v9332_v4 = vadd.f32 %v16576_v47, %v9220_v34 }
 0x9cb   : > { %10062 = vst.msk [vmem:[%s16079_s21 + $0xa8] sm:$0xff] %vm10040_vm4, %v9997_v31  ;;  %9598 = vadd.xlane.f32.xlu1 %v9489_v28  ;;  %v16648_v31 = vpop.f32.mrf.mxu0 }
 0x9cc   : > { %9929 = vadd.xlane.f32.xlu0 %v9821_v21  ;;  %10530 = vst.msk [vmem:[%s16079_s21 + $0xa8] sm:$0xff] %vm10508_vm5, %v10465_v25  ;;  %v9222_v39 = vpop.xlane.xlu1 %9221  ;;  %v8789_v21 = vadd.f32 %v16560_v18, %v16301_v12  ;;  %v9492_v12 = vmul.f32 %v16179_v48, %v8962_v5  ;;  %v8792_v25 = vadd.f32 %v16593_v1, %v16314_v11 }
 0x9cd   : > { %9397 = vst.msk [vmem:[%s16079_s21 + $0xb0] sm:$0xff] %vm9374_vm2, %v9332_v4  ;;  %v9333_v35 = vadd.f32 %v16576_v47, %v9222_v39  ;;  %v9553_v3 = vpop.xlane.xlu0 %9552  ;;  %v8411_v57 = vpop.f32.mrf.mxu0  ;;  %v9825_v11 = vmul.f32 %v16230_v7, %v8962_v5 }
 0x9ce   : > { %v9665_v22 = vadd.f32 %v16576_v47, %v9553_v3  ;;  %v8900_v18 = vadd.f32 %v16156_v63, %v8789_v21  ;;  %v16672_v3 = vld [vmem:[%s17299_s9] ss:$0 sm:$0xff] }
 0x9cf   : > { %9398 = vst.msk [vmem:[%s16079_s21 + $0xb8] sm:$0xff] %vm9374_vm2, %v9333_v35  ;;  %9931 = vadd.xlane.f32.xlu1 %v9822_v45  ;;  %v9160_v45 = vmul.f32 %v16200_v14, %v8963_v55  ;;  %v10468_v35 = vadd.f32 %v16620_v13, %v15893_v46  ;;  %v8901_v46 = vadd.f32 %v16672_v3, %v8792_v25 }
 0x9d0   : > { %9267 = vadd.xlane.f32.xlu0 %v9157_v37  ;;  %9730 = vst.msk [vmem:[%s16079_s21 + $0xb0] sm:$0xff] %vm9707_vm3, %v9665_v22  ;;  %v9555_v40 = vpop.xlane.xlu1 %9554  ;;  %v8964_v1 = vmax.f32 %v8900_v18, 0.0  ;;  %v9493_v22 = vmul.f32 %v16179_v48, %v8963_v55  ;;  %v9826_v48 = vmul.f32 %v16230_v7, %v8963_v55 }
 0x9d1   : > { %v9666_v33 = vadd.f32 %v16576_v47, %v9555_v40  ;;  %v9886_v8 = vpop.xlane.xlu0 %9885  ;;  %v10469_v40 = vadd.f32 %v16620_v13, %v15900_v60  ;;  %v8797_v60 = vadd.f32 %v16333_v16, %v8411_v57  ;;  %v16702_v16 = vld [vmem:[%s17300_s10 + $0x1] ss:$0 sm:$0xff] }
 0x9d2   : > { %v9998_v0 = vadd.f32 %v16576_v47, %v9886_v8  ;;  %v9494_v5 = vmul.f32 %v16702_v16, %v8964_v1 }
 0x9d3   : > { %9731 = vst.msk [vmem:[%s16079_s21 + $0xb8] sm:$0xff] %vm9707_vm3, %v9666_v33  ;;  %9269 = vadd.xlane.f32.xlu1 %v9158_v59  ;;  %v8965_v33 = vmax.f32 %v8901_v46, 0.0 }
 0x9d4   : > { %9600 = vadd.xlane.f32.xlu0 %v9490_v6  ;;  %10063 = vst.msk [vmem:[%s16079_s21 + $0xb0] sm:$0xff] %vm10040_vm4, %v9998_v0  ;;  %v9888_v38 = vpop.xlane.xlu1 %9887  ;;  %v16681_v6 = vpop.f32.mrf.mxu0  ;;  %v9161_v0 = vmul.f32 %v16200_v14, %v8964_v1  ;;  %v8902_v14 = vadd.f32 %v16672_v3, %v8797_v60 }
 0x9d5   : > { %10531 = vst.msk [vmem:[%s16079_s21 + $0xb0] sm:$0xff] %vm10508_vm5, %v10466_v62  ;;  %v9999_v42 = vadd.f32 %v16576_v47, %v9888_v38  ;;  %v9224_v17 = vpop.xlane.xlu0 %9223 }
 0x9d6   : > { %v9334_v29 = vadd.f32 %v16576_v47, %v9224_v17  ;;  %v8414_v62 = vpop.f32.mrf.mxu0  ;;  %v8966_v55 = vmax.f32 %v8902_v14, 0.0 }
 0x9d7   : > { %10064 = vst.msk [vmem:[%s16079_s21 + $0xb8] sm:$0xff] %vm10040_vm4, %v9999_v42  ;;  %9602 = vadd.xlane.f32.xlu1 %v9491_v32  ;;  %v8800_v49 = vadd.f32 %v16346_v43, %v8414_v62  ;;  %v16711_v32 = vld [vmem:[%s17300_s10] ss:$0 sm:$0xff] }
 0x9d8   : > { %9933 = vadd.xlane.f32.xlu0 %v9823_v23  ;;  %10532 = vst.msk [vmem:[%s16079_s21 + $0xb8] sm:$0xff] %vm10508_vm5, %v10467_v19  ;;  %v9226_v54 = vpop.xlane.xlu1 %9225  ;;  %v9162_v19 = vmul.f32 %v16711_v32, %v8965_v33  ;;  %v9163_v57 = vmul.f32 %v16711_v32, %v8966_v55 }
 0x9d9   : > { %9399 = vst.msk [vmem:[%s16079_s21 + $0xc0] sm:$0xff] %vm9374_vm2, %v9334_v29  ;;  %v9335_v20 = vadd.f32 %v16576_v47, %v9226_v54  ;;  %v9557_v9 = vpop.xlane.xlu0 %9556  ;;  %v10470_v54 = vadd.f32 %v16620_v13, %v15902_v52  ;;  %v8903_v21 = vadd.f32 %v16672_v3, %v8800_v49  ;;  %v9495_v52 = vmul.f32 %v16702_v16, %v8965_v33 }
 0x9da   : > { %v9667_v34 = vadd.f32 %v16576_v47, %v9557_v9 }
 0x9db   : > { %9400 = vst.msk [vmem:[%s16079_s21 + $0xc8] sm:$0xff] %vm9374_vm2, %v9335_v20  ;;  %9935 = vadd.xlane.f32.xlu1 %v9824_v53  ;;  %v9827_v53 = vmul.f32 %v16230_v7, %v8964_v1  ;;  %v8967_v25 = vmax.f32 %v8903_v21, 0.0 }
 0x9dc   : > { %9271 = vadd.xlane.f32.xlu0 %v9159_v2  ;;  %9732 = vst.msk [vmem:[%s16079_s21 + $0xc0] sm:$0xff] %vm9707_vm3, %v9667_v34  ;;  %v9559_v28 = vpop.xlane.xlu1 %9558  ;;  %v17341_v2 = vld [vmem:[#allocation4_spill] sm:$0xff] }
 0x9dd   : > { %v9668_v4 = vadd.f32 %v16576_v47, %v9559_v28  ;;  %v9890_v39 = vpop.xlane.xlu0 %9889  ;;  %v10471_v34 = vadd.f32 %v16620_v13, %v17341_v2  ;;  %v17344_v2 = vld [vmem:[#allocation7_spill] sm:$0xff] }
 0x9de   : > { %v10000_v44 = vadd.f32 %v16576_v47, %v9890_v39 }
 0x9df   : > { %9733 = vst.msk [vmem:[%s16079_s21 + $0xc8] sm:$0xff] %vm9707_vm3, %v9668_v4  ;;  %9273 = vadd.xlane.f32.xlu1 %v9160_v45  ;;  %v8805_v4 = vadd.f32 %v16648_v31, %v16358_v50  ;;  %v9496_v50 = vmul.f32 %v16702_v16, %v8966_v55 }
 0x9e0   : > { %9604 = vadd.xlane.f32.xlu0 %v9492_v12  ;;  %10065 = vst.msk [vmem:[%s16079_s21 + $0xc0] sm:$0xff] %vm10040_vm4, %v10000_v44  ;;  %v9892_v63 = vpop.xlane.xlu1 %9891  ;;  %v16739_v12 = vld [vmem:[%s17300_s10 + $0x2] ss:$0 sm:$0xff]  ;;  %v16746_v44 = vpop.f32.mrf.mxu0 }
 0x9e1   : > { %10533 = vst.msk [vmem:[%s16079_s21 + $0xc0] sm:$0xff] %vm10508_vm5, %v10468_v35  ;;  %v10001_v37 = vadd.f32 %v16576_v47, %v9892_v63  ;;  %v9228_v15 = vpop.xlane.xlu0 %9227  ;;  %v9828_v18 = vmul.f32 %v16739_v12, %v8965_v33  ;;  %v8904_v31 = vadd.f32 %v16672_v3, %v8805_v4 }
 0x9e2   : > { %v9336_v41 = vadd.f32 %v16576_v47, %v9228_v15  ;;  %v8427_v15 = vpop.f32.mrf.mxu0 }
 0x9e3   : > { %10066 = vst.msk [vmem:[%s16079_s21 + $0xc8] sm:$0xff] %vm10040_vm4, %v10001_v37  ;;  %9606 = vadd.xlane.f32.xlu1 %v9493_v22  ;;  %v9164_v37 = vmul.f32 %v16711_v32, %v8967_v25  ;;  %v8813_v49 = vadd.f32 %v16391_v27, %v8427_v15 }
 0x9e4   : > { %9937 = vadd.xlane.f32.xlu0 %v9825_v11  ;;  %10534 = vst.msk [vmem:[%s16079_s21 + $0xc8] sm:$0xff] %vm10508_vm5, %v10469_v40  ;;  %v9230_v51 = vpop.xlane.xlu1 %9229  ;;  %v8808_v11 = vadd.f32 %v16681_v6, %v16375_v24  ;;  %v17342_v40 = vld [vmem:[#allocation5_spill] sm:$0xff]  ;;  %v9829_v6 = vmul.f32 %v16739_v12, %v8966_v55  ;;  %v16774_v62 = vpop.f32.mrf.mxu0 }
 0x9e5   : > { %9401 = vst.msk [vmem:[%s16079_s21 + $0xd0] sm:$0xff] %vm9374_vm2, %v9336_v41  ;;  %v9337_v8 = vadd.f32 %v16576_v47, %v9230_v51  ;;  %v9561_v59 = vpop.xlane.xlu0 %9560  ;;  %v10472_v41 = vadd.f32 %v16620_v13, %v17342_v40  ;;  %v8968_v51 = vmax.f32 %v8904_v31, 0.0  ;;  %v8906_v27 = vadd.f32 %v16672_v3, %v8813_v49 }
 0x9e6   : > { %v9669_v38 = vadd.f32 %v16576_v47, %v9561_v59  ;;  %v17343_v59 = vld [vmem:[#allocation6_spill] sm:$0xff] }
 0x9e7   : > { %9402 = vst.msk [vmem:[%s16079_s21 + $0xd8] sm:$0xff] %vm9374_vm2, %v9337_v8  ;;  %9939 = vadd.xlane.f32.xlu1 %v9826_v48  ;;  %v8905_v48 = vadd.f32 %v16672_v3, %v8808_v11  ;;  %v9497_v8 = vmul.f32 %v16702_v16, %v8967_v25  ;;  %v8821_v11 = vadd.f32 %v16746_v44, %v16423_v10 }
 0x9e8   : > { %9275 = vadd.xlane.f32.xlu0 %v9161_v0  ;;  %9734 = vst.msk [vmem:[%s16079_s21 + $0xd0] sm:$0xff] %vm9707_vm3, %v9669_v38  ;;  %v9563_v23 = vpop.xlane.xlu1 %9562  ;;  %v10473_v0 = vadd.f32 %v16620_v13, %v17343_v59 }
 0x9e9   : > { %v9670_v42 = vadd.f32 %v16576_v47, %v9563_v23  ;;  %v9894_v17 = vpop.xlane.xlu0 %9893  ;;  %v8969_v14 = vmax.f32 %v8905_v48, 0.0  ;;  %v8908_v44 = vadd.f32 %v16672_v3, %v8821_v11 }
 0x9ea   : > { %v10002_v29 = vadd.f32 %v16576_v47, %v9894_v17 }
 0x9eb   : > { %9735 = vst.msk [vmem:[%s16079_s21 + $0xd8] sm:$0xff] %vm9707_vm3, %v9670_v42  ;;  %9277 = vadd.xlane.f32.xlu1 %v9162_v19  ;;  %v9165_v19 = vmul.f32 %v16711_v32, %v8968_v51 }
 0x9ec   : > { %9608 = vadd.xlane.f32.xlu0 %v9494_v5  ;;  %10067 = vst.msk [vmem:[%s16079_s21 + $0xd0] sm:$0xff] %vm10040_vm4, %v10002_v29  ;;  %v9896_v43 = vpop.xlane.xlu1 %9895  ;;  %v9830_v5 = vmul.f32 %v16739_v12, %v8967_v25  ;;  %v8430_v29 = vpop.f32.mrf.mxu0 }
 0x9ed   : > { %10535 = vst.msk [vmem:[%s16079_s21 + $0xd0] sm:$0xff] %vm10508_vm5, %v10470_v54  ;;  %v10003_v20 = vadd.f32 %v16576_v47, %v9896_v43  ;;  %v9232_v9 = vpop.xlane.xlu0 %9231  ;;  %v8816_v55 = vadd.f32 %v16404_v58, %v8430_v29 }
 0x9ee   : > { %v9338_v28 = vadd.f32 %v16576_v47, %v9232_v9  ;;  %v9166_v9 = vmul.f32 %v16711_v32, %v8969_v14  ;;  %v16824_v15 = vpop.f32.mrf.mxu0 }
 0x9ef   : > { %10068 = vst.msk [vmem:[%s16079_s21 + $0xd8] sm:$0xff] %vm10040_vm4, %v10003_v20  ;;  %9610 = vadd.xlane.f32.xlu1 %v9495_v52 }
 0x9f0   : > { %9941 = vadd.xlane.f32.xlu0 %v9827_v53  ;;  %10536 = vst.msk [vmem:[%s16079_s21 + $0xd8] sm:$0xff] %vm10508_vm5, %v10471_v34  ;;  %v9234_v7 = vpop.xlane.xlu1 %9233  ;;  %v9498_v53 = vmul.f32 %v16702_v16, %v8968_v51  ;;  %v10474_v34 = vadd.f32 %v16620_v13, %v17344_v2  ;;  %v8443_v48 = vpop.f32.mrf.mxu0 }
 0x9f1   : > { %9403 = vst.msk [vmem:[%s16079_s21 + $0xe0] sm:$0xff] %vm9374_vm2, %v9338_v28  ;;  %v9339_v39 = vadd.f32 %v16576_v47, %v9234_v7  ;;  %v9565_v45 = vpop.xlane.xlu0 %9564  ;;  %v9831_v28 = vmul.f32 %v16739_v12, %v8968_v51  ;;  %v8970_v7 = vmax.f32 %v8906_v27, 0.0 }
 0x9f2   : > { %v9671_v35 = vadd.f32 %v16576_v47, %v9565_v45  ;;  %v17345_v45 = vld [vmem:[#allocation8_spill] sm:$0xff] }
 0x9f3   : > { %9404 = vst.msk [vmem:[%s16079_s21 + $0xe8] sm:$0xff] %vm9374_vm2, %v9339_v39  ;;  %9943 = vadd.xlane.f32.xlu1 %v9828_v18  ;;  %v8907_v18 = vadd.f32 %v16672_v3, %v8816_v55  ;;  %v9499_v39 = vmul.f32 %v16702_v16, %v8969_v14  ;;  %v9500_v10 = vmul.f32 %v16702_v16, %v8970_v7 }
 0x9f4   : > { %9279 = vadd.xlane.f32.xlu0 %v9163_v57  ;;  %9736 = vst.msk [vmem:[%s16079_s21 + $0xe0] sm:$0xff] %vm9707_vm3, %v9671_v35  ;;  %v9567_v63 = vpop.xlane.xlu1 %9566  ;;  %v10475_v57 = vadd.f32 %v16620_v13, %v17345_v45  ;;  %v9833_v59 = vmul.f32 %v16739_v12, %v8970_v7 }
 0x9f5   : > { %v9672_v1 = vadd.f32 %v16576_v47, %v9567_v63  ;;  %v9898_v46 = vpop.xlane.xlu0 %9897  ;;  %v8971_v31 = vmax.f32 %v8907_v18, 0.0  ;;  %v17348_v18 = vld [vmem:[#allocation11_spill] sm:$0xff] }
 0x9f6   : > { %v10004_v22 = vadd.f32 %v16576_v47, %v9898_v46 }
 0x9f7   : > { %9737 = vst.msk [vmem:[%s16079_s21 + $0xe8] sm:$0xff] %vm9707_vm3, %v9672_v1  ;;  %9281 = vadd.xlane.f32.xlu1 %v9164_v37  ;;  %v9167_v37 = vmul.f32 %v16711_v32, %v8970_v7  ;;  %v9168_v51 = vmul.f32 %v16711_v32, %v8971_v31  ;;  %v9834_v29 = vmul.f32 %v16739_v12, %v8971_v31 }
 0x9f8   : > { %9612 = vadd.xlane.f32.xlu0 %v9496_v50  ;;  %10069 = vst.msk [vmem:[%s16079_s21 + $0xe0] sm:$0xff] %vm10040_vm4, %v10004_v22  ;;  %v9900_v24 = vpop.xlane.xlu1 %9899  ;;  %v9832_v50 = vmul.f32 %v16739_v12, %v8969_v14  ;;  %v17347_v14 = vld [vmem:[#allocation10_spill] sm:$0xff] }
 0x9f9   : > { %10537 = vst.msk [vmem:[%s16079_s21 + $0xe0] sm:$0xff] %vm10508_vm5, %v10472_v41  ;;  %v10005_v33 = vadd.f32 %v16576_v47, %v9900_v24  ;;  %v9236_v60 = vpop.xlane.xlu0 %9235  ;;  %v8824_v41 = vadd.f32 %v16774_v62, %v16436_v30  ;;  %v10477_v49 = vadd.f32 %v16620_v13, %v17347_v14  ;;  %v17351_v14 = vld [vmem:[#allocation14_spill] sm:$0xff] }
 0x9fa   : > { %v9340_v38 = vadd.f32 %v16576_v47, %v9236_v60  ;;  %v17346_v60 = vld [vmem:[#allocation9_spill] sm:$0xff] }
 0x9fb   : > { %10070 = vst.msk [vmem:[%s16079_s21 + $0xe8] sm:$0xff] %vm10040_vm4, %v10005_v33  ;;  %9614 = vadd.xlane.f32.xlu1 %v9497_v8  ;;  %v10476_v8 = vadd.f32 %v16620_v13, %v17346_v60  ;;  %v8909_v62 = vadd.f32 %v16672_v3, %v8824_v41 }
 0x9fc   : > { %9945 = vadd.xlane.f32.xlu0 %v9829_v6  ;;  %10538 = vst.msk [vmem:[%s16079_s21 + $0xe8] sm:$0xff] %vm10508_vm5, %v10473_v0  ;;  %v9238_v23 = vpop.xlane.xlu1 %9237  ;;  %v8972_v0 = vmax.f32 %v8908_v44, 0.0 }
 0x9fd   : > { %9405 = vst.msk [vmem:[%s16079_s21 + $0xf0] sm:$0xff] %vm9374_vm2, %v9340_v38  ;;  %v9341_v42 = vadd.f32 %v16576_v47, %v9238_v23  ;;  %v9569_v17 = vpop.xlane.xlu0 %9568 }
 0x9fe   : > { %v9673_v54 = vadd.f32 %v16576_v47, %v9569_v17  ;;  %v9169_v55 = vmul.f32 %v16711_v32, %v8972_v0 }
 0x9ff   : > { %9406 = vst.msk [vmem:[%s16079_s21 + $0xf8] sm:$0xff] %vm9374_vm2, %v9341_v42  ;;  %9947 = vadd.xlane.f32.xlu1 %v9830_v5  ;;  %v9501_v5 = vmul.f32 %v16702_v16, %v8971_v31  ;;  %v16852_v42 = vpop.f32.mrf.mxu0 }
 0xa00   : > { %9283 = vadd.xlane.f32.xlu0 %v9165_v19  ;;  %9738 = vst.msk [vmem:[%s16079_s21 + $0xf0] sm:$0xff] %vm9707_vm3, %v9673_v54  ;;  %v9571_v43 = vpop.xlane.xlu1 %9570  ;;  %v8973_v54 = vmax.f32 %v8909_v62, 0.0 }
 0xa01   : > { %v9674_v21 = vadd.f32 %v16576_v47, %v9571_v43  ;;  %v9902_v20 = vpop.xlane.xlu0 %9901  ;;  %v8829_v43 = vadd.f32 %v16448_v26, %v8443_v48 }
 0xa02   : > { %v10006_v52 = vadd.f32 %v16576_v47, %v9902_v20 }
 0xa03   : > { %9739 = vst.msk [vmem:[%s16079_s21 + $0xf8] sm:$0xff] %vm9707_vm3, %v9674_v21  ;;  %9285 = vadd.xlane.f32.xlu1 %v9166_v9  ;;  %v8446_v21 = vpop.f32.mrf.mxu0  ;;  %v8910_v26 = vadd.f32 %v16672_v3, %v8829_v43 }
 0xa04   : > { %9616 = vadd.xlane.f32.xlu0 %v9498_v53  ;;  %10071 = vst.msk [vmem:[%s16079_s21 + $0xf0] sm:$0xff] %vm10040_vm4, %v10006_v52  ;;  %v9904_v58 = vpop.xlane.xlu1 %9903  ;;  %v9502_v52 = vmul.f32 %v16702_v16, %v8972_v0  ;;  %v8832_v2 = vadd.f32 %v16465_v56, %v8446_v21 }
 0xa05   : > { %10539 = vst.msk [vmem:[%s16079_s21 + $0xf0] sm:$0xff] %vm10508_vm5, %v10474_v34  ;;  %v10007_v25 = vadd.f32 %v16576_v47, %v9904_v58  ;;  %v9240_v4 = vpop.xlane.xlu0 %9239 }
 0xa06   : > { %v9342_v35 = vadd.f32 %v16576_v47, %v9240_v4  ;;  %v9835_v4 = vmul.f32 %v16739_v12, %v8972_v0  ;;  %v8911_v45 = vadd.f32 %v16672_v3, %v8832_v2 }
 0xa07   : > { %10072 = vst.msk [vmem:[%s16079_s21 + $0xf8] sm:$0xff] %vm10040_vm4, %v10007_v25  ;;  %9618 = vadd.xlane.f32.xlu1 %v9499_v39  ;;  %v10478_v25 = vadd.f32 %v16620_v13, %v17348_v18  ;;  %v8974_v39 = vmax.f32 %v8910_v26, 0.0  ;;  %v17352_v26 = vld [vmem:[#allocation15_spill] sm:$0xff]  ;;  %v17353_v18 = vld [vmem:[#allocation16_spill] sm:$0xff] }
 0xa08   : > { %9949 = vadd.xlane.f32.xlu0 %v9831_v28  ;;  %10540 = vst.msk [vmem:[%s16079_s21 + $0xf8] sm:$0xff] %vm10508_vm5, %v10475_v57  ;;  %v9242_v63 = vpop.xlane.xlu1 %9241  ;;  %v9170_v28 = vmul.f32 %v16711_v32, %v8973_v54  ;;  %v10482_v2 = vadd.f32 %v16620_v13, %v17352_v26 }
 0xa09   : > { %9407 = vst.msk [vmem:[%s16079_s21 + $0x100] sm:$0xff] %vm9374_vm2, %v9342_v35  ;;  %v9343_v1 = vadd.f32 %v16576_v47, %v9242_v63  ;;  %v9573_v46 = vpop.xlane.xlu0 %9572  ;;  %v9503_v63 = vmul.f32 %v16702_v16, %v8973_v54  ;;  %v9171_v44 = vmul.f32 %v16711_v32, %v8974_v39 }
 0xa0a   : > { %v9675_v22 = vadd.f32 %v16576_v47, %v9573_v46  ;;  %v9836_v46 = vmul.f32 %v16739_v12, %v8973_v54 }
 0xa0b   : > { %9408 = vst.msk [vmem:[%s16079_s21 + $0x108] sm:$0xff] %vm9374_vm2, %v9343_v1  ;;  %9951 = vadd.xlane.f32.xlu1 %v9832_v50  ;;  %v17349_v50 = vld [vmem:[#allocation12_spill] sm:$0xff] }
 0xa0c   : > { %9287 = vadd.xlane.f32.xlu0 %v9167_v37  ;;  %9740 = vst.msk [vmem:[%s16079_s21 + $0x100] sm:$0xff] %vm9707_vm3, %v9675_v22  ;;  %v9575_v40 = vpop.xlane.xlu1 %9574  ;;  %v10479_v31 = vadd.f32 %v16620_v13, %v17349_v50  ;;  %v8975_v37 = vmax.f32 %v8911_v45, 0.0  ;;  %v8837_v22 = vadd.f32 %v16824_v15, %v16481_v36  ;;  %v8840_v15 = vadd.f32 %v16852_v42, %v16494_v61 }
 0xa0d   : > { %v9676_v24 = vadd.f32 %v16576_v47, %v9575_v40  ;;  %v9906_v6 = vpop.xlane.xlu0 %9905 }
 0xa0e   : > { %v10008_v33 = vadd.f32 %v16576_v47, %v9906_v6  ;;  %v9504_v6 = vmul.f32 %v16702_v16, %v8974_v39  ;;  %v8912_v36 = vadd.f32 %v16672_v3, %v8837_v22  ;;  %v8913_v62 = vadd.f32 %v16672_v3, %v8840_v15 }
 0xa0f   : > { %9741 = vst.msk [vmem:[%s16079_s21 + $0x108] sm:$0xff] %vm9707_vm3, %v9676_v24  ;;  %9289 = vadd.xlane.f32.xlu1 %v9168_v51  ;;  %v9838_v54 = vmul.f32 %v16739_v12, %v8975_v37 }
 0xa10   : > { %9620 = vadd.xlane.f32.xlu0 %v9500_v10  ;;  %10073 = vst.msk [vmem:[%s16079_s21 + $0x100] sm:$0xff] %vm10040_vm4, %v10008_v33  ;;  %v9908_v30 = vpop.xlane.xlu1 %9907  ;;  %v9172_v33 = vmul.f32 %v16711_v32, %v8975_v37  ;;  %v8976_v0 = vmax.f32 %v8912_v36, 0.0 }
 0xa11   : > { %10541 = vst.msk [vmem:[%s16079_s21 + $0x100] sm:$0xff] %vm10508_vm5, %v10476_v8  ;;  %v10009_v38 = vadd.f32 %v16576_v47, %v9908_v30  ;;  %v9244_v23 = vpop.xlane.xlu0 %9243  ;;  %v17350_v8 = vld [vmem:[#allocation13_spill] sm:$0xff] }
 0xa12   : > { %v9344_v17 = vadd.f32 %v16576_v47, %v9244_v23  ;;  %v10480_v30 = vadd.f32 %v16620_v13, %v17350_v8  ;;  %v9173_v43 = vmul.f32 %v16711_v32, %v8976_v0  ;;  %v17358_v8 = vld [vmem:[#allocation19_spill] sm:$0xff] }
 0xa13   : > { %10074 = vst.msk [vmem:[%s16079_s21 + $0x108] sm:$0xff] %vm10040_vm4, %v10009_v38  ;;  %9622 = vadd.xlane.f32.xlu1 %v9501_v5  ;;  %v9505_v5 = vmul.f32 %v16702_v16, %v8975_v37 }
 0xa14   : > { %9953 = vadd.xlane.f32.xlu0 %v9833_v59  ;;  %10542 = vst.msk [vmem:[%s16079_s21 + $0x108] sm:$0xff] %vm10508_vm5, %v10477_v49  ;;  %v9246_v19 = vpop.xlane.xlu1 %9245  ;;  %v9837_v59 = vmul.f32 %v16739_v12, %v8974_v39  ;;  %v10481_v49 = vadd.f32 %v16620_v13, %v17351_v14 }
 0xa15   : > { %9409 = vst.msk [vmem:[%s16079_s21 + $0x110] sm:$0xff] %vm9374_vm2, %v9344_v17  ;;  %v9345_v53 = vadd.f32 %v16576_v47, %v9246_v19  ;;  %v9577_v27 = vpop.xlane.xlu0 %9576  ;;  %v8977_v17 = vmax.f32 %v8913_v62, 0.0  ;;  %v17359_v62 = vld [vmem:[#allocation20_spill] sm:$0xff] }
 0xa16   : > { %v9677_v20 = vadd.f32 %v16576_v47, %v9577_v27 }
 0xa17   : > { %9410 = vst.msk [vmem:[%s16079_s21 + $0x118] sm:$0xff] %vm9374_vm2, %v9345_v53  ;;  %9955 = vadd.xlane.f32.xlu1 %v9834_v29  ;;  %v9840_v45 = vmul.f32 %v16739_v12, %v8977_v17 }
 0xa18   : > { %9291 = vadd.xlane.f32.xlu0 %v9169_v55  ;;  %9742 = vst.msk [vmem:[%s16079_s21 + $0x110] sm:$0xff] %vm9707_vm3, %v9677_v20  ;;  %v9579_v9 = vpop.xlane.xlu1 %9578  ;;  %v9174_v20 = vmul.f32 %v16711_v32, %v8977_v17 }
 0xa19   : > { %v9678_v34 = vadd.f32 %v16576_v47, %v9579_v9  ;;  %v9910_v58 = vpop.xlane.xlu0 %9909  ;;  %v9506_v9 = vmul.f32 %v16702_v16, %v8976_v0 }
 0xa1a   : > { %v10010_v7 = vadd.f32 %v16576_v47, %v9910_v58 }
 0xa1b   : > { %9743 = vst.msk [vmem:[%s16079_s21 + $0x118] sm:$0xff] %vm9707_vm3, %v9678_v34  ;;  %9293 = vadd.xlane.f32.xlu1 %v9170_v28  ;;  %v9507_v28 = vmul.f32 %v16702_v16, %v8977_v17 }
 0xa1c   : > { %9624 = vadd.xlane.f32.xlu0 %v9502_v52  ;;  %10075 = vst.msk [vmem:[%s16079_s21 + $0x110] sm:$0xff] %vm10040_vm4, %v10010_v7  ;;  %v9912_v56 = vpop.xlane.xlu1 %9911  ;;  %v9839_v7 = vmul.f32 %v16739_v12, %v8976_v0 }
 0xa1d   : > { %10543 = vst.msk [vmem:[%s16079_s21 + $0x110] sm:$0xff] %vm10508_vm5, %v10478_v25  ;;  %v10011_v57 = vadd.f32 %v16576_v47, %v9912_v56  ;;  %v9248_v35 = vpop.xlane.xlu0 %9247  ;;  %v10483_v25 = vadd.f32 %v16620_v13, %v17353_v18  ;;  %v17362_v18 = vld [vmem:[#allocation23_spill] sm:$0xff] }
 0xa1e   : > { %v9346_v11 = vadd.f32 %v16576_v47, %v9248_v35  ;;  %v17354_v35 = vld [vmem:[#allocation2_spill] sm:$0xff] }
 0xa1f   : > { %10076 = vst.msk [vmem:[%s16079_s21 + $0x118] sm:$0xff] %vm10040_vm4, %v10011_v57  ;;  %9626 = vadd.xlane.f32.xlu1 %v9503_v63 }
 0xa20   : > { %9957 = vadd.xlane.f32.xlu0 %v9835_v4  ;;  %10544 = vst.msk [vmem:[%s16079_s21 + $0x118] sm:$0xff] %vm10508_vm5, %v10479_v31  ;;  %v9250_v1 = vpop.xlane.xlu1 %9249 }
 0xa21   : > { %9411 = vst.msk [vmem:[%s16079_s21 + $0x120] sm:$0xff] %vm9374_vm2, %v9346_v11  ;;  %v9347_v40 = vadd.f32 %v16576_v47, %v9250_v1  ;;  %v9581_v10 = vpop.xlane.xlu0 %9580  ;;  %v17355_v1 = vld [vmem:[#allocation17_spill] sm:$0xff] }
 0xa22   : > { %v9679_v41 = vadd.f32 %v16576_v47, %v9581_v10  ;;  %v10484_v12 = vadd.f32 %v16620_v13, %v17355_v1  ;;  %v17357_v10 = vld [vmem:[#allocation18_spill] sm:$0xff] }
 0xa23   : > { %9412 = vst.msk [vmem:[%s16079_s21 + $0x128] sm:$0xff] %vm9374_vm2, %v9347_v40  ;;  %9959 = vadd.xlane.f32.xlu1 %v9836_v46  ;;  %v17356_v46 = vld [vmem:[#allocation3_spill] sm:$0xff] }
 0xa24   : > { %9295 = vadd.xlane.f32.xlu0 %v9171_v44  ;;  %9744 = vst.msk [vmem:[%s16079_s21 + $0x120] sm:$0xff] %vm9707_vm3, %v9679_v41  ;;  %v9583_v24 = vpop.xlane.xlu1 %9582  ;;  %v10485_v44 = vadd.f32 %v16620_v13, %v17357_v10 }
 0xa25   : > { %v9680_v51 = vadd.f32 %v16576_v47, %v9583_v24  ;;  %v9914_v48 = vpop.xlane.xlu0 %9913 }
 0xa26   : > { %v10012_v60 = vadd.f32 %v16576_v47, %v9914_v48 }
 0xa27   : > { %9745 = vst.msk [vmem:[%s16079_s21 + $0x128] sm:$0xff] %vm9707_vm3, %v9680_v51  ;;  %9297 = vadd.xlane.f32.xlu1 %v9172_v33 }
 0xa28   : > { %9628 = vadd.xlane.f32.xlu0 %v9504_v6  ;;  %10077 = vst.msk [vmem:[%s16079_s21 + $0x120] sm:$0xff] %vm10040_vm4, %v10012_v60  ;;  %v9916_v61 = vpop.xlane.xlu1 %9915 }
 0xa29   : > { %10545 = vst.msk [vmem:[%s16079_s21 + $0x120] sm:$0xff] %vm10508_vm5, %v10480_v30  ;;  %v10013_v38 = vadd.f32 %v16576_v47, %v9916_v61  ;;  %v9252_v23 = vpop.xlane.xlu0 %9251  ;;  %v10486_v30 = vadd.f32 %v16620_v13, %v17358_v8 }
 0xa2a   : > { %v9348_v42 = vadd.f32 %v16576_v47, %v9252_v23 }
 0xa2b   : > { %10078 = vst.msk [vmem:[%s16079_s21 + $0x128] sm:$0xff] %vm10040_vm4, %v10013_v38  ;;  %9630 = vadd.xlane.f32.xlu1 %v9505_v5  ;;  %v10487_v38 = vadd.f32 %v16620_v13, %v17359_v62 }
 0xa2c   : > { %9961 = vadd.xlane.f32.xlu0 %v9837_v59  ;;  %10546 = vst.msk [vmem:[%s16079_s21 + $0x128] sm:$0xff] %vm10508_vm5, %v10481_v49  ;;  %v9254_v3 = vpop.xlane.xlu1 %9253 }
 0xa2d   : > { %9413 = vst.msk [vmem:[%s16079_s21 + $0x130] sm:$0xff] %vm9374_vm2, %v9348_v42  ;;  %v9349_v19 = vadd.f32 %v16576_v47, %v9254_v3  ;;  %v9585_v29 = vpop.xlane.xlu0 %9584 }
 0xa2e   : > { %v9681_v53 = vadd.f32 %v16576_v47, %v9585_v29 }
 0xa2f   : > { %9414 = vst.msk [vmem:[%s16079_s21 + $0x138] sm:$0xff] %vm9374_vm2, %v9349_v19  ;;  %9963 = vadd.xlane.f32.xlu1 %v9838_v54  ;;  %v17360_v54 = vld [vmem:[#allocation21_spill] sm:$0xff] }
 0xa30   : > { %9299 = vadd.xlane.f32.xlu0 %v9173_v43  ;;  %9746 = vst.msk [vmem:[%s16079_s21 + $0x130] sm:$0xff] %vm9707_vm3, %v9681_v53  ;;  %v9587_v27 = vpop.xlane.xlu1 %9586  ;;  %v10488_v43 = vadd.f32 %v16620_v13, %v17360_v54 }
 0xa31   : > { %v9682_v55 = vadd.f32 %v16576_v47, %v9587_v27  ;;  %v9918_v21 = vpop.xlane.xlu0 %9917 }
 0xa32   : > { %v10014_v52 = vadd.f32 %v16576_v47, %v9918_v21  ;;  %v17361_v21 = vld [vmem:[#allocation22_spill] sm:$0xff] }
 0xa33   : > { %9747 = vst.msk [vmem:[%s16079_s21 + $0x138] sm:$0xff] %vm9707_vm3, %v9682_v55  ;;  %9301 = vadd.xlane.f32.xlu1 %v9174_v20  ;;  %v10489_v20 = vadd.f32 %v16620_v13, %v17361_v21 }
 0xa34   : > { %9632 = vadd.xlane.f32.xlu0 %v9506_v9  ;;  %10079 = vst.msk [vmem:[%s16079_s21 + $0x130] sm:$0xff] %vm10040_vm4, %v10014_v52  ;;  %v9920_v34 = vpop.xlane.xlu1 %9919 }
 0xa35   : > { %10547 = vst.msk [vmem:[%s16079_s21 + $0x130] sm:$0xff] %vm10508_vm5, %v10482_v2  ;;  %v10015_v32 = vadd.f32 %v16576_v47, %v9920_v34  ;;  %v9256_v58 = vpop.xlane.xlu0 %9255 }
 0xa36   : > { %v9350_v56 = vadd.f32 %v16576_v47, %v9256_v58 }
 0xa37   : > { %10080 = vst.msk [vmem:[%s16079_s21 + $0x138] sm:$0xff] %vm10040_vm4, %v10015_v32  ;;  %9634 = vadd.xlane.f32.xlu1 %v9507_v28 }
 0xa38   : > { %9965 = vadd.xlane.f32.xlu0 %v9839_v7  ;;  %10548 = vst.msk [vmem:[%s16079_s21 + $0x138] sm:$0xff] %vm10508_vm5, %v10483_v25  ;;  %v9258_v4 = vpop.xlane.xlu1 %9257  ;;  %v10490_v25 = vadd.f32 %v16620_v13, %v17362_v18 }
 0xa39   : > { %9415 = vst.msk [vmem:[%s16079_s21 + $0x140] sm:$0xff] %vm9374_vm2, %v9350_v56  ;;  %v9351_v16 = vadd.f32 %v16576_v47, %v9258_v4  ;;  %v9589_v39 = vpop.xlane.xlu0 %9588 }
 0xa3a   : > { %v9683_v57 = vadd.f32 %v16576_v47, %v9589_v39  ;;  %v17363_v39 = vld [vmem:[#allocation24_spill] sm:$0xff] }
 0xa3b   : > { %9416 = vst.msk [vmem:[%s16079_s21 + $0x148] sm:$0xff] %vm9374_vm2, %v9351_v16  ;;  %9967 = vadd.xlane.f32.xlu1 %v9840_v45  ;;  %v10491_v45 = vadd.f32 %v16620_v13, %v17363_v39 }
 0xa3c   : > { %10432 = vadd.xlane.f32.xlu0 %v17354_v35  ;;  %9748 = vst.msk [vmem:[%s16079_s21 + $0x140] sm:$0xff] %vm9707_vm3, %v9683_v57  ;;  %v9591_v63 = vpop.xlane.xlu1 %9590 }
 0xa3d   : > { %v9684_v50 = vadd.f32 %v16576_v47, %v9591_v63  ;;  %v9922_v31 = vpop.xlane.xlu0 %9921 }
 0xa3e   : > { %v10016_v11 = vadd.f32 %v16576_v47, %v9922_v31 }
 0xa3f   : > { %9749 = vst.msk [vmem:[%s16079_s21 + $0x148] sm:$0xff] %vm9707_vm3, %v9684_v50  ;;  %10435 = vadd.xlane.f32.xlu1 %v17356_v46 }
 0xa40   : > { %10081 = vst.msk [vmem:[%s16079_s21 + $0x140] sm:$0xff] %vm10040_vm4, %v10016_v11  ;;  %v9924_v37 = vpop.xlane.xlu1 %9923 }
 0xa41   : > { %10549 = vst.msk [vmem:[%s16079_s21 + $0x140] sm:$0xff] %vm10508_vm5, %v10484_v12  ;;  %v10017_v22 = vadd.f32 %v16576_v47, %v9924_v37  ;;  %v9260_v40 = vpop.xlane.xlu0 %9259  ;;  %v17364_v37 = vld [vmem:[#allocation25_spill] sm:$0xff] }
 0xa42   : > { %v9352_v41 = vadd.f32 %v16576_v47, %v9260_v40 }
 0xa43   : > { %10082 = vst.msk [vmem:[%s16079_s21 + $0x148] sm:$0xff] %vm10040_vm4, %v10017_v22  ;;  %v10492_v22 = vadd.f32 %v16620_v13, %v17364_v37 }
 0xa44   : > { %10550 = vst.msk [vmem:[%s16079_s21 + $0x148] sm:$0xff] %vm10508_vm5, %v10485_v44  ;;  %v9262_v24 = vpop.xlane.xlu1 %9261 }
 0xa45   : > { %9417 = vst.msk [vmem:[%s16079_s21 + $0x150] sm:$0xff] %vm9374_vm2, %v9352_v41  ;;  %v9353_v6 = vadd.f32 %v16576_v47, %v9262_v24  ;;  %v9593_v36 = vpop.xlane.xlu0 %9592  ;;  %v17365_v41 = vld [vmem:[#allocation26_spill] sm:$0xff] }
 0xa46   : > { %v9685_v15 = vadd.f32 %v16576_v47, %v9593_v36  ;;  %v10493_v24 = vadd.f32 %v16620_v13, %v17365_v41 }
 0xa47   : > { %9418 = vst.msk [vmem:[%s16079_s21 + $0x158] sm:$0xff] %vm9374_vm2, %v9353_v6 }
 0xa48   : > { %9750 = vst.msk [vmem:[%s16079_s21 + $0x150] sm:$0xff] %vm9707_vm3, %v9685_v15  ;;  %v9595_v51 = vpop.xlane.xlu1 %9594 }
 0xa49   : > { %v9686_v48 = vadd.f32 %v16576_v47, %v9595_v51  ;;  %v9926_v33 = vpop.xlane.xlu0 %9925 }
 0xa4a   : > { %v10018_v60 = vadd.f32 %v16576_v47, %v9926_v33 }
 0xa4b   : > { %9751 = vst.msk [vmem:[%s16079_s21 + $0x158] sm:$0xff] %vm9707_vm3, %v9686_v48 }
 0xa4c   : > { %10083 = vst.msk [vmem:[%s16079_s21 + $0x150] sm:$0xff] %vm10040_vm4, %v10018_v60  ;;  %v9928_v61 = vpop.xlane.xlu1 %9927 }
 0xa4d   : > { %10551 = vst.msk [vmem:[%s16079_s21 + $0x150] sm:$0xff] %vm10508_vm5, %v10486_v30  ;;  %v10019_v59 = vadd.f32 %v16576_v47, %v9928_v61  ;;  %v9264_v0 = vpop.xlane.xlu0 %9263  ;;  %v17110_v30 = vld [vmem:[%s17302_s12] ss:$0 sm:$0xff] }
 0xa4e   : > { %v9354_v23 = vadd.f32 %v16576_v47, %v9264_v0 }
 0xa4f   : > { %10084 = vst.msk [vmem:[%s16079_s21 + $0x158] sm:$0xff] %vm10040_vm4, %v10019_v59  ;;  %v17366_v59 = vld [vmem:[#allocation27_spill] sm:$0xff] }
 0xa50   : > { %10552 = vst.msk [vmem:[%s16079_s21 + $0x158] sm:$0xff] %vm10508_vm5, %v10487_v38  ;;  %v9266_v5 = vpop.xlane.xlu1 %9265  ;;  %v10494_v0 = vadd.f32 %v16620_v13, %v17366_v59 }
 0xa51   : > { %9419 = vst.msk [vmem:[%s16079_s21 + $0x160] sm:$0xff] %vm9374_vm2, %v9354_v23  ;;  %v9355_v14 = vadd.f32 %v16576_v47, %v9266_v5  ;;  %v9597_v49 = vpop.xlane.xlu0 %9596  ;;  %v17367_v23 = vld [vmem:[#allocation28_spill] sm:$0xff] }
 0xa52   : > { %v9687_v42 = vadd.f32 %v16576_v47, %v9597_v49  ;;  %v10495_v5 = vadd.f32 %v16620_v13, %v17367_v23 }
 0xa53   : > { %9420 = vst.msk [vmem:[%s16079_s21 + $0x168] sm:$0xff] %vm9374_vm2, %v9355_v14 }
 0xa54   : > { %9752 = vst.msk [vmem:[%s16079_s21 + $0x160] sm:$0xff] %vm9707_vm3, %v9687_v42  ;;  %v9599_v3 = vpop.xlane.xlu1 %9598 }
 0xa55   : > { %v9688_v17 = vadd.f32 %v16576_v47, %v9599_v3  ;;  %v9930_v19 = vpop.xlane.xlu0 %9929 }
 0xa56   : > { %v10020_v29 = vadd.f32 %v16576_v47, %v9930_v19 }
 0xa57   : > { %9753 = vst.msk [vmem:[%s16079_s21 + $0x168] sm:$0xff] %vm9707_vm3, %v9688_v17 }
 0xa58   : > { %10085 = vst.msk [vmem:[%s16079_s21 + $0x160] sm:$0xff] %vm10040_vm4, %v10020_v29  ;;  %v9932_v53 = vpop.xlane.xlu1 %9931 }
 0xa59   : > { %10553 = vst.msk [vmem:[%s16079_s21 + $0x160] sm:$0xff] %vm10508_vm5, %v10488_v43  ;;  %v10021_v27 = vadd.f32 %v16576_v47, %v9932_v53  ;;  %v9268_v55 = vpop.xlane.xlu0 %9267  ;;  %v17368_v53 = vld [vmem:[#allocation29_spill] sm:$0xff] }
 0xa5a   : > { %v9356_v9 = vadd.f32 %v16576_v47, %v9268_v55 }
 0xa5b   : > { %10086 = vst.msk [vmem:[%s16079_s21 + $0x168] sm:$0xff] %vm10040_vm4, %v10021_v27  ;;  %v10496_v27 = vadd.f32 %v16620_v13, %v17368_v53 }
 0xa5c   : > { %10554 = vst.msk [vmem:[%s16079_s21 + $0x168] sm:$0xff] %vm10508_vm5, %v10489_v20  ;;  %v9270_v52 = vpop.xlane.xlu1 %9269 }
 0xa5d   : > { %9421 = vst.msk [vmem:[%s16079_s21 + $0x170] sm:$0xff] %vm9374_vm2, %v9356_v9  ;;  %v9357_v26 = vadd.f32 %v16576_v47, %v9270_v52  ;;  %v9601_v2 = vpop.xlane.xlu0 %9600  ;;  %v17369_v9 = vld [vmem:[#allocation30_spill] sm:$0xff] }
 0xa5e   : > { %v9689_v34 = vadd.f32 %v16576_v47, %v9601_v2  ;;  %v10497_v52 = vadd.f32 %v16620_v13, %v17369_v9 }
 0xa5f   : > { %9422 = vst.msk [vmem:[%s16079_s21 + $0x178] sm:$0xff] %vm9374_vm2, %v9357_v26 }
 0xa60   : > { %9754 = vst.msk [vmem:[%s16079_s21 + $0x170] sm:$0xff] %vm9707_vm3, %v9689_v34  ;;  %v9603_v32 = vpop.xlane.xlu1 %9602 }
 0xa61   : > { %v9690_v58 = vadd.f32 %v16576_v47, %v9603_v32  ;;  %v9934_v28 = vpop.xlane.xlu0 %9933 }
 0xa62   : > { %v10022_v7 = vadd.f32 %v16576_v47, %v9934_v28 }
 0xa63   : > { %9755 = vst.msk [vmem:[%s16079_s21 + $0x178] sm:$0xff] %vm9707_vm3, %v9690_v58 }
 0xa64   : > { %10087 = vst.msk [vmem:[%s16079_s21 + $0x170] sm:$0xff] %vm10040_vm4, %v10022_v7  ;;  %v9936_v56 = vpop.xlane.xlu1 %9935 }
 0xa65   : > { %10555 = vst.msk [vmem:[%s16079_s21 + $0x170] sm:$0xff] %vm10508_vm5, %v10490_v25  ;;  %v10023_v4 = vadd.f32 %v16576_v47, %v9936_v56  ;;  %v9272_v16 = vpop.xlane.xlu0 %9271  ;;  %v17168_v25 = vld [vmem:[%s17302_s12] ss:$0 sm:$0xff]  ;;  %v17370_v56 = vld [vmem:[#allocation31_spill] sm:$0xff] }
 0xa66   : > { %v9358_v57 = vadd.f32 %v16576_v47, %v9272_v16 }
 0xa67   : > { %10088 = vst.msk [vmem:[%s16079_s21 + $0x178] sm:$0xff] %vm10040_vm4, %v10023_v4  ;;  %v10498_v4 = vadd.f32 %v17168_v25, %v17370_v56 }
 0xa68   : > { %10556 = vst.msk [vmem:[%s16079_s21 + $0x178] sm:$0xff] %vm10508_vm5, %v10491_v45  ;;  %v9274_v35 = vpop.xlane.xlu1 %9273 }
 0xa69   : > { %9423 = vst.msk [vmem:[%s16079_s21 + $0x180] sm:$0xff] %vm9374_vm2, %v9358_v57  ;;  %v9359_v63 = vadd.f32 %v16576_v47, %v9274_v35  ;;  %v9605_v50 = vpop.xlane.xlu0 %9604  ;;  %v17371_v57 = vld [vmem:[#allocation32_spill] sm:$0xff] }
 0xa6a   : > { %v9691_v31 = vadd.f32 %v16576_v47, %v9605_v50  ;;  %v10499_v35 = vadd.f32 %v17168_v25, %v17371_v57 }
 0xa6b   : > { %9424 = vst.msk [vmem:[%s16079_s21 + $0x188] sm:$0xff] %vm9374_vm2, %v9359_v63 }
 0xa6c   : > { %9756 = vst.msk [vmem:[%s16079_s21 + $0x180] sm:$0xff] %vm9707_vm3, %v9691_v31  ;;  %v9607_v11 = vpop.xlane.xlu1 %9606 }
 0xa6d   : > { %v9692_v1 = vadd.f32 %v16576_v47, %v9607_v11  ;;  %v9938_v12 = vpop.xlane.xlu0 %9937 }
 0xa6e   : > { %v10024_v46 = vadd.f32 %v16576_v47, %v9938_v12 }
 0xa6f   : > { %9757 = vst.msk [vmem:[%s16079_s21 + $0x188] sm:$0xff] %vm9707_vm3, %v9692_v1 }
 0xa70   : > { %10089 = vst.msk [vmem:[%s16079_s21 + $0x180] sm:$0xff] %vm10040_vm4, %v10024_v46  ;;  %v9940_v40 = vpop.xlane.xlu1 %9939 }
 0xa71   : > { %10557 = vst.msk [vmem:[%s16079_s21 + $0x180] sm:$0xff] %vm10508_vm5, %v10492_v22  ;;  %v10025_v10 = vadd.f32 %v16576_v47, %v9940_v40  ;;  %v9276_v44 = vpop.xlane.xlu0 %9275  ;;  %v17372_v40 = vld [vmem:[#allocation33_spill] sm:$0xff] }
 0xa72   : > { %v9360_v6 = vadd.f32 %v16576_v47, %v9276_v44 }
 0xa73   : > { %10090 = vst.msk [vmem:[%s16079_s21 + $0x188] sm:$0xff] %vm10040_vm4, %v10025_v10  ;;  %v10500_v10 = vadd.f32 %v17168_v25, %v17372_v40 }
 0xa74   : > { %10558 = vst.msk [vmem:[%s16079_s21 + $0x188] sm:$0xff] %vm10508_vm5, %v10493_v24  ;;  %v9278_v36 = vpop.xlane.xlu1 %9277 }
 0xa75   : > { %9425 = vst.msk [vmem:[%s16079_s21 + $0x190] sm:$0xff] %vm9374_vm2, %v9360_v6  ;;  %v9361_v15 = vadd.f32 %v16576_v47, %v9278_v36  ;;  %v9609_v51 = vpop.xlane.xlu0 %9608  ;;  %v17373_v6 = vld [vmem:[#allocation34_spill] sm:$0xff] }
 0xa76   : > { %v9693_v48 = vadd.f32 %v16576_v47, %v9609_v51  ;;  %v10501_v36 = vadd.f32 %v17168_v25, %v17373_v6 }
 0xa77   : > { %9426 = vst.msk [vmem:[%s16079_s21 + $0x198] sm:$0xff] %vm9374_vm2, %v9361_v15 }
 0xa78   : > { %9758 = vst.msk [vmem:[%s16079_s21 + $0x190] sm:$0xff] %vm9707_vm3, %v9693_v48  ;;  %v9611_v33 = vpop.xlane.xlu1 %9610 }
 0xa79   : > { %v9694_v60 = vadd.f32 %v16576_v47, %v9611_v33  ;;  %v9942_v8 = vpop.xlane.xlu0 %9941 }
 0xa7a   : > { %v10026_v61 = vadd.f32 %v17110_v30, %v9942_v8 }
 0xa7b   : > { %9759 = vst.msk [vmem:[%s16079_s21 + $0x198] sm:$0xff] %vm9707_vm3, %v9694_v60 }
 0xa7c   : > { %10091 = vst.msk [vmem:[%s16079_s21 + $0x190] sm:$0xff] %vm10040_vm4, %v10026_v61  ;;  %v9944_v62 = vpop.xlane.xlu1 %9943 }
 0xa7d   : > { %10559 = vst.msk [vmem:[%s16079_s21 + $0x190] sm:$0xff] %vm10508_vm5, %v10494_v0  ;;  %v10027_v47 = vadd.f32 %v17110_v30, %v9944_v62  ;;  %v9280_v38 = vpop.xlane.xlu0 %9279  ;;  %v17374_v62 = vld [vmem:[#allocation35_spill] sm:$0xff] }
 0xa7e   : > { %v9362_v14 = vadd.f32 %v17110_v30, %v9280_v38 }
 0xa7f   : > { %10092 = vst.msk [vmem:[%s16079_s21 + $0x198] sm:$0xff] %vm10040_vm4, %v10027_v47  ;;  %v10502_v47 = vadd.f32 %v17168_v25, %v17374_v62 }
 0xa80   : > { %10560 = vst.msk [vmem:[%s16079_s21 + $0x198] sm:$0xff] %vm10508_vm5, %v10495_v5  ;;  %v9282_v49 = vpop.xlane.xlu1 %9281 }
 0xa81   : > { %9427 = vst.msk [vmem:[%s16079_s21 + $0x1a0] sm:$0xff] %vm9374_vm2, %v9362_v14  ;;  %v9363_v42 = vadd.f32 %v17110_v30, %v9282_v49  ;;  %v9613_v3 = vpop.xlane.xlu0 %9612  ;;  %v17375_v14 = vld [vmem:[#allocation36_spill] sm:$0xff] }
 0xa82   : > { %v9695_v17 = vadd.f32 %v17110_v30, %v9613_v3  ;;  %v10503_v49 = vadd.f32 %v17168_v25, %v17375_v14 }
 0xa83   : > { %9428 = vst.msk [vmem:[%s16079_s21 + $0x1a8] sm:$0xff] %vm9374_vm2, %v9363_v42 }
 0xa84   : > { %9760 = vst.msk [vmem:[%s16079_s21 + $0x1a0] sm:$0xff] %vm9707_vm3, %v9695_v17  ;;  %v9615_v19 = vpop.xlane.xlu1 %9614 }
 0xa85   : > { %v9696_v29 = vadd.f32 %v17110_v30, %v9615_v19  ;;  %v9946_v54 = vpop.xlane.xlu0 %9945 }
 0xa86   : > { %v10028_v43 = vadd.f32 %v17110_v30, %v9946_v54 }
 0xa87   : > { %9761 = vst.msk [vmem:[%s16079_s21 + $0x1a8] sm:$0xff] %vm9707_vm3, %v9696_v29 }
 0xa88   : > { %10093 = vst.msk [vmem:[%s16079_s21 + $0x1a0] sm:$0xff] %vm10040_vm4, %v10028_v43  ;;  %v9948_v55 = vpop.xlane.xlu1 %9947 }
 0xa89   : > { %10561 = vst.msk [vmem:[%s16079_s21 + $0x1a0] sm:$0xff] %vm10508_vm5, %v10496_v27  ;;  %v10029_v21 = vadd.f32 %v17110_v30, %v9948_v55  ;;  %v9284_v20 = vpop.xlane.xlu0 %9283  ;;  %v17376_v55 = vld [vmem:[#allocation37_spill] sm:$0xff] }
 0xa8a   : > { %v9364_v26 = vadd.f32 %v17110_v30, %v9284_v20 }
 0xa8b   : > { %10094 = vst.msk [vmem:[%s16079_s21 + $0x1a8] sm:$0xff] %vm10040_vm4, %v10029_v21  ;;  %v10504_v21 = vadd.f32 %v17168_v25, %v17376_v55 }
 0xa8c   : > { %10562 = vst.msk [vmem:[%s16079_s21 + $0x1a8] sm:$0xff] %vm10508_vm5, %v10497_v52  ;;  %v9286_v2 = vpop.xlane.xlu1 %9285 }
 0xa8d   : > { %9429 = vst.msk [vmem:[%s16079_s21 + $0x1b0] sm:$0xff] %vm9374_vm2, %v9364_v26  ;;  %v9365_v34 = vadd.f32 %v17110_v30, %v9286_v2  ;;  %v9617_v32 = vpop.xlane.xlu0 %9616  ;;  %v17377_v26 = vld [vmem:[#allocation38_spill] sm:$0xff] }
 0xa8e   : > { %v9697_v58 = vadd.f32 %v17110_v30, %v9617_v32  ;;  %v10505_v2 = vadd.f32 %v17168_v25, %v17377_v26 }
 0xa8f   : > { %9430 = vst.msk [vmem:[%s16079_s21 + $0x1b8] sm:$0xff] %vm9374_vm2, %v9365_v34 }
 0xa90   : > { %9762 = vst.msk [vmem:[%s16079_s21 + $0x1b0] sm:$0xff] %vm9707_vm3, %v9697_v58  ;;  %v9619_v13 = vpop.xlane.xlu1 %9618 }
 0xa91   : > { %v9698_v28 = vadd.f32 %v17110_v30, %v9619_v13  ;;  %v9950_v7 = vpop.xlane.xlu0 %9949 }
 0xa92   : > { %v10030_v18 = vadd.f32 %v17110_v30, %v9950_v7 }
 0xa93   : > { %9763 = vst.msk [vmem:[%s16079_s21 + $0x1b8] sm:$0xff] %vm9707_vm3, %v9698_v28 }
 0xa94   : > { %10095 = vst.msk [vmem:[%s16079_s21 + $0x1b0] sm:$0xff] %vm10040_vm4, %v10030_v18  ;;  %v9952_v16 = vpop.xlane.xlu1 %9951 }
 0xa95   : > { %10563 = vst.msk [vmem:[%s16079_s21 + $0x1b0] sm:$0xff] %vm10508_vm5, %v10498_v4  ;;  %v10031_v39 = vadd.f32 %v17110_v30, %v9952_v16  ;;  %v9288_v45 = vpop.xlane.xlu0 %9287 }
 0xa96   : > { %v9366_v63 = vadd.f32 %v17110_v30, %v9288_v45 }
 0xa97   : > { %10096 = vst.msk [vmem:[%s16079_s21 + $0x1b8] sm:$0xff] %vm10040_vm4, %v10031_v39 }
 0xa98   : > { %10564 = vst.msk [vmem:[%s16079_s21 + $0x1b8] sm:$0xff] %vm10508_vm5, %v10499_v35  ;;  %v9290_v50 = vpop.xlane.xlu1 %9289 }
 0xa99   : > { %9431 = vst.msk [vmem:[%s16079_s21 + $0x1c0] sm:$0xff] %vm9374_vm2, %v9366_v63  ;;  %v9367_v31 = vadd.f32 %v17110_v30, %v9290_v50  ;;  %v9621_v11 = vpop.xlane.xlu0 %9620 }
 0xa9a   : > { %v9699_v1 = vadd.f32 %v17110_v30, %v9621_v11 }
 0xa9b   : > { %9432 = vst.msk [vmem:[%s16079_s21 + $0x1c8] sm:$0xff] %vm9374_vm2, %v9367_v31 }
 0xa9c   : > { %9764 = vst.msk [vmem:[%s16079_s21 + $0x1c0] sm:$0xff] %vm9707_vm3, %v9699_v1  ;;  %v9623_v12 = vpop.xlane.xlu1 %9622 }
 0xa9d   : > { %v9700_v46 = vadd.f32 %v17110_v30, %v9623_v12  ;;  %v9954_v37 = vpop.xlane.xlu0 %9953 }
 0xa9e   : > { %v10032_v22 = vadd.f32 %v17110_v30, %v9954_v37 }
 0xa9f   : > { %9765 = vst.msk [vmem:[%s16079_s21 + $0x1c8] sm:$0xff] %vm9707_vm3, %v9700_v46 }
 0xaa0   : > { %10097 = vst.msk [vmem:[%s16079_s21 + $0x1c0] sm:$0xff] %vm10040_vm4, %v10032_v22  ;;  %v9956_v44 = vpop.xlane.xlu1 %9955 }
 0xaa1   : > { %10565 = vst.msk [vmem:[%s16079_s21 + $0x1c0] sm:$0xff] %vm10508_vm5, %v10500_v10  ;;  %v10033_v41 = vadd.f32 %v17110_v30, %v9956_v44  ;;  %v9292_v24 = vpop.xlane.xlu0 %9291 }
 0xaa2   : > { %v9368_v15 = vadd.f32 %v17110_v30, %v9292_v24 }
 0xaa3   : > { %10098 = vst.msk [vmem:[%s16079_s21 + $0x1c8] sm:$0xff] %vm10040_vm4, %v10033_v41 }
 0xaa4   : > { %10566 = vst.msk [vmem:[%s16079_s21 + $0x1c8] sm:$0xff] %vm10508_vm5, %v10501_v36  ;;  %v9294_v51 = vpop.xlane.xlu1 %9293 }
 0xaa5   : > { %9433 = vst.msk [vmem:[%s16079_s21 + $0x1d0] sm:$0xff] %vm9374_vm2, %v9368_v15  ;;  %v9369_v48 = vadd.f32 %v17110_v30, %v9294_v51  ;;  %v9625_v33 = vpop.xlane.xlu0 %9624 }
 0xaa6   : > { %v9701_v60 = vadd.f32 %v17110_v30, %v9625_v33 }
 0xaa7   : > { %9434 = vst.msk [vmem:[%s16079_s21 + $0x1d8] sm:$0xff] %vm9374_vm2, %v9369_v48 }
 0xaa8   : > { %9766 = vst.msk [vmem:[%s16079_s21 + $0x1d0] sm:$0xff] %vm9707_vm3, %v9701_v60  ;;  %v9627_v8 = vpop.xlane.xlu1 %9626 }
 0xaa9   : > { %v9702_v61 = vadd.f32 %v17110_v30, %v9627_v8  ;;  %v9958_v59 = vpop.xlane.xlu0 %9957 }
 0xaaa   : > { %v10034_v0 = vadd.f32 %v17110_v30, %v9958_v59 }
 0xaab   : > { %9767 = vst.msk [vmem:[%s16079_s21 + $0x1d8] sm:$0xff] %vm9707_vm3, %v9702_v61 }
 0xaac   : > { %10099 = vst.msk [vmem:[%s16079_s21 + $0x1d0] sm:$0xff] %vm10040_vm4, %v10034_v0  ;;  %v9960_v38 = vpop.xlane.xlu1 %9959 }
 0xaad   : > { %10567 = vst.msk [vmem:[%s16079_s21 + $0x1d0] sm:$0xff] %vm10508_vm5, %v10502_v47  ;;  %v10035_v23 = vadd.f32 %v17110_v30, %v9960_v38  ;;  %v9296_v5 = vpop.xlane.xlu0 %9295 }
 0xaae   : > { %v9370_v42 = vadd.f32 %v17110_v30, %v9296_v5 }
 0xaaf   : > { %10100 = vst.msk [vmem:[%s16079_s21 + $0x1d8] sm:$0xff] %vm10040_vm4, %v10035_v23 }
 0xab0   : > { %10568 = vst.msk [vmem:[%s16079_s21 + $0x1d8] sm:$0xff] %vm10508_vm5, %v10503_v49  ;;  %v9298_v3 = vpop.xlane.xlu1 %9297 }
 0xab1   : > { %9435 = vst.msk [vmem:[%s16079_s21 + $0x1e0] sm:$0xff] %vm9374_vm2, %v9370_v42  ;;  %v9371_v17 = vadd.f32 %v17110_v30, %v9298_v3  ;;  %v9629_v19 = vpop.xlane.xlu0 %9628 }
 0xab2   : > { %v9703_v29 = vadd.f32 %v17110_v30, %v9629_v19 }
 0xab3   : > { %9436 = vst.msk [vmem:[%s16079_s21 + $0x1e8] sm:$0xff] %vm9374_vm2, %v9371_v17 }
 0xab4   : > { %9768 = vst.msk [vmem:[%s16079_s21 + $0x1e0] sm:$0xff] %vm9707_vm3, %v9703_v29  ;;  %v9631_v54 = vpop.xlane.xlu1 %9630 }
 0xab5   : > { %v9704_v43 = vadd.f32 %v17110_v30, %v9631_v54  ;;  %v9962_v53 = vpop.xlane.xlu0 %9961 }
 0xab6   : > { %v10036_v27 = vadd.f32 %v17110_v30, %v9962_v53 }
 0xab7   : > { %9769 = vst.msk [vmem:[%s16079_s21 + $0x1e8] sm:$0xff] %vm9707_vm3, %v9704_v43 }
 0xab8   : > { %10101 = vst.msk [vmem:[%s16079_s21 + $0x1e0] sm:$0xff] %vm10040_vm4, %v10036_v27  ;;  %v9964_v20 = vpop.xlane.xlu1 %9963 }
 0xab9   : > { %10569 = vst.msk [vmem:[%s16079_s21 + $0x1e0] sm:$0xff] %vm10508_vm5, %v10504_v21  ;;  %v10037_v9 = vadd.f32 %v17110_v30, %v9964_v20  ;;  %v9300_v52 = vpop.xlane.xlu0 %9299 }
 0xaba   : > { %v9372_v34 = vadd.f32 %v17110_v30, %v9300_v52 }
 0xabb   : > { %10102 = vst.msk [vmem:[%s16079_s21 + $0x1e8] sm:$0xff] %vm10040_vm4, %v10037_v9 }
 0xabc   : > { %10570 = vst.msk [vmem:[%s16079_s21 + $0x1e8] sm:$0xff] %vm10508_vm5, %v10505_v2  ;;  %v9302_v32 = vpop.xlane.xlu1 %9301 }
 0xabd   : > { %9437 = vst.msk [vmem:[%s16079_s21 + $0x1f0] sm:$0xff] %vm9374_vm2, %v9372_v34  ;;  %v9373_v58 = vadd.f32 %v17110_v30, %v9302_v32  ;;  %v9633_v13 = vpop.xlane.xlu0 %9632 }
 0xabe   : > { %v9705_v28 = vadd.f32 %v17110_v30, %v9633_v13 }
 0xabf   : > { %9438 = vst.msk [vmem:[%s16079_s21 + $0x1f8] sm:$0xff] %vm9374_vm2, %v9373_v58 }
 0xac0   : > { %9770 = vst.msk [vmem:[%s16079_s21 + $0x1f0] sm:$0xff] %vm9707_vm3, %v9705_v28  ;;  %v9635_v7 = vpop.xlane.xlu1 %9634 }
 0xac1   : > { %v9706_v18 = vadd.f32 %v17110_v30, %v9635_v7  ;;  %v9966_v56 = vpop.xlane.xlu0 %9965 }
 0xac2   : > { %v10038_v4 = vadd.f32 %v17110_v30, %v9966_v56 }
 0xac3   : > { %9771 = vst.msk [vmem:[%s16079_s21 + $0x1f8] sm:$0xff] %vm9707_vm3, %v9706_v18 }
 0xac4   : > { %10103 = vst.msk [vmem:[%s16079_s21 + $0x1f0] sm:$0xff] %vm10040_vm4, %v10038_v4  ;;  %v9968_v16 = vpop.xlane.xlu1 %9967 }
 0xac5   : > { %v10039_v39 = vadd.f32 %v17110_v30, %v9968_v16  ;;  %v10433_v45 = vpop.xlane.xlu0 %10432 }
 0xac6   : > { %v10506_v57 = vadd.f32 %v17168_v25, %v10433_v45 }
 0xac7   : > { %10104 = vst.msk [vmem:[%s16079_s21 + $0x1f8] sm:$0xff] %vm10040_vm4, %v10039_v39 }
 0xac8   : > { %10571 = vst.msk [vmem:[%s16079_s21 + $0x1f0] sm:$0xff] %vm10508_vm5, %v10506_v57  ;;  %v10436_v35 = vpop.xlane.xlu1 %10435 }
 0xac9   : > { %v10507_v63 = vadd.f32 %v17168_v25, %v10436_v35 }
 0xacb   : > { %10572 = vst.msk [vmem:[%s16079_s21 + $0x1f8] sm:$0xff] %vm10508_vm5, %v10507_v63 }
 0xacc PF: > { %s23_s25 = sadd.s32 1, %s12026_s25  }
 0xacd   : > { %p20_p4 = scmp.ge.s32.totalorder %s23_s25, 4  }
 0xacf   :  { %22 = sbr.rel (!%p20_p4) target bundleno = 1 (0x1), region = 119 }

</bundles_post_ra>
